<compile_context>
chip_gen: v6e
topology: v6e:2x2x1
jax: 0.10.0
libtpu: 0.0.40
codegen_flags: <defaults>
</compile_context>

<pallas_src>
import functools
import math

import jax
import jax.numpy as jnp
from jax.experimental import pallas as pl
from jax.experimental.pallas import tpu as pltpu

LN_EPS = 1e-5  # PyTorch nn.LayerNorm default


def _row_tile(m, cap=512):
    """Token-axis tile: largest legal tile <= cap dividing m, preferring >=2
    grid programs (v7x has 2 TensorCores)."""
    if m <= cap:
        half = m // 2
        if m % 2 == 0 and half % 8 == 0:
            return half                      # 2 programs when (8,·)-legal
        return m
    for t in (512, 256, 128, 64, 32, 16, 8):
        if t <= cap and m % t == 0:
            return t
    return m


def _q_tile(n, cap=256):
    """Query-row tile for attention (scores stay ~tq x N f32 per head)."""
    if n <= cap:
        return n
    for t in (256, 128, 64, 32, 16, 8):
        if n % t == 0:
            return t
    return n


# ---------------------------------------------------------------------------
# Pallas kernels
# ---------------------------------------------------------------------------
def _patch_embed_kernel(p_ref, w_ref, b_ref, pos_ref, o_ref):
    """tok = patches @ W + b + pos_embed   (pos-embed add fused, no broadcast)."""
    acc = jnp.dot(p_ref[0].astype(jnp.bfloat16), w_ref[...].astype(jnp.bfloat16),
                  preferred_element_type=jnp.float32)
    acc = acc + b_ref[...].astype(jnp.float32) + pos_ref[0].astype(jnp.float32)
    o_ref[0] = acc.astype(o_ref.dtype)


def _ln_qkv_kernel(x_ref, g_ref, beta_ref, wq_ref, bq_ref, wkv_ref, bkv_ref,
                   q_ref, kv_ref):
    """(q, kv) = LayerNorm(x) @ (Wq, Wkv) + (bq, bkv); outputs in bf16 so the
    largest activation never round-trips HBM in f32."""
    x = x_ref[...].astype(jnp.float32)
    mean = jnp.mean(x, axis=-1, keepdims=True)
    var = jnp.mean((x - mean) ** 2, axis=-1, keepdims=True)
    xn = (x - mean) * jax.lax.rsqrt(var + LN_EPS)
    xn = xn * g_ref[...].astype(jnp.float32) + beta_ref[...].astype(jnp.float32)
    xn = xn.astype(jnp.bfloat16)
    q = jnp.dot(xn, wq_ref[...].astype(jnp.bfloat16),
                preferred_element_type=jnp.float32) + bq_ref[...].astype(jnp.float32)
    kv = jnp.dot(xn, wkv_ref[...].astype(jnp.bfloat16),
                 preferred_element_type=jnp.float32) + bkv_ref[...].astype(jnp.float32)
    q_ref[...] = q.astype(q_ref.dtype)
    kv_ref[...] = kv.astype(kv_ref.dtype)


def _attn_kernel(q_ref, kv_ref, wp_ref, bp_ref, res_ref, o_ref,
                 *, num_heads: int, head_dim: int):
    """Query-tiled multi-head attention + output projection + residual.

    q_ref : (1, tq, C)  bf16 query rows for this tile
    kv_ref: (1, N, 2C)  bf16 keys|values for the whole sequence (resident)
    o_ref : (1, tq, C)  = res + bp + sum_h softmax(q_h k_h^T/sqrt(d)) v_h @ Wp_h

    Per-head work slices q/k/v/Wp straight from the refs (no full-block f32
    materialization) and accumulates the projection per head (no concat /
    lane relayout); accumulator stays lane-dense (tq, 384 = 3x128).
    """
    C = num_heads * head_dim
    scale = 1.0 / math.sqrt(head_dim)
    # residual + projection bias seed the accumulator (bias added once).
    y = res_ref[0].astype(jnp.float32) + bp_ref[...].astype(jnp.float32)
    for h in range(num_heads):                          # static unroll (6)
        lo, hi = h * head_dim, (h + 1) * head_dim
        q = q_ref[0, :, lo:hi]                          # (tq, hd) bf16
        k = kv_ref[0, :, lo:hi]                         # (N,  hd) bf16
        v = kv_ref[0, :, C + lo:C + hi]                 # (N,  hd) bf16
        # contract last dims directly (no .T / XLU transpose before the MXU)
        s = jax.lax.dot_general(q, k, (((1,), (1,)), ((), ())),
                                preferred_element_type=jnp.float32) * scale
        s = s - jnp.max(s, axis=-1, keepdims=True)
        p = jnp.exp(s)                                  # EUP; keep softmax minimal
        p = p * pl.reciprocal(jnp.sum(p, axis=-1, keepdims=True), approx=True)
        att = jnp.dot(p.astype(jnp.bfloat16), v,
                      preferred_element_type=jnp.float32)           # (tq, hd)
        y = y + jnp.dot(att.astype(jnp.bfloat16), wp_ref[lo:hi, :],
                        preferred_element_type=jnp.float32)         # (tq, C)
    o_ref[0] = y.astype(o_ref.dtype)


def _mlp_kernel(x_ref, g_ref, beta_ref, w1_ref, b1_ref, w2_ref, b2_ref, o_ref):
    """y = x + fc2(gelu(fc1(LayerNorm(x))))  (whole MLP branch fused)."""
    x = x_ref[...].astype(jnp.float32)
    mean = jnp.mean(x, axis=-1, keepdims=True)
    var = jnp.mean((x - mean) ** 2, axis=-1, keepdims=True)
    xn = (x - mean) * jax.lax.rsqrt(var + LN_EPS)
    xn = xn * g_ref[...].astype(jnp.float32) + beta_ref[...].astype(jnp.float32)
    h = jnp.dot(xn.astype(jnp.bfloat16), w1_ref[...].astype(jnp.bfloat16),
                preferred_element_type=jnp.float32)
    # TODO(synk): tanh-approx GELU vs PyTorch's exact-erf default.
    h = jax.nn.gelu(h + b1_ref[...].astype(jnp.float32), approximate=True)
    y = jnp.dot(h.astype(jnp.bfloat16), w2_ref[...].astype(jnp.bfloat16),
                preferred_element_type=jnp.float32)
    y = y + b2_ref[...].astype(jnp.float32) + x
    o_ref[...] = y.astype(o_ref.dtype)


def _head_kernel(f_ref, w_ref, b_ref, o_ref):
    """adaptive_avg_pool2d((1,1)) + 1x1 conv for the WHOLE batch in one step:
    mean(XW+b) == mean(X)W + b, so compute B means then one (B,Cin)@(Cin,Cout)."""
    f = f_ref[...].astype(jnp.float32)                   # (B, HW, Cin)
    m = jnp.mean(f, axis=1)                              # (B, Cin)
    y = jnp.dot(m.astype(jnp.bfloat16), w_ref[...].astype(jnp.bfloat16),
                preferred_element_type=jnp.float32)
    o_ref[...] = (y + b_ref[...].astype(jnp.float32)).astype(o_ref.dtype)


# ---------------------------------------------------------------------------
# Pallas wrappers
# ---------------------------------------------------------------------------
def _patch_embed(patches, w, b, pos_embed):
    B, N, PD = patches.shape
    C = w.shape[1]
    tn = _row_tile(N)
    return pl.pallas_call(
        _patch_embed_kernel,
        out_shape=jax.ShapeDtypeStruct((B, N, C), jnp.float32),
        grid=(B, N // tn),
        in_specs=[pl.BlockSpec((1, tn, PD), lambda b, i: (b, i, 0)),
                  pl.BlockSpec((PD, C), lambda b, i: (0, 0)),
                  pl.BlockSpec((1, C), lambda b, i: (0, 0)),
                  # pos_embed indexed independently of batch -> no broadcast buffer
                  pl.BlockSpec((1, tn, C), lambda b, i: (0, i, 0))],
        out_specs=pl.BlockSpec((1, tn, C), lambda b, i: (b, i, 0)),
        compiler_params=pltpu.CompilerParams(
            dimension_semantics=("parallel", "parallel")),
    )(patches, w, b.reshape(1, C), pos_embed)


def _ln_qkv(x, ln_g, ln_b, wq, bq, wkv, bkv):
    M, C = x.shape
    C2 = wkv.shape[1]
    tm = _row_tile(M)
    return pl.pallas_call(
        _ln_qkv_kernel,
        out_shape=(jax.ShapeDtypeStruct((M, C), jnp.bfloat16),
                   jax.ShapeDtypeStruct((M, C2), jnp.bfloat16)),
        grid=(M // tm,),
        in_specs=[pl.BlockSpec((tm, C), lambda i: (i, 0)),
                  pl.BlockSpec((1, C), lambda i: (0, 0)),
                  pl.BlockSpec((1, C), lambda i: (0, 0)),
                  pl.BlockSpec((C, C), lambda i: (0, 0)),    # M-invariant weights
                  pl.BlockSpec((1, C), lambda i: (0, 0)),
                  pl.BlockSpec((C, C2), lambda i: (0, 0)),
                  pl.BlockSpec((1, C2), lambda i: (0, 0))],
        out_specs=(pl.BlockSpec((tm, C), lambda i: (i, 0)),
                   pl.BlockSpec((tm, C2), lambda i: (i, 0))),
        compiler_params=pltpu.CompilerParams(dimension_semantics=("parallel",)),
    )(x, ln_g.reshape(1, C), ln_b.reshape(1, C), wq, bq.reshape(1, C),
      wkv, bkv.reshape(1, C2))


def _attention(q, kv, w_proj, b_proj, residual, *, num_heads):
    # q: (B, N, C) bf16, kv: (B, N, 2C) bf16, residual: (B, N, C) f32
    B, N, C = residual.shape
    head_dim = C // num_heads
    tq = _q_tile(N)
    kernel = functools.partial(_attn_kernel, num_heads=num_heads,
                               head_dim=head_dim)
    return pl.pallas_call(
        kernel,
        out_shape=jax.ShapeDtypeStruct((B, N, C), jnp.float32),
        grid=(B, N // tq),
        in_specs=[pl.BlockSpec((1, tq, C), lambda b, i: (b, i, 0)),
                  # full-sequence K/V block; same index across q tiles -> resident
                  pl.BlockSpec((1, N, 2 * C), lambda b, i: (b, 0, 0)),
                  pl.BlockSpec((C, C), lambda b, i: (0, 0)),
                  pl.BlockSpec((1, C), lambda b, i: (0, 0)),
                  pl.BlockSpec((1, tq, C), lambda b, i: (b, i, 0))],
        out_specs=pl.BlockSpec((1, tq, C), lambda b, i: (b, i, 0)),
        compiler_params=pltpu.CompilerParams(
            dimension_semantics=("parallel", "parallel")),
    )(q, kv, w_proj, b_proj.reshape(1, C), residual)


def _mlp(x, ln_g, ln_b, w1, b1, w2, b2):
    M, C = x.shape
    H = w1.shape[1]
    tm = _row_tile(M)
    return pl.pallas_call(
        _mlp_kernel,
        out_shape=jax.ShapeDtypeStruct((M, C), jnp.float32),
        grid=(M // tm,),
        in_specs=[pl.BlockSpec((tm, C), lambda i: (i, 0)),
                  pl.BlockSpec((1, C), lambda i: (0, 0)),
                  pl.BlockSpec((1, C), lambda i: (0, 0)),
                  pl.BlockSpec((C, H), lambda i: (0, 0)),
                  pl.BlockSpec((1, H), lambda i: (0, 0)),
                  pl.BlockSpec((H, C), lambda i: (0, 0)),
                  pl.BlockSpec((1, C), lambda i: (0, 0))],
        out_specs=pl.BlockSpec((tm, C), lambda i: (i, 0)),
        compiler_params=pltpu.CompilerParams(dimension_semantics=("parallel",)),
    )(x, ln_g.reshape(1, C), ln_b.reshape(1, C), w1, b1.reshape(1, H),
      w2, b2.reshape(1, C))


def _head(feat, w, b):
    # feat: (B, HW, Cin) -> (B, Cout); single kernel for the whole batch.
    B, HW, Cin = feat.shape
    Cout = w.shape[1]
    return pl.pallas_call(
        _head_kernel,
        out_shape=jax.ShapeDtypeStruct((B, Cout), jnp.float32),
        grid=(1,),
        in_specs=[pl.BlockSpec((B, HW, Cin), lambda i: (0, 0, 0)),
                  pl.BlockSpec((Cin, Cout), lambda i: (0, 0)),
                  pl.BlockSpec((1, Cout), lambda i: (0, 0))],
        out_specs=pl.BlockSpec((B, Cout), lambda i: (0, 0)),
        compiler_params=pltpu.CompilerParams(dimension_semantics=("arbitrary",)),
    )(feat, w, b.reshape(1, Cout))


# ---------------------------------------------------------------------------
# Model (host glue in plain JAX, hot paths in fused Pallas kernels)
# ---------------------------------------------------------------------------
def _extract_patches(x_nhwc, patch):
    B, H, W, C = x_nhwc.shape
    gh, gw = H // patch, W // patch
    x = x_nhwc.reshape(B, gh, patch, gw, patch, C)
    x = x.transpose(0, 1, 3, 2, 4, 5)                    # (B, gh, gw, p, p, C)
    return x.reshape(B, gh * gw, patch * patch * C)


def _vit_block(tok, blk, num_heads):
    B, N, C = tok.shape
    xf = tok.reshape(B * N, C)
    # attention branch: LN1 + QKV fused (bf16 q / kv out), then q-tiled
    # (attention + out-proj + residual) fused kernel.
    q, kv = _ln_qkv(xf, blk["ln1_g"], blk["ln1_b"],
                    blk["w_q"], blk["b_q"], blk["w_kv"], blk["b_kv"])
    tok = _attention(q.reshape(B, N, C), kv.reshape(B, N, 2 * C),
                     blk["w_proj"], blk["b_proj"], tok, num_heads=num_heads)
    # MLP branch: LN2 + fc1 + GELU + fc2 + residual fused.
    xf = _mlp(tok.reshape(B * N, C), blk["ln2_g"], blk["ln2_b"],
              blk["w_fc1"], blk["b_fc1"], blk["w_fc2"], blk["b_fc2"])
    return xf.reshape(B, N, C)


def sam_encoder_forward(x_nchw, params, *, patch, num_heads):
    x = jnp.transpose(x_nchw, (0, 2, 3, 1))              # NCHW -> NHWC
    patches = _extract_patches(x, patch)                 # (B, N, p*p*3)
    tok = _patch_embed(patches, params["pe_w"], params["pe_b"],
                       params["pos_embed"])              # (B, N, C)
    for blk in params["blocks"]:
        tok = _vit_block(tok, blk, num_heads)
    # head: g (1x1 conv) + adaptive_avg_pool2d((1,1)) + flatten (mean first)
    return _head(tok, params["g_w"], params["g_b"])      # (B, feature_dim)


# ---------------------------------------------------------------------------
# Deterministic synthetic parameters
# ---------------------------------------------------------------------------
def init_params(key, *, image_size=32, patch=16, in_chans=3, embed_dim=384,
                depth=2, num_heads=6, mlp_ratio=4, feature_dim=128):
    def nrm(k, shape, scale=0.02, dtype=jnp.bfloat16):
        return (scale * jax.random.normal(k, shape, jnp.float32)).astype(dtype)

    keys = jax.random.split(key, 3 + 5 * depth)
    ki = iter(keys)
    n_tokens = (image_size // patch) ** 2
    hidden = embed_dim * mlp_ratio

    params = {
        # matmul weights stored in bf16 (MXU inputs); biases/LN/pos-embed in f32
        "pe_w": nrm(next(ki), (patch * patch * in_chans, embed_dim)),
        "pe_b": jnp.zeros((embed_dim,), jnp.float32),
        "pos_embed": nrm(next(ki), (1, n_tokens, embed_dim), dtype=jnp.float32),
        "g_w": nrm(next(ki), (embed_dim, feature_dim)),
        "g_b": jnp.zeros((feature_dim,), jnp.float32),
        "blocks": [],
    }
    for _b in range(depth):
        params["blocks"].append({
            "ln1_g": jnp.ones((embed_dim,), jnp.float32),
            "ln1_b": jnp.zeros((embed_dim,), jnp.float32),
            "w_q": nrm(next(ki), (embed_dim, embed_dim)),
            "b_q": jnp.zeros((embed_dim,), jnp.float32),
            "w_kv": nrm(next(ki), (embed_dim, 2 * embed_dim)),
            "b_kv": jnp.zeros((2 * embed_dim,), jnp.float32),
            "w_proj": nrm(next(ki), (embed_dim, embed_dim)),
            "b_proj": jnp.zeros((embed_dim,), jnp.float32),
            "ln2_g": jnp.ones((embed_dim,), jnp.float32),
            "ln2_b": jnp.zeros((embed_dim,), jnp.float32),
            "w_fc1": nrm(next(ki), (embed_dim, hidden)),
            "b_fc1": jnp.zeros((hidden,), jnp.float32),
            "w_fc2": nrm(next(ki), (hidden, embed_dim)),
            "b_fc2": jnp.zeros((embed_dim,), jnp.float32),
        })
    return params


# ---------------------------------------------------------------------------
if __name__ == "__main__":
    key = jax.random.PRNGKey(0)
    pkey, xkey = jax.random.split(key)

    # small shapes: batch=2, 3-channel 32x32 image, patch 16 -> 2x2=4 tokens,
    # embed_dim=384 (module's featdim), feature_dim=128.
    PATCH, NUM_HEADS = 16, 6
    params = init_params(pkey, image_size=32, patch=PATCH, embed_dim=384,
                         depth=2, num_heads=NUM_HEADS, feature_dim=128)
    x = jax.random.normal(xkey, (2, 3, 32, 32), jnp.float32)

    # static config bound via partial (NOT traced through jit)
    fwd = jax.jit(functools.partial(sam_encoder_forward,
                                    patch=PATCH, num_heads=NUM_HEADS))
    out = jax.block_until_ready(fwd(x, params))

    assert out.shape == (2, 128), out.shape
    assert out.dtype == jnp.float32
    assert bool(jnp.all(jnp.isfinite(out)))
    print("KERNEL_OK")
</pallas_src>

<mosaic_0001>
module attributes {stable_mosaic.version = 11 : i64} {
  func.func @_patch_embed_kernel(%arg0: i32, %arg1: i32, %arg2: memref<1x4x768xf32, #tpu.memory_space<vmem>>, %arg3: memref<768x384xbf16, #tpu.memory_space<vmem>>, %arg4: memref<1x384xf32, #tpu.memory_space<vmem>>, %arg5: memref<1x4x384xf32, #tpu.memory_space<vmem>>, %arg6: memref<1x4x384xf32, #tpu.memory_space<vmem>>) attributes {dimension_semantics = [#tpu.dimension_semantics<parallel>, #tpu.dimension_semantics<parallel>], iteration_bounds = array<i64: 2, 1>, scalar_prefetch = 0 : i64, scratch_operands = 0 : i64, tpu.core_type = #tpu.core_type<tc>, window_params = [{transform_indices = @transform_0, window_bounds = array<i64: 1, 4, 768>}, {pipeline_mode = #tpu.pipeline_mode<synchronous>, transform_indices = @transform_1, window_bounds = array<i64: 768, 384>}, {pipeline_mode = #tpu.pipeline_mode<synchronous>, transform_indices = @transform_2, window_bounds = array<i64: 1, 384>}, {transform_indices = @transform_3, window_bounds = array<i64: 1, 4, 384>}, {transform_indices = @transform_4, window_bounds = array<i64: 1, 4, 384>}]} {
    %c0 = arith.constant 0 : index
    %c0_0 = arith.constant 0 : index
    %c0_1 = arith.constant 0 : index
    %0 = vector.load %arg2[%c0, %c0_0, %c0_1] : memref<1x4x768xf32, #tpu.memory_space<vmem>>, vector<1x4x768xf32>
    %1 = vector.shape_cast %0 : vector<1x4x768xf32> to vector<4x768xf32>
    %2 = arith.truncf %1 : vector<4x768xf32> to vector<4x768xbf16>
    %c0_2 = arith.constant 0 : index
    %c0_3 = arith.constant 0 : index
    %3 = vector.load %arg3[%c0_2, %c0_3] : memref<768x384xbf16, #tpu.memory_space<vmem>>, vector<768x384xbf16>
    %cst = arith.constant dense<0.000000e+00> : vector<4x384xf32>
    %4 = tpu.matmul %2, %3, %cst {dimension_numbers = #tpu.dot_dimension_numbers<[1], [0], [0], [1], [0, 0, 1, 1], [], []>} : vector<4x768xbf16>, vector<768x384xbf16>, vector<4x384xf32> -> vector<4x384xf32>
    %c0_4 = arith.constant 0 : index
    %c0_5 = arith.constant 0 : index
    %5 = vector.load %arg4[%c0_4, %c0_5] : memref<1x384xf32, #tpu.memory_space<vmem>>, vector<1x384xf32>
    %6 = vector.broadcast %5 : vector<1x384xf32> to vector<4x384xf32>
    %7 = arith.addf %4, %6 : vector<4x384xf32>
    %c0_6 = arith.constant 0 : index
    %c0_7 = arith.constant 0 : index
    %c0_8 = arith.constant 0 : index
    %8 = vector.load %arg5[%c0_6, %c0_7, %c0_8] : memref<1x4x384xf32, #tpu.memory_space<vmem>>, vector<1x4x384xf32>
    %9 = vector.shape_cast %8 : vector<1x4x384xf32> to vector<4x384xf32>
    %10 = arith.addf %7, %9 : vector<4x384xf32>
    %c0_9 = arith.constant 0 : index
    %c0_10 = arith.constant 0 : index
    %c0_11 = arith.constant 0 : index
    %11 = vector.load %arg6[%c0_9, %c0_10, %c0_11] : memref<1x4x384xf32, #tpu.memory_space<vmem>>, vector<1x4x384xf32>
    %12 = vector.shape_cast %11 : vector<1x4x384xf32> to vector<4x384xf32>
    %13 = vector.shape_cast %10 : vector<4x384xf32> to vector<1x4x384xf32>
    tpu.vector_store %arg6[%c0_9, %c0_10, %c0_11], %13 {strides = array<i32>} : memref<1x4x384xf32, #tpu.memory_space<vmem>>, vector<1x4x384xf32>,
    return
  }
  func.func @transform_0(%arg0: i32, %arg1: i32) -> (i32, i32, i32) {
    %c0_i32 = arith.constant 0 : i32
    %c0_i32_0 = arith.constant 0 : i32
    return %arg0, %arg1, %c0_i32 : i32, i32, i32
  }
  func.func @transform_1(%arg0: i32, %arg1: i32) -> (i32, i32) {
    %c0_i32 = arith.constant 0 : i32
    %c0_i32_0 = arith.constant 0 : i32
    %c0_i32_1 = arith.constant 0 : i32
    return %c0_i32, %c0_i32_0 : i32, i32
  }
  func.func @transform_2(%arg0: i32, %arg1: i32) -> (i32, i32) {
    %c0_i32 = arith.constant 0 : i32
    %c0_i32_0 = arith.constant 0 : i32
    %c0_i32_1 = arith.constant 0 : i32
    return %c0_i32, %c0_i32_0 : i32, i32
  }
  func.func @transform_3(%arg0: i32, %arg1: i32) -> (i32, i32, i32) {
    %c0_i32 = arith.constant 0 : i32
    %c0_i32_0 = arith.constant 0 : i32
    %c0_i32_1 = arith.constant 0 : i32
    return %c0_i32, %arg1, %c0_i32_0 : i32, i32, i32
  }
  func.func @transform_4(%arg0: i32, %arg1: i32) -> (i32, i32, i32) {
    %c0_i32 = arith.constant 0 : i32
    %c0_i32_0 = arith.constant 0 : i32
    return %arg0, %arg1, %c0_i32 : i32, i32, i32
  }
}

module attributes {stable_mosaic.version = 11 : i64} {
  func.func @_ln_qkv_kernel(%arg0: i32, %arg1: memref<8x384xf32, #tpu.memory_space<vmem>>, %arg2: memref<1x384xf32, #tpu.memory_space<vmem>>, %arg3: memref<1x384xf32, #tpu.memory_space<vmem>>, %arg4: memref<384x384xbf16, #tpu.memory_space<vmem>>, %arg5: memref<1x384xf32, #tpu.memory_space<vmem>>, %arg6: memref<384x768xbf16, #tpu.memory_space<vmem>>, %arg7: memref<1x768xf32, #tpu.memory_space<vmem>>, %arg8: memref<8x384xbf16, #tpu.memory_space<vmem>>, %arg9: memref<8x768xbf16, #tpu.memory_space<vmem>>) attributes {dimension_semantics = [#tpu.dimension_semantics<parallel>], iteration_bounds = array<i64: 1>, scalar_prefetch = 0 : i64, scratch_operands = 0 : i64, tpu.core_type = #tpu.core_type<tc>, window_params = [{transform_indices = @transform_0, window_bounds = array<i64: 8, 384>}, {pipeline_mode = #tpu.pipeline_mode<synchronous>, transform_indices = @transform_1, window_bounds = array<i64: 1, 384>}, {pipeline_mode = #tpu.pipeline_mode<synchronous>, transform_indices = @transform_2, window_bounds = array<i64: 1, 384>}, {pipeline_mode = #tpu.pipeline_mode<synchronous>, transform_indices = @transform_3, window_bounds = array<i64: 384, 384>}, {pipeline_mode = #tpu.pipeline_mode<synchronous>, transform_indices = @transform_4, window_bounds = array<i64: 1, 384>}, {pipeline_mode = #tpu.pipeline_mode<synchronous>, transform_indices = @transform_5, window_bounds = array<i64: 384, 768>}, {pipeline_mode = #tpu.pipeline_mode<synchronous>, transform_indices = @transform_6, window_bounds = array<i64: 1, 768>}, {transform_indices = @transform_7, window_bounds = array<i64: 8, 384>}, {transform_indices = @transform_8, window_bounds = array<i64: 8, 768>}]} {
    %c0 = arith.constant 0 : index
    %c0_0 = arith.constant 0 : index
    %0 = vector.load %arg1[%c0, %c0_0] : memref<8x384xf32, #tpu.memory_space<vmem>>, vector<8x384xf32>
    %cst = arith.constant dense<0.000000e+00> : vector<8xf32>
    %1 = vector.multi_reduction <add>, %0, %cst [1] : vector<8x384xf32> to vector<8xf32>
    %2 = vector.shape_cast %1 : vector<8xf32> to vector<8x1xf32>
    %cst_1 = arith.constant 3.840000e+02 : f32
    %3 = vector.broadcast %cst_1 : f32 to vector<8x1xf32>
    %4 = arith.divf %2, %3 : vector<8x1xf32>
    %5 = vector.broadcast %4 : vector<8x1xf32> to vector<8x384xf32>
    %6 = arith.subf %0, %5 : vector<8x384xf32>
    %7 = arith.mulf %6, %6 : vector<8x384xf32>
    %cst_2 = arith.constant dense<0.000000e+00> : vector<8xf32>
    %8 = vector.multi_reduction <add>, %7, %cst_2 [1] : vector<8x384xf32> to vector<8xf32>
    %9 = vector.shape_cast %8 : vector<8xf32> to vector<8x1xf32>
    %cst_3 = arith.constant 3.840000e+02 : f32
    %10 = vector.broadcast %cst_3 : f32 to vector<8x1xf32>
    %11 = arith.divf %9, %10 : vector<8x1xf32>
    %12 = vector.broadcast %4 : vector<8x1xf32> to vector<8x384xf32>
    %13 = arith.subf %0, %12 : vector<8x384xf32>
    %cst_4 = arith.constant 9.99999974E-6 : f32
    %14 = vector.broadcast %cst_4 : f32 to vector<8x1xf32>
    %15 = arith.addf %11, %14 : vector<8x1xf32>
    %16 = math.rsqrt %15 : vector<8x1xf32>
    %17 = vector.broadcast %16 : vector<8x1xf32> to vector<8x384xf32>
    %18 = arith.mulf %13, %17 : vector<8x384xf32>
    %c0_5 = arith.constant 0 : index
    %c0_6 = arith.constant 0 : index
    %19 = vector.load %arg2[%c0_5, %c0_6] : memref<1x384xf32, #tpu.memory_space<vmem>>, vector<1x384xf32>
    %20 = vector.broadcast %19 : vector<1x384xf32> to vector<8x384xf32>
    %21 = arith.mulf %18, %20 : vector<8x384xf32>
    %c0_7 = arith.constant 0 : index
    %c0_8 = arith.constant 0 : index
    %22 = vector.load %arg3[%c0_7, %c0_8] : memref<1x384xf32, #tpu.memory_space<vmem>>, vector<1x384xf32>
    %23 = vector.broadcast %22 : vector<1x384xf32> to vector<8x384xf32>
    %24 = arith.addf %21, %23 : vector<8x384xf32>
    %25 = arith.truncf %24 : vector<8x384xf32> to vector<8x384xbf16>
    %c0_9 = arith.constant 0 : index
    %c0_10 = arith.constant 0 : index
    %26 = vector.load %arg4[%c0_9, %c0_10] : memref<384x384xbf16, #tpu.memory_space<vmem>>, vector<384x384xbf16>
    %cst_11 = arith.constant dense<0.000000e+00> : vector<8x384xf32>
    %27 = tpu.matmul %25, %26, %cst_11 {dimension_numbers = #tpu.dot_dimension_numbers<[1], [0], [0], [1], [0, 0, 1, 1], [], []>} : vector<8x384xbf16>, vector<384x384xbf16>, vector<8x384xf32> -> vector<8x384xf32>
    %c0_12 = arith.constant 0 : index
    %c0_13 = arith.constant 0 : index
    %28 = vector.load %arg5[%c0_12, %c0_13] : memref<1x384xf32, #tpu.memory_space<vmem>>, vector<1x384xf32>
    %29 = vector.broadcast %28 : vector<1x384xf32> to vector<8x384xf32>
    %30 = arith.addf %27, %29 : vector<8x384xf32>
    %c0_14 = arith.constant 0 : index
    %c0_15 = arith.constant 0 : index
    %31 = vector.load %arg6[%c0_14, %c0_15] : memref<384x768xbf16, #tpu.memory_space<vmem>>, vector<384x768xbf16>
    %cst_16 = arith.constant dense<0.000000e+00> : vector<8x768xf32>
    %32 = tpu.matmul %25, %31, %cst_16 {dimension_numbers = #tpu.dot_dimension_numbers<[1], [0], [0], [1], [0, 0, 1, 1], [], []>} : vector<8x384xbf16>, vector<384x768xbf16>, vector<8x768xf32> -> vector<8x768xf32>
    %c0_17 = arith.constant 0 : index
    %c0_18 = arith.constant 0 : index
    %33 = vector.load %arg7[%c0_17, %c0_18] : memref<1x768xf32, #tpu.memory_space<vmem>>, vector<1x768xf32>
    %34 = vector.broadcast %33 : vector<1x768xf32> to vector<8x768xf32>
    %35 = arith.addf %32, %34 : vector<8x768xf32>
    %36 = arith.truncf %30 : vector<8x384xf32> to vector<8x384xbf16>
    %c0_19 = arith.constant 0 : index
    %c0_20 = arith.constant 0 : index
    %37 = vector.load %arg8[%c0_19, %c0_20] : memref<8x384xbf16, #tpu.memory_space<vmem>>, vector<8x384xbf16>
    tpu.vector_store %arg8[%c0_19, %c0_20], %36 {strides = array<i32>} : memref<8x384xbf16, #tpu.memory_space<vmem>>, vector<8x384xbf16>,
    %38 = arith.truncf %35 : vector<8x768xf32> to vector<8x768xbf16>
    %c0_21 = arith.constant 0 : index
    %c0_22 = arith.constant 0 : index
    %39 = vector.load %arg9[%c0_21, %c0_22] : memref<8x768xbf16, #tpu.memory_space<vmem>>, vector<8x768xbf16>
    tpu.vector_store %arg9[%c0_21, %c0_22], %38 {strides = array<i32>} : memref<8x768xbf16, #tpu.memory_space<vmem>>, vector<8x768xbf16>,
    return
  }
  func.func @transform_0(%arg0: i32) -> (i32, i32) {
    %c0_i32 = arith.constant 0 : i32
    %c0_i32_0 = arith.constant 0 : i32
    return %arg0, %c0_i32 : i32, i32
  }
  func.func @transform_1(%arg0: i32) -> (i32, i32) {
    %c0_i32 = arith.constant 0 : i32
    %c0_i32_0 = arith.constant 0 : i32
    %c0_i32_1 = arith.constant 0 : i32
    return %c0_i32, %c0_i32_0 : i32, i32
  }
  func.func @transform_2(%arg0: i32) -> (i32, i32) {
    %c0_i32 = arith.constant 0 : i32
    %c0_i32_0 = arith.constant 0 : i32
    %c0_i32_1 = arith.constant 0 : i32
    return %c0_i32, %c0_i32_0 : i32, i32
  }
  func.func @transform_3(%arg0: i32) -> (i32, i32) {
    %c0_i32 = arith.constant 0 : i32
    %c0_i32_0 = arith.constant 0 : i32
    %c0_i32_1 = arith.constant 0 : i32
    return %c0_i32, %c0_i32_0 : i32, i32
  }
  func.func @transform_4(%arg0: i32) -> (i32, i32) {
    %c0_i32 = arith.constant 0 : i32
    %c0_i32_0 = arith.constant 0 : i32
    %c0_i32_1 = arith.constant 0 : i32
    return %c0_i32, %c0_i32_0 : i32, i32
  }
  func.func @transform_5(%arg0: i32) -> (i32, i32) {
    %c0_i32 = arith.constant 0 : i32
    %c0_i32_0 = arith.constant 0 : i32
    %c0_i32_1 = arith.constant 0 : i32
    return %c0_i32, %c0_i32_0 : i32, i32
  }
  func.func @transform_6(%arg0: i32) -> (i32, i32) {
    %c0_i32 = arith.constant 0 : i32
    %c0_i32_0 = arith.constant 0 : i32
    %c0_i32_1 = arith.constant 0 : i32
    return %c0_i32, %c0_i32_0 : i32, i32
  }
  func.func @transform_7(%arg0: i32) -> (i32, i32) {
    %c0_i32 = arith.constant 0 : i32
    %c0_i32_0 = arith.constant 0 : i32
    return %arg0, %c0_i32 : i32, i32
  }
  func.func @transform_8(%arg0: i32) -> (i32, i32) {
    %c0_i32 = arith.constant 0 : i32
    %c0_i32_0 = arith.constant 0 : i32
    return %arg0, %c0_i32 : i32, i32
  }
}

module attributes {stable_mosaic.version = 11 : i64} {
  func.func @_attn_kernel(%arg0: i32, %arg1: i32, %arg2: memref<1x4x384xbf16, #tpu.memory_space<vmem>>, %arg3: memref<1x4x768xbf16, #tpu.memory_space<vmem>>, %arg4: memref<384x384xbf16, #tpu.memory_space<vmem>>, %arg5: memref<1x384xf32, #tpu.memory_space<vmem>>, %arg6: memref<1x4x384xf32, #tpu.memory_space<vmem>>, %arg7: memref<1x4x384xf32, #tpu.memory_space<vmem>>) attributes {dimension_semantics = [#tpu.dimension_semantics<parallel>, #tpu.dimension_semantics<parallel>], iteration_bounds = array<i64: 2, 1>, scalar_prefetch = 0 : i64, scratch_operands = 0 : i64, tpu.core_type = #tpu.core_type<tc>, window_params = [{transform_indices = @transform_0, window_bounds = array<i64: 1, 4, 384>}, {transform_indices = @transform_1, window_bounds = array<i64: 1, 4, 768>}, {pipeline_mode = #tpu.pipeline_mode<synchronous>, transform_indices = @transform_2, window_bounds = array<i64: 384, 384>}, {pipeline_mode = #tpu.pipeline_mode<synchronous>, transform_indices = @transform_3, window_bounds = array<i64: 1, 384>}, {transform_indices = @transform_4, window_bounds = array<i64: 1, 4, 384>}, {transform_indices = @transform_5, window_bounds = array<i64: 1, 4, 384>}]} {
    %c0 = arith.constant 0 : index
    %c0_0 = arith.constant 0 : index
    %c0_1 = arith.constant 0 : index
    %0 = vector.load %arg6[%c0, %c0_0, %c0_1] : memref<1x4x384xf32, #tpu.memory_space<vmem>>, vector<1x4x384xf32>
    %1 = vector.shape_cast %0 : vector<1x4x384xf32> to vector<4x384xf32>
    %c0_2 = arith.constant 0 : index
    %c0_3 = arith.constant 0 : index
    %2 = vector.load %arg5[%c0_2, %c0_3] : memref<1x384xf32, #tpu.memory_space<vmem>>, vector<1x384xf32>
    %3 = vector.broadcast %2 : vector<1x384xf32> to vector<4x384xf32>
    %4 = arith.addf %1, %3 : vector<4x384xf32>
    %c0_4 = arith.constant 0 : index
    %c0_5 = arith.constant 0 : index
    %c0_6 = arith.constant 0 : index
    %5 = vector.load %arg2[%c0_4, %c0_5, %c0_6] : memref<1x4x384xbf16, #tpu.memory_space<vmem>>, vector<1x4x64xbf16>
    %6 = vector.shape_cast %5 : vector<1x4x64xbf16> to vector<4x64xbf16>
    %c0_7 = arith.constant 0 : index
    %c0_8 = arith.constant 0 : index
    %c0_9 = arith.constant 0 : index
    %7 = vector.load %arg3[%c0_7, %c0_8, %c0_9] : memref<1x4x768xbf16, #tpu.memory_space<vmem>>, vector<1x4x64xbf16>
    %8 = vector.shape_cast %7 : vector<1x4x64xbf16> to vector<4x64xbf16>
    %c0_10 = arith.constant 0 : index
    %c0_11 = arith.constant 0 : index
    %c384 = arith.constant 384 : index
    %9 = vector.load %arg3[%c0_10, %c0_11, %c384] : memref<1x4x768xbf16, #tpu.memory_space<vmem>>, vector<1x4x64xbf16>
    %10 = vector.shape_cast %9 : vector<1x4x64xbf16> to vector<4x64xbf16>
    %cst = arith.constant dense<0.000000e+00> : vector<4x4xf32>
    %11 = tpu.matmul %6, %8, %cst {dimension_numbers = #tpu.dot_dimension_numbers<[1], [1], [0], [0], [0, 0, 1, 0], [], []>} : vector<4x64xbf16>, vector<4x64xbf16>, vector<4x4xf32> -> vector<4x4xf32>
    %cst_12 = arith.constant 1.250000e-01 : f32
    %12 = vector.broadcast %cst_12 : f32 to vector<4x4xf32>
    %13 = arith.mulf %11, %12 : vector<4x4xf32>
    %cst_13 = arith.constant dense<0xFF800000> : vector<4xf32>
    %14 = vector.multi_reduction <maximumf>, %13, %cst_13 [1] : vector<4x4xf32> to vector<4xf32>
    %15 = vector.shape_cast %14 : vector<4xf32> to vector<4x1xf32>
    %16 = vector.broadcast %15 : vector<4x1xf32> to vector<4x4xf32>
    %17 = arith.subf %13, %16 : vector<4x4xf32>
    %18 = math.exp %17 : vector<4x4xf32>
    %cst_14 = arith.constant dense<0.000000e+00> : vector<4xf32>
    %19 = vector.multi_reduction <add>, %18, %cst_14 [1] : vector<4x4xf32> to vector<4xf32>
    %20 = vector.shape_cast %19 : vector<4xf32> to vector<4x1xf32>
    %21 = tpu.reciprocal %20 {approx = true} : vector<4x1xf32> -> vector<4x1xf32>
    %22 = vector.broadcast %21 : vector<4x1xf32> to vector<4x4xf32>
    %23 = arith.mulf %18, %22 : vector<4x4xf32>
    %24 = arith.truncf %23 : vector<4x4xf32> to vector<4x4xbf16>
    %cst_15 = arith.constant dense<0.000000e+00> : vector<4x64xf32>
    %25 = tpu.matmul %24, %10, %cst_15 {dimension_numbers = #tpu.dot_dimension_numbers<[1], [0], [0], [1], [0, 0, 1, 1], [], []>} : vector<4x4xbf16>, vector<4x64xbf16>, vector<4x64xf32> -> vector<4x64xf32>
    %26 = arith.truncf %25 : vector<4x64xf32> to vector<4x64xbf16>
    %c0_16 = arith.constant 0 : index
    %c0_17 = arith.constant 0 : index
    %27 = vector.load %arg4[%c0_16, %c0_17] : memref<384x384xbf16, #tpu.memory_space<vmem>>, vector<64x384xbf16>
    %cst_18 = arith.constant dense<0.000000e+00> : vector<4x384xf32>
    %28 = tpu.matmul %26, %27, %cst_18 {dimension_numbers = #tpu.dot_dimension_numbers<[1], [0], [0], [1], [0, 0, 1, 1], [], []>} : vector<4x64xbf16>, vector<64x384xbf16>, vector<4x384xf32> -> vector<4x384xf32>
    %29 = arith.addf %4, %28 : vector<4x384xf32>
    %c0_19 = arith.constant 0 : index
    %c0_20 = arith.constant 0 : index
    %c64 = arith.constant 64 : index
    %30 = vector.load %arg2[%c0_19, %c0_20, %c64] : memref<1x4x384xbf16, #tpu.memory_space<vmem>>, vector<1x4x64xbf16>
    %31 = vector.shape_cast %30 : vector<1x4x64xbf16> to vector<4x64xbf16>
    %c0_21 = arith.constant 0 : index
    %c0_22 = arith.constant 0 : index
    %c64_23 = arith.constant 64 : index
    %32 = vector.load %arg3[%c0_21, %c0_22, %c64_23] : memref<1x4x768xbf16, #tpu.memory_space<vmem>>, vector<1x4x64xbf16>
    %33 = vector.shape_cast %32 : vector<1x4x64xbf16> to vector<4x64xbf16>
    %c0_24 = arith.constant 0 : index
    %c0_25 = arith.constant 0 : index
    %c448 = arith.constant 448 : index
    %34 = vector.load %arg3[%c0_24, %c0_25, %c448] : memref<1x4x768xbf16, #tpu.memory_space<vmem>>, vector<1x4x64xbf16>
    %35 = vector.shape_cast %34 : vector<1x4x64xbf16> to vector<4x64xbf16>
    %cst_26 = arith.constant dense<0.000000e+00> : vector<4x4xf32>
    %36 = tpu.matmul %31, %33, %cst_26 {dimension_numbers = #tpu.dot_dimension_numbers<[1], [1], [0], [0], [0, 0, 1, 0], [], []>} : vector<4x64xbf16>, vector<4x64xbf16>, vector<4x4xf32> -> vector<4x4xf32>
    %cst_27 = arith.constant 1.250000e-01 : f32
    %37 = vector.broadcast %cst_27 : f32 to vector<4x4xf32>
    %38 = arith.mulf %36, %37 : vector<4x4xf32>
    %cst_28 = arith.constant dense<0xFF800000> : vector<4xf32>
    %39 = vector.multi_reduction <maximumf>, %38, %cst_28 [1] : vector<4x4xf32> to vector<4xf32>
    %40 = vector.shape_cast %39 : vector<4xf32> to vector<4x1xf32>
    %41 = vector.broadcast %40 : vector<4x1xf32> to vector<4x4xf32>
    %42 = arith.subf %38, %41 : vector<4x4xf32>
    %43 = math.exp %42 : vector<4x4xf32>
    %cst_29 = arith.constant dense<0.000000e+00> : vector<4xf32>
    %44 = vector.multi_reduction <add>, %43, %cst_29 [1] : vector<4x4xf32> to vector<4xf32>
    %45 = vector.shape_cast %44 : vector<4xf32> to vector<4x1xf32>
    %46 = tpu.reciprocal %45 {approx = true} : vector<4x1xf32> -> vector<4x1xf32>
    %47 = vector.broadcast %46 : vector<4x1xf32> to vector<4x4xf32>
    %48 = arith.mulf %43, %47 : vector<4x4xf32>
    %49 = arith.truncf %48 : vector<4x4xf32> to vector<4x4xbf16>
    %cst_30 = arith.constant dense<0.000000e+00> : vector<4x64xf32>
    %50 = tpu.matmul %49, %35, %cst_30 {dimension_numbers = #tpu.dot_dimension_numbers<[1], [0], [0], [1], [0, 0, 1, 1], [], []>} : vector<4x4xbf16>, vector<4x64xbf16>, vector<4x64xf32> -> vector<4x64xf32>
    %51 = arith.truncf %50 : vector<4x64xf32> to vector<4x64xbf16>
    %c64_31 = arith.constant 64 : index
    %c0_32 = arith.constant 0 : index
    %52 = vector.load %arg4[%c64_31, %c0_32] : memref<384x384xbf16, #tpu.memory_space<vmem>>, vector<64x384xbf16>
    %cst_33 = arith.constant dense<0.000000e+00> : vector<4x384xf32>
    %53 = tpu.matmul %51, %52, %cst_33 {dimension_numbers = #tpu.dot_dimension_numbers<[1], [0], [0], [1], [0, 0, 1, 1], [], []>} : vector<4x64xbf16>, vector<64x384xbf16>, vector<4x384xf32> -> vector<4x384xf32>
    %54 = arith.addf %29, %53 : vector<4x384xf32>
    %c0_34 = arith.constant 0 : index
    %c0_35 = arith.constant 0 : index
    %c128 = arith.constant 128 : index
    %55 = vector.load %arg2[%c0_34, %c0_35, %c128] : memref<1x4x384xbf16, #tpu.memory_space<vmem>>, vector<1x4x64xbf16>
    %56 = vector.shape_cast %55 : vector<1x4x64xbf16> to vector<4x64xbf16>
    %c0_36 = arith.constant 0 : index
    %c0_37 = arith.constant 0 : index
    %c128_38 = arith.constant 128 : index
    %57 = vector.load %arg3[%c0_36, %c0_37, %c128_38] : memref<1x4x768xbf16, #tpu.memory_space<vmem>>, vector<1x4x64xbf16>
    %58 = vector.shape_cast %57 : vector<1x4x64xbf16> to vector<4x64xbf16>
    %c0_39 = arith.constant 0 : index
    %c0_40 = arith.constant 0 : index
    %c512 = arith.constant 512 : index
    %59 = vector.load %arg3[%c0_39, %c0_40, %c512] : memref<1x4x768xbf16, #tpu.memory_space<vmem>>, vector<1x4x64xbf16>
    %60 = vector.shape_cast %59 : vector<1x4x64xbf16> to vector<4x64xbf16>
    %cst_41 = arith.constant dense<0.000000e+00> : vector<4x4xf32>
    %61 = tpu.matmul %56, %58, %cst_41 {dimension_numbers = #tpu.dot_dimension_numbers<[1], [1], [0], [0], [0, 0, 1, 0], [], []>} : vector<4x64xbf16>, vector<4x64xbf16>, vector<4x4xf32> -> vector<4x4xf32>
    %cst_42 = arith.constant 1.250000e-01 : f32
    %62 = vector.broadcast %cst_42 : f32 to vector<4x4xf32>
    %63 = arith.mulf %61, %62 : vector<4x4xf32>
    %cst_43 = arith.constant dense<0xFF800000> : vector<4xf32>
    %64 = vector.multi_reduction <maximumf>, %63, %cst_43 [1] : vector<4x4xf32> to vector<4xf32>
    %65 = vector.shape_cast %64 : vector<4xf32> to vector<4x1xf32>
    %66 = vector.broadcast %65 : vector<4x1xf32> to vector<4x4xf32>
    %67 = arith.subf %63, %66 : vector<4x4xf32>
    %68 = math.exp %67 : vector<4x4xf32>
    %cst_44 = arith.constant dense<0.000000e+00> : vector<4xf32>
    %69 = vector.multi_reduction <add>, %68, %cst_44 [1] : vector<4x4xf32> to vector<4xf32>
    %70 = vector.shape_cast %69 : vector<4xf32> to vector<4x1xf32>
    %71 = tpu.reciprocal %70 {approx = true} : vector<4x1xf32> -> vector<4x1xf32>
    %72 = vector.broadcast %71 : vector<4x1xf32> to vector<4x4xf32>
    %73 = arith.mulf %68, %72 : vector<4x4xf32>
    %74 = arith.truncf %73 : vector<4x4xf32> to vector<4x4xbf16>
    %cst_45 = arith.constant dense<0.000000e+00> : vector<4x64xf32>
    %75 = tpu.matmul %74, %60, %cst_45 {dimension_numbers = #tpu.dot_dimension_numbers<[1], [0], [0], [1], [0, 0, 1, 1], [], []>} : vector<4x4xbf16>, vector<4x64xbf16>, vector<4x64xf32> -> vector<4x64xf32>
    %76 = arith.truncf %75 : vector<4x64xf32> to vector<4x64xbf16>
    %c128_46 = arith.constant 128 : index
    %c0_47 = arith.constant 0 : index
    %77 = vector.load %arg4[%c128_46, %c0_47] : memref<384x384xbf16, #tpu.memory_space<vmem>>, vector<64x384xbf16>
    %cst_48 = arith.constant dense<0.000000e+00> : vector<4x384xf32>
    %78 = tpu.matmul %76, %77, %cst_48 {dimension_numbers = #tpu.dot_dimension_numbers<[1], [0], [0], [1], [0, 0, 1, 1], [], []>} : vector<4x64xbf16>, vector<64x384xbf16>, vector<4x384xf32> -> vector<4x384xf32>
    %79 = arith.addf %54, %78 : vector<4x384xf32>
    %c0_49 = arith.constant 0 : index
    %c0_50 = arith.constant 0 : index
    %c192 = arith.constant 192 : index
    %80 = vector.load %arg2[%c0_49, %c0_50, %c192] : memref<1x4x384xbf16, #tpu.memory_space<vmem>>, vector<1x4x64xbf16>
    %81 = vector.shape_cast %80 : vector<1x4x64xbf16> to vector<4x64xbf16>
    %c0_51 = arith.constant 0 : index
    %c0_52 = arith.constant 0 : index
    %c192_53 = arith.constant 192 : index
    %82 = vector.load %arg3[%c0_51, %c0_52, %c192_53] : memref<1x4x768xbf16, #tpu.memory_space<vmem>>, vector<1x4x64xbf16>
    %83 = vector.shape_cast %82 : vector<1x4x64xbf16> to vector<4x64xbf16>
    %c0_54 = arith.constant 0 : index
    %c0_55 = arith.constant 0 : index
    %c576 = arith.constant 576 : index
    %84 = vector.load %arg3[%c0_54, %c0_55, %c576] : memref<1x4x768xbf16, #tpu.memory_space<vmem>>, vector<1x4x64xbf16>
    %85 = vector.shape_cast %84 : vector<1x4x64xbf16> to vector<4x64xbf16>
    %cst_56 = arith.constant dense<0.000000e+00> : vector<4x4xf32>
    %86 = tpu.matmul %81, %83, %cst_56 {dimension_numbers = #tpu.dot_dimension_numbers<[1], [1], [0], [0], [0, 0, 1, 0], [], []>} : vector<4x64xbf16>, vector<4x64xbf16>, vector<4x4xf32> -> vector<4x4xf32>
    %cst_57 = arith.constant 1.250000e-01 : f32
    %87 = vector.broadcast %cst_57 : f32 to vector<4x4xf32>
    %88 = arith.mulf %86, %87 : vector<4x4xf32>
    %cst_58 = arith.constant dense<0xFF800000> : vector<4xf32>
    %89 = vector.multi_reduction <maximumf>, %88, %cst_58 [1] : vector<4x4xf32> to vector<4xf32>
    %90 = vector.shape_cast %89 : vector<4xf32> to vector<4x1xf32>
    %91 = vector.broadcast %90 : vector<4x1xf32> to vector<4x4xf32>
    %92 = arith.subf %88, %91 : vector<4x4xf32>
    %93 = math.exp %92 : vector<4x4xf32>
    %cst_59 = arith.constant dense<0.000000e+00> : vector<4xf32>
    %94 = vector.multi_reduction <add>, %93, %cst_59 [1] : vector<4x4xf32> to vector<4xf32>
    %95 = vector.shape_cast %94 : vector<4xf32> to vector<4x1xf32>
    %96 = tpu.reciprocal %95 {approx = true} : vector<4x1xf32> -> vector<4x1xf32>
    %97 = vector.broadcast %96 : vector<4x1xf32> to vector<4x4xf32>
    %98 = arith.mulf %93, %97 : vector<4x4xf32>
    %99 = arith.truncf %98 : vector<4x4xf32> to vector<4x4xbf16>
    %cst_60 = arith.constant dense<0.000000e+00> : vector<4x64xf32>
    %100 = tpu.matmul %99, %85, %cst_60 {dimension_numbers = #tpu.dot_dimension_numbers<[1], [0], [0], [1], [0, 0, 1, 1], [], []>} : vector<4x4xbf16>, vector<4x64xbf16>, vector<4x64xf32> -> vector<4x64xf32>
    %101 = arith.truncf %100 : vector<4x64xf32> to vector<4x64xbf16>
    %c192_61 = arith.constant 192 : index
    %c0_62 = arith.constant 0 : index
    %102 = vector.load %arg4[%c192_61, %c0_62] : memref<384x384xbf16, #tpu.memory_space<vmem>>, vector<64x384xbf16>
    %cst_63 = arith.constant dense<0.000000e+00> : vector<4x384xf32>
    %103 = tpu.matmul %101, %102, %cst_63 {dimension_numbers = #tpu.dot_dimension_numbers<[1], [0], [0], [1], [0, 0, 1, 1], [], []>} : vector<4x64xbf16>, vector<64x384xbf16>, vector<4x384xf32> -> vector<4x384xf32>
    %104 = arith.addf %79, %103 : vector<4x384xf32>
    %c0_64 = arith.constant 0 : index
    %c0_65 = arith.constant 0 : index
    %c256 = arith.constant 256 : index
    %105 = vector.load %arg2[%c0_64, %c0_65, %c256] : memref<1x4x384xbf16, #tpu.memory_space<vmem>>, vector<1x4x64xbf16>
    %106 = vector.shape_cast %105 : vector<1x4x64xbf16> to vector<4x64xbf16>
    %c0_66 = arith.constant 0 : index
    %c0_67 = arith.constant 0 : index
    %c256_68 = arith.constant 256 : index
    %107 = vector.load %arg3[%c0_66, %c0_67, %c256_68] : memref<1x4x768xbf16, #tpu.memory_space<vmem>>, vector<1x4x64xbf16>
    %108 = vector.shape_cast %107 : vector<1x4x64xbf16> to vector<4x64xbf16>
    %c0_69 = arith.constant 0 : index
    %c0_70 = arith.constant 0 : index
    %c640 = arith.constant 640 : index
    %109 = vector.load %arg3[%c0_69, %c0_70, %c640] : memref<1x4x768xbf16, #tpu.memory_space<vmem>>, vector<1x4x64xbf16>
    %110 = vector.shape_cast %109 : vector<1x4x64xbf16> to vector<4x64xbf16>
    %cst_71 = arith.constant dense<0.000000e+00> : vector<4x4xf32>
    %111 = tpu.matmul %106, %108, %cst_71 {dimension_numbers = #tpu.dot_dimension_numbers<[1], [1], [0], [0], [0, 0, 1, 0], [], []>} : vector<4x64xbf16>, vector<4x64xbf16>, vector<4x4xf32> -> vector<4x4xf32>
    %cst_72 = arith.constant 1.250000e-01 : f32
    %112 = vector.broadcast %cst_72 : f32 to vector<4x4xf32>
    %113 = arith.mulf %111, %112 : vector<4x4xf32>
    %cst_73 = arith.constant dense<0xFF800000> : vector<4xf32>
    %114 = vector.multi_reduction <maximumf>, %113, %cst_73 [1] : vector<4x4xf32> to vector<4xf32>
    %115 = vector.shape_cast %114 : vector<4xf32> to vector<4x1xf32>
    %116 = vector.broadcast %115 : vector<4x1xf32> to vector<4x4xf32>
    %117 = arith.subf %113, %116 : vector<4x4xf32>
    %118 = math.exp %117 : vector<4x4xf32>
    %cst_74 = arith.constant dense<0.000000e+00> : vector<4xf32>
    %119 = vector.multi_reduction <add>, %118, %cst_74 [1] : vector<4x4xf32> to vector<4xf32>
    %120 = vector.shape_cast %119 : vector<4xf32> to vector<4x1xf32>
    %121 = tpu.reciprocal %120 {approx = true} : vector<4x1xf32> -> vector<4x1xf32>
    %122 = vector.broadcast %121 : vector<4x1xf32> to vector<4x4xf32>
    %123 = arith.mulf %118, %122 : vector<4x4xf32>
    %124 = arith.truncf %123 : vector<4x4xf32> to vector<4x4xbf16>
    %cst_75 = arith.constant dense<0.000000e+00> : vector<4x64xf32>
    %125 = tpu.matmul %124, %110, %cst_75 {dimension_numbers = #tpu.dot_dimension_numbers<[1], [0], [0], [1], [0, 0, 1, 1], [], []>} : vector<4x4xbf16>, vector<4x64xbf16>, vector<4x64xf32> -> vector<4x64xf32>
    %126 = arith.truncf %125 : vector<4x64xf32> to vector<4x64xbf16>
    %c256_76 = arith.constant 256 : index
    %c0_77 = arith.constant 0 : index
    %127 = vector.load %arg4[%c256_76, %c0_77] : memref<384x384xbf16, #tpu.memory_space<vmem>>, vector<64x384xbf16>
    %cst_78 = arith.constant dense<0.000000e+00> : vector<4x384xf32>
    %128 = tpu.matmul %126, %127, %cst_78 {dimension_numbers = #tpu.dot_dimension_numbers<[1], [0], [0], [1], [0, 0, 1, 1], [], []>} : vector<4x64xbf16>, vector<64x384xbf16>, vector<4x384xf32> -> vector<4x384xf32>
    %129 = arith.addf %104, %128 : vector<4x384xf32>
    %c0_79 = arith.constant 0 : index
    %c0_80 = arith.constant 0 : index
    %c320 = arith.constant 320 : index
    %130 = vector.load %arg2[%c0_79, %c0_80, %c320] : memref<1x4x384xbf16, #tpu.memory_space<vmem>>, vector<1x4x64xbf16>
    %131 = vector.shape_cast %130 : vector<1x4x64xbf16> to vector<4x64xbf16>
    %c0_81 = arith.constant 0 : index
    %c0_82 = arith.constant 0 : index
    %c320_83 = arith.constant 320 : index
    %132 = vector.load %arg3[%c0_81, %c0_82, %c320_83] : memref<1x4x768xbf16, #tpu.memory_space<vmem>>, vector<1x4x64xbf16>
    %133 = vector.shape_cast %132 : vector<1x4x64xbf16> to vector<4x64xbf16>
    %c0_84 = arith.constant 0 : index
    %c0_85 = arith.constant 0 : index
    %c704 = arith.constant 704 : index
    %134 = vector.load %arg3[%c0_84, %c0_85, %c704] : memref<1x4x768xbf16, #tpu.memory_space<vmem>>, vector<1x4x64xbf16>
    %135 = vector.shape_cast %134 : vector<1x4x64xbf16> to vector<4x64xbf16>
    %cst_86 = arith.constant dense<0.000000e+00> : vector<4x4xf32>
    %136 = tpu.matmul %131, %133, %cst_86 {dimension_numbers = #tpu.dot_dimension_numbers<[1], [1], [0], [0], [0, 0, 1, 0], [], []>} : vector<4x64xbf16>, vector<4x64xbf16>, vector<4x4xf32> -> vector<4x4xf32>
    %cst_87 = arith.constant 1.250000e-01 : f32
    %137 = vector.broadcast %cst_87 : f32 to vector<4x4xf32>
    %138 = arith.mulf %136, %137 : vector<4x4xf32>
    %cst_88 = arith.constant dense<0xFF800000> : vector<4xf32>
    %139 = vector.multi_reduction <maximumf>, %138, %cst_88 [1] : vector<4x4xf32> to vector<4xf32>
    %140 = vector.shape_cast %139 : vector<4xf32> to vector<4x1xf32>
    %141 = vector.broadcast %140 : vector<4x1xf32> to vector<4x4xf32>
    %142 = arith.subf %138, %141 : vector<4x4xf32>
    %143 = math.exp %142 : vector<4x4xf32>
    %cst_89 = arith.constant dense<0.000000e+00> : vector<4xf32>
    %144 = vector.multi_reduction <add>, %143, %cst_89 [1] : vector<4x4xf32> to vector<4xf32>
    %145 = vector.shape_cast %144 : vector<4xf32> to vector<4x1xf32>
    %146 = tpu.reciprocal %145 {approx = true} : vector<4x1xf32> -> vector<4x1xf32>
    %147 = vector.broadcast %146 : vector<4x1xf32> to vector<4x4xf32>
    %148 = arith.mulf %143, %147 : vector<4x4xf32>
    %149 = arith.truncf %148 : vector<4x4xf32> to vector<4x4xbf16>
    %cst_90 = arith.constant dense<0.000000e+00> : vector<4x64xf32>
    %150 = tpu.matmul %149, %135, %cst_90 {dimension_numbers = #tpu.dot_dimension_numbers<[1], [0], [0], [1], [0, 0, 1, 1], [], []>} : vector<4x4xbf16>, vector<4x64xbf16>, vector<4x64xf32> -> vector<4x64xf32>
    %151 = arith.truncf %150 : vector<4x64xf32> to vector<4x64xbf16>
    %c320_91 = arith.constant 320 : index
    %c0_92 = arith.constant 0 : index
    %152 = vector.load %arg4[%c320_91, %c0_92] : memref<384x384xbf16, #tpu.memory_space<vmem>>, vector<64x384xbf16>
    %cst_93 = arith.constant dense<0.000000e+00> : vector<4x384xf32>
    %153 = tpu.matmul %151, %152, %cst_93 {dimension_numbers = #tpu.dot_dimension_numbers<[1], [0], [0], [1], [0, 0, 1, 1], [], []>} : vector<4x64xbf16>, vector<64x384xbf16>, vector<4x384xf32> -> vector<4x384xf32>
    %154 = arith.addf %129, %153 : vector<4x384xf32>
    %c0_94 = arith.constant 0 : index
    %c0_95 = arith.constant 0 : index
    %c0_96 = arith.constant 0 : index
    %155 = vector.load %arg7[%c0_94, %c0_95, %c0_96] : memref<1x4x384xf32, #tpu.memory_space<vmem>>, vector<1x4x384xf32>
    %156 = vector.shape_cast %155 : vector<1x4x384xf32> to vector<4x384xf32>
    %157 = vector.shape_cast %154 : vector<4x384xf32> to vector<1x4x384xf32>
    tpu.vector_store %arg7[%c0_94, %c0_95, %c0_96], %157 {strides = array<i32>} : memref<1x4x384xf32, #tpu.memory_space<vmem>>, vector<1x4x384xf32>,
    return
  }
  func.func @transform_0(%arg0: i32, %arg1: i32) -> (i32, i32, i32) {
    %c0_i32 = arith.constant 0 : i32
    %c0_i32_0 = arith.constant 0 : i32
    return %arg0, %arg1, %c0_i32 : i32, i32, i32
  }
  func.func @transform_1(%arg0: i32, %arg1: i32) -> (i32, i32, i32) {
    %c0_i32 = arith.constant 0 : i32
    %c0_i32_0 = arith.constant 0 : i32
    %c0_i32_1 = arith.constant 0 : i32
    return %arg0, %c0_i32, %c0_i32_0 : i32, i32, i32
  }
  func.func @transform_2(%arg0: i32, %arg1: i32) -> (i32, i32) {
    %c0_i32 = arith.constant 0 : i32
    %c0_i32_0 = arith.constant 0 : i32
    %c0_i32_1 = arith.constant 0 : i32
    return %c0_i32, %c0_i32_0 : i32, i32
  }
  func.func @transform_3(%arg0: i32, %arg1: i32) -> (i32, i32) {
    %c0_i32 = arith.constant 0 : i32
    %c0_i32_0 = arith.constant 0 : i32
    %c0_i32_1 = arith.constant 0 : i32
    return %c0_i32, %c0_i32_0 : i32, i32
  }
  func.func @transform_4(%arg0: i32, %arg1: i32) -> (i32, i32, i32) {
    %c0_i32 = arith.constant 0 : i32
    %c0_i32_0 = arith.constant 0 : i32
    return %arg0, %arg1, %c0_i32 : i32, i32, i32
  }
  func.func @transform_5(%arg0: i32, %arg1: i32) -> (i32, i32, i32) {
    %c0_i32 = arith.constant 0 : i32
    %c0_i32_0 = arith.constant 0 : i32
    return %arg0, %arg1, %c0_i32 : i32, i32, i32
  }
}

module attributes {stable_mosaic.version = 11 : i64} {
  func.func @_mlp_kernel(%arg0: i32, %arg1: memref<8x384xf32, #tpu.memory_space<vmem>>, %arg2: memref<1x384xf32, #tpu.memory_space<vmem>>, %arg3: memref<1x384xf32, #tpu.memory_space<vmem>>, %arg4: memref<384x1536xbf16, #tpu.memory_space<vmem>>, %arg5: memref<1x1536xf32, #tpu.memory_space<vmem>>, %arg6: memref<1536x384xbf16, #tpu.memory_space<vmem>>, %arg7: memref<1x384xf32, #tpu.memory_space<vmem>>, %arg8: memref<8x384xf32, #tpu.memory_space<vmem>>) attributes {dimension_semantics = [#tpu.dimension_semantics<parallel>], iteration_bounds = array<i64: 1>, scalar_prefetch = 0 : i64, scratch_operands = 0 : i64, tpu.core_type = #tpu.core_type<tc>, window_params = [{transform_indices = @transform_0, window_bounds = array<i64: 8, 384>}, {pipeline_mode = #tpu.pipeline_mode<synchronous>, transform_indices = @transform_1, window_bounds = array<i64: 1, 384>}, {pipeline_mode = #tpu.pipeline_mode<synchronous>, transform_indices = @transform_2, window_bounds = array<i64: 1, 384>}, {pipeline_mode = #tpu.pipeline_mode<synchronous>, transform_indices = @transform_3, window_bounds = array<i64: 384, 1536>}, {pipeline_mode = #tpu.pipeline_mode<synchronous>, transform_indices = @transform_4, window_bounds = array<i64: 1, 1536>}, {pipeline_mode = #tpu.pipeline_mode<synchronous>, transform_indices = @transform_5, window_bounds = array<i64: 1536, 384>}, {pipeline_mode = #tpu.pipeline_mode<synchronous>, transform_indices = @transform_6, window_bounds = array<i64: 1, 384>}, {transform_indices = @transform_7, window_bounds = array<i64: 8, 384>}]} {
    %c0 = arith.constant 0 : index
    %c0_0 = arith.constant 0 : index
    %0 = vector.load %arg1[%c0, %c0_0] : memref<8x384xf32, #tpu.memory_space<vmem>>, vector<8x384xf32>
    %cst = arith.constant dense<0.000000e+00> : vector<8xf32>
    %1 = vector.multi_reduction <add>, %0, %cst [1] : vector<8x384xf32> to vector<8xf32>
    %2 = vector.shape_cast %1 : vector<8xf32> to vector<8x1xf32>
    %cst_1 = arith.constant 3.840000e+02 : f32
    %3 = vector.broadcast %cst_1 : f32 to vector<8x1xf32>
    %4 = arith.divf %2, %3 : vector<8x1xf32>
    %5 = vector.broadcast %4 : vector<8x1xf32> to vector<8x384xf32>
    %6 = arith.subf %0, %5 : vector<8x384xf32>
    %7 = arith.mulf %6, %6 : vector<8x384xf32>
    %cst_2 = arith.constant dense<0.000000e+00> : vector<8xf32>
    %8 = vector.multi_reduction <add>, %7, %cst_2 [1] : vector<8x384xf32> to vector<8xf32>
    %9 = vector.shape_cast %8 : vector<8xf32> to vector<8x1xf32>
    %cst_3 = arith.constant 3.840000e+02 : f32
    %10 = vector.broadcast %cst_3 : f32 to vector<8x1xf32>
    %11 = arith.divf %9, %10 : vector<8x1xf32>
    %12 = vector.broadcast %4 : vector<8x1xf32> to vector<8x384xf32>
    %13 = arith.subf %0, %12 : vector<8x384xf32>
    %cst_4 = arith.constant 9.99999974E-6 : f32
    %14 = vector.broadcast %cst_4 : f32 to vector<8x1xf32>
    %15 = arith.addf %11, %14 : vector<8x1xf32>
    %16 = math.rsqrt %15 : vector<8x1xf32>
    %17 = vector.broadcast %16 : vector<8x1xf32> to vector<8x384xf32>
    %18 = arith.mulf %13, %17 : vector<8x384xf32>
    %c0_5 = arith.constant 0 : index
    %c0_6 = arith.constant 0 : index
    %19 = vector.load %arg2[%c0_5, %c0_6] : memref<1x384xf32, #tpu.memory_space<vmem>>, vector<1x384xf32>
    %20 = vector.broadcast %19 : vector<1x384xf32> to vector<8x384xf32>
    %21 = arith.mulf %18, %20 : vector<8x384xf32>
    %c0_7 = arith.constant 0 : index
    %c0_8 = arith.constant 0 : index
    %22 = vector.load %arg3[%c0_7, %c0_8] : memref<1x384xf32, #tpu.memory_space<vmem>>, vector<1x384xf32>
    %23 = vector.broadcast %22 : vector<1x384xf32> to vector<8x384xf32>
    %24 = arith.addf %21, %23 : vector<8x384xf32>
    %25 = arith.truncf %24 : vector<8x384xf32> to vector<8x384xbf16>
    %c0_9 = arith.constant 0 : index
    %c0_10 = arith.constant 0 : index
    %26 = vector.load %arg4[%c0_9, %c0_10] : memref<384x1536xbf16, #tpu.memory_space<vmem>>, vector<384x1536xbf16>
    %cst_11 = arith.constant dense<0.000000e+00> : vector<8x1536xf32>
    %27 = tpu.matmul %25, %26, %cst_11 {dimension_numbers = #tpu.dot_dimension_numbers<[1], [0], [0], [1], [0, 0, 1, 1], [], []>} : vector<8x384xbf16>, vector<384x1536xbf16>, vector<8x1536xf32> -> vector<8x1536xf32>
    %c0_12 = arith.constant 0 : index
    %c0_13 = arith.constant 0 : index
    %28 = vector.load %arg5[%c0_12, %c0_13] : memref<1x1536xf32, #tpu.memory_space<vmem>>, vector<1x1536xf32>
    %29 = vector.broadcast %28 : vector<1x1536xf32> to vector<8x1536xf32>
    %30 = arith.addf %27, %29 : vector<8x1536xf32>
    %31 = arith.mulf %30, %30 : vector<8x1536xf32>
    %32 = arith.mulf %30, %31 : vector<8x1536xf32>
    %cst_14 = arith.constant 4.471500e-02 : f32
    %33 = vector.broadcast %cst_14 : f32 to vector<8x1536xf32>
    %34 = arith.mulf %33, %32 : vector<8x1536xf32>
    %35 = arith.addf %30, %34 : vector<8x1536xf32>
    %cst_15 = arith.constant 0.797884583 : f32
    %36 = vector.broadcast %cst_15 : f32 to vector<8x1536xf32>
    %37 = arith.mulf %36, %35 : vector<8x1536xf32>
    %38 = math.tanh %37 : vector<8x1536xf32>
    %cst_16 = arith.constant 1.000000e+00 : f32
    %39 = vector.broadcast %cst_16 : f32 to vector<8x1536xf32>
    %40 = arith.addf %39, %38 : vector<8x1536xf32>
    %cst_17 = arith.constant 5.000000e-01 : f32
    %41 = vector.broadcast %cst_17 : f32 to vector<8x1536xf32>
    %42 = arith.mulf %41, %40 : vector<8x1536xf32>
    %43 = arith.mulf %30, %42 : vector<8x1536xf32>
    %44 = arith.truncf %43 : vector<8x1536xf32> to vector<8x1536xbf16>
    %c0_18 = arith.constant 0 : index
    %c0_19 = arith.constant 0 : index
    %45 = vector.load %arg6[%c0_18, %c0_19] : memref<1536x384xbf16, #tpu.memory_space<vmem>>, vector<1536x384xbf16>
    %cst_20 = arith.constant dense<0.000000e+00> : vector<8x384xf32>
    %46 = tpu.matmul %44, %45, %cst_20 {dimension_numbers = #tpu.dot_dimension_numbers<[1], [0], [0], [1], [0, 0, 1, 1], [], []>} : vector<8x1536xbf16>, vector<1536x384xbf16>, vector<8x384xf32> -> vector<8x384xf32>
    %c0_21 = arith.constant 0 : index
    %c0_22 = arith.constant 0 : index
    %47 = vector.load %arg7[%c0_21, %c0_22] : memref<1x384xf32, #tpu.memory_space<vmem>>, vector<1x384xf32>
    %48 = vector.broadcast %47 : vector<1x384xf32> to vector<8x384xf32>
    %49 = arith.addf %46, %48 : vector<8x384xf32>
    %50 = arith.addf %49, %0 : vector<8x384xf32>
    %c0_23 = arith.constant 0 : index
    %c0_24 = arith.constant 0 : index
    %51 = vector.load %arg8[%c0_23, %c0_24] : memref<8x384xf32, #tpu.memory_space<vmem>>, vector<8x384xf32>
    tpu.vector_store %arg8[%c0_23, %c0_24], %50 {strides = array<i32>} : memref<8x384xf32, #tpu.memory_space<vmem>>, vector<8x384xf32>,
    return
  }
  func.func @transform_0(%arg0: i32) -> (i32, i32) {
    %c0_i32 = arith.constant 0 : i32
    %c0_i32_0 = arith.constant 0 : i32
    return %arg0, %c0_i32 : i32, i32
  }
  func.func @transform_1(%arg0: i32) -> (i32, i32) {
    %c0_i32 = arith.constant 0 : i32
    %c0_i32_0 = arith.constant 0 : i32
    %c0_i32_1 = arith.constant 0 : i32
    return %c0_i32, %c0_i32_0 : i32, i32
  }
  func.func @transform_2(%arg0: i32) -> (i32, i32) {
    %c0_i32 = arith.constant 0 : i32
    %c0_i32_0 = arith.constant 0 : i32
    %c0_i32_1 = arith.constant 0 : i32
    return %c0_i32, %c0_i32_0 : i32, i32
  }
  func.func @transform_3(%arg0: i32) -> (i32, i32) {
    %c0_i32 = arith.constant 0 : i32
    %c0_i32_0 = arith.constant 0 : i32
    %c0_i32_1 = arith.constant 0 : i32
    return %c0_i32, %c0_i32_0 : i32, i32
  }
  func.func @transform_4(%arg0: i32) -> (i32, i32) {
    %c0_i32 = arith.constant 0 : i32
    %c0_i32_0 = arith.constant 0 : i32
    %c0_i32_1 = arith.constant 0 : i32
    return %c0_i32, %c0_i32_0 : i32, i32
  }
  func.func @transform_5(%arg0: i32) -> (i32, i32) {
    %c0_i32 = arith.constant 0 : i32
    %c0_i32_0 = arith.constant 0 : i32
    %c0_i32_1 = arith.constant 0 : i32
    return %c0_i32, %c0_i32_0 : i32, i32
  }
  func.func @transform_6(%arg0: i32) -> (i32, i32) {
    %c0_i32 = arith.constant 0 : i32
    %c0_i32_0 = arith.constant 0 : i32
    %c0_i32_1 = arith.constant 0 : i32
    return %c0_i32, %c0_i32_0 : i32, i32
  }
  func.func @transform_7(%arg0: i32) -> (i32, i32) {
    %c0_i32 = arith.constant 0 : i32
    %c0_i32_0 = arith.constant 0 : i32
    return %arg0, %c0_i32 : i32, i32
  }
}

module attributes {stable_mosaic.version = 11 : i64} {
  func.func @_head_kernel(%arg0: i32, %arg1: memref<2x4x384xf32, #tpu.memory_space<vmem>>, %arg2: memref<384x128xbf16, #tpu.memory_space<vmem>>, %arg3: memref<1x128xf32, #tpu.memory_space<vmem>>, %arg4: memref<2x128xf32, #tpu.memory_space<vmem>>) attributes {dimension_semantics = [#tpu.dimension_semantics<arbitrary>], iteration_bounds = array<i64: 1>, scalar_prefetch = 0 : i64, scratch_operands = 0 : i64, tpu.core_type = #tpu.core_type<tc>, window_params = [{pipeline_mode = #tpu.pipeline_mode<synchronous>, transform_indices = @transform_0, window_bounds = array<i64: 2, 4, 384>}, {pipeline_mode = #tpu.pipeline_mode<synchronous>, transform_indices = @transform_1, window_bounds = array<i64: 384, 128>}, {pipeline_mode = #tpu.pipeline_mode<synchronous>, transform_indices = @transform_2, window_bounds = array<i64: 1, 128>}, {pipeline_mode = #tpu.pipeline_mode<synchronous>, transform_indices = @transform_3, window_bounds = array<i64: 2, 128>}]} {
    %c0 = arith.constant 0 : index
    %c0_0 = arith.constant 0 : index
    %c0_1 = arith.constant 0 : index
    %0 = vector.load %arg1[%c0, %c0_0, %c0_1] : memref<2x4x384xf32, #tpu.memory_space<vmem>>, vector<2x4x384xf32>
    %cst = arith.constant dense<0.000000e+00> : vector<2x384xf32>
    %1 = vector.multi_reduction <add>, %0, %cst [1] : vector<2x4x384xf32> to vector<2x384xf32>
    %cst_2 = arith.constant 4.000000e+00 : f32
    %2 = vector.broadcast %cst_2 : f32 to vector<2x384xf32>
    %3 = arith.divf %1, %2 : vector<2x384xf32>
    %4 = arith.truncf %3 : vector<2x384xf32> to vector<2x384xbf16>
    %c0_3 = arith.constant 0 : index
    %c0_4 = arith.constant 0 : index
    %5 = vector.load %arg2[%c0_3, %c0_4] : memref<384x128xbf16, #tpu.memory_space<vmem>>, vector<384x128xbf16>
    %cst_5 = arith.constant dense<0.000000e+00> : vector<2x128xf32>
    %6 = tpu.matmul %4, %5, %cst_5 {dimension_numbers = #tpu.dot_dimension_numbers<[1], [0], [0], [1], [0, 0, 1, 1], [], []>} : vector<2x384xbf16>, vector<384x128xbf16>, vector<2x128xf32> -> vector<2x128xf32>
    %c0_6 = arith.constant 0 : index
    %c0_7 = arith.constant 0 : index
    %7 = vector.load %arg3[%c0_6, %c0_7] : memref<1x128xf32, #tpu.memory_space<vmem>>, vector<1x128xf32>
    %8 = vector.broadcast %7 : vector<1x128xf32> to vector<2x128xf32>
    %9 = arith.addf %6, %8 : vector<2x128xf32>
    %c0_8 = arith.constant 0 : index
    %c0_9 = arith.constant 0 : index
    %10 = vector.load %arg4[%c0_8, %c0_9] : memref<2x128xf32, #tpu.memory_space<vmem>>, vector<2x128xf32>
    tpu.vector_store %arg4[%c0_8, %c0_9], %9 {strides = array<i32>} : memref<2x128xf32, #tpu.memory_space<vmem>>, vector<2x128xf32>,
    return
  }
  func.func @transform_0(%arg0: i32) -> (i32, i32, i32) {
    %c0_i32 = arith.constant 0 : i32
    %c0_i32_0 = arith.constant 0 : i32
    %c0_i32_1 = arith.constant 0 : i32
    %c0_i32_2 = arith.constant 0 : i32
    return %c0_i32, %c0_i32_0, %c0_i32_1 : i32, i32, i32
  }
  func.func @transform_1(%arg0: i32) -> (i32, i32) {
    %c0_i32 = arith.constant 0 : i32
    %c0_i32_0 = arith.constant 0 : i32
    %c0_i32_1 = arith.constant 0 : i32
    return %c0_i32, %c0_i32_0 : i32, i32
  }
  func.func @transform_2(%arg0: i32) -> (i32, i32) {
    %c0_i32 = arith.constant 0 : i32
    %c0_i32_0 = arith.constant 0 : i32
    %c0_i32_1 = arith.constant 0 : i32
    return %c0_i32, %c0_i32_0 : i32, i32
  }
  func.func @transform_3(%arg0: i32) -> (i32, i32) {
    %c0_i32 = arith.constant 0 : i32
    %c0_i32_0 = arith.constant 0 : i32
    %c0_i32_1 = arith.constant 0 : i32
    return %c0_i32, %c0_i32_0 : i32, i32
  }
}

</mosaic_0001>

<bundles_post_ra>
// kernel: sam_encoder_forward.8
= control target key start
LH: loop header
LB: loop body
LE: loop exit
PB: predicated region body
PF: predicated region fallthrough
CT: control target
= control target key end

     0   :  { %s2106_s15 = smov 0   ;;  %s2108_s16 = smov 0   ;;  %s2615_s0 = inlined_call_operand.vmem [shape: f32[2,4,768], index: 0, kind: input, shape index: {}]   ;;  %s2616_s1 = inlined_call_operand.vmem [shape: bf16[768,384], index: 1, kind: input, shape index: {}]   ;;  %s2617_s2 = inlined_call_operand.vmem [shape: f32[1,384], index: 2, kind: input, shape index: {}]   ;;  %s2618_s3 = inlined_call_operand.vmem [shape: f32[1,4,384], index: 3, kind: input, shape index: {}]   ;;  %s2619_s4 = inlined_call_operand.vmem [shape: f32[2,4,384], index: 4, kind: output, shape index: {}]  }
   0x1   :  { %s2110_s17 = smov 0  }
   0x2 LB: > { %s26_s18 = sadd.s32 1, %s2075_s16  ;;  %p1620_p0 = scmp.ge.s32.totalorder %s2079_s17, 1  ;;  %s2079_s17 = sphi %s2110_s17, %s14_s17   ;;  %s2075_s16 = sphi %s2108_s16, %s2621_s16   ;;  %s2071_s15 = sphi %s2106_s15, %s2620_s15  }
   0x3   : > { %p28_p1 = scmp.ge.s32.totalorder %s26_s18, 2  ;;  %p192_p2 = scmp.lt.s32.totalorder %s2079_s17, 3 }
   0x5   : > { %s2623_s18 = smov (%p28_p1, %s26_s18), 0  ;;  %p193_p3 = pnand %p1620_p0, %p192_p2 }
   0x6   : > { %p231_p4 = scmp.lt.s32.totalorder (!%p193_p3), %s2071_s15, 1 }
   0x7   : > { %196 = sbr.rel (%p193_p3) target bundleno = 375 (0x177), region = 36 }
   0xc   : > { %v1861_v0 = vld [vmem:[%s2616_s1 + $0xac] ss:$12 sps:$4 sm:$0xff]   ;;  %v1865_v2 = vld [vmem:[%s2616_s1 + $0xa8] ss:$12 sps:$4 sm:$0xff]   ;;  %v1871_v6 = vld [vmem:[%s2616_s1 + $0x90] ss:$12 sps:$4 sm:$0xff]  }
   0xd   : > { %v1863_v1 = vld [vmem:[%s2616_s1 + $0x22c] ss:$12 sps:$4 sm:$0xff]   ;;  %1250 = vmatprep.subr.bf16.mxu0 %v1861_v0  ;;  %v1866_v3 = vld [vmem:[%s2616_s1 + $0x228] ss:$12 sps:$4 sm:$0xff]   ;;  %v1872_v7 = vld [vmem:[%s2616_s1 + $0x210] ss:$12 sps:$4 sm:$0xff]  }
   0xe   : > { %1291 = vmatprep.subr.bf16.mxu1 %v1863_v1  ;;  %v1867_v4 = vld [vmem:[%s2616_s1 + $0x94] ss:$12 sps:$4 sm:$0xff]   ;;  %1251 = vmatpush1.bf16.msra.mxu0 %v1865_v2  ;;  %v1873_v8 = vld [vmem:[%s2616_s1 + $0x7c] ss:$12 sps:$4 sm:$0xff]   ;;  %v1877_v10 = vld [vmem:[%s2616_s1 + $0x78] ss:$12 sps:$4 sm:$0xff]  }
   0xf   : > { %1292 = vmatpush1.bf16.msra.mxu1 %v1866_v3  ;;  %v1869_v5 = vld [vmem:[%s2616_s1 + $0x214] ss:$12 sps:$4 sm:$0xff]   ;;  %1252 = vmatprep.subr.bf16.mxu0 %v1867_v4  ;;  %v1875_v9 = vld [vmem:[%s2616_s1 + $0x1fc] ss:$12 sps:$4 sm:$0xff]   ;;  %v1878_v11 = vld [vmem:[%s2616_s1 + $0x1f8] ss:$12 sps:$4 sm:$0xff]  }
  0x10   : > { %1293 = vmatprep.subr.bf16.mxu1 %v1869_v5  ;;  %v1879_v12 = vld [vmem:[%s2616_s1 + $0x64] ss:$12 sps:$4 sm:$0xff]   ;;  %v1883_v14 = vld [vmem:[%s2616_s1 + $0x60] ss:$12 sps:$4 sm:$0xff]   ;;  %v1889_v18 = vld [vmem:[%s2616_s1 + $0x48] ss:$12 sps:$4 sm:$0xff]  }
  0x11   : > { %v1881_v13 = vld [vmem:[%s2616_s1 + $0x1e4] ss:$12 sps:$4 sm:$0xff]   ;;  %v1884_v15 = vld [vmem:[%s2616_s1 + $0x1e0] ss:$12 sps:$4 sm:$0xff]   ;;  %v1890_v19 = vld [vmem:[%s2616_s1 + $0x1c8] ss:$12 sps:$4 sm:$0xff]  }
  0x12   : > { %1253 = vmatpush1.bf16.msra.mxu0 %v1871_v6  ;;  %v1885_v16 = vld [vmem:[%s2616_s1 + $0x4c] ss:$12 sps:$4 sm:$0xff]   ;;  %v1891_v20 = vld [vmem:[%s2616_s1 + $0x34] ss:$12 sps:$4 sm:$0xff]   ;;  %v1895_v22 = vld [vmem:[%s2616_s1 + $0x30] ss:$12 sps:$4 sm:$0xff]  }
  0x13   : > { %1294 = vmatpush1.bf16.msra.mxu1 %v1872_v7  ;;  %1254 = vmatprep.subr.bf16.mxu0 %v1873_v8  ;;  %v1887_v17 = vld [vmem:[%s2616_s1 + $0x1cc] ss:$12 sps:$4 sm:$0xff]   ;;  %v1893_v21 = vld [vmem:[%s2616_s1 + $0x1b4] ss:$12 sps:$4 sm:$0xff]   ;;  %v1896_v23 = vld [vmem:[%s2616_s1 + $0x1b0] ss:$12 sps:$4 sm:$0xff]  }
  0x14   : > { %1295 = vmatprep.subr.bf16.mxu1 %v1875_v9  ;;  %v1897_v24 = vld [vmem:[%s2616_s1 + $0x1c] ss:$12 sps:$4 sm:$0xff]   ;;  %v1901_v26 = vld [vmem:[%s2616_s1 + $0x18] ss:$12 sps:$4 sm:$0xff]   ;;  %v1907_v30 = vld [vmem:[%s2616_s1] ss:$12 sps:$4 sm:$0xff]  }
  0x15   : > { %v1899_v25 = vld [vmem:[%s2616_s1 + $0x19c] ss:$12 sps:$4 sm:$0xff]   ;;  %v1902_v27 = vld [vmem:[%s2616_s1 + $0x198] ss:$12 sps:$4 sm:$0xff]   ;;  %v1908_v31 = vld [vmem:[%s2616_s1 + $0x180] ss:$12 sps:$4 sm:$0xff]  }
  0x16   : > { %1255 = vmatpush1.bf16.msra.mxu0 %v1877_v10  ;;  %v1903_v28 = vld [vmem:[%s2616_s1 + $0x4] ss:$12 sps:$4 sm:$0xff]   ;;  %v1909_v32 = vld [vmem:[%s2616_s1 + $0x16c] ss:$12 sps:$4 sm:$0xff]   ;;  %v1913_v34 = vld [vmem:[%s2616_s1 + $0x168] ss:$12 sps:$4 sm:$0xff]  }
  0x17   : > { %1296 = vmatpush1.bf16.msra.mxu1 %v1878_v11  ;;  %1256 = vmatprep.subr.bf16.mxu0 %v1879_v12  ;;  %v1905_v29 = vld [vmem:[%s2616_s1 + $0x184] ss:$12 sps:$4 sm:$0xff]   ;;  %v1911_v33 = vld [vmem:[%s2616_s1 + $0x2ec] ss:$12 sps:$4 sm:$0xff]   ;;  %v1914_v35 = vld [vmem:[%s2616_s1 + $0x2e8] ss:$12 sps:$4 sm:$0xff]  }
  0x18   : > { %1297 = vmatprep.subr.bf16.mxu1 %v1881_v13  ;;  %s2625_s15 = smov (!%p231_p4, %s2071_s15), 1  ;;  %v1915_v36 = vld [vmem:[%s2616_s1 + $0x154] ss:$12 sps:$4 sm:$0xff]   ;;  %v1919_v38 = vld [vmem:[%s2616_s1 + $0x150] ss:$12 sps:$4 sm:$0xff]  }
  0x19   : > { %v1917_v37 = vld [vmem:[%s2616_s1 + $0x2d4] ss:$12 sps:$4 sm:$0xff]   ;;  %s1835_s5 = smul.u32 24, %s2625_s15  ;;  %v1920_v39 = vld [vmem:[%s2616_s1 + $0x2d0] ss:$12 sps:$4 sm:$0xff]  }
  0x1a   : > { %1257 = vmatpush1.bf16.msra.mxu0 %v1883_v14  ;;  %v1921_v40 = vld [vmem:[%s2616_s1 + $0x13c] ss:$12 sps:$4 sm:$0xff]   ;;  %v1925_v42 = vld [vmem:[%s2616_s1 + $0x138] ss:$12 sps:$4 sm:$0xff]   ;;  %v1931_v46 = vld [vmem:[%s2616_s1 + $0x120] ss:$12 sps:$4 sm:$0xff]  }
  0x1b   : > { %1298 = vmatpush1.bf16.msra.mxu1 %v1884_v15  ;;  %1258 = vmatprep.subr.bf16.mxu0 %v1885_v16  ;;  %v1923_v41 = vld [vmem:[%s2616_s1 + $0x2bc] ss:$12 sps:$4 sm:$0xff]   ;;  %v1926_v43 = vld [vmem:[%s2616_s1 + $0x2b8] ss:$12 sps:$4 sm:$0xff]   ;;  %s2266_s22 = scalar_lea.vmem %s2615_s0, %s1835_s5  ;;  %v1932_v50 = vld [vmem:[%s2616_s1 + $0x2a0] ss:$12 sps:$4 sm:$0xff]  }
  0x1c   : > { %1299 = vmatprep.subr.bf16.mxu1 %v1887_v17  ;;  %v1927_v44 = vld [vmem:[%s2616_s1 + $0x124] ss:$12 sps:$4 sm:$0xff]   ;;  %v256_v49 = vld [vmem:[%s2266_s22 + $0x8] sm:$0xff]  ;;  %v1939_v58 = vld [vmem:[%s2616_s1 + $0xf4] ss:$12 sps:$4 sm:$0xff]   ;;  %s1836_s8 = smul.u32 12, %s2625_s15 }
  0x1d   : > { %v1929_v45 = vld [vmem:[%s2616_s1 + $0x2a4] ss:$12 sps:$4 sm:$0xff]   ;;  %v1933_v51 = vld [vmem:[%s2616_s1 + $0x10c] ss:$12 sps:$4 sm:$0xff]   ;;  %v262_v52 = vcombine.high %v256_v49, %v256_v49  ;;  %v1937_v56 = vld [vmem:[%s2616_s1 + $0x108] ss:$12 sps:$4 sm:$0xff]   ;;  %v2344_v10 = vpack.c.bf16 %v256_v49, %v256_v49 }
  0x1e   : > { %1259 = vmatpush1.bf16.msra.mxu0 %v1889_v18  ;;  %v255_v47 = vld [vmem:[%s2266_s22] sm:$0xff]  ;;  %v1935_v53 = vld [vmem:[%s2616_s1 + $0x28c] ss:$12 sps:$4 sm:$0xff]   ;;  %v1938_v57 = vld [vmem:[%s2616_s1 + $0x288] ss:$12 sps:$4 sm:$0xff]   ;;  %s253_s11 = scalar_lea.vmem %s2619_s4, %s1836_s8 }
  0x1f   : > { %1300 = vmatpush1.bf16.msra.mxu1 %v1890_v19  ;;  %1260 = vmatprep.subr.bf16.mxu0 %v1891_v20  ;;  %v261_v48 = vcombine.high %v255_v47, %v255_v47  ;;  %v2288_v55 = vpack.c.bf16 %v262_v52, %v262_v52  ;;  %v1941_v59 = vld [vmem:[%s2616_s1 + $0x274] ss:$12 sps:$4 sm:$0xff]   ;;  %v1943_v60 = vld [vmem:[%s2616_s1 + $0xf0] ss:$12 sps:$4 sm:$0xff]   ;;  %v1949_v0 = vld [vmem:[%s2616_s1 + $0xd8] ss:$12 sps:$4 sm:$0xff]   ;;  %v2339_v8 = vpack.c.bf16 %v255_v47, %v255_v47 }
  0x20   : > { %1301 = vmatprep.subr.bf16.mxu1 %v1893_v21  ;;  %v1944_v61 = vld [vmem:[%s2616_s1 + $0x270] ss:$12 sps:$4 sm:$0xff]   ;;  %v1950_v1 = vld [vmem:[%s2616_s1 + $0x258] ss:$12 sps:$4 sm:$0xff]   ;;  %v1955_v4 = vld [vmem:[%s2616_s1 + $0xc0] ss:$12 sps:$4 sm:$0xff]  }
  0x21   : > { %v268_v54 = vpack.c.bf16 %v261_v48, %v261_v48  ;;  %1323 = vmatprep.mubr.bf16.mxu1 %v2288_v55  ;;  %v1945_v62 = vld [vmem:[%s2616_s1 + $0xdc] ss:$12 sps:$4 sm:$0xff]   ;;  %v1951_v2 = vld [vmem:[%s2616_s1 + $0xc4] ss:$12 sps:$4 sm:$0xff]   ;;  %v1956_v5 = vld [vmem:[%s2616_s1 + $0x240] ss:$12 sps:$4 sm:$0xff]  }
  0x22   : > { %1261 = vmatpush1.bf16.msra.mxu0 %v1895_v22  ;;  %v1947_v63 = vld [vmem:[%s2616_s1 + $0x25c] ss:$12 sps:$4 sm:$0xff]   ;;  %v1953_v3 = vld [vmem:[%s2616_s1 + $0x244] ss:$12 sps:$4 sm:$0xff]   ;;  %v1961_v6 = vld [vmem:[%s2616_s1 + $0x3ac] ss:$12 sps:$4 sm:$0xff]  }
  0x23   : > { %1302 = vmatpush1.bf16.msra.mxu1 %v1896_v23  ;;  %1262 = vmatprep.subr.bf16.mxu0 %v1897_v24  ;;  %v1962_v7 = vld [vmem:[%s2616_s1 + $0x170] ss:$12 sps:$4 sm:$0xff]   ;;  %v1959_v9 = vld [vmem:[%s2616_s1 + $0x3a8] ss:$12 sps:$4 sm:$0xff]   ;;  %v1967_v13 = vld [vmem:[%s2616_s1 + $0x158] ss:$12 sps:$4 sm:$0xff]  }
  0x24   : > { %1303 = vmatprep.subr.bf16.mxu1 %v1899_v25  ;;  %1282 = vmatprep.mubr.bf16.mxu0 %v268_v54  ;;  %v1963_v11 = vld [vmem:[%s2616_s1 + $0xb0] ss:$12 sps:$4 sm:$0xff]   ;;  %v1966_v12 = vld [vmem:[%s2616_s1 + $0x394] ss:$12 sps:$4 sm:$0xff]   ;;  %v1968_v15 = vld [vmem:[%s2616_s1 + $0x98] ss:$12 sps:$4 sm:$0xff]  }
  0x25   : > { %v1964_v14 = vld [vmem:[%s2616_s1 + $0x390] ss:$12 sps:$4 sm:$0xff]   ;;  %v1972_v17 = vld [vmem:[%s2616_s1 + $0x140] ss:$12 sps:$4 sm:$0xff]   ;;  %v1969_v18 = vld [vmem:[%s2616_s1 + $0x378] ss:$12 sps:$4 sm:$0xff]  }
  0x26   : > { %1263 = vmatpush1.bf16.msra.mxu0 %v1901_v26  ;;  %v1971_v16 = vld [vmem:[%s2616_s1 + $0x37c] ss:$12 sps:$4 sm:$0xff]   ;;  %v1973_v19 = vld [vmem:[%s2616_s1 + $0x80] ss:$12 sps:$4 sm:$0xff]   ;;  %v1976_v20 = vld [vmem:[%s2616_s1 + $0x364] ss:$12 sps:$4 sm:$0xff]  }
  0x27   : > { %1304 = vmatpush1.bf16.msra.mxu1 %v1902_v27  ;;  %1264 = vmatprep.subr.bf16.mxu0 %v1903_v28  ;;  %v1977_v21 = vld [vmem:[%s2616_s1 + $0x128] ss:$12 sps:$4 sm:$0xff]   ;;  %v1974_v22 = vld [vmem:[%s2616_s1 + $0x360] ss:$12 sps:$4 sm:$0xff]   ;;  %v1982_v25 = vld [vmem:[%s2616_s1 + $0x110] ss:$12 sps:$4 sm:$0xff]  }
  0x28   : > { %1305 = vmatprep.subr.bf16.mxu1 %v1905_v29  ;;  %v1978_v23 = vld [vmem:[%s2616_s1 + $0x68] ss:$12 sps:$4 sm:$0xff]   ;;  %v1981_v24 = vld [vmem:[%s2616_s1 + $0x34c] ss:$12 sps:$4 sm:$0xff]   ;;  %v1983_v27 = vld [vmem:[%s2616_s1 + $0x50] ss:$12 sps:$4 sm:$0xff]  }
  0x29   : > { %v1979_v26 = vld [vmem:[%s2616_s1 + $0x348] ss:$12 sps:$4 sm:$0xff]   ;;  %v1987_v29 = vld [vmem:[%s2616_s1 + $0xf8] ss:$12 sps:$4 sm:$0xff]   ;;  %v2004_v48 = vld [vmem:[%s2616_s1 + $0x450] ss:$12 sps:$4 sm:$0xff]  }
  0x2a   : > { %1265 = vmatpush1.bf16.msra.mxu0 %v1907_v30  ;;  %v1986_v28 = vld [vmem:[%s2616_s1 + $0x334] ss:$12 sps:$4 sm:$0xff]   ;;  %v1984_v30 = vld [vmem:[%s2616_s1 + $0x330] ss:$12 sps:$4 sm:$0xff]   ;;  %v2008_v49 = vld [vmem:[%s2616_s1 + $0x218] ss:$12 sps:$4 sm:$0xff]  }
  0x2b   : > { %1306 = vmatpush1.bf16.msra.mxu1 %v1908_v31  ;;  %1266 = vmatprep.subr.bf16.mxu0 %v1909_v32  ;;  %v1988_v31 = vld [vmem:[%s2616_s1 + $0x38] ss:$12 sps:$4 sm:$0xff]   ;;  %v1991_v32 = vld [vmem:[%s2616_s1 + $0x31c] ss:$12 sps:$4 sm:$0xff]   ;;  %v2012_v52 = vld [vmem:[%s2616_s1 + $0x2c0] ss:$12 sps:$4 sm:$0xff]  }
  0x2c   : > { %1307 = vmatprep.subr.bf16.mxu1 %v1911_v33  ;;  %v1992_v33 = vld [vmem:[%s2616_s1 + $0xe0] ss:$12 sps:$4 sm:$0xff]  }
  0x2e   : > { %1267 = vmatpush2.bf16.msra.mxu0 %v1913_v34  ;;  %v1989_v34 = vld [vmem:[%s2616_s1 + $0x318] ss:$12 sps:$4 sm:$0xff]  }
  0x2f   : > { %1308 = vmatpush2.bf16.msra.mxu1 %v1914_v35  ;;  %1268 = vmatprep.subr.bf16.mxu0 %v1915_v36  ;;  %v1993_v35 = vld [vmem:[%s2616_s1 + $0x20] ss:$12 sps:$4 sm:$0xff]   ;;  %v1996_v36 = vld [vmem:[%s2616_s1 + $0x304] ss:$12 sps:$4 sm:$0xff]  }
  0x30   : > { %1309 = vmatprep.subr.bf16.mxu1 %v1917_v37  ;;  %v1997_v37 = vld [vmem:[%s2616_s1 + $0xc8] ss:$12 sps:$4 sm:$0xff]  }
  0x32   : > { %1269 = vmatpush2.bf16.msra.mxu0 %v1919_v38  ;;  %v1994_v38 = vld [vmem:[%s2616_s1 + $0x300] ss:$12 sps:$4 sm:$0xff]  }
  0x33   : > { %1310 = vmatpush2.bf16.msra.mxu1 %v1920_v39  ;;  %1270 = vmatprep.subr.bf16.mxu0 %v1921_v40  ;;  %v1998_v39 = vld [vmem:[%s2616_s1 + $0x8] ss:$12 sps:$4 sm:$0xff]   ;;  %v2001_v40 = vld [vmem:[%s2616_s1 + $0x46c] ss:$12 sps:$4 sm:$0xff]  }
  0x34   : > { %1311 = vmatprep.subr.bf16.mxu1 %v1923_v41  ;;  %v2002_v41 = vld [vmem:[%s2616_s1 + $0x2f0] ss:$12 sps:$4 sm:$0xff]  }
  0x36   : > { %1271 = vmatpush2.bf16.msra.mxu0 %v1925_v42  ;;  %v1999_v42 = vld [vmem:[%s2616_s1 + $0x468] ss:$12 sps:$4 sm:$0xff]  }
  0x37   : > { %1312 = vmatpush2.bf16.msra.mxu1 %v1926_v43  ;;  %1272 = vmatprep.subr.bf16.mxu0 %v1927_v44  ;;  %v2003_v43 = vld [vmem:[%s2616_s1 + $0x230] ss:$12 sps:$4 sm:$0xff]   ;;  %v2006_v44 = vld [vmem:[%s2616_s1 + $0x454] ss:$12 sps:$4 sm:$0xff]  }
  0x38   : > { %1313 = vmatprep.subr.bf16.mxu1 %v1929_v45  ;;  %v2451_v45 = vld [vmem:[%s2266_s22 + $0x10] sm:$0xff] }
  0x39   : > { %v263_v47 = vcombine.high %v2451_v45, %v2451_v45 }
  0x3a   : > { %1273 = vmatpush2.bf16.msra.mxu0 %v1931_v46  ;;  %v2007_v46 = vld [vmem:[%s2616_s1 + $0x2d8] ss:$12 sps:$4 sm:$0xff]  }
  0x3b   : > { %1314 = vmatpush2.bf16.msra.mxu1 %v1932_v50  ;;  %1274 = vmatprep.subr.bf16.mxu0 %v1933_v51  ;;  %v2465_v50 = vpack.c.bf16 %v263_v47, %v263_v47  ;;  %v2011_v51 = vld [vmem:[%s2616_s1 + $0x43c] ss:$12 sps:$4 sm:$0xff]  }
  0x3c   : > { %1315 = vmatprep.subr.bf16.mxu1 %v1935_v53  ;;  %v2009_v53 = vld [vmem:[%s2616_s1 + $0x438] ss:$12 sps:$4 sm:$0xff]  }
  0x3e   : > { %1275 = vmatpush2.bf16.msra.mxu0 %v1937_v56  ;;  %v2016_v56 = vld [vmem:[%s2616_s1 + $0x424] ss:$12 sps:$4 sm:$0xff]  }
  0x3f   : > { %1316 = vmatpush2.bf16.msra.mxu1 %v1938_v57  ;;  %1276 = vmatprep.subr.bf16.mxu0 %v1939_v58  ;;  %v2017_v57 = vld [vmem:[%s2616_s1 + $0x2a8] ss:$12 sps:$4 sm:$0xff]  }
  0x40   : > { %1317 = vmatprep.subr.bf16.mxu1 %v1941_v59  ;;  %v2018_v58 = vld [vmem:[%s2616_s1 + $0x1e8] ss:$12 sps:$4 sm:$0xff]   ;;  %v2021_v59 = vld [vmem:[%s2616_s1 + $0x40c] ss:$12 sps:$4 sm:$0xff]  }
  0x42   : > { %1277 = vmatpush2.bf16.msra.mxu0 %v1943_v60  ;;  %v2022_v60 = vld [vmem:[%s2616_s1 + $0x290] ss:$12 sps:$4 sm:$0xff]  }
  0x43   : > { %1318 = vmatpush2.bf16.msra.mxu1 %v1944_v61  ;;  %1278 = vmatprep.subr.bf16.mxu0 %v1945_v62  ;;  %v2019_v61 = vld [vmem:[%s2616_s1 + $0x408] ss:$12 sps:$4 sm:$0xff]   ;;  %v2023_v62 = vld [vmem:[%s2616_s1 + $0x1d0] ss:$12 sps:$4 sm:$0xff]  }
  0x44   : > { %1319 = vmatprep.subr.bf16.mxu1 %v1947_v63  ;;  %v2026_v63 = vld [vmem:[%s2616_s1 + $0x3f4] ss:$12 sps:$4 sm:$0xff]  }
  0x46   : > { %1279 = vmatpush2.bf16.msra.mxu0 %v1949_v0  ;;  %v2027_v0 = vld [vmem:[%s2616_s1 + $0x278] ss:$12 sps:$4 sm:$0xff]  }
  0x47   : > { %1320 = vmatpush2.bf16.msra.mxu1 %v1950_v1  ;;  %1280 = vmatprep.subr.bf16.mxu0 %v1951_v2  ;;  %v2024_v1 = vld [vmem:[%s2616_s1 + $0x3f0] ss:$12 sps:$4 sm:$0xff]   ;;  %v2028_v2 = vld [vmem:[%s2616_s1 + $0x1b8] ss:$12 sps:$4 sm:$0xff]  }
  0x48   : > { %1321 = vmatprep.subr.bf16.mxu1 %v1953_v3  ;;  %v2031_v3 = vld [vmem:[%s2616_s1 + $0x3dc] ss:$12 sps:$4 sm:$0xff]  }
  0x4a   : > { %1281 = vmatpush2.bf16.msra.mxu0 %v1955_v4  ;;  %v2032_v4 = vld [vmem:[%s2616_s1 + $0x260] ss:$12 sps:$4 sm:$0xff]  }
  0x4b   : > { %1322 = vmatpush2.bf16.msra.mxu1 %v1956_v5  ;;  %1332 = vmatprep.subr.bf16.mxu0 %v1961_v6  ;;  %v2029_v5 = vld [vmem:[%s2616_s1 + $0x3d8] ss:$12 sps:$4 sm:$0xff]   ;;  %v2033_v6 = vld [vmem:[%s2616_s1 + $0x1a0] ss:$12 sps:$4 sm:$0xff]  }
  0x4c   : > { %1769 = vmatprep.subr.bf16.mxu1 %v1962_v7  ;;  %v2036_v7 = vld [vmem:[%s2616_s1 + $0x3c4] ss:$12 sps:$4 sm:$0xff]  }
  0x4d   : > { %1283 = vmatmul.mubr.bf16.vlgmr.msra.gmra.mxu0 %v2339_v8 }
  0x4e   : > { %1324 = vmatmul.mubr.bf16.vlgmr.msra.gmra.mxu1 %v2344_v10  ;;  %1333 = vmatpush1.bf16.msra.mxu0 %v1959_v9  ;;  %v2034_v9 = vld [vmem:[%s2616_s1 + $0x3c0] ss:$12 sps:$4 sm:$0xff]  }
  0x4f   : > { %1770 = vmatpush3.bf16.msra.mxu1 %v1963_v11  ;;  %1334 = vmatprep.subr.bf16.mxu0 %v1966_v12  ;;  %v2038_v11 = vld [vmem:[%s2616_s1 + $0x188] ss:$12 sps:$4 sm:$0xff]   ;;  %v2040_v12 = vld [vmem:[%s2616_s1 + $0x470] ss:$12 sps:$4 sm:$0xff]  }
  0x50   : > { %1771 = vmatprep.subr.bf16.mxu1 %v1967_v13  ;;  %1405 = vmatprep.mubr.bf16.mxu1 %v268_v54  ;;  %v2013_v54 = vld [vmem:[%s2616_s1 + $0x200] ss:$12 sps:$4 sm:$0xff]   ;;  %v271_v13 = vpack.c.bf16 %v2451_v45, %v2451_v45 }
  0x51   : > { %1364 = vmatprep.mubr.bf16.mxu0 %v2465_v50 }
  0x52   : > { %1335 = vmatpush1.bf16.msra.mxu0 %v1964_v14  ;;  %v2041_v14 = vld [vmem:[%s2616_s1 + $0x3b0] ss:$12 sps:$4 sm:$0xff]  }
  0x53   : > { %1772 = vmatpush3.bf16.msra.mxu1 %v1968_v15  ;;  %1336 = vmatprep.subr.bf16.mxu0 %v1971_v16  ;;  %v2042_v15 = vld [vmem:[%s2616_s1 + $0x458] ss:$12 sps:$4 sm:$0xff]  }
  0x54   : > { %1773 = vmatprep.subr.bf16.mxu1 %v1972_v17  ;;  %v2043_v16 = vld [vmem:[%s2616_s1 + $0x398] ss:$12 sps:$4 sm:$0xff]   ;;  %v2044_v17 = vld [vmem:[%s2616_s1 + $0x440] ss:$12 sps:$4 sm:$0xff]  }
  0x56   : > { %1337 = vmatpush1.bf16.msra.mxu0 %v1969_v18  ;;  %v2045_v18 = vld [vmem:[%s2616_s1 + $0x380] ss:$12 sps:$4 sm:$0xff]  }
  0x57   : > { %1774 = vmatpush3.bf16.msra.mxu1 %v1973_v19  ;;  %1338 = vmatprep.subr.bf16.mxu0 %v1976_v20  ;;  %v2047_v19 = vld [vmem:[%s2616_s1 + $0x368] ss:$12 sps:$4 sm:$0xff]   ;;  %v2048_v20 = vld [vmem:[%s2616_s1 + $0x410] ss:$12 sps:$4 sm:$0xff]  }
  0x58   : > { %1775 = vmatprep.subr.bf16.mxu1 %v1977_v21  ;;  %v2049_v21 = vld [vmem:[%s2616_s1 + $0x350] ss:$12 sps:$4 sm:$0xff]  }
  0x5a   : > { %1339 = vmatpush1.bf16.msra.mxu0 %v1974_v22  ;;  %v2050_v22 = vld [vmem:[%s2616_s1 + $0x3f8] ss:$12 sps:$4 sm:$0xff]  }
  0x5b   : > { %1776 = vmatpush3.bf16.msra.mxu1 %v1978_v23  ;;  %1340 = vmatprep.subr.bf16.mxu0 %v1981_v24  ;;  %v2051_v23 = vld [vmem:[%s2616_s1 + $0x338] ss:$12 sps:$4 sm:$0xff]   ;;  %v2052_v24 = vld [vmem:[%s2616_s1 + $0x3e0] ss:$12 sps:$4 sm:$0xff]  }
  0x5c   : > { %1777 = vmatprep.subr.bf16.mxu1 %v1982_v25  ;;  %v2053_v25 = vld [vmem:[%s2616_s1 + $0x320] ss:$12 sps:$4 sm:$0xff]  }
  0x5e   : > { %1341 = vmatpush1.bf16.msra.mxu0 %v1979_v26  ;;  %v2054_v26 = vld [vmem:[%s2616_s1 + $0x3c8] ss:$12 sps:$4 sm:$0xff]  }
  0x5f   : > { %1778 = vmatpush3.bf16.msra.mxu1 %v1983_v27  ;;  %1342 = vmatprep.subr.bf16.mxu0 %v1986_v28  ;;  %v2055_v27 = vld [vmem:[%s2616_s1 + $0x308] ss:$12 sps:$4 sm:$0xff]  }
  0x60   : > { %1779 = vmatprep.subr.bf16.mxu1 %v1987_v29 }
  0x62   : > { %1343 = vmatpush1.bf16.msra.mxu0 %v1984_v30 }
  0x63   : > { %1780 = vmatpush3.bf16.msra.mxu1 %v1988_v31  ;;  %1344 = vmatprep.subr.bf16.mxu0 %v1991_v32 }
  0x64   : > { %1781 = vmatprep.subr.bf16.mxu1 %v1992_v33 }
  0x66   : > { %1345 = vmatpush1.bf16.msra.mxu0 %v1989_v34 }
  0x67   : > { %1782 = vmatpush3.bf16.msra.mxu1 %v1993_v35  ;;  %1346 = vmatprep.subr.bf16.mxu0 %v1996_v36 }
  0x68   : > { %1783 = vmatprep.subr.bf16.mxu1 %v1997_v37 }
  0x6a   : > { %1347 = vmatpush1.bf16.msra.mxu0 %v1994_v38 }
  0x6b   : > { %1784 = vmatpush3.bf16.msra.mxu1 %v1998_v39  ;;  %1348 = vmatprep.subr.bf16.mxu0 %v2001_v40  ;;  %v467_v40 = vlaneseq }
  0x6c   : > { %1791 = vmatprep.subr.bf16.mxu1 %v2002_v41 }
  0x6d   : > { %v468_v41 = vshrl.u32 %v467_v40, 7 }
  0x6e   : > { %1406 = vmatmul.mubr.bf16.vlgmr.msra.gmra.mxu1 %v2339_v8  ;;  %1349 = vmatpush2.bf16.msra.mxu0 %v1999_v42  ;;  %v2037_v8 = vld [vmem:[%s2616_s1 + $0x248] ss:$12 sps:$4 sm:$0xff]  }
  0x6f   : > { %1792 = vmatpush3.bf16.msra.mxu1 %v2003_v43  ;;  %1350 = vmatprep.subr.bf16.mxu0 %v2006_v44  ;;  %v469_v42 = vsub.s32 0, %v468_v41  ;;  %v465_v43 = vld [vmem:[%s2617_s2] sm:$0x7]  ;;  %v473_v44 = vsub.s32 1, %v468_v41 }
  0x70   : > { %1793 = vmatprep.subr.bf16.mxu1 %v2007_v46  ;;  %1445 = vmatprep.mubr.bf16.mxu1 %v2288_v55  ;;  %v2014_v55 = vld [vmem:[%s2616_s1 + $0x420] ss:$12 sps:$4 sm:$0xff]  }
  0x71   : > { %v470_v45 = vrot.slane %v465_v43, %v469_v42  ;;  %v474_v46 = vrot.slane %v465_v43, %v473_v44 }
  0x72   : > { %1351 = vmatpush2.bf16.msra.mxu0 %v2004_v48 }
  0x73   : > { %1794 = vmatpush3.bf16.msra.mxu1 %v2008_v49  ;;  %1352 = vmatprep.subr.bf16.mxu0 %v2011_v51  ;;  %v1493_v49 = vld [vmem:[%s2618_s3] sm:$0xff] }
  0x74   : > { %1795 = vmatprep.subr.bf16.mxu1 %v2012_v52 }
  0x76   : > { %1353 = vmatpush2.bf16.msra.mxu0 %v2009_v53 }
  0x77   : > { %1796 = vmatpush3.bf16.msra.mxu1 %v2013_v54  ;;  %1354 = vmatprep.subr.bf16.mxu0 %v2016_v56  ;;  %v1496_v56 = vcombine.high %v1493_v49, %v1493_v49 }
  0x78   : > { %1797 = vmatprep.subr.bf16.mxu1 %v2017_v57 }
  0x7a   : > { %1355 = vmatpush2.bf16.msra.mxu0 %v2014_v55 }
  0x7b   : > { %1798 = vmatpush3.bf16.msra.mxu1 %v2018_v58  ;;  %1356 = vmatprep.subr.bf16.mxu0 %v2021_v59 }
  0x7c   : > { %1799 = vmatprep.subr.bf16.mxu1 %v2022_v60 }
  0x7e   : > { %1357 = vmatpush2.bf16.msra.mxu0 %v2019_v61 }
  0x7f   : > { %1800 = vmatpush3.bf16.msra.mxu1 %v2023_v62  ;;  %1358 = vmatprep.subr.bf16.mxu0 %v2026_v63 }
  0x80   : > { %1801 = vmatprep.subr.bf16.mxu1 %v2027_v0 }
  0x82   : > { %1359 = vmatpush2.bf16.msra.mxu0 %v2024_v1 }
  0x83   : > { %1802 = vmatpush3.bf16.msra.mxu1 %v2028_v2  ;;  %1360 = vmatprep.subr.bf16.mxu0 %v2031_v3  ;;  %v477_v2 = vsub.s32 2, %v468_v41 }
  0x84   : > { %1803 = vmatprep.subr.bf16.mxu1 %v2032_v4 }
  0x85   : > { %v478_v3 = vrot.slane %v465_v43, %v477_v2 }
  0x86   : > { %1361 = vmatpush2.bf16.msra.mxu0 %v2029_v5 }
  0x87   : > { %1804 = vmatpush3.bf16.msra.mxu1 %v2033_v6  ;;  %1362 = vmatprep.subr.bf16.mxu0 %v2036_v7 }
  0x88   : > { %1805 = vmatprep.subr.bf16.mxu1 %v2037_v8 }
  0x8a   : > { %1363 = vmatpush2.bf16.msra.mxu0 %v2034_v9 }
  0x8b   : > { %1806 = vmatpush3.bf16.msra.mxu1 %v2038_v11  ;;  %1813 = vmatprep.subr.bf16.mxu0 %v2040_v12  ;;  %v1494_v12 = vld [vmem:[%s2618_s3 + $0x8] sm:$0xf] }
  0x8d   : > { %1365 = vmatmul.mubr.bf16.vlgmr.msra.gmra.mxu0 %v271_v13 }
  0x8e   : > { %1446 = vmatmul.mubr.bf16.vlgmr.msra.gmra.mxu1 %v2344_v10  ;;  %1814 = vmatpush3.bf16.msra.mxu0 %v2041_v14  ;;  %v2046_v10 = vld [vmem:[%s2616_s1 + $0x428] ss:$12 sps:$4 sm:$0xff]  }
  0x8f   : > { %1485 = vmatprep.mubr.bf16.mxu0 %v2465_v50  ;;  %1815 = vmatprep.subr.bf16.mxu0 %v2042_v15 }
  0x92   : > { %1816 = vmatpush3.bf16.msra.mxu0 %v2043_v16 }
  0x93   : > { %1817 = vmatprep.subr.bf16.mxu0 %v2044_v17 }
  0x96   : > { %1818 = vmatpush3.bf16.msra.mxu0 %v2045_v18 }
  0x97   : > { %1819 = vmatprep.subr.bf16.mxu0 %v2046_v10 }
  0x9a   : > { %1820 = vmatpush3.bf16.msra.mxu0 %v2047_v19 }
  0x9b   : > { %1821 = vmatprep.subr.bf16.mxu0 %v2048_v20 }
  0x9e   : > { %1822 = vmatpush3.bf16.msra.mxu0 %v2049_v21 }
  0x9f   : > { %1823 = vmatprep.subr.bf16.mxu0 %v2050_v22 }
  0xa2   : > { %1824 = vmatpush3.bf16.msra.mxu0 %v2051_v23 }
  0xa3   : > { %1825 = vmatprep.subr.bf16.mxu0 %v2052_v24 }
  0xa6   : > { %1826 = vmatpush3.bf16.msra.mxu0 %v2053_v25 }
  0xa7   : > { %1827 = vmatprep.subr.bf16.mxu0 %v2054_v26 }
  0xaa   : > { %1828 = vmatpush3.bf16.msra.mxu0 %v2055_v27 }
  0xad   : > { %1486 = vmatmul.mubr.bf16.vlgmr.msra.gmra.mxu0 %v271_v13 }
 0x10d   : > { %v1284_v28 = vpop.f32.mrf.mxu0 }
 0x10e   : > { %v1325_v29 = vpop.f32.mrf.mxu1  ;;  %v1285_v47 = vadd.f32 %v1284_v28, %v470_v45 }
 0x10f   : > { %v1286_v30 = vpop.f32.mrf.mxu0 }
 0x110   : > { %v1327_v31 = vpop.f32.mrf.mxu1  ;;  %v1287_v48 = vadd.f32 %v1286_v30, %v474_v46  ;;  %v1326_v50 = vadd.f32 %v1325_v29, %v1285_v47 }
 0x111   : > { %v1288_v32 = vpop.f32.mrf.mxu0 }
 0x112   : > { %v1329_v33 = vpop.f32.mrf.mxu1  ;;  %v1328_v53 = vadd.f32 %v1327_v31, %v1287_v48 }
 0x113   : > { %v1289_v34 = vpop.f32.mrf.mxu0 }
 0x114   : > { %v1330_v35 = vpop.f32.mrf.mxu1 }
 0x12e   : > { %v1785_v36 = vpop.f32.mrf.mxu1 }
 0x130   : > { %v1786_v37 = vpop.f32.mrf.mxu1 }
 0x131   : > { %v1787_v4 = vadd.f32 %v1786_v37, %v1785_v36 }
 0x132   : > { %v1788_v38 = vpop.f32.mrf.mxu1 }
 0x133   : > { %v1408_v5 = vadd.f32 %v1787_v4, %v478_v3 }
 0x134   : > { %v1789_v39 = vpop.f32.mrf.mxu1 }
 0x14d   : > { %v1366_v51 = vpop.f32.mrf.mxu0 }
 0x14e   : > { %v1807_v52 = vpop.f32.mrf.mxu1  ;;  %v1367_v54 = vadd.f32 %v1366_v51, %v1326_v50 }
 0x14f   : > { %v1368_v57 = vpop.f32.mrf.mxu0 }
 0x150   : > { %v1808_v55 = vpop.f32.mrf.mxu1  ;;  %v1369_v58 = vadd.f32 %v1368_v57, %v1328_v53  ;;  %v1498_v61 = vadd.f32 %v1493_v49, %v1367_v54 }
 0x151   : > { %v1370_v59 = vpop.f32.mrf.mxu0  ;;  %v1809_v6 = vadd.f32 %v1808_v55, %v1807_v52 }
 0x152   : > { %v1810_v60 = vpop.f32.mrf.mxu1  ;;  %v1499_v62 = vadd.f32 %v1496_v56, %v1369_v58 }
 0x153   : > { %v1371_v63 = vpop.f32.mrf.mxu0  ;;  %v1448_v9 = vadd.f32 %v1809_v6, %v1408_v5 }
 0x154   : > { %v1811_v0 = vpop.f32.mrf.mxu1  ;;  %v1503_v1 = vcombine.low %v1498_v61, %v1499_v62 }
 0x156   : > { %1505 = vst [vmem:[%s253_s11] sm:$0xff] %v1503_v1 }
 0x16d   : > { %v1829_v7 = vpop.f32.mrf.mxu0 }
 0x16f   : > { %v1830_v8 = vpop.f32.mrf.mxu0 }
 0x170   : > { %v1831_v11 = vadd.f32 %v1830_v8, %v1829_v7 }
 0x171   : > { %v1832_v13 = vpop.f32.mrf.mxu0 }
 0x172   : > { %v1488_v14 = vadd.f32 %v1831_v11, %v1448_v9 }
 0x173   : > { %v1833_v15 = vpop.f32.mrf.mxu0 }
 0x174   : > { %v1500_v16 = vadd.f32 %v1494_v12, %v1488_v14 }
 0x176   : > { %1506 = vst [vmem:[%s253_s11 + $0x8] sm:$0xf] %v1500_v16 }
 0x177 PF: > { %s14_s17 = sadd.s32 1, %s2079_s17   ;;  %s2620_s15 = smov %s2075_s16 }
 0x178   : > { %p11_p5 = scmp.ge.s32.totalorder %s14_s17, 4   ;;  %s2621_s16 = smov %s2623_s18 }
 0x17a   :  { %13 = sbr.rel (!%p11_p5) target bundleno = 2 (0x2), region = 69 }

// kernel: sam_encoder_forward.9
= control target key start
LH: loop header
LB: loop body
LE: loop exit
PB: predicated region body
PF: predicated region fallthrough
CT: control target
= control target key end

     0   :  { %v2542_v57 = vmov 0   ;;  %vm2544_vm0 = vmmov 0   ;;  %s3349_s0 = inlined_call_operand.vmem [shape: f32[8,384], index: 0, kind: input, shape index: {}]   ;;  %s3350_s3 = inlined_call_operand.vmem [shape: bf16[384,384], index: 3, kind: input, shape index: {}]   ;;  %s3351_s5 = inlined_call_operand.vmem [shape: bf16[384,768], index: 5, kind: input, shape index: {}]   ;;  %s3352_s1 = inlined_call_operand.vmem [shape: f32[1,384], index: 1, kind: input, shape index: {}]   ;;  %s3353_s2 = inlined_call_operand.vmem [shape: f32[1,384], index: 2, kind: input, shape index: {}]   ;;  %s3354_s4 = inlined_call_operand.vmem [shape: f32[1,384], index: 4, kind: input, shape index: {}]   ;;  %s3355_s7 = inlined_call_operand.vmem [shape: bf16[8,384], index: 7, kind: output, shape index: {0}]   ;;  %s3356_s6 = inlined_call_operand.vmem [shape: f32[1,768], index: 6, kind: input, shape index: {}]   ;;  %s3357_s8 = inlined_call_operand.vmem [shape: bf16[8,768], index: 8, kind: output, shape index: {1}]  }
   0x1   :  { %v29_v0 = vld [vmem:[%s3349_s0] sm:$0xff]  ;;  %v30_v1 = vld [vmem:[%s3349_s0 + $0x8] sm:$0xff]  ;;  %v31_v2 = vld [vmem:[%s3349_s0 + $0x10] sm:$0xff]  ;;  %667 = vmatprep.mubr.bf16.mxu1 %v2542_v57 }
   0x2   :  { %v32_v3 = vadd.f32 %v30_v1, %v29_v0  ;;  %v2228_v5 = vld [vmem:[%s3350_s3 + $0xac] ss:$12 sps:$4 sm:$0xff]   ;;  %v2230_v6 = vld [vmem:[%s3350_s3 + $0xa8] ss:$12 sps:$4 sm:$0xff]   ;;  %v2233_v8 = vld [vmem:[%s3350_s3 + $0x90] ss:$12 sps:$4 sm:$0xff]  }
   0x3   :  { %594 = vmatprep.subr.bf16.mxu0 %v2228_v5  ;;  %v2231_v7 = vld [vmem:[%s3350_s3 + $0x94] ss:$12 sps:$4 sm:$0xff]   ;;  %v2234_v9 = vld [vmem:[%s3350_s3 + $0x7c] ss:$12 sps:$4 sm:$0xff]   ;;  %v2236_v10 = vld [vmem:[%s3350_s3 + $0x78] ss:$12 sps:$4 sm:$0xff]   ;;  %v56_v5 = vlaneseq }
   0x4   :  { %v33_v4 = vadd.f32 %v32_v3, %v31_v2  ;;  %595 = vmatpush1.bf16.msra.mxu0 %v2230_v6  ;;  %v2237_v11 = vld [vmem:[%s3350_s3 + $0x64] ss:$12 sps:$4 sm:$0xff]   ;;  %v2239_v12 = vld [vmem:[%s3350_s3 + $0x60] ss:$12 sps:$4 sm:$0xff]   ;;  %v2256_v15 = vld [vmem:[%s3350_s3 + $0x228] ss:$12 sps:$4 sm:$0xff]  }
   0x5   :  { %596 = vmatprep.subr.bf16.mxu0 %v2231_v7  ;;  %v2252_v13 = vld [vmem:[%s3350_s3 + $0x22c] ss:$12 sps:$4 sm:$0xff]   ;;  %v2258_v16 = vld [vmem:[%s3350_s3 + $0x214] ss:$12 sps:$4 sm:$0xff]   ;;  %v2262_v19 = vld [vmem:[%s3350_s3 + $0x210] ss:$12 sps:$4 sm:$0xff]  }
   0x6   :  { %34 = vadd.xlane.f32.xlu0 %v33_v4  ;;  %v2240_v14 = vld [vmem:[%s3350_s3 + $0x4c] ss:$12 sps:$4 sm:$0xff]   ;;  %635 = vmatprep.subr.bf16.mxu1 %v2252_v13  ;;  %v2242_v17 = vld [vmem:[%s3350_s3 + $0x48] ss:$12 sps:$4 sm:$0xff]   ;;  %v2245_v20 = vld [vmem:[%s3350_s3 + $0x30] ss:$12 sps:$4 sm:$0xff]  }
   0x7   :  { %636 = vmatpush1.bf16.msra.mxu1 %v2256_v15  ;;  %v2243_v18 = vld [vmem:[%s3350_s3 + $0x34] ss:$12 sps:$4 sm:$0xff]   ;;  %v2246_v21 = vld [vmem:[%s3350_s3 + $0x1c] ss:$12 sps:$4 sm:$0xff]   ;;  %v2248_v22 = vld [vmem:[%s3350_s3 + $0x18] ss:$12 sps:$4 sm:$0xff]  }
   0x8   :  { %597 = vmatpush1.bf16.msra.mxu0 %v2233_v8  ;;  %637 = vmatprep.subr.bf16.mxu1 %v2258_v16  ;;  %v2249_v23 = vld [vmem:[%s3350_s3 + $0x4] ss:$12 sps:$4 sm:$0xff]   ;;  %v2251_v24 = vld [vmem:[%s3350_s3] ss:$12 sps:$4 sm:$0xff]   ;;  %v2257_v26 = vld [vmem:[%s3350_s3 + $0x168] ss:$12 sps:$4 sm:$0xff]  }
   0x9   :  { %598 = vmatprep.subr.bf16.mxu0 %v2234_v9  ;;  %v2254_v25 = vld [vmem:[%s3350_s3 + $0x16c] ss:$12 sps:$4 sm:$0xff]   ;;  %v2260_v27 = vld [vmem:[%s3350_s3 + $0x154] ss:$12 sps:$4 sm:$0xff]   ;;  %v2263_v28 = vld [vmem:[%s3350_s3 + $0x150] ss:$12 sps:$4 sm:$0xff]  }
   0xa   :  { %v2264_v39 = vld [vmem:[%s3350_s3 + $0x1fc] ss:$12 sps:$4 sm:$0xff]   ;;  %v2268_v41 = vld [vmem:[%s3350_s3 + $0x1f8] ss:$12 sps:$4 sm:$0xff]   ;;  %v2274_v45 = vld [vmem:[%s3350_s3 + $0x1e0] ss:$12 sps:$4 sm:$0xff]  }
   0xb   :  { %638 = vmatpush1.bf16.msra.mxu1 %v2262_v19  ;;  %v2266_v40 = vld [vmem:[%s3350_s3 + $0x13c] ss:$12 sps:$4 sm:$0xff]   ;;  %v2269_v42 = vld [vmem:[%s3350_s3 + $0x138] ss:$12 sps:$4 sm:$0xff]   ;;  %v2275_v46 = vld [vmem:[%s3350_s3 + $0x120] ss:$12 sps:$4 sm:$0xff]  }
   0xc   :  { %599 = vmatpush1.bf16.msra.mxu0 %v2236_v10  ;;  %639 = vmatprep.subr.bf16.mxu1 %v2264_v39  ;;  %v2270_v43 = vld [vmem:[%s3350_s3 + $0x1e4] ss:$12 sps:$4 sm:$0xff]   ;;  %v2276_v47 = vld [vmem:[%s3350_s3 + $0x1cc] ss:$12 sps:$4 sm:$0xff]   ;;  %v2280_v49 = vld [vmem:[%s3350_s3 + $0x1c8] ss:$12 sps:$4 sm:$0xff]  }
   0xd   :  { %600 = vmatprep.subr.bf16.mxu0 %v2237_v11  ;;  %v2272_v44 = vld [vmem:[%s3350_s3 + $0x124] ss:$12 sps:$4 sm:$0xff]   ;;  %v2278_v48 = vld [vmem:[%s3350_s3 + $0x10c] ss:$12 sps:$4 sm:$0xff]   ;;  %v2281_v50 = vld [vmem:[%s3350_s3 + $0x108] ss:$12 sps:$4 sm:$0xff]  }
   0xe   :  { %v2282_v51 = vld [vmem:[%s3350_s3 + $0x1b4] ss:$12 sps:$4 sm:$0xff]   ;;  %v2286_v53 = vld [vmem:[%s3350_s3 + $0x1b0] ss:$12 sps:$4 sm:$0xff]   ;;  %v2292_v58 = vld [vmem:[%s3350_s3 + $0x198] ss:$12 sps:$4 sm:$0xff]  }
   0xf   :  { %640 = vmatpush1.bf16.msra.mxu1 %v2268_v41  ;;  %v2284_v52 = vld [vmem:[%s3350_s3 + $0xf4] ss:$12 sps:$4 sm:$0xff]   ;;  %v2287_v54 = vld [vmem:[%s3350_s3 + $0xf0] ss:$12 sps:$4 sm:$0xff]   ;;  %v2293_v59 = vld [vmem:[%s3350_s3 + $0xd8] ss:$12 sps:$4 sm:$0xff]  }
  0x10   :  { %601 = vmatpush1.bf16.msra.mxu0 %v2239_v12  ;;  %641 = vmatprep.subr.bf16.mxu1 %v2270_v43  ;;  %v2288_v55 = vld [vmem:[%s3350_s3 + $0x19c] ss:$12 sps:$4 sm:$0xff]   ;;  %v2294_v60 = vld [vmem:[%s3350_s3 + $0x184] ss:$12 sps:$4 sm:$0xff]   ;;  %v2298_v62 = vld [vmem:[%s3350_s3 + $0x180] ss:$12 sps:$4 sm:$0xff]  }
  0x11   :  { %602 = vmatprep.subr.bf16.mxu0 %v2240_v14  ;;  %v2290_v56 = vld [vmem:[%s3350_s3 + $0xdc] ss:$12 sps:$4 sm:$0xff]   ;;  %v2296_v61 = vld [vmem:[%s3350_s3 + $0xc4] ss:$12 sps:$4 sm:$0xff]   ;;  %v2299_v63 = vld [vmem:[%s3350_s3 + $0xc0] ss:$12 sps:$4 sm:$0xff]  }
  0x12   :  { %v2760_v6 = vshrl.u32 %v56_v5, 7  ;;  %v54_v10 = vld [vmem:[%s3352_s1] sm:$0x7]  ;;  %v2309_v39 = vld [vmem:[%s3350_s3 + $0x128] ss:$12 sps:$4 sm:$0xff]  }
  0x13   :  { %642 = vmatpush1.bf16.msra.mxu1 %v2274_v45  ;;  %v74_v11 = vld [vmem:[%s3353_s2] sm:$0x7]  ;;  %v2311_v41 = vld [vmem:[%s3350_s3 + $0x1e8] ss:$12 sps:$4 sm:$0xff]   ;;  %v2313_v43 = vld [vmem:[%s3350_s3 + $0x50] ss:$12 sps:$4 sm:$0xff]  }
  0x14   :  { %603 = vmatpush1.bf16.msra.mxu0 %v2242_v17  ;;  %643 = vmatprep.subr.bf16.mxu1 %v2276_v47  ;;  %v2763_v7 = vsub.s32 1, %v2760_v6  ;;  %v2766_v8 = vsub.s32 2, %v2760_v6  ;;  %v2769_v9 = vsub.s32 0, %v2760_v6  ;;  %v2315_v45 = vld [vmem:[%s3350_s3 + $0xf8] ss:$12 sps:$4 sm:$0xff]  }
  0x15   :  { %604 = vmatprep.subr.bf16.mxu0 %v2243_v18  ;;  %v2317_v47 = vld [vmem:[%s3350_s3 + $0x1b8] ss:$12 sps:$4 sm:$0xff]  }
  0x16   :  { %v63_v12 = vrot.slane %v54_v10, %v2763_v7  ;;  %v67_v13 = vrot.slane %v54_v10, %v2766_v8  ;;  %v59_v14 = vrot.slane %v54_v10, %v2769_v9  ;;  %v83_v16 = vrot.slane %v74_v11, %v2763_v7  ;;  %v2342_v5 = vld [vmem:[%s3351_s5 + $0xc0] ss:$24 sps:$4 sm:$0xff]  }
  0x17   :  { %644 = vmatpush1.bf16.msra.mxu1 %v2280_v49  ;;  %v87_v17 = vrot.slane %v74_v11, %v2766_v8  ;;  %v2319_v49 = vld [vmem:[%s3350_s3 + $0x20] ss:$12 sps:$4 sm:$0xff]  }
  0x18   :  { %605 = vmatpush1.bf16.msra.mxu0 %v2245_v20  ;;  %645 = vmatprep.subr.bf16.mxu1 %v2282_v51  ;;  %v2321_v51 = vld [vmem:[%s3350_s3 + $0xc8] ss:$12 sps:$4 sm:$0xff]   ;;  %v2345_v10 = vld [vmem:[%s3351_s5 + $0x3c0] ss:$24 sps:$4 sm:$0xff]  }
  0x19   :  { %606 = vmatprep.subr.bf16.mxu0 %v2246_v21  ;;  %v79_v21 = vrot.slane %v74_v11, %v2769_v9  ;;  %v2350_v11 = vld [vmem:[%s3351_s5 + $0x94] ss:$24 sps:$4 sm:$0xff]  }
  0x1b   :  { %646 = vmatpush1.bf16.msra.mxu1 %v2286_v53  ;;  %v2323_v53 = vld [vmem:[%s3350_s3 + $0x188] ss:$12 sps:$4 sm:$0xff]  }
  0x1c   :  { %607 = vmatpush1.bf16.msra.mxu0 %v2248_v22  ;;  %647 = vmatprep.subr.bf16.mxu1 %v2288_v55  ;;  %v2329_v55 = vld [vmem:[%s3351_s5 + $0x454] ss:$24 sps:$4 sm:$0xff]  }
  0x1d   :  { %608 = vmatprep.subr.bf16.mxu0 %v2249_v23 }
  0x1f   :  { %648 = vmatpush1.bf16.msra.mxu1 %v2292_v58  ;;  %v2327_v58 = vld [vmem:[%s3351_s5 + $0x450] ss:$24 sps:$4 sm:$0xff]  }
  0x20   :  { %609 = vmatpush1.bf16.msra.mxu0 %v2251_v24  ;;  %649 = vmatprep.subr.bf16.mxu1 %v2294_v60  ;;  %v2335_v60 = vld [vmem:[%s3351_s5 + $0x424] ss:$24 sps:$4 sm:$0xff]  }
  0x21   :  { %610 = vmatprep.subr.bf16.mxu0 %v2254_v25 }
  0x23   :  { %650 = vmatpush1.bf16.msra.mxu1 %v2298_v62  ;;  %v2333_v62 = vld [vmem:[%s3351_s5 + $0x420] ss:$24 sps:$4 sm:$0xff]  }
  0x24   :  { %611 = vmatpush2.bf16.msra.mxu0 %v2257_v26 }
  0x25   :  { %612 = vmatprep.subr.bf16.mxu0 %v2260_v27 }
  0x28   :  { %613 = vmatpush2.bf16.msra.mxu0 %v2263_v28  ;;  %v2301_v28 = vld [vmem:[%s3350_s3 + $0xb0] ss:$12 sps:$4 sm:$0xff]  }
  0x29   :  { %614 = vmatprep.subr.bf16.mxu0 %v2266_v40  ;;  %v2310_v40 = vld [vmem:[%s3350_s3 + $0x68] ss:$12 sps:$4 sm:$0xff]  }
  0x2c   :  { %615 = vmatpush2.bf16.msra.mxu0 %v2269_v42  ;;  %v2312_v42 = vld [vmem:[%s3350_s3 + $0x110] ss:$12 sps:$4 sm:$0xff]  }
  0x2d   :  { %616 = vmatprep.subr.bf16.mxu0 %v2272_v44  ;;  %v2314_v44 = vld [vmem:[%s3350_s3 + $0x1d0] ss:$12 sps:$4 sm:$0xff]  }
  0x30   :  { %617 = vmatpush2.bf16.msra.mxu0 %v2275_v46  ;;  %v2316_v46 = vld [vmem:[%s3350_s3 + $0x38] ss:$12 sps:$4 sm:$0xff]  }
  0x31   :  { %618 = vmatprep.subr.bf16.mxu0 %v2278_v48  ;;  %v2318_v48 = vld [vmem:[%s3350_s3 + $0xe0] ss:$12 sps:$4 sm:$0xff]  }
  0x34   :  { %619 = vmatpush2.bf16.msra.mxu0 %v2281_v50  ;;  %v2320_v50 = vld [vmem:[%s3350_s3 + $0x1a0] ss:$12 sps:$4 sm:$0xff]  }
  0x35   :  { %620 = vmatprep.subr.bf16.mxu0 %v2284_v52  ;;  %v2322_v52 = vld [vmem:[%s3350_s3 + $0x8] ss:$12 sps:$4 sm:$0xff]  }
  0x38   :  { %621 = vmatpush2.bf16.msra.mxu0 %v2287_v54  ;;  %v2326_v54 = vld [vmem:[%s3351_s5 + $0x154] ss:$24 sps:$4 sm:$0xff]  }
  0x39   :  { %622 = vmatprep.subr.bf16.mxu0 %v2290_v56  ;;  %v2324_v56 = vld [vmem:[%s3351_s5 + $0x150] ss:$24 sps:$4 sm:$0xff]  }
  0x3c   :  { %623 = vmatpush2.bf16.msra.mxu0 %v2293_v59  ;;  %v2332_v59 = vld [vmem:[%s3351_s5 + $0x124] ss:$24 sps:$4 sm:$0xff]  }
  0x3d   :  { %624 = vmatprep.subr.bf16.mxu0 %v2296_v61  ;;  %v2330_v61 = vld [vmem:[%s3351_s5 + $0x120] ss:$24 sps:$4 sm:$0xff]  }
  0x40   :  { %625 = vmatpush2.bf16.msra.mxu0 %v2299_v63  ;;  %v2338_v63 = vld [vmem:[%s3351_s5 + $0xf4] ss:$24 sps:$4 sm:$0xff]  }
  0x8f   :  { %v35_v29 = vpop.xlane.xlu0 %34 }
  0x90   :  { %v37_v30 = vmul.f32 0.0026041667, %v35_v29 }
  0x92   :  { %v2671_v31 = vsub.f32 %v29_v0, %v37_v30  ;;  %v2673_v32 = vsub.f32 %v30_v1, %v37_v30  ;;  %v2675_v33 = vsub.f32 %v31_v2, %v37_v30  ;;  %v2300_v0 = vld [vmem:[%s3350_s3 + $0x170] ss:$12 sps:$4 sm:$0xff]   ;;  %v2543_v1 = vmov 0.0  }
  0x93   :  { %2174 = vmatprep.subr.bf16.mxu1 %v2300_v0  ;;  %2205 = vmatprep.subr.bf16.mxu0 %v2543_v1  ;;  %v2341_v0 = vld [vmem:[%s3351_s5 + $0x3f4] ss:$24 sps:$4 sm:$0xff]  }
  0x94   :  { %v41_v34 = vmul.f32 %v2671_v31, %v2671_v31  ;;  %v42_v35 = vmul.f32 %v2673_v32, %v2673_v32  ;;  %v43_v36 = vmul.f32 %v2675_v33, %v2675_v33 }
  0x96   :  { %v44_v37 = vadd.f32 %v42_v35, %v41_v34  ;;  %v2304_v34 = vld [vmem:[%s3350_s3 + $0x98] ss:$12 sps:$4 sm:$0xff]  }
  0x97   :  { %v2305_v35 = vld [vmem:[%s3350_s3 + $0x218] ss:$12 sps:$4 sm:$0xff]  }
  0x98   :  { %v45_v38 = vadd.f32 %v44_v37, %v43_v36  ;;  %v2306_v36 = vld [vmem:[%s3350_s3 + $0x140] ss:$12 sps:$4 sm:$0xff]  }
  0x99   :  { %v2307_v37 = vld [vmem:[%s3350_s3 + $0x80] ss:$12 sps:$4 sm:$0xff]  }
  0x9a   :  { %46 = vadd.xlane.f32.xlu0 %v45_v38  ;;  %v2308_v38 = vld [vmem:[%s3350_s3 + $0x200] ss:$12 sps:$4 sm:$0xff]  }
 0x123   :  { %v47_v2 = vpop.xlane.xlu0 %46 }
 0x124   :  { %v48_v3 = vmul.f32 0.0026041667, %v47_v2  ;;  %v2339_v2 = vld [vmem:[%s3351_s5 + $0x3f0] ss:$24 sps:$4 sm:$0xff]  }
 0x126   :  { %v49_v4 = vadd.f32 1e-05, %v48_v3  ;;  %v2344_v3 = vld [vmem:[%s3351_s5 + $0xc4] ss:$24 sps:$4 sm:$0xff]  }
 0x128   :  { %2540 = vrsqrt.f32 %v49_v4  ;;  %v2347_v4 = vld [vmem:[%s3351_s5 + $0x3c4] ss:$24 sps:$4 sm:$0xff]  }
 0x135   :  { %v2541_v15 = vpop.eup %2540 }
 0x136   :  { %v52_v18 = vmul.f32 %v2541_v15, %v2673_v32  ;;  %v53_v19 = vmul.f32 %v2541_v15, %v2675_v33  ;;  %v51_v20 = vmul.f32 %v2541_v15, %v2671_v31  ;;  %v2302_v31 = vld [vmem:[%s3350_s3 + $0x230] ss:$12 sps:$4 sm:$0xff]   ;;  %v2303_v33 = vld [vmem:[%s3350_s3 + $0x158] ss:$12 sps:$4 sm:$0xff]  }
 0x137   :  { %v2356_v15 = vld [vmem:[%s3351_s5 + $0x64] ss:$24 sps:$4 sm:$0xff]  }
 0x138   :  { %v72_v22 = vmul.f32 %v63_v12, %v52_v18  ;;  %v73_v23 = vmul.f32 %v67_v13, %v53_v19  ;;  %v71_v24 = vmul.f32 %v59_v14, %v51_v20  ;;  %v2353_v12 = vld [vmem:[%s3351_s5 + $0x394] ss:$24 sps:$4 sm:$0xff]   ;;  %v2348_v13 = vld [vmem:[%s3351_s5 + $0x90] ss:$24 sps:$4 sm:$0xff]   ;;  %v2357_v18 = vld [vmem:[%s3351_s5 + $0x360] ss:$24 sps:$4 sm:$0xff]  }
 0x139   :  { %v2351_v14 = vld [vmem:[%s3351_s5 + $0x390] ss:$24 sps:$4 sm:$0xff]   ;;  %v2362_v19 = vld [vmem:[%s3351_s5 + $0x34] ss:$24 sps:$4 sm:$0xff]  }
 0x13a   :  { %v92_v25 = vadd.f32 %v83_v16, %v72_v22  ;;  %v93_v26 = vadd.f32 %v87_v17, %v73_v23  ;;  %v91_v27 = vadd.f32 %v79_v21, %v71_v24  ;;  %v2359_v16 = vld [vmem:[%s3351_s5 + $0x364] ss:$24 sps:$4 sm:$0xff]   ;;  %v2354_v17 = vld [vmem:[%s3351_s5 + $0x60] ss:$24 sps:$4 sm:$0xff]   ;;  %v2365_v20 = vld [vmem:[%s3351_s5 + $0x334] ss:$24 sps:$4 sm:$0xff]  }
 0x13b   :  { %v2360_v21 = vld [vmem:[%s3351_s5 + $0x30] ss:$24 sps:$4 sm:$0xff]   ;;  %v2368_v23 = vld [vmem:[%s3351_s5 + $0x4] ss:$24 sps:$4 sm:$0xff]  }
 0x13c   :  { %v2789_v29 = vpack.c.bf16 %v92_v25, %v92_v25  ;;  %v2791_v30 = vpack.c.bf16 %v93_v26, %v93_v26  ;;  %v2793_v32 = vpack.c.bf16 %v91_v27, %v91_v27  ;;  %v2363_v22 = vld [vmem:[%s3351_s5 + $0x330] ss:$24 sps:$4 sm:$0xff]   ;;  %v2371_v24 = vld [vmem:[%s3351_s5 + $0x304] ss:$24 sps:$4 sm:$0xff]   ;;  %v2366_v25 = vld [vmem:[%s3351_s5] ss:$24 sps:$4 sm:$0xff]  }
 0x13d   :  { %v2369_v26 = vld [vmem:[%s3351_s5 + $0x300] ss:$24 sps:$4 sm:$0xff]   ;;  %v2374_v27 = vld [vmem:[%s3351_s5 + $0x2d4] ss:$24 sps:$4 sm:$0xff]  }
 0x13e   :  { %626 = vmatprep.mubr.bf16.mxu0 %v2789_v29  ;;  %668 = vmatmul.mubr.bf16.vlgmr.msra.gmra.mxu1 %v2791_v30 }
 0x13f   :  { %2175 = vmatpush3.bf16.msra.mxu1 %v2301_v28  ;;  %627 = vmatmul.mubr.bf16.vlgmr.msra.gmra.mxu0 %v2793_v32  ;;  %v2377_v28 = vld [vmem:[%s3351_s5 + $0x15c] ss:$24 sps:$4 sm:$0xff]  }
 0x140   :  { %708 = vmatprep.mubr.bf16.mxu1 %v2789_v29  ;;  %2206 = vmatpush3.bf16.msra.mxu0 %v2302_v31  ;;  %v2372_v31 = vld [vmem:[%s3351_s5 + $0x2d0] ss:$24 sps:$4 sm:$0xff]  }
 0x141   :  { %2176 = vmatprep.subr.bf16.mxu1 %v2303_v33  ;;  %2207 = vmatprep.subr.bf16.mxu0 %v2543_v1  ;;  %v2375_v33 = vld [vmem:[%s3351_s5 + $0x158] ss:$24 sps:$4 sm:$0xff]  }
 0x142   :  { %2221 = vmatprep.mubr.msk.bf16.mxu0 %vm2544_vm0, %v2543_v1 }
 0x143   :  { %2177 = vmatpush3.bf16.msra.mxu1 %v2304_v34  ;;  %v2380_v34 = vld [vmem:[%s3351_s5 + $0x2a4] ss:$24 sps:$4 sm:$0xff]  }
 0x144   :  { %2208 = vmatpush3.bf16.msra.mxu0 %v2305_v35  ;;  %2178 = vmatprep.subr.bf16.mxu1 %v2306_v36  ;;  %v2383_v35 = vld [vmem:[%s3351_s5 + $0x12c] ss:$24 sps:$4 sm:$0xff]   ;;  %v2378_v36 = vld [vmem:[%s3351_s5 + $0x2a0] ss:$24 sps:$4 sm:$0xff]  }
 0x145   :  { %2209 = vmatprep.subr.bf16.mxu0 %v2543_v1 }
 0x147   :  { %2179 = vmatpush3.bf16.msra.mxu1 %v2307_v37  ;;  %v2381_v37 = vld [vmem:[%s3351_s5 + $0x128] ss:$24 sps:$4 sm:$0xff]  }
 0x148   :  { %2210 = vmatpush3.bf16.msra.mxu0 %v2308_v38  ;;  %2180 = vmatprep.subr.bf16.mxu1 %v2309_v39  ;;  %v2386_v38 = vld [vmem:[%s3351_s5 + $0x274] ss:$24 sps:$4 sm:$0xff]  }
 0x149   :  { %2211 = vmatprep.subr.bf16.mxu0 %v2543_v1  ;;  %v2389_v39 = vld [vmem:[%s3351_s5 + $0xfc] ss:$24 sps:$4 sm:$0xff]  }
 0x14b   :  { %2181 = vmatpush3.bf16.msra.mxu1 %v2310_v40  ;;  %v2384_v40 = vld [vmem:[%s3351_s5 + $0x270] ss:$24 sps:$4 sm:$0xff]  }
 0x14c   :  { %2212 = vmatpush3.bf16.msra.mxu0 %v2311_v41  ;;  %2182 = vmatprep.subr.bf16.mxu1 %v2312_v42  ;;  %v2387_v41 = vld [vmem:[%s3351_s5 + $0xf8] ss:$24 sps:$4 sm:$0xff]   ;;  %v2392_v42 = vld [vmem:[%s3351_s5 + $0x244] ss:$24 sps:$4 sm:$0xff]  }
 0x14d   :  { %2213 = vmatprep.subr.bf16.mxu0 %v2543_v1 }
 0x14f   :  { %2183 = vmatpush3.bf16.msra.mxu1 %v2313_v43  ;;  %v2395_v43 = vld [vmem:[%s3351_s5 + $0xcc] ss:$24 sps:$4 sm:$0xff]  }
 0x150   :  { %2214 = vmatpush3.bf16.msra.mxu0 %v2314_v44  ;;  %2184 = vmatprep.subr.bf16.mxu1 %v2315_v45  ;;  %v2390_v44 = vld [vmem:[%s3351_s5 + $0x240] ss:$24 sps:$4 sm:$0xff]  }
 0x151   :  { %2215 = vmatprep.subr.bf16.mxu0 %v2543_v1  ;;  %v2393_v45 = vld [vmem:[%s3351_s5 + $0xc8] ss:$24 sps:$4 sm:$0xff]  }
 0x153   :  { %2185 = vmatpush3.bf16.msra.mxu1 %v2316_v46  ;;  %v2398_v46 = vld [vmem:[%s3351_s5 + $0x214] ss:$24 sps:$4 sm:$0xff]  }
 0x154   :  { %2216 = vmatpush3.bf16.msra.mxu0 %v2317_v47  ;;  %2186 = vmatprep.subr.bf16.mxu1 %v2318_v48  ;;  %v2401_v47 = vld [vmem:[%s3351_s5 + $0x9c] ss:$24 sps:$4 sm:$0xff]   ;;  %v2396_v48 = vld [vmem:[%s3351_s5 + $0x210] ss:$24 sps:$4 sm:$0xff]  }
 0x155   :  { %2217 = vmatprep.subr.bf16.mxu0 %v2543_v1 }
 0x157   :  { %2187 = vmatpush3.bf16.msra.mxu1 %v2319_v49  ;;  %v2399_v49 = vld [vmem:[%s3351_s5 + $0x98] ss:$24 sps:$4 sm:$0xff]  }
 0x158   :  { %2218 = vmatpush3.bf16.msra.mxu0 %v2320_v50  ;;  %2188 = vmatprep.subr.bf16.mxu1 %v2321_v51  ;;  %v2404_v50 = vld [vmem:[%s3351_s5 + $0x1e4] ss:$24 sps:$4 sm:$0xff]  }
 0x159   :  { %2219 = vmatprep.subr.bf16.mxu0 %v2543_v1  ;;  %v2336_v1 = vld [vmem:[%s3351_s5 + $0xf0] ss:$24 sps:$4 sm:$0xff]   ;;  %v2407_v51 = vld [vmem:[%s3351_s5 + $0x6c] ss:$24 sps:$4 sm:$0xff]  }
 0x15b   :  { %2189 = vmatpush3.bf16.msra.mxu1 %v2322_v52  ;;  %v2402_v52 = vld [vmem:[%s3351_s5 + $0x1e0] ss:$24 sps:$4 sm:$0xff]  }
 0x15c   :  { %2220 = vmatpush3.bf16.msra.mxu0 %v2323_v53  ;;  %1652 = vmatprep.subr.bf16.mxu1 %v2326_v54  ;;  %v2405_v53 = vld [vmem:[%s3351_s5 + $0x68] ss:$24 sps:$4 sm:$0xff]   ;;  %v2410_v54 = vld [vmem:[%s3351_s5 + $0x1b4] ss:$24 sps:$4 sm:$0xff]  }
 0x15d   :  { %1693 = vmatprep.subr.bf16.mxu0 %v2329_v55  ;;  %v2413_v55 = vld [vmem:[%s3351_s5 + $0x3c] ss:$24 sps:$4 sm:$0xff]  }
 0x15e   :  { %709 = vmatmul.mubr.bf16.vlgmr.msra.gmra.mxu1 %v2793_v32 }
 0x15f   :  { %2222 = vmatmul.mubr.bf16.vlgmr.msra.gmra.mxu0 %v2791_v30  ;;  %1653 = vmatpush1.bf16.msra.mxu1 %v2324_v56  ;;  %v2408_v56 = vld [vmem:[%s3351_s5 + $0x1b0] ss:$24 sps:$4 sm:$0xff]  }
 0x160   :  { %1684 = vmatprep.mubr.bf16.mxu1 %v2789_v29  ;;  %1694 = vmatpush1.bf16.msra.mxu0 %v2327_v58  ;;  %v2411_v58 = vld [vmem:[%s3351_s5 + $0x38] ss:$24 sps:$4 sm:$0xff]  }
 0x161   :  { %1654 = vmatprep.subr.bf16.mxu1 %v2332_v59  ;;  %1695 = vmatprep.subr.bf16.mxu0 %v2335_v60  ;;  %v2416_v59 = vld [vmem:[%s3351_s5 + $0x184] ss:$24 sps:$4 sm:$0xff]  }
 0x162   :  { %1725 = vmatprep.mubr.bf16.mxu0 %v2542_v57  ;;  %v2419_v60 = vld [vmem:[%s3351_s5 + $0xc] ss:$24 sps:$4 sm:$0xff]  }
 0x163   :  { %1655 = vmatpush1.bf16.msra.mxu1 %v2330_v61  ;;  %v2414_v61 = vld [vmem:[%s3351_s5 + $0x180] ss:$24 sps:$4 sm:$0xff]  }
 0x164   :  { %1696 = vmatpush1.bf16.msra.mxu0 %v2333_v62  ;;  %1656 = vmatprep.subr.bf16.mxu1 %v2338_v63  ;;  %v2417_v62 = vld [vmem:[%s3351_s5 + $0x8] ss:$24 sps:$4 sm:$0xff]   ;;  %v2422_v63 = vld [vmem:[%s3351_s5 + $0x45c] ss:$24 sps:$4 sm:$0xff]  }
 0x165   :  { %1697 = vmatprep.subr.bf16.mxu0 %v2341_v0  ;;  %v2425_v0 = vld [vmem:[%s3351_s5 + $0x2dc] ss:$24 sps:$4 sm:$0xff]  }
 0x167   :  { %1657 = vmatpush1.bf16.msra.mxu1 %v2336_v1  ;;  %v2420_v1 = vld [vmem:[%s3351_s5 + $0x458] ss:$24 sps:$4 sm:$0xff]  }
 0x168   :  { %1698 = vmatpush1.bf16.msra.mxu0 %v2339_v2  ;;  %1658 = vmatprep.subr.bf16.mxu1 %v2344_v3  ;;  %v2423_v2 = vld [vmem:[%s3351_s5 + $0x2d8] ss:$24 sps:$4 sm:$0xff]   ;;  %v2428_v3 = vld [vmem:[%s3351_s5 + $0x42c] ss:$24 sps:$4 sm:$0xff]  }
 0x169   :  { %1699 = vmatprep.subr.bf16.mxu0 %v2347_v4  ;;  %v2431_v4 = vld [vmem:[%s3351_s5 + $0x2ac] ss:$24 sps:$4 sm:$0xff]  }
 0x16b   :  { %1659 = vmatpush1.bf16.msra.mxu1 %v2342_v5  ;;  %v2426_v5 = vld [vmem:[%s3351_s5 + $0x428] ss:$24 sps:$4 sm:$0xff]  }
 0x16c   :  { %1700 = vmatpush1.bf16.msra.mxu0 %v2345_v10  ;;  %1660 = vmatprep.subr.bf16.mxu1 %v2350_v11  ;;  %v2429_v10 = vld [vmem:[%s3351_s5 + $0x2a8] ss:$24 sps:$4 sm:$0xff]   ;;  %v2434_v11 = vld [vmem:[%s3351_s5 + $0x3fc] ss:$24 sps:$4 sm:$0xff]  }
 0x16d   :  { %1701 = vmatprep.subr.bf16.mxu0 %v2353_v12  ;;  %v2437_v12 = vld [vmem:[%s3351_s5 + $0x27c] ss:$24 sps:$4 sm:$0xff]  }
 0x16f   :  { %1661 = vmatpush1.bf16.msra.mxu1 %v2348_v13  ;;  %v2432_v13 = vld [vmem:[%s3351_s5 + $0x3f8] ss:$24 sps:$4 sm:$0xff]  }
 0x170   :  { %1702 = vmatpush1.bf16.msra.mxu0 %v2351_v14  ;;  %1662 = vmatprep.subr.bf16.mxu1 %v2356_v15  ;;  %v2435_v14 = vld [vmem:[%s3351_s5 + $0x278] ss:$24 sps:$4 sm:$0xff]   ;;  %v2440_v15 = vld [vmem:[%s3351_s5 + $0x3cc] ss:$24 sps:$4 sm:$0xff]  }
 0x171   :  { %1703 = vmatprep.subr.bf16.mxu0 %v2359_v16  ;;  %v2443_v16 = vld [vmem:[%s3351_s5 + $0x24c] ss:$24 sps:$4 sm:$0xff]  }
 0x173   :  { %1663 = vmatpush1.bf16.msra.mxu1 %v2354_v17  ;;  %v2438_v17 = vld [vmem:[%s3351_s5 + $0x3c8] ss:$24 sps:$4 sm:$0xff]  }
 0x174   :  { %1704 = vmatpush1.bf16.msra.mxu0 %v2357_v18  ;;  %1664 = vmatprep.subr.bf16.mxu1 %v2362_v19  ;;  %v2441_v18 = vld [vmem:[%s3351_s5 + $0x248] ss:$24 sps:$4 sm:$0xff]   ;;  %v2446_v19 = vld [vmem:[%s3351_s5 + $0x39c] ss:$24 sps:$4 sm:$0xff]  }
 0x175   :  { %1705 = vmatprep.subr.bf16.mxu0 %v2365_v20  ;;  %v2449_v20 = vld [vmem:[%s3351_s5 + $0x21c] ss:$24 sps:$4 sm:$0xff]  }
 0x177   :  { %1665 = vmatpush1.bf16.msra.mxu1 %v2360_v21  ;;  %v2444_v21 = vld [vmem:[%s3351_s5 + $0x398] ss:$24 sps:$4 sm:$0xff]  }
 0x178   :  { %1706 = vmatpush1.bf16.msra.mxu0 %v2363_v22  ;;  %1666 = vmatprep.subr.bf16.mxu1 %v2368_v23  ;;  %v2447_v22 = vld [vmem:[%s3351_s5 + $0x218] ss:$24 sps:$4 sm:$0xff]   ;;  %v2452_v23 = vld [vmem:[%s3351_s5 + $0x36c] ss:$24 sps:$4 sm:$0xff]  }
 0x179   :  { %1707 = vmatprep.subr.bf16.mxu0 %v2371_v24  ;;  %v2455_v24 = vld [vmem:[%s3351_s5 + $0x1ec] ss:$24 sps:$4 sm:$0xff]  }
 0x17b   :  { %1667 = vmatpush1.bf16.msra.mxu1 %v2366_v25  ;;  %v2450_v25 = vld [vmem:[%s3351_s5 + $0x368] ss:$24 sps:$4 sm:$0xff]  }
 0x17c   :  { %1708 = vmatpush1.bf16.msra.mxu0 %v2369_v26  ;;  %1668 = vmatprep.subr.bf16.mxu1 %v2374_v27  ;;  %v2453_v26 = vld [vmem:[%s3351_s5 + $0x1e8] ss:$24 sps:$4 sm:$0xff]   ;;  %v2458_v27 = vld [vmem:[%s3351_s5 + $0x33c] ss:$24 sps:$4 sm:$0xff]  }
 0x17d   :  { %1734 = vmatprep.subr.bf16.mxu0 %v2377_v28  ;;  %v2461_v28 = vld [vmem:[%s3351_s5 + $0x1bc] ss:$24 sps:$4 sm:$0xff]  }
 0x17f   :  { %1669 = vmatpush2.bf16.msra.mxu1 %v2372_v31  ;;  %1726 = vmatmul.mubr.bf16.vlgmr.msra.gmra.mxu0 %v2791_v30  ;;  %v2456_v31 = vld [vmem:[%s3351_s5 + $0x338] ss:$24 sps:$4 sm:$0xff]  }
 0x180   :  { %1735 = vmatpush1.bf16.msra.mxu0 %v2375_v33  ;;  %1766 = vmatprep.mubr.bf16.mxu0 %v2789_v29  ;;  %v2459_v33 = vld [vmem:[%s3351_s5 + $0x1b8] ss:$24 sps:$4 sm:$0xff]  }
 0x181   :  { %1670 = vmatprep.subr.bf16.mxu1 %v2380_v34  ;;  %1736 = vmatprep.subr.bf16.mxu0 %v2383_v35  ;;  %v2464_v34 = vld [vmem:[%s3351_s5 + $0x30c] ss:$24 sps:$4 sm:$0xff]  }
 0x182   :  { %v2467_v35 = vld [vmem:[%s3351_s5 + $0x18c] ss:$24 sps:$4 sm:$0xff]  }
 0x183   :  { %1671 = vmatpush2.bf16.msra.mxu1 %v2378_v36  ;;  %v2462_v36 = vld [vmem:[%s3351_s5 + $0x308] ss:$24 sps:$4 sm:$0xff]  }
 0x184   :  { %1737 = vmatpush1.bf16.msra.mxu0 %v2381_v37  ;;  %1672 = vmatprep.subr.bf16.mxu1 %v2386_v38  ;;  %v2465_v37 = vld [vmem:[%s3351_s5 + $0x188] ss:$24 sps:$4 sm:$0xff]   ;;  %v2470_v38 = vld [vmem:[%s3351_s5 + $0x164] ss:$24 sps:$4 sm:$0xff]  }
 0x185   :  { %1738 = vmatprep.subr.bf16.mxu0 %v2389_v39  ;;  %v2473_v39 = vld [vmem:[%s3351_s5 + $0x464] ss:$24 sps:$4 sm:$0xff]  }
 0x187   :  { %1673 = vmatpush2.bf16.msra.mxu1 %v2384_v40  ;;  %v2468_v40 = vld [vmem:[%s3351_s5 + $0x160] ss:$24 sps:$4 sm:$0xff]  }
 0x188   :  { %1739 = vmatpush1.bf16.msra.mxu0 %v2387_v41  ;;  %1674 = vmatprep.subr.bf16.mxu1 %v2392_v42  ;;  %v2471_v41 = vld [vmem:[%s3351_s5 + $0x460] ss:$24 sps:$4 sm:$0xff]   ;;  %v2476_v42 = vld [vmem:[%s3351_s5 + $0x134] ss:$24 sps:$4 sm:$0xff]  }
 0x189   :  { %1740 = vmatprep.subr.bf16.mxu0 %v2395_v43  ;;  %v2479_v43 = vld [vmem:[%s3351_s5 + $0x434] ss:$24 sps:$4 sm:$0xff]  }
 0x18b   :  { %1675 = vmatpush2.bf16.msra.mxu1 %v2390_v44  ;;  %v2474_v44 = vld [vmem:[%s3351_s5 + $0x130] ss:$24 sps:$4 sm:$0xff]  }
 0x18c   :  { %1741 = vmatpush1.bf16.msra.mxu0 %v2393_v45  ;;  %1676 = vmatprep.subr.bf16.mxu1 %v2398_v46  ;;  %v2477_v45 = vld [vmem:[%s3351_s5 + $0x430] ss:$24 sps:$4 sm:$0xff]   ;;  %v2482_v46 = vld [vmem:[%s3351_s5 + $0x104] ss:$24 sps:$4 sm:$0xff]  }
 0x18d   :  { %1742 = vmatprep.subr.bf16.mxu0 %v2401_v47  ;;  %v2485_v47 = vld [vmem:[%s3351_s5 + $0x404] ss:$24 sps:$4 sm:$0xff]  }
 0x18f   :  { %1677 = vmatpush2.bf16.msra.mxu1 %v2396_v48  ;;  %v2483_v48 = vld [vmem:[%s3351_s5 + $0x400] ss:$24 sps:$4 sm:$0xff]  }
 0x190   :  { %1743 = vmatpush1.bf16.msra.mxu0 %v2399_v49  ;;  %1678 = vmatprep.subr.bf16.mxu1 %v2404_v50  ;;  %v2488_v49 = vld [vmem:[%s3351_s5 + $0xd4] ss:$24 sps:$4 sm:$0xff]   ;;  %v2486_v50 = vld [vmem:[%s3351_s5 + $0xd0] ss:$24 sps:$4 sm:$0xff]  }
 0x191   :  { %1744 = vmatprep.subr.bf16.mxu0 %v2407_v51  ;;  %v2489_v51 = vld [vmem:[%s3351_s5 + $0x3d0] ss:$24 sps:$4 sm:$0xff]  }
 0x193   :  { %1679 = vmatpush2.bf16.msra.mxu1 %v2402_v52  ;;  %v2494_v52 = vld [vmem:[%s3351_s5 + $0xa4] ss:$24 sps:$4 sm:$0xff]  }
 0x194   :  { %1745 = vmatpush1.bf16.msra.mxu0 %v2405_v53  ;;  %1680 = vmatprep.subr.bf16.mxu1 %v2410_v54  ;;  %v2497_v53 = vld [vmem:[%s3351_s5 + $0x3a4] ss:$24 sps:$4 sm:$0xff]   ;;  %v2492_v54 = vld [vmem:[%s3351_s5 + $0xa0] ss:$24 sps:$4 sm:$0xff]  }
 0x195   :  { %1746 = vmatprep.subr.bf16.mxu0 %v2413_v55  ;;  %v2495_v55 = vld [vmem:[%s3351_s5 + $0x3a0] ss:$24 sps:$4 sm:$0xff]  }
 0x197   :  { %1681 = vmatpush2.bf16.msra.mxu1 %v2408_v56  ;;  %v2500_v56 = vld [vmem:[%s3351_s5 + $0x74] ss:$24 sps:$4 sm:$0xff]  }
 0x198   :  { %1747 = vmatpush1.bf16.msra.mxu0 %v2411_v58  ;;  %1682 = vmatprep.subr.bf16.mxu1 %v2416_v59  ;;  %v2503_v58 = vld [vmem:[%s3351_s5 + $0x374] ss:$24 sps:$4 sm:$0xff]   ;;  %v2498_v59 = vld [vmem:[%s3351_s5 + $0x70] ss:$24 sps:$4 sm:$0xff]  }
 0x199   :  { %1748 = vmatprep.subr.bf16.mxu0 %v2419_v60  ;;  %v2501_v60 = vld [vmem:[%s3351_s5 + $0x370] ss:$24 sps:$4 sm:$0xff]  }
 0x19b   :  { %1683 = vmatpush2.bf16.msra.mxu1 %v2414_v61  ;;  %v2506_v61 = vld [vmem:[%s3351_s5 + $0x44] ss:$24 sps:$4 sm:$0xff]  }
 0x19c   :  { %1749 = vmatpush1.bf16.msra.mxu0 %v2417_v62  ;;  %1775 = vmatprep.subr.bf16.mxu1 %v2422_v63  ;;  %v2509_v62 = vld [vmem:[%s3351_s5 + $0x344] ss:$24 sps:$4 sm:$0xff]   ;;  %v2504_v63 = vld [vmem:[%s3351_s5 + $0x40] ss:$24 sps:$4 sm:$0xff]  }
 0x19d   :  { %1750 = vmatprep.subr.bf16.mxu0 %v2425_v0  ;;  %v2507_v0 = vld [vmem:[%s3351_s5 + $0x340] ss:$24 sps:$4 sm:$0xff]  }
 0x19e   :  { %1685 = vmatmul.mubr.bf16.vlgmr.msra.gmra.mxu1 %v2793_v32 }
 0x19f   :  { %1776 = vmatpush1.bf16.msra.mxu1 %v2420_v1  ;;  %1807 = vmatprep.mubr.bf16.mxu1 %v2542_v57  ;;  %v2512_v1 = vld [vmem:[%s3351_s5 + $0x14] ss:$24 sps:$4 sm:$0xff]  }
 0x1a0   :  { %1751 = vmatpush2.bf16.msra.mxu0 %v2423_v2  ;;  %1777 = vmatprep.subr.bf16.mxu1 %v2428_v3  ;;  %v2515_v2 = vld [vmem:[%s3351_s5 + $0x314] ss:$24 sps:$4 sm:$0xff]   ;;  %v2510_v3 = vld [vmem:[%s3351_s5 + $0x10] ss:$24 sps:$4 sm:$0xff]  }
 0x1a1   :  { %1752 = vmatprep.subr.bf16.mxu0 %v2431_v4  ;;  %v2513_v4 = vld [vmem:[%s3351_s5 + $0x310] ss:$24 sps:$4 sm:$0xff]  }
 0x1a3   :  { %1778 = vmatpush1.bf16.msra.mxu1 %v2426_v5  ;;  %v2518_v5 = vld [vmem:[%s3351_s5 + $0x2e4] ss:$24 sps:$4 sm:$0xff]  }
 0x1a4   :  { %1753 = vmatpush2.bf16.msra.mxu0 %v2429_v10  ;;  %1779 = vmatprep.subr.bf16.mxu1 %v2434_v11  ;;  %v2516_v10 = vld [vmem:[%s3351_s5 + $0x2e0] ss:$24 sps:$4 sm:$0xff]   ;;  %v2521_v11 = vld [vmem:[%s3351_s5 + $0x2b4] ss:$24 sps:$4 sm:$0xff]  }
 0x1a5   :  { %1754 = vmatprep.subr.bf16.mxu0 %v2437_v12  ;;  %v2519_v12 = vld [vmem:[%s3351_s5 + $0x2b0] ss:$24 sps:$4 sm:$0xff]  }
 0x1a7   :  { %1780 = vmatpush1.bf16.msra.mxu1 %v2432_v13  ;;  %v2524_v13 = vld [vmem:[%s3351_s5 + $0x284] ss:$24 sps:$4 sm:$0xff]  }
 0x1a8   :  { %1755 = vmatpush2.bf16.msra.mxu0 %v2435_v14  ;;  %1781 = vmatprep.subr.bf16.mxu1 %v2440_v15  ;;  %v2522_v14 = vld [vmem:[%s3351_s5 + $0x280] ss:$24 sps:$4 sm:$0xff]   ;;  %v2527_v15 = vld [vmem:[%s3351_s5 + $0x254] ss:$24 sps:$4 sm:$0xff]  }
 0x1a9   :  { %1756 = vmatprep.subr.bf16.mxu0 %v2443_v16  ;;  %v2530_v16 = vld [vmem:[%s3351_s5 + $0x224] ss:$24 sps:$4 sm:$0xff]  }
 0x1ab   :  { %1782 = vmatpush1.bf16.msra.mxu1 %v2438_v17  ;;  %v2528_v17 = vld [vmem:[%s3351_s5 + $0x220] ss:$24 sps:$4 sm:$0xff]  }
 0x1ac   :  { %1757 = vmatpush2.bf16.msra.mxu0 %v2441_v18  ;;  %1783 = vmatprep.subr.bf16.mxu1 %v2446_v19  ;;  %v2533_v18 = vld [vmem:[%s3351_s5 + $0x1f4] ss:$24 sps:$4 sm:$0xff]   ;;  %v2531_v19 = vld [vmem:[%s3351_s5 + $0x1f0] ss:$24 sps:$4 sm:$0xff]  }
 0x1ad   :  { %1758 = vmatprep.subr.bf16.mxu0 %v2449_v20  ;;  %v2536_v20 = vld [vmem:[%s3351_s5 + $0x1c4] ss:$24 sps:$4 sm:$0xff]  }
 0x1af   :  { %1784 = vmatpush1.bf16.msra.mxu1 %v2444_v21  ;;  %v2534_v21 = vld [vmem:[%s3351_s5 + $0x1c0] ss:$24 sps:$4 sm:$0xff]  }
 0x1b0   :  { %1759 = vmatpush2.bf16.msra.mxu0 %v2447_v22  ;;  %1785 = vmatprep.subr.bf16.mxu1 %v2452_v23  ;;  %v2539_v22 = vld [vmem:[%s3351_s5 + $0x194] ss:$24 sps:$4 sm:$0xff]   ;;  %v2537_v23 = vld [vmem:[%s3351_s5 + $0x190] ss:$24 sps:$4 sm:$0xff]  }
 0x1b1   :  { %1760 = vmatprep.subr.bf16.mxu0 %v2455_v24  ;;  %v193_v24 = vld [vmem:[%s3354_s4] sm:$0x7] }
 0x1b3   :  { %1786 = vmatpush1.bf16.msra.mxu1 %v2450_v25  ;;  %v198_v25 = vrot.slane %v193_v24, %v2769_v9 }
 0x1b4   :  { %1761 = vmatpush2.bf16.msra.mxu0 %v2453_v26  ;;  %1787 = vmatprep.subr.bf16.mxu1 %v2458_v27  ;;  %v202_v27 = vrot.slane %v193_v24, %v2763_v7 }
 0x1b5   :  { %1762 = vmatprep.subr.bf16.mxu0 %v2461_v28 }
 0x1b7   :  { %1788 = vmatpush1.bf16.msra.mxu1 %v2456_v31 }
 0x1b8   :  { %1763 = vmatpush2.bf16.msra.mxu0 %v2459_v33  ;;  %1789 = vmatprep.subr.bf16.mxu1 %v2464_v34 }
 0x1b9   :  { %1764 = vmatprep.subr.bf16.mxu0 %v2467_v35 }
 0x1bb   :  { %1790 = vmatpush1.bf16.msra.mxu1 %v2462_v36 }
 0x1bc   :  { %1765 = vmatpush2.bf16.msra.mxu0 %v2465_v37  ;;  %1816 = vmatprep.subr.bf16.mxu1 %v2470_v38 }
 0x1bd   :  { %1857 = vmatprep.subr.bf16.mxu0 %v2473_v39 }
 0x1be   :  { %1808 = vmatmul.mubr.bf16.vlgmr.msra.gmra.mxu1 %v2791_v30 }
 0x1bf   :  { %1767 = vmatmul.mubr.bf16.vlgmr.msra.gmra.mxu0 %v2793_v32  ;;  %1817 = vmatpush1.bf16.msra.mxu1 %v2468_v40 }
 0x1c0   :  { %1848 = vmatprep.mubr.bf16.mxu1 %v2789_v29  ;;  %1858 = vmatpush1.bf16.msra.mxu0 %v2471_v41  ;;  %v2480_v29 = vld [vmem:[%s3351_s5 + $0x100] ss:$24 sps:$4 sm:$0xff]  }
 0x1c1   :  { %1818 = vmatprep.subr.bf16.mxu1 %v2476_v42  ;;  %1859 = vmatprep.subr.bf16.mxu0 %v2479_v43 }
 0x1c2   :  { %1889 = vmatprep.mubr.bf16.mxu0 %v2542_v57  ;;  %v2491_v57 = vld [vmem:[%s3351_s5 + $0x3d4] ss:$24 sps:$4 sm:$0xff]  }
 0x1c3   :  { %1819 = vmatpush1.bf16.msra.mxu1 %v2474_v44  ;;  %v206_v44 = vrot.slane %v193_v24, %v2766_v8 }
 0x1c4   :  { %1860 = vmatpush1.bf16.msra.mxu0 %v2477_v45  ;;  %1820 = vmatprep.subr.bf16.mxu1 %v2482_v46 }
 0x1c5   :  { %1861 = vmatprep.subr.bf16.mxu0 %v2485_v47 }
 0x1c7   :  { %1821 = vmatpush1.bf16.msra.mxu1 %v2480_v29 }
 0x1c8   :  { %1862 = vmatpush1.bf16.msra.mxu0 %v2483_v48  ;;  %1822 = vmatprep.subr.bf16.mxu1 %v2488_v49 }
 0x1c9   :  { %1863 = vmatprep.subr.bf16.mxu0 %v2491_v57 }
 0x1cb   :  { %1823 = vmatpush1.bf16.msra.mxu1 %v2486_v50 }
 0x1cc   :  { %1864 = vmatpush1.bf16.msra.mxu0 %v2489_v51  ;;  %1824 = vmatprep.subr.bf16.mxu1 %v2494_v52 }
 0x1cd   :  { %1865 = vmatprep.subr.bf16.mxu0 %v2497_v53 }
 0x1cf   :  { %1825 = vmatpush1.bf16.msra.mxu1 %v2492_v54 }
 0x1d0   :  { %1866 = vmatpush1.bf16.msra.mxu0 %v2495_v55  ;;  %1826 = vmatprep.subr.bf16.mxu1 %v2500_v56 }
 0x1d1   :  { %1867 = vmatprep.subr.bf16.mxu0 %v2503_v58  ;;  %v900_v58 = vld [vmem:[%s3356_s6] sm:$0x3f] }
 0x1d3   :  { %1827 = vmatpush1.bf16.msra.mxu1 %v2498_v59  ;;  %v905_v59 = vrot.slane %v900_v58, %v2769_v9 }
 0x1d4   :  { %1868 = vmatpush1.bf16.msra.mxu0 %v2501_v60  ;;  %1828 = vmatprep.subr.bf16.mxu1 %v2506_v61  ;;  %v909_v60 = vrot.slane %v900_v58, %v2763_v7 }
 0x1d5   :  { %1869 = vmatprep.subr.bf16.mxu0 %v2509_v62 }
 0x1d7   :  { %1829 = vmatpush1.bf16.msra.mxu1 %v2504_v63 }
 0x1d8   :  { %1870 = vmatpush1.bf16.msra.mxu0 %v2507_v0  ;;  %1830 = vmatprep.subr.bf16.mxu1 %v2512_v1 }
 0x1d9   :  { %1871 = vmatprep.subr.bf16.mxu0 %v2515_v2 }
 0x1db   :  { %1831 = vmatpush1.bf16.msra.mxu1 %v2510_v3 }
 0x1dc   :  { %1872 = vmatpush1.bf16.msra.mxu0 %v2513_v4  ;;  %1832 = vmatprep.subr.bf16.mxu1 %v2518_v5 }
 0x1df   :  { %1833 = vmatpush2.bf16.msra.mxu1 %v2516_v10  ;;  %1890 = vmatmul.mubr.bf16.vlgmr.msra.gmra.mxu0 %v2791_v30  ;;  %v2525_v30 = vld [vmem:[%s3351_s5 + $0x250] ss:$24 sps:$4 sm:$0xff]   ;;  %v916_v10 = vsub.s32 3, %v2760_v6 }
 0x1e0   :  { %1834 = vmatprep.subr.bf16.mxu1 %v2521_v11  ;;  %v913_v11 = vrot.slane %v900_v58, %v2766_v8 }
 0x1e3   :  { %1835 = vmatpush2.bf16.msra.mxu1 %v2519_v12  ;;  %v917_v12 = vrot.slane %v900_v58, %v916_v10 }
 0x1e4   :  { %1836 = vmatprep.subr.bf16.mxu1 %v2524_v13 }
 0x1e7   :  { %1837 = vmatpush2.bf16.msra.mxu1 %v2522_v14 }
 0x1e8   :  { %1838 = vmatprep.subr.bf16.mxu1 %v2527_v15 }
 0x1eb   :  { %1839 = vmatpush2.bf16.msra.mxu1 %v2525_v30 }
 0x1ec   :  { %1840 = vmatprep.subr.bf16.mxu1 %v2530_v16 }
 0x1ef   :  { %1841 = vmatpush2.bf16.msra.mxu1 %v2528_v17 }
 0x1f0   :  { %1842 = vmatprep.subr.bf16.mxu1 %v2533_v18 }
 0x1f3   :  { %1843 = vmatpush2.bf16.msra.mxu1 %v2531_v19 }
 0x1f4   :  { %1844 = vmatprep.subr.bf16.mxu1 %v2536_v20 }
 0x1f7   :  { %1845 = vmatpush2.bf16.msra.mxu1 %v2534_v21 }
 0x1f8   :  { %1846 = vmatprep.subr.bf16.mxu1 %v2539_v22 }
 0x1fb   :  { %1847 = vmatpush2.bf16.msra.mxu1 %v2537_v23 }
 0x1fe   :  { %1849 = vmatmul.mubr.bf16.vlgmr.msra.gmra.mxu1 %v2793_v32  ;;  %v669_v26 = vpop.f32.mrf.mxu1 }
 0x1ff   :  { %v628_v28 = vpop.f32.mrf.mxu0 }
 0x200   :  { %v629_v31 = vadd.f32 %v628_v28, %v198_v25  ;;  %v671_v33 = vpop.f32.mrf.mxu1 }
 0x201   :  { %v630_v34 = vpop.f32.mrf.mxu0 }
 0x202   :  { %v631_v35 = vadd.f32 %v630_v34, %v202_v27  ;;  %v673_v36 = vpop.f32.mrf.mxu1  ;;  %v670_v38 = vadd.f32 %v669_v26, %v629_v31  ;;  %v920_v26 = vsub.s32 4, %v2760_v6  ;;  %v924_v27 = vsub.s32 5, %v2760_v6 }
 0x203   :  { %v632_v37 = vpop.f32.mrf.mxu0 }
 0x204   :  { %v672_v39 = vadd.f32 %v671_v33, %v631_v35  ;;  %v674_v40 = vpop.f32.mrf.mxu1  ;;  %v921_v28 = vrot.slane %v900_v58, %v920_v26  ;;  %v925_v31 = vrot.slane %v900_v58, %v924_v27 }
 0x205   :  { %v633_v41 = vpop.f32.mrf.mxu0 }
 0x206   :  { %v2169_v42 = vpack.c.bf16 %v672_v39, %v670_v38 }
 0x208   :  { %1911 = vst [vmem:[%s3355_s7] sm:$0xff] %v2169_v42 }
 0x21e   :  { %v2190_v32 = vpop.f32.mrf.mxu1 }
 0x21f   :  { %v750_v43 = vpop.f32.mrf.mxu0 }
 0x220   :  { %v2191_v45 = vpop.f32.mrf.mxu1 }
 0x221   :  { %v2192_v46 = vadd.f32 %v2191_v45, %v2190_v32  ;;  %v2223_v47 = vpop.f32.mrf.mxu0 }
 0x222   :  { %v2193_v29 = vpop.f32.mrf.mxu1 }
 0x223   :  { %v711_v48 = vadd.f32 %v2192_v46, %v206_v44  ;;  %v753_v49 = vpop.f32.mrf.mxu0 }
 0x224   :  { %v2194_v57 = vpop.f32.mrf.mxu1 }
 0x225   :  { %v751_v50 = vadd.f32 %v750_v43, %v711_v48  ;;  %v2224_v51 = vpop.f32.mrf.mxu0 }
 0x227   :  { %v2170_v52 = vpack.c.bf16 %v751_v50, %v751_v50 }
 0x229   :  { %1912 = vst [vmem:[%s3355_s7 + $0x8] sm:$0xf] %v2170_v52 }
 0x23f   :  { %v1727_v53 = vpop.f32.mrf.mxu0 }
 0x241   :  { %v1729_v54 = vpop.f32.mrf.mxu0 }
 0x243   :  { %v1731_v55 = vpop.f32.mrf.mxu0 }
 0x245   :  { %v1732_v56 = vpop.f32.mrf.mxu0 }
 0x25e   :  { %v1686_v61 = vpop.f32.mrf.mxu1 }
 0x25f   :  { %v1687_v62 = vadd.f32 %v1686_v61, %v905_v59 }
 0x260   :  { %v1688_v63 = vpop.f32.mrf.mxu1 }
 0x261   :  { %v1689_v0 = vadd.f32 %v1688_v63, %v909_v60  ;;  %v1728_v2 = vadd.f32 %v1727_v53, %v1687_v62 }
 0x262   :  { %v1690_v1 = vpop.f32.mrf.mxu1 }
 0x263   :  { %v1730_v3 = vadd.f32 %v1729_v54, %v1689_v0 }
 0x264   :  { %v1691_v4 = vpop.f32.mrf.mxu1 }
 0x265   :  { %v2171_v5 = vpack.c.bf16 %v1730_v3, %v1728_v2 }
 0x267   :  { %1937 = vst [vmem:[%s3357_s8] sm:$0xff] %v2171_v5 }
 0x27e   :  { %v1809_v9 = vpop.f32.mrf.mxu1 }
 0x27f   :  { %v1768_v7 = vpop.f32.mrf.mxu0 }
 0x280   :  { %v1769_v13 = vadd.f32 %v1768_v7, %v913_v11  ;;  %v1811_v14 = vpop.f32.mrf.mxu1 }
 0x281   :  { %v1770_v15 = vpop.f32.mrf.mxu0 }
 0x282   :  { %v1771_v30 = vadd.f32 %v1770_v15, %v917_v12  ;;  %v1813_v16 = vpop.f32.mrf.mxu1  ;;  %v1810_v18 = vadd.f32 %v1809_v9, %v1769_v13 }
 0x283   :  { %v1772_v17 = vpop.f32.mrf.mxu0 }
 0x284   :  { %v1812_v19 = vadd.f32 %v1811_v14, %v1771_v30  ;;  %v1814_v20 = vpop.f32.mrf.mxu1 }
 0x285   :  { %v1773_v21 = vpop.f32.mrf.mxu0 }
 0x286   :  { %v2172_v22 = vpack.c.bf16 %v1812_v19, %v1810_v18 }
 0x288   :  { %1938 = vst [vmem:[%s3357_s8 + $0x8] sm:$0xff] %v2172_v22 }
 0x29f   :  { %v1891_v23 = vpop.f32.mrf.mxu0 }
 0x2a1   :  { %v1893_v8 = vpop.f32.mrf.mxu0 }
 0x2a3   :  { %v1895_v24 = vpop.f32.mrf.mxu0 }
 0x2a5   :  { %v1896_v25 = vpop.f32.mrf.mxu0 }
 0x2be   :  { %v1850_v33 = vpop.f32.mrf.mxu1 }
 0x2bf   :  { %v1851_v34 = vadd.f32 %v1850_v33, %v921_v28 }
 0x2c0   :  { %v1852_v35 = vpop.f32.mrf.mxu1 }
 0x2c1   :  { %v1853_v36 = vadd.f32 %v1852_v35, %v925_v31  ;;  %v1892_v38 = vadd.f32 %v1891_v23, %v1851_v34 }
 0x2c2   :  { %v1854_v37 = vpop.f32.mrf.mxu1 }
 0x2c3   :  { %v1894_v39 = vadd.f32 %v1893_v8, %v1853_v36 }
 0x2c4   :  { %v1855_v40 = vpop.f32.mrf.mxu1 }
 0x2c5   :  { %v2173_v41 = vpack.c.bf16 %v1894_v39, %v1892_v38 }
 0x2c7   :  { %1939 = vst [vmem:[%s3357_s8 + $0x10] sm:$0xff] %v2173_v41 }

// kernel: sam_encoder_forward.10
= control target key start
LH: loop header
LB: loop body
LE: loop exit
PB: predicated region body
PF: predicated region fallthrough
CT: control target
= control target key end

     0   :  { %s2754_s18 = smov 0   ;;  %s2756_s19 = smov 0   ;;  %s3210_s0 = inlined_call_operand.vmem [shape: bf16[2,4,384], index: 0, kind: input, shape index: {}]   ;;  %s3211_s1 = inlined_call_operand.vmem [shape: bf16[2,4,768], index: 1, kind: input, shape index: {}]   ;;  %s3212_s2 = inlined_call_operand.vmem [shape: bf16[384,384], index: 2, kind: input, shape index: {}]   ;;  %s3213_s3 = inlined_call_operand.vmem [shape: f32[1,384], index: 3, kind: input, shape index: {}]   ;;  %s3214_s4 = inlined_call_operand.vmem [shape: f32[2,4,384], index: 4, kind: input, shape index: {}]   ;;  %s3215_s5 = inlined_call_operand.vmem [shape: f32[2,4,384], index: 5, kind: output, shape index: {}]  }
   0x1   :  { %s2758_s20 = smov 0  }
   0x2 LB: > { %s27_s21 = sadd.s32 1, %s2714_s19  ;;  %p2236_p0 = scmp.ge.s32.totalorder %s2718_s20, 1  ;;  %s2718_s20 = sphi %s2758_s20, %s15_s20   ;;  %s2714_s19 = sphi %s2756_s19, %s3217_s19   ;;  %s2710_s18 = sphi %s2754_s18, %s3216_s18  }
   0x3   : > { %p29_p1 = scmp.ge.s32.totalorder %s27_s21, 2  ;;  %p233_p2 = scmp.lt.s32.totalorder %s2718_s20, 3 }
   0x5   : > { %s3219_s21 = smov (%p29_p1, %s27_s21), 0  ;;  %p234_p3 = pnand %p2236_p0, %p233_p2 }
   0x6   : > { %p283_p4 = scmp.lt.s32.totalorder (!%p234_p3), %s2710_s18, 1  ;;  %s2722_s30 = smov (!%p234_p3), 64  }
   0x7   : > { %237 = sbr.rel (%p234_p3) target bundleno = 4489 (0x1189), region = 40 }
   0xc   : > { %v2720_v0 = vmov 0.0   ;;  %vm2721_vm0 = vmmov 0   ;;  %s3221_s18 = smov (!%p283_p4, %s2710_s18), 1  ;;  %vm340_vm1 = vcmask 523264   ;;  %vm388_vm2 = vcmask 27648  }
   0xd   : > { %2402 = vmatprep.subr.bf16.mxu0 %v2720_v0  ;;  %2404 = vmatprep.mubr.msk.bf16.mxu0 %vm2721_vm0, %v2720_v0  ;;  %s2778_s22 = smul.u32 12, %s3221_s18  ;;  %vm405_vm3 = vcmask 1041408   ;;  %v2578_v19 = vld [vmem:[%s3212_s2 + $0x4c] ss:$12 sps:$4 sm:$0xff]   ;;  %v2579_v20 = vld [vmem:[%s3212_s2 + $0x50] ss:$12 sps:$4 sm:$0xff]  }
   0xe   : > { %2408 = vmatprep.subr.bf16.mxu1 %v2720_v0  ;;  %2410 = vmatprep.mubr.msk.bf16.mxu1 %vm2721_vm0, %v2720_v0  ;;  %s2546_s23 = smul.u32 6, %s3221_s18  ;;  %v2583_v21 = vld [vmem:[%s3212_s2 + $0x38] ss:$12 sps:$4 sm:$0xff]   ;;  %v2587_v22 = vld [vmem:[%s3212_s2 + $0x20] ss:$12 sps:$4 sm:$0xff]   ;;  %vm401_vm4 = vcmask 31744  }
   0xf   : > { %s2784_s26 = scalar_lea.vmem %s3211_s1, %s2778_s22  ;;  %v2576_v26 = vld [vmem:[%s3212_s2 + $0x48] ss:$12 sps:$4 sm:$0xff]   ;;  %v2580_v29 = vld [vmem:[%s3212_s2 + $0x30] ss:$12 sps:$4 sm:$0xff]   ;;  %v2584_v31 = vld [vmem:[%s3212_s2 + $0x18] ss:$12 sps:$4 sm:$0xff]   ;;  %s305_s27 = scalar_lea.vmem %s3214_s4, %s2778_s22 }
  0x10   : > { %v338_v1 = vld [vmem:[%s2784_s26] sm:$0x3]  ;;  %s2791_s29 = scalar_lea.vmem %s3210_s0, %s2546_s23  ;;  %v339_v15 = vld [vmem:[%s2784_s26 + $0x6] sm:$0x3]  ;;  %v2586_v30 = vld [vmem:[%s3212_s2 + $0x1c] ss:$12 sps:$4 sm:$0xff]   ;;  %s314_s9 = scalar_lea.vmem %s3215_s5, %s2778_s22 }
  0x11   : > { %v345_v2 = vsel %vm340_vm1, %v338_v1, 0  ;;  %v337_v3 = vld [vmem:[%s2791_s29] sm:$0x3]  ;;  %v407_v16 = vsel %vm405_vm3, %v339_v15, 0  ;;  %v2590_v32 = vld [vmem:[%s3212_s2 + $0x4] ss:$12 sps:$4 sm:$0xff]  }
  0x12   : > { %2403 = vmatpush3.bf16.xpose.msra.mxu0 %v345_v2  ;;  %2409 = vmatpush3.bf16.msra.mxu1 %v407_v16  ;;  %v2258_v17 = vld.sshfl [vmem:[%s2784_s26] sm:$0x3 pattern:$0x76325410]  ;;  %v2591_v34 = vld [vmem:[%s3212_s2 + $0x8] ss:$12 sps:$4 sm:$0xff]  }
  0x13   : > { %2414 = vmatprep.subr.bf16.mxu0 %v2720_v0  ;;  %641 = vrot.lane.b32.xlu1 %v2258_v17, %s2722_s30  ;;  %v2257_v18 = vld.sshfl [vmem:[%s2791_s29] sm:$0x3 pattern:$0x76325410]  ;;  %v2723_v35 = vmov 0  }
  0x14   : > { %541 = vmatprep.subr.bf16.mxu1 %v2578_v19  ;;  %v2582_v28 = vld [vmem:[%s3212_s2 + $0x34] ss:$12 sps:$4 sm:$0xff]   ;;  %v2260_v59 = vld.sshfl [vmem:[%s2784_s26 + $0x6] sm:$0x3 pattern:$0x76325410] }
  0x15   : > { %v2588_v33 = vld [vmem:[%s3212_s2] ss:$12 sps:$4 sm:$0xff]   ;;  %v2595_v15 = vld [vmem:[%s3212_s2 + $0xb0] ss:$12 sps:$4 sm:$0xff]   ;;  %v2599_v17 = vld [vmem:[%s3212_s2 + $0x98] ss:$12 sps:$4 sm:$0xff]  }
  0x16   : > { %v2607_v19 = vld [vmem:[%s3212_s2 + $0x68] ss:$12 sps:$4 sm:$0xff]  }
  0x17   : > { %631 = vrot.lane.b32.xlu1 %v2257_v18, %s2722_s30  ;;  %v2603_v18 = vld [vmem:[%s3212_s2 + $0x80] ss:$12 sps:$4 sm:$0xff]  }
  0x19   : > { %2405 = vmatmul.mubr.msk.bf16.vlgmr.msra.gmra.mxu0 %vm340_vm1, %v337_v3 }
  0x1a   : > { %2422 = vmatprep.mubr.msk.bf16.mxu0 %vm2721_vm0, %v2720_v0  ;;  %2415 = vmatpush3.bf16.msra.mxu0 %v2579_v20  ;;  %v930_v20 = vld [vmem:[%s2784_s26 + $0x2] sm:$0x3] }
  0x1b   : > { %2416 = vmatprep.subr.bf16.mxu0 %v2720_v0 }
  0x1e   : > { %2417 = vmatpush3.bf16.msra.mxu0 %v2583_v21 }
  0x1f   : > { %2418 = vmatprep.subr.bf16.mxu0 %v2720_v0 }
  0x22   : > { %2419 = vmatpush3.bf16.msra.mxu0 %v2587_v22 }
  0x23   : > { %2420 = vmatprep.subr.bf16.mxu0 %v2720_v0 }
  0x26   : > { %2421 = vmatpush3.bf16.msra.mxu0 %v2591_v34 }
  0x27   : > { %2432 = vmatprep.subr.bf16.mxu0 %v2720_v0 }
  0x85   : > { %v642_v36 = vpop.permute.xlu1 %641 }
  0x86   : > { %v647_v39 = vsel %vm340_vm1, %v642_v36, 0 }
  0x89   : > { %v632_v43 = vpop.permute.xlu1 %631 }
  0xd9   : > { %v381_v4 = vpop.f32.mrf.mxu0 }
  0xda   : > { %v387_v5 = vmul.f32 0.125, %v381_v4  ;;  %v2592_v4 = vld [vmem:[%s3212_s2 + $0xa8] ss:$12 sps:$4 sm:$0xff]  }
  0xdb   : > { %v2406_v6 = vpop.f32.mrf.mxu0 }
  0xdc   : > { %v389_v7 = vsel %vm388_vm2, %v387_v5, -inf  ;;  %v2598_v6 = vld [vmem:[%s3212_s2 + $0x94] ss:$12 sps:$4 sm:$0xff]  }
  0xdd   : > { %390 = vmax.xlane.f32.xlu0 %v389_v7  ;;  %v384_v8 = vpop.f32.mrf.mxu0  ;;  %v2596_v7 = vld [vmem:[%s3212_s2 + $0x90] ss:$12 sps:$4 sm:$0xff]  }
  0xde   : > { %v2602_v8 = vld [vmem:[%s3212_s2 + $0x7c] ss:$12 sps:$4 sm:$0xff]  }
  0xdf   : > { %v2407_v9 = vpop.f32.mrf.mxu0 }
  0xe0   : > { %v2600_v9 = vld [vmem:[%s3212_s2 + $0x78] ss:$12 sps:$4 sm:$0xff]  }
 0x166   : > { %v391_v10 = vpop.xlane.xlu0 %390 }
 0x167   : > { %v392_v11 = vsub.f32 %v387_v5, %v391_v10  ;;  %v2594_v5 = vld [vmem:[%s3212_s2 + $0xac] ss:$12 sps:$4 sm:$0xff]   ;;  %v2606_v10 = vld [vmem:[%s3212_s2 + $0x64] ss:$12 sps:$4 sm:$0xff]  }
 0x169   : > { %v393_v12 = vmul.f32 1.442695, %v392_v11  ;;  %v2604_v11 = vld [vmem:[%s3212_s2 + $0x60] ss:$12 sps:$4 sm:$0xff]  }
 0x16b   : > { %2672 = vpow2.f32 %v393_v12 }
 0x178   : > { %v2673_v13 = vpop.eup %2672 }
 0x179   : > { %v395_v14 = vsel %vm388_vm2, %v2673_v13, 0.0 }
 0x17a   : > { %396 = vadd.xlane.f32.xlu0 %v395_v14 }
 0x203   : > { %v397_v23 = vpop.xlane.xlu0 %396 }
 0x204   : > { %2674 = vrcp.f32 %v397_v23  ;;  %v936_v23 = vsel %vm340_vm1, %v930_v20, 0 }
 0x211   : > { %v2675_v24 = vpop.eup %2674 }
 0x212   : > { %v399_v25 = vmul.f32 %v2675_v24, %v2673_v13 }
 0x214   : > { %v400_v27 = vpack.c.bf16 %v399_v25, %v399_v25 }
 0x216   : > { %2411 = vmatmul.mubr.msk.bf16.vlgmr.msra.gmra.mxu1 %vm401_vm4, %v400_v27  ;;  %v929_v27 = vld [vmem:[%s2791_s29 + $0x2] sm:$0x3] }
 0x217   : > { %542 = vmatpush1.bf16.msra.mxu1 %v2576_v26  ;;  %565 = vmatprep.mubr.bf16.mxu1 %v2723_v35 }
 0x218   : > { %543 = vmatprep.subr.bf16.mxu1 %v2582_v28  ;;  %v320_v28 = vlaneseq }
 0x21b   : > { %544 = vmatpush1.bf16.msra.mxu1 %v2580_v29  ;;  %v321_v29 = vshrl.u32 %v320_v28, 7 }
 0x21c   : > { %545 = vmatprep.subr.bf16.mxu1 %v2586_v30 }
 0x21d   : > { %v330_v30 = vsub.s32 2, %v321_v29 }
 0x21f   : > { %546 = vmatpush1.bf16.msra.mxu1 %v2584_v31  ;;  %v322_v31 = vsub.s32 0, %v321_v29 }
 0x220   : > { %547 = vmatprep.subr.bf16.mxu1 %v2590_v32  ;;  %v326_v32 = vsub.s32 1, %v321_v29 }
 0x223   : > { %548 = vmatpush1.bf16.msra.mxu1 %v2588_v33  ;;  %v318_v33 = vld [vmem:[%s3213_s3] sm:$0x7] }
 0x224   : > { %2426 = vmatprep.subr.bf16.mxu1 %v2720_v0  ;;  %v331_v34 = vrot.slane %v318_v33, %v330_v30  ;;  %v323_v36 = vrot.slane %v318_v33, %v322_v31 }
 0x2d6   : > { %v443_v37 = vpop.f32.mrf.mxu1 }
 0x2d7   : > { %v449_v38 = vpack.c.bf16 %v443_v37, %v443_v37  ;;  %v327_v37 = vrot.slane %v318_v33, %v326_v32 }
 0x2d8   : > { %v2412_v40 = vpop.f32.mrf.mxu1 }
 0x2d9   : > { %2255 = vmatmul.mubr.msk.bf16.vlgmr.msra.gmra.mxu1 %vm340_vm1, %v449_v38  ;;  %2423 = vmatmul.mubr.msk.bf16.vlgmr.msra.gmra.mxu0 %vm340_vm1, %v449_v38  ;;  %v317_v38 = vld [vmem:[%s305_s27 + $0x8] sm:$0xf]  ;;  %v333_v40 = vcombine.low %v323_v36, %v327_v37 }
 0x2da   : > { %2427 = vmatpush3.bf16.xpose.msra.mxu1 %v647_v39  ;;  %v446_v41 = vpop.f32.mrf.mxu1  ;;  %2428 = vmatprep.mubr.msk.bf16.mxu1 %vm2721_vm0, %v2720_v0  ;;  %v336_v39 = vadd.f32 %v331_v34, %v317_v38 }
 0x2db   : > { %2434 = vmatprep.mubr.msk.bf16.mxu0 %vm2721_vm0, %v2720_v0  ;;  %850 = vmatprep.subr.bf16.mxu1 %v2594_v5  ;;  %v316_v41 = vld [vmem:[%s305_s27] sm:$0xff] }
 0x2dc   : > { %v2413_v42 = vpop.f32.mrf.mxu1 }
 0x2e1   : > { %2429 = vmatmul.mubr.msk.bf16.vlgmr.msra.gmra.mxu1 %vm340_vm1, %v632_v43  ;;  %v335_v43 = vadd.f32 %v333_v40, %v316_v41 }
 0x2e2   : > { %874 = vmatprep.mubr.bf16.mxu1 %v2723_v35  ;;  %851 = vmatpush1.bf16.msra.mxu1 %v2592_v4  ;;  %v931_v4 = vld [vmem:[%s2784_s26 + $0x8] sm:$0x3] }
 0x2e3   : > { %852 = vmatprep.subr.bf16.mxu1 %v2598_v6  ;;  %v995_v5 = vsel %vm405_vm3, %v931_v4, 0  ;;  %v2293_v6 = vld.sshfl [vmem:[%s2784_s26 + $0x2] sm:$0x3 pattern:$0x76325410] }
 0x2e6   : > { %853 = vmatpush1.bf16.msra.mxu1 %v2596_v7  ;;  %v2608_v7 = vld [vmem:[%s3212_s2 + $0x108] ss:$12 sps:$4 sm:$0xff]  }
 0x2e7   : > { %854 = vmatprep.subr.bf16.mxu1 %v2602_v8  ;;  %v2292_v8 = vld.sshfl [vmem:[%s2791_s29 + $0x2] sm:$0x3 pattern:$0x76325410] }
 0x2ea   : > { %855 = vmatpush1.bf16.msra.mxu1 %v2600_v9  ;;  %v2610_v9 = vld [vmem:[%s3212_s2 + $0x10c] ss:$12 sps:$4 sm:$0xff]  }
 0x2eb   : > { %856 = vmatprep.subr.bf16.mxu1 %v2606_v10  ;;  %v2614_v10 = vld [vmem:[%s3212_s2 + $0xf4] ss:$12 sps:$4 sm:$0xff]  }
 0x2ee   : > { %857 = vmatpush1.bf16.msra.mxu1 %v2604_v11  ;;  %v2612_v11 = vld [vmem:[%s3212_s2 + $0xf0] ss:$12 sps:$4 sm:$0xff]  }
 0x2ef   : > { %2450 = vmatprep.subr.bf16.mxu1 %v2720_v0 }
 0x399   : > { %v2858_v44 = vpop.f32.mrf.mxu1  ;;  %v2860_v45 = vpop.f32.mrf.mxu0 }
 0x39a   : > { %v619_v42 = vadd.f32 %v2860_v45, %v336_v39 }
 0x39b   : > { %v2862_v46 = vpop.f32.mrf.mxu1  ;;  %v2424_v47 = vpop.f32.mrf.mxu0 }
 0x39c   : > { %v616_v48 = vcombine.low %v2858_v44, %v2862_v46 }
 0x39d   : > { %v571_v49 = vpop.f32.mrf.mxu1  ;;  %v611_v50 = vpop.f32.mrf.mxu0 }
 0x39f   : > { %v572_v51 = vpop.f32.mrf.mxu1  ;;  %v2425_v52 = vpop.f32.mrf.mxu0 }
 0x3a1   : > { %v683_v53 = vpop.f32.mrf.mxu1 }
 0x3a2   : > { %v689_v54 = vmul.f32 0.125, %v683_v53  ;;  %v618_v53 = vadd.f32 %v616_v48, %v335_v43 }
 0x3a3   : > { %v2430_v55 = vpop.f32.mrf.mxu1 }
 0x3a4   : > { %v690_v56 = vsel %vm388_vm2, %v689_v54, -inf }
 0x3a5   : > { %691 = vmax.xlane.f32.xlu0 %v690_v56  ;;  %v686_v57 = vpop.f32.mrf.mxu1 }
 0x3a7   : > { %v2431_v58 = vpop.f32.mrf.mxu1 }
 0x3bb   : > { %710 = vrot.lane.b32.xlu0 %v2260_v59, %s2722_s30 }
 0x42e   : > { %v692_v60 = vpop.xlane.xlu0 %691 }
 0x42f   : > { %v693_v61 = vsub.f32 %v689_v54, %v692_v60 }
 0x431   : > { %v694_v62 = vmul.f32 1.442695, %v693_v61 }
 0x432   : > { %v711_v2 = vpop.permute.xlu0 %710 }
 0x433   : > { %2676 = vpow2.f32 %v694_v62  ;;  %v716_v3 = vsel %vm405_vm3, %v711_v2, 0 }
 0x434   : > { %2433 = vmatpush3.bf16.msra.mxu0 %v716_v3 }
 0x435   : > { %2438 = vmatprep.subr.bf16.mxu0 %v2720_v0 }
 0x440   : > { %v2677_v63 = vpop.eup %2676 }
 0x441   : > { %v696_v1 = vsel %vm388_vm2, %v2677_v63, 0.0 }
 0x442   : > { %697 = vadd.xlane.f32.xlu1 %v696_v1 }
 0x4cb   : > { %v698_v12 = vpop.xlane.xlu1 %697 }
 0x4cc   : > { %2678 = vrcp.f32 %v698_v12  ;;  %v2618_v12 = vld [vmem:[%s3212_s2 + $0xdc] ss:$12 sps:$4 sm:$0xff]  }
 0x4d9   : > { %v2679_v13 = vpop.eup %2678 }
 0x4da   : > { %v700_v14 = vmul.f32 %v2679_v13, %v2677_v63  ;;  %v2616_v13 = vld [vmem:[%s3212_s2 + $0xd8] ss:$12 sps:$4 sm:$0xff]  }
 0x4dc   : > { %v701_v16 = vpack.c.bf16 %v700_v14, %v700_v14  ;;  %v2622_v14 = vld [vmem:[%s3212_s2 + $0xc4] ss:$12 sps:$4 sm:$0xff]  }
 0x4de   : > { %2435 = vmatmul.mubr.msk.bf16.vlgmr.msra.gmra.mxu0 %vm401_vm4, %v701_v16 }
 0x4df   : > { %2439 = vmatpush3.bf16.msra.mxu0 %v2595_v15  ;;  %2446 = vmatprep.mubr.msk.bf16.mxu0 %vm2721_vm0, %v2720_v0  ;;  %v2620_v15 = vld [vmem:[%s3212_s2 + $0xc0] ss:$12 sps:$4 sm:$0xff]  }
 0x4e0   : > { %2440 = vmatprep.subr.bf16.mxu0 %v2720_v0 }
 0x4e3   : > { %2441 = vmatpush3.bf16.msra.mxu0 %v2599_v17 }
 0x4e4   : > { %2442 = vmatprep.subr.bf16.mxu0 %v2720_v0 }
 0x4e7   : > { %2443 = vmatpush3.bf16.msra.mxu0 %v2603_v18 }
 0x4e8   : > { %2444 = vmatprep.subr.bf16.mxu0 %v2720_v0 }
 0x4eb   : > { %2445 = vmatpush3.bf16.msra.mxu0 %v2607_v19  ;;  %v2611_v19 = vld [vmem:[%s3212_s2 + $0x110] ss:$12 sps:$4 sm:$0xff]  }
 0x4ec   : > { %2456 = vmatprep.subr.bf16.mxu0 %v2720_v0 }
 0x59e   : > { %v752_v21 = vpop.f32.mrf.mxu0 }
 0x59f   : > { %v758_v22 = vpack.c.bf16 %v752_v21, %v752_v21  ;;  %v2615_v21 = vld [vmem:[%s3212_s2 + $0xf8] ss:$12 sps:$4 sm:$0xff]  }
 0x5a0   : > { %v2436_v24 = vpop.f32.mrf.mxu0 }
 0x5a1   : > { %2274 = vmatmul.mubr.msk.bf16.vlgmr.msra.gmra.mxu1 %vm340_vm1, %v758_v22  ;;  %2447 = vmatmul.mubr.msk.bf16.vlgmr.msra.gmra.mxu0 %vm340_vm1, %v758_v22  ;;  %v2619_v22 = vld [vmem:[%s3212_s2 + $0xe0] ss:$12 sps:$4 sm:$0xff]  }
 0x5a2   : > { %2451 = vmatpush3.bf16.xpose.msra.mxu1 %v936_v23  ;;  %v755_v25 = vpop.f32.mrf.mxu0  ;;  %2452 = vmatprep.mubr.msk.bf16.mxu1 %vm2721_vm0, %v2720_v0  ;;  %v2623_v23 = vld [vmem:[%s3212_s2 + $0xc8] ss:$12 sps:$4 sm:$0xff]  }
 0x5a3   : > { %2458 = vmatprep.mubr.msk.bf16.mxu0 %vm2721_vm0, %v2720_v0  ;;  %2457 = vmatpush3.bf16.msra.mxu0 %v995_v5 }
 0x5a4   : > { %v2437_v26 = vpop.f32.mrf.mxu0  ;;  %2462 = vmatprep.subr.bf16.mxu0 %v2720_v0  ;;  %1129 = vmatprep.subr.bf16.mxu1 %v2610_v9  ;;  %v2635_v9 = vld [vmem:[%s3212_s2 + $0x140] ss:$12 sps:$4 sm:$0xff]  }
 0x5a9   : > { %2453 = vmatmul.mubr.msk.bf16.vlgmr.msra.gmra.mxu1 %vm340_vm1, %v929_v27 }
 0x5aa   : > { %1153 = vmatprep.mubr.bf16.mxu1 %v2723_v35  ;;  %1130 = vmatpush1.bf16.msra.mxu1 %v2608_v7 }
 0x5ab   : > { %1131 = vmatprep.subr.bf16.mxu1 %v2614_v10  ;;  %v2639_v10 = vld [vmem:[%s3212_s2 + $0x128] ss:$12 sps:$4 sm:$0xff]  }
 0x5ae   : > { %1132 = vmatpush1.bf16.msra.mxu1 %v2612_v11  ;;  %v1518_v11 = vld [vmem:[%s2784_s26 + $0x4] sm:$0x3] }
 0x5af   : > { %1133 = vmatprep.subr.bf16.mxu1 %v2618_v12 }
 0x5b2   : > { %1134 = vmatpush1.bf16.msra.mxu1 %v2616_v13 }
 0x5b3   : > { %1135 = vmatprep.subr.bf16.mxu1 %v2622_v14  ;;  %v1524_v14 = vsel %vm340_vm1, %v1518_v11, 0 }
 0x5b6   : > { %1136 = vmatpush1.bf16.msra.mxu1 %v2620_v15 }
 0x5b7   : > { %2474 = vmatprep.subr.bf16.mxu1 %v2720_v0 }
 0x661   : > { %v876_v47 = vpop.f32.mrf.mxu1  ;;  %v917_v49 = vpop.f32.mrf.mxu0 }
 0x662   : > { %v2935_v50 = vadd.f32 %v917_v49, %v619_v42 }
 0x663   : > { %v878_v51 = vpop.f32.mrf.mxu1  ;;  %v2448_v52 = vpop.f32.mrf.mxu0 }
 0x664   : > { %v925_v54 = vcombine.low %v876_v47, %v878_v51 }
 0x665   : > { %v880_v55 = vpop.f32.mrf.mxu1  ;;  %v920_v56 = vpop.f32.mrf.mxu0 }
 0x666   : > { %v2940_v57 = vadd.f32 %v925_v54, %v618_v53  ;;  %v2295_v54 = vld.sshfl [vmem:[%s2784_s26 + $0x8] sm:$0x3 pattern:$0x76325410] }
 0x667   : > { %v881_v58 = vpop.f32.mrf.mxu1  ;;  %v2449_v59 = vpop.f32.mrf.mxu0 }
 0x669   : > { %v972_v45 = vpop.f32.mrf.mxu1 }
 0x66a   : > { %v978_v60 = vmul.f32 0.125, %v972_v45 }
 0x66b   : > { %v2454_v61 = vpop.f32.mrf.mxu1 }
 0x66c   : > { %v979_v62 = vsel %vm388_vm2, %v978_v60, -inf  ;;  %v2624_v61 = vld [vmem:[%s3212_s2 + $0x168] ss:$12 sps:$4 sm:$0xff]  }
 0x66d   : > { %980 = vmax.xlane.f32.xlu0 %v979_v62  ;;  %v975_v63 = vpop.f32.mrf.mxu1  ;;  %v2626_v62 = vld [vmem:[%s3212_s2 + $0x16c] ss:$12 sps:$4 sm:$0xff]  }
 0x66e   : > { %v2630_v63 = vld [vmem:[%s3212_s2 + $0x154] ss:$12 sps:$4 sm:$0xff]  }
 0x66f   : > { %v2455_v1 = vpop.f32.mrf.mxu1 }
 0x670   : > { %v2628_v1 = vld [vmem:[%s3212_s2 + $0x150] ss:$12 sps:$4 sm:$0xff]  }
 0x683   : > { %1219 = vrot.lane.b32.xlu0 %v2292_v8, %s2722_s30  ;;  %v2631_v8 = vld [vmem:[%s3212_s2 + $0x158] ss:$12 sps:$4 sm:$0xff]  }
 0x6f6   : > { %v981_v44 = vpop.xlane.xlu0 %980 }
 0x6f7   : > { %v982_v46 = vsub.f32 %v978_v60, %v981_v44  ;;  %v2634_v44 = vld [vmem:[%s3212_s2 + $0x13c] ss:$12 sps:$4 sm:$0xff]  }
 0x6f9   : > { %v983_v48 = vmul.f32 1.442695, %v982_v46  ;;  %v2632_v46 = vld [vmem:[%s3212_s2 + $0x138] ss:$12 sps:$4 sm:$0xff]  }
 0x6fa   : > { %v1220_v31 = vpop.permute.xlu0 %1219 }
 0x6fb   : > { %2680 = vpow2.f32 %v983_v48  ;;  %v2638_v48 = vld [vmem:[%s3212_s2 + $0x124] ss:$12 sps:$4 sm:$0xff]  }
 0x708   : > { %v2681_v2 = vpop.eup %2680 }
 0x709   : > { %v985_v3 = vsel %vm388_vm2, %v2681_v2, 0.0 }
 0x70a   : > { %986 = vadd.xlane.f32.xlu1 %v985_v3 }
 0x71b   : > { %1229 = vrot.lane.b32.xlu1 %v2293_v6, %s2722_s30  ;;  %v2627_v6 = vld [vmem:[%s3212_s2 + $0x170] ss:$12 sps:$4 sm:$0xff]  }
 0x793   : > { %v987_v16 = vpop.xlane.xlu1 %986 }
 0x794   : > { %2682 = vrcp.f32 %v987_v16 }
 0x797   : > { %v1230_v24 = vpop.permute.xlu1 %1229 }
 0x798   : > { %v1235_v27 = vsel %vm340_vm1, %v1230_v24, 0 }
 0x7a1   : > { %v2683_v17 = vpop.eup %2682 }
 0x7a2   : > { %v989_v18 = vmul.f32 %v2683_v17, %v2681_v2  ;;  %v2636_v2 = vld [vmem:[%s3212_s2 + $0x120] ss:$12 sps:$4 sm:$0xff]  }
 0x7a4   : > { %v990_v20 = vpack.c.bf16 %v989_v18, %v989_v18  ;;  %v1517_v18 = vld [vmem:[%s2791_s29 + $0x4] sm:$0x3] }
 0x7a6   : > { %2459 = vmatmul.mubr.msk.bf16.vlgmr.msra.gmra.mxu0 %vm401_vm4, %v990_v20 }
 0x7a7   : > { %2463 = vmatpush3.bf16.msra.mxu0 %v2611_v19  ;;  %2470 = vmatprep.mubr.msk.bf16.mxu0 %vm2721_vm0, %v2720_v0 }
 0x7a8   : > { %2464 = vmatprep.subr.bf16.mxu0 %v2720_v0 }
 0x7ab   : > { %2465 = vmatpush3.bf16.msra.mxu0 %v2615_v21 }
 0x7ac   : > { %2466 = vmatprep.subr.bf16.mxu0 %v2720_v0 }
 0x7af   : > { %2467 = vmatpush3.bf16.msra.mxu0 %v2619_v22 }
 0x7b0   : > { %2468 = vmatprep.subr.bf16.mxu0 %v2720_v0 }
 0x7b3   : > { %2469 = vmatpush3.bf16.msra.mxu0 %v2623_v23 }
 0x7b4   : > { %2480 = vmatprep.subr.bf16.mxu0 %v2720_v0 }
 0x866   : > { %v1031_v25 = vpop.f32.mrf.mxu0 }
 0x867   : > { %v1037_v26 = vpack.c.bf16 %v1031_v25, %v1031_v25 }
 0x868   : > { %v2460_v28 = vpop.f32.mrf.mxu0 }
 0x869   : > { %2290 = vmatmul.mubr.msk.bf16.vlgmr.msra.gmra.mxu1 %vm340_vm1, %v1037_v26  ;;  %2471 = vmatmul.mubr.msk.bf16.vlgmr.msra.gmra.mxu0 %vm340_vm1, %v1037_v26 }
 0x86a   : > { %2475 = vmatpush3.bf16.xpose.msra.mxu1 %v1235_v27  ;;  %v1034_v29 = vpop.f32.mrf.mxu0  ;;  %2476 = vmatprep.mubr.msk.bf16.mxu1 %vm2721_vm0, %v2720_v0 }
 0x86b   : > { %2482 = vmatprep.mubr.msk.bf16.mxu0 %vm2721_vm0, %v2720_v0  ;;  %1438 = vmatprep.subr.bf16.mxu1 %v2626_v62  ;;  %v2647_v62 = vld [vmem:[%s3212_s2 + $0x1b8] ss:$12 sps:$4 sm:$0xff]  }
 0x86c   : > { %v2461_v30 = vpop.f32.mrf.mxu0 }
 0x871   : > { %2477 = vmatmul.mubr.msk.bf16.vlgmr.msra.gmra.mxu1 %vm340_vm1, %v1220_v31 }
 0x872   : > { %1462 = vmatprep.mubr.bf16.mxu1 %v2723_v35  ;;  %1439 = vmatpush1.bf16.msra.mxu1 %v2624_v61 }
 0x873   : > { %1440 = vmatprep.subr.bf16.mxu1 %v2630_v63  ;;  %v2651_v63 = vld [vmem:[%s3212_s2 + $0x1a0] ss:$12 sps:$4 sm:$0xff]  }
 0x876   : > { %1441 = vmatpush1.bf16.msra.mxu1 %v2628_v1  ;;  %v2655_v1 = vld [vmem:[%s3212_s2 + $0x188] ss:$12 sps:$4 sm:$0xff]  }
 0x877   : > { %1442 = vmatprep.subr.bf16.mxu1 %v2634_v44 }
 0x87a   : > { %1443 = vmatpush1.bf16.msra.mxu1 %v2632_v46 }
 0x87b   : > { %1444 = vmatprep.subr.bf16.mxu1 %v2638_v48 }
 0x87e   : > { %1445 = vmatpush1.bf16.msra.mxu1 %v2636_v2 }
 0x87f   : > { %2498 = vmatprep.subr.bf16.mxu1 %v2720_v0 }
 0x929   : > { %v1155_v32 = vpop.f32.mrf.mxu1  ;;  %v1196_v33 = vpop.f32.mrf.mxu0 }
 0x92a   : > { %v3005_v34 = vadd.f32 %v1196_v33, %v2935_v50 }
 0x92b   : > { %v1157_v36 = vpop.f32.mrf.mxu1  ;;  %v2472_v37 = vpop.f32.mrf.mxu0 }
 0x92c   : > { %v1204_v38 = vcombine.low %v1155_v32, %v1157_v36 }
 0x92d   : > { %v1159_v39 = vpop.f32.mrf.mxu1  ;;  %v1199_v40 = vpop.f32.mrf.mxu0 }
 0x92e   : > { %v3008_v41 = vadd.f32 %v1204_v38, %v2940_v57 }
 0x92f   : > { %v1160_v42 = vpop.f32.mrf.mxu1  ;;  %v2473_v43 = vpop.f32.mrf.mxu0 }
 0x930   : > { %v1519_v42 = vld [vmem:[%s2784_s26 + $0xa] sm:$0x3] }
 0x931   : > { %v1271_v47 = vpop.f32.mrf.mxu1  ;;  %v1583_v43 = vsel %vm405_vm3, %v1519_v42, 0 }
 0x932   : > { %v1277_v49 = vmul.f32 0.125, %v1271_v47  ;;  %v2328_v47 = vld.sshfl [vmem:[%s2784_s26 + $0x4] sm:$0x3 pattern:$0x76325410] }
 0x933   : > { %v2478_v51 = vpop.f32.mrf.mxu1 }
 0x934   : > { %v1278_v52 = vsel %vm388_vm2, %v1277_v49, -inf  ;;  %v2642_v51 = vld [vmem:[%s3212_s2 + $0x1cc] ss:$12 sps:$4 sm:$0xff]  }
 0x935   : > { %1279 = vmax.xlane.f32.xlu1 %v1278_v52  ;;  %v1274_v53 = vpop.f32.mrf.mxu1  ;;  %v2327_v52 = vld.sshfl [vmem:[%s2791_s29 + $0x4] sm:$0x3 pattern:$0x76325410] }
 0x936   : > { %v2646_v53 = vld [vmem:[%s3212_s2 + $0x1b4] ss:$12 sps:$4 sm:$0xff]  }
 0x937   : > { %v2479_v50 = vpop.f32.mrf.mxu1 }
 0x938   : > { %v2644_v50 = vld [vmem:[%s3212_s2 + $0x1b0] ss:$12 sps:$4 sm:$0xff]  }
 0x946   : > { %1298 = vrot.lane.b32.xlu1 %v2295_v54, %s2722_s30  ;;  %v2650_v54 = vld [vmem:[%s3212_s2 + $0x19c] ss:$12 sps:$4 sm:$0xff]  }
 0x9be   : > { %v1280_v55 = vpop.xlane.xlu1 %1279 }
 0x9bf   : > { %v1281_v56 = vsub.f32 %v1277_v49, %v1280_v55  ;;  %v2640_v49 = vld [vmem:[%s3212_s2 + $0x1c8] ss:$12 sps:$4 sm:$0xff]   ;;  %v2648_v55 = vld [vmem:[%s3212_s2 + $0x198] ss:$12 sps:$4 sm:$0xff]  }
 0x9c1   : > { %v1282_v58 = vmul.f32 1.442695, %v1281_v56  ;;  %v2654_v56 = vld [vmem:[%s3212_s2 + $0x184] ss:$12 sps:$4 sm:$0xff]  }
 0x9c2   : > { %v1299_v45 = vpop.permute.xlu1 %1298 }
 0x9c3   : > { %2684 = vpow2.f32 %v1282_v58  ;;  %v1304_v60 = vsel %vm405_vm3, %v1299_v45, 0  ;;  %v2652_v58 = vld [vmem:[%s3212_s2 + $0x180] ss:$12 sps:$4 sm:$0xff]  }
 0x9c4   : > { %2481 = vmatpush3.bf16.msra.mxu0 %v1304_v60  ;;  %v2643_v60 = vld [vmem:[%s3212_s2 + $0x1d0] ss:$12 sps:$4 sm:$0xff]  }
 0x9c5   : > { %2486 = vmatprep.subr.bf16.mxu0 %v2720_v0 }
 0x9d0   : > { %v2685_v59 = vpop.eup %2684 }
 0x9d1   : > { %v1284_v57 = vsel %vm388_vm2, %v2685_v59, 0.0 }
 0x9d2   : > { %1285 = vadd.xlane.f32.xlu0 %v1284_v57 }
 0xa5b   : > { %v1286_v3 = vpop.xlane.xlu0 %1285 }
 0xa5c   : > { %2686 = vrcp.f32 %v1286_v3 }
 0xa69   : > { %v2687_v4 = vpop.eup %2686 }
 0xa6a   : > { %v1288_v5 = vmul.f32 %v2687_v4, %v2685_v59 }
 0xa6c   : > { %v1289_v7 = vpack.c.bf16 %v1288_v5, %v1288_v5 }
 0xa6e   : > { %2483 = vmatmul.mubr.msk.bf16.vlgmr.msra.gmra.mxu0 %vm401_vm4, %v1289_v7 }
 0xa6f   : > { %2487 = vmatpush3.bf16.msra.mxu0 %v2627_v6  ;;  %2494 = vmatprep.mubr.msk.bf16.mxu0 %vm2721_vm0, %v2720_v0 }
 0xa70   : > { %2488 = vmatprep.subr.bf16.mxu0 %v2720_v0 }
 0xa73   : > { %2489 = vmatpush3.bf16.msra.mxu0 %v2631_v8 }
 0xa74   : > { %2490 = vmatprep.subr.bf16.mxu0 %v2720_v0 }
 0xa77   : > { %2491 = vmatpush3.bf16.msra.mxu0 %v2635_v9 }
 0xa78   : > { %2492 = vmatprep.subr.bf16.mxu0 %v2720_v0 }
 0xa7b   : > { %2493 = vmatpush3.bf16.msra.mxu0 %v2639_v10 }
 0xa7c   : > { %2504 = vmatprep.subr.bf16.mxu0 %v2720_v0 }
 0xb2e   : > { %v1340_v12 = vpop.f32.mrf.mxu0 }
 0xb2f   : > { %v1346_v13 = vpack.c.bf16 %v1340_v12, %v1340_v12 }
 0xb30   : > { %v2484_v15 = vpop.f32.mrf.mxu0 }
 0xb31   : > { %2309 = vmatmul.mubr.msk.bf16.vlgmr.msra.gmra.mxu1 %vm340_vm1, %v1346_v13  ;;  %2495 = vmatmul.mubr.msk.bf16.vlgmr.msra.gmra.mxu0 %vm340_vm1, %v1346_v13 }
 0xb32   : > { %2499 = vmatpush3.bf16.xpose.msra.mxu1 %v1524_v14  ;;  %v1343_v16 = vpop.f32.mrf.mxu0  ;;  %2500 = vmatprep.mubr.msk.bf16.mxu1 %vm2721_vm0, %v2720_v0 }
 0xb33   : > { %2506 = vmatprep.mubr.msk.bf16.mxu0 %vm2721_vm0, %v2720_v0  ;;  %2505 = vmatpush3.bf16.msra.mxu0 %v1583_v43  ;;  %v2659_v43 = vld [vmem:[%s3212_s2 + $0x230] ss:$12 sps:$4 sm:$0xff]  }
 0xb34   : > { %v2485_v17 = vpop.f32.mrf.mxu0  ;;  %2510 = vmatprep.subr.bf16.mxu0 %v2720_v0  ;;  %1717 = vmatprep.subr.bf16.mxu1 %v2642_v51  ;;  %v2667_v51 = vld [vmem:[%s3212_s2 + $0x200] ss:$12 sps:$4 sm:$0xff]  }
 0xb39   : > { %2501 = vmatmul.mubr.msk.bf16.vlgmr.msra.gmra.mxu1 %vm340_vm1, %v1517_v18 }
 0xb3a   : > { %1741 = vmatprep.mubr.bf16.mxu1 %v2723_v35  ;;  %1718 = vmatpush1.bf16.msra.mxu1 %v2640_v49  ;;  %v2663_v49 = vld [vmem:[%s3212_s2 + $0x218] ss:$12 sps:$4 sm:$0xff]  }
 0xb3b   : > { %1719 = vmatprep.subr.bf16.mxu1 %v2646_v53 }
 0xb3e   : > { %1720 = vmatpush1.bf16.msra.mxu1 %v2644_v50 }
 0xb3f   : > { %1721 = vmatprep.subr.bf16.mxu1 %v2650_v54 }
 0xb42   : > { %1722 = vmatpush1.bf16.msra.mxu1 %v2648_v55 }
 0xb43   : > { %1723 = vmatprep.subr.bf16.mxu1 %v2654_v56 }
 0xb46   : > { %1724 = vmatpush1.bf16.msra.mxu1 %v2652_v58 }
 0xb47   : > { %2522 = vmatprep.subr.bf16.mxu1 %v2720_v0 }
 0xbf1   : > { %v1464_v19 = vpop.f32.mrf.mxu1  ;;  %v1505_v20 = vpop.f32.mrf.mxu0 }
 0xbf2   : > { %v3072_v21 = vadd.f32 %v1505_v20, %v3005_v34 }
 0xbf3   : > { %v1466_v22 = vpop.f32.mrf.mxu1  ;;  %v2496_v23 = vpop.f32.mrf.mxu0 }
 0xbf4   : > { %v1513_v24 = vcombine.low %v1464_v19, %v1466_v22 }
 0xbf5   : > { %v1468_v25 = vpop.f32.mrf.mxu1  ;;  %v1508_v26 = vpop.f32.mrf.mxu0 }
 0xbf6   : > { %v3075_v27 = vadd.f32 %v1513_v24, %v3008_v41 }
 0xbf7   : > { %v1469_v28 = vpop.f32.mrf.mxu1  ;;  %v2497_v29 = vpop.f32.mrf.mxu0 }
 0xbf8   : > { %v2656_v29 = vld [vmem:[%s3212_s2 + $0x228] ss:$12 sps:$4 sm:$0xff]  }
 0xbf9   : > { %v1560_v30 = vpop.f32.mrf.mxu1 }
 0xbfa   : > { %v1566_v31 = vmul.f32 0.125, %v1560_v30  ;;  %v2658_v30 = vld [vmem:[%s3212_s2 + $0x22c] ss:$12 sps:$4 sm:$0xff]  }
 0xbfb   : > { %v2502_v32 = vpop.f32.mrf.mxu1 }
 0xbfc   : > { %v1567_v33 = vsel %vm388_vm2, %v1566_v31, -inf  ;;  %v2660_v32 = vld [vmem:[%s3212_s2 + $0x210] ss:$12 sps:$4 sm:$0xff]  }
 0xbfd   : > { %1568 = vmax.xlane.f32.xlu0 %v1567_v33  ;;  %v1563_v34 = vpop.f32.mrf.mxu1  ;;  %v2666_v33 = vld [vmem:[%s3212_s2 + $0x1fc] ss:$12 sps:$4 sm:$0xff]  }
 0xbfe   : > { %v2664_v34 = vld [vmem:[%s3212_s2 + $0x1f8] ss:$12 sps:$4 sm:$0xff]  }
 0xbff   : > { %v2503_v36 = vpop.f32.mrf.mxu1 }
 0xc00   : > { %v2670_v36 = vld [vmem:[%s3212_s2 + $0x1e4] ss:$12 sps:$4 sm:$0xff]  }
 0xc13   : > { %1817 = vrot.lane.b32.xlu0 %v2328_v47, %s2722_s30 }
 0xc17   : > { %1807 = vrot.lane.b32.xlu0 %v2327_v52, %s2722_s30  ;;  %v2671_v52 = vld [vmem:[%s3212_s2 + $0x1e8] ss:$12 sps:$4 sm:$0xff]  }
 0xc86   : > { %v1569_v37 = vpop.xlane.xlu0 %1568 }
 0xc87   : > { %v1570_v38 = vsub.f32 %v1566_v31, %v1569_v37  ;;  %v2662_v31 = vld [vmem:[%s3212_s2 + $0x214] ss:$12 sps:$4 sm:$0xff]  }
 0xc88   : > { %v2668_v37 = vld [vmem:[%s3212_s2 + $0x1e0] ss:$12 sps:$4 sm:$0xff]  }
 0xc89   : > { %v1571_v39 = vmul.f32 1.442695, %v1570_v38 }
 0xc8a   : > { %v1818_v44 = vpop.permute.xlu0 %1817 }
 0xc8b   : > { %2688 = vpow2.f32 %v1571_v39  ;;  %v1823_v2 = vsel %vm340_vm1, %v1818_v44, 0 }
 0xc8e   : > { %v1808_v6 = vpop.permute.xlu0 %1807 }
 0xc98   : > { %v2689_v40 = vpop.eup %2688 }
 0xc99   : > { %v1573_v41 = vsel %vm388_vm2, %v2689_v40, 0.0 }
 0xc9a   : > { %1574 = vadd.xlane.f32.xlu1 %v1573_v41 }
 0xd23   : > { %v1575_v59 = vpop.xlane.xlu1 %1574 }
 0xd24   : > { %2690 = vrcp.f32 %v1575_v59 }
 0xd31   : > { %v2691_v57 = vpop.eup %2690 }
 0xd32   : > { %v1577_v45 = vmul.f32 %v2691_v57, %v2689_v40 }
 0xd34   : > { %v1578_v61 = vpack.c.bf16 %v1577_v45, %v1577_v45 }
 0xd36   : > { %2507 = vmatmul.mubr.msk.bf16.vlgmr.msra.gmra.mxu0 %vm401_vm4, %v1578_v61 }
 0xd37   : > { %2511 = vmatpush3.bf16.msra.mxu0 %v2643_v60  ;;  %2518 = vmatprep.mubr.msk.bf16.mxu0 %vm2721_vm0, %v2720_v0 }
 0xd38   : > { %2512 = vmatprep.subr.bf16.mxu0 %v2720_v0 }
 0xd3b   : > { %2513 = vmatpush3.bf16.msra.mxu0 %v2647_v62 }
 0xd3c   : > { %2514 = vmatprep.subr.bf16.mxu0 %v2720_v0 }
 0xd3f   : > { %2515 = vmatpush3.bf16.msra.mxu0 %v2651_v63 }
 0xd40   : > { %2516 = vmatprep.subr.bf16.mxu0 %v2720_v0 }
 0xd43   : > { %2517 = vmatpush3.bf16.msra.mxu0 %v2655_v1 }
 0xd44   : > { %2528 = vmatprep.subr.bf16.mxu0 %v2720_v0 }
 0xdf6   : > { %v1619_v46 = vpop.f32.mrf.mxu0 }
 0xdf7   : > { %v1625_v48 = vpack.c.bf16 %v1619_v46, %v1619_v46 }
 0xdf8   : > { %v2508_v3 = vpop.f32.mrf.mxu0 }
 0xdf9   : > { %2325 = vmatmul.mubr.msk.bf16.vlgmr.msra.gmra.mxu1 %vm340_vm1, %v1625_v48  ;;  %2519 = vmatmul.mubr.msk.bf16.vlgmr.msra.gmra.mxu0 %vm340_vm1, %v1625_v48 }
 0xdfa   : > { %2523 = vmatpush3.bf16.xpose.msra.mxu1 %v1823_v2  ;;  %v1622_v4 = vpop.f32.mrf.mxu0  ;;  %2524 = vmatprep.mubr.msk.bf16.mxu1 %vm2721_vm0, %v2720_v0 }
 0xdfb   : > { %2530 = vmatprep.mubr.msk.bf16.mxu0 %vm2721_vm0, %v2720_v0  ;;  %2026 = vmatprep.subr.bf16.mxu1 %v2658_v30 }
 0xdfc   : > { %v2509_v5 = vpop.f32.mrf.mxu0 }
 0xe01   : > { %2525 = vmatmul.mubr.msk.bf16.vlgmr.msra.gmra.mxu1 %vm340_vm1, %v1808_v6 }
 0xe02   : > { %2050 = vmatprep.mubr.bf16.mxu1 %v2723_v35  ;;  %2027 = vmatpush1.bf16.msra.mxu1 %v2656_v29 }
 0xe03   : > { %2028 = vmatprep.subr.bf16.mxu1 %v2662_v31 }
 0xe06   : > { %2029 = vmatpush1.bf16.msra.mxu1 %v2660_v32 }
 0xe07   : > { %2030 = vmatprep.subr.bf16.mxu1 %v2666_v33 }
 0xe0a   : > { %2031 = vmatpush1.bf16.msra.mxu1 %v2664_v34 }
 0xe0b   : > { %2032 = vmatprep.subr.bf16.mxu1 %v2670_v36 }
 0xe0e   : > { %2033 = vmatpush1.bf16.msra.mxu1 %v2668_v37 }
 0xeb9   : > { %v1743_v7 = vpop.f32.mrf.mxu1  ;;  %v1784_v8 = vpop.f32.mrf.mxu0 }
 0xeba   : > { %v3140_v9 = vadd.f32 %v1784_v8, %v3072_v21 }
 0xebb   : > { %v1745_v10 = vpop.f32.mrf.mxu1  ;;  %v2520_v11 = vpop.f32.mrf.mxu0 }
 0xebc   : > { %v1792_v12 = vcombine.low %v1743_v7, %v1745_v10 }
 0xebd   : > { %v1747_v13 = vpop.f32.mrf.mxu1  ;;  %v1787_v14 = vpop.f32.mrf.mxu0 }
 0xebe   : > { %v3143_v15 = vadd.f32 %v1792_v12, %v3075_v27  ;;  %v2330_v27 = vld.sshfl [vmem:[%s2784_s26 + $0xa] sm:$0x3 pattern:$0x76325410] }
 0xebf   : > { %v1748_v16 = vpop.f32.mrf.mxu1  ;;  %v2521_v17 = vpop.f32.mrf.mxu0 }
 0xec1   : > { %v1859_v18 = vpop.f32.mrf.mxu1 }
 0xec2   : > { %v1865_v19 = vmul.f32 0.125, %v1859_v18 }
 0xec3   : > { %v2526_v20 = vpop.f32.mrf.mxu1 }
 0xec4   : > { %v1866_v35 = vsel %vm388_vm2, %v1865_v19, -inf }
 0xec5   : > { %1867 = vmax.xlane.f32.xlu0 %v1866_v35  ;;  %v1862_v22 = vpop.f32.mrf.mxu1 }
 0xec7   : > { %v2527_v21 = vpop.f32.mrf.mxu1 }
 0xf4e   : > { %v1868_v23 = vpop.xlane.xlu0 %1867 }
 0xf4f   : > { %v1869_v24 = vsub.f32 %v1865_v19, %v1868_v23 }
 0xf51   : > { %v1870_v25 = vmul.f32 1.442695, %v1869_v24 }
 0xf53   : > { %2692 = vpow2.f32 %v1870_v25 }
 0xf60   : > { %v2693_v26 = vpop.eup %2692 }
 0xf61   : > { %v1872_v28 = vsel %vm388_vm2, %v2693_v26, 0.0 }
 0xf62   : > { %1873 = vadd.xlane.f32.xlu1 %v1872_v28 }
 0xf73   : > { %1886 = vrot.lane.b32.xlu1 %v2330_v27, %s2722_s30 }
 0xfeb   : > { %v1874_v38 = vpop.xlane.xlu1 %1873 }
 0xfec   : > { %2694 = vrcp.f32 %v1874_v38 }
 0xfef   : > { %v1887_v39 = vpop.permute.xlu1 %1886 }
 0xff0   : > { %v1892_v40 = vsel %vm405_vm3, %v1887_v39, 0 }
 0xff1   : > { %2529 = vmatpush3.bf16.msra.mxu0 %v1892_v40 }
 0xff2   : > { %2534 = vmatprep.subr.bf16.mxu0 %v2720_v0 }
 0xff9   : > { %v2695_v41 = vpop.eup %2694 }
 0xffa   : > { %v1876_v42 = vmul.f32 %v2695_v41, %v2693_v26 }
 0xffc   : > { %v1877_v47 = vpack.c.bf16 %v1876_v42, %v1876_v42 }
 0xffe   : > { %2531 = vmatmul.mubr.msk.bf16.vlgmr.msra.gmra.mxu0 %vm401_vm4, %v1877_v47 }
 0xfff   : > { %2535 = vmatpush3.bf16.msra.mxu0 %v2659_v43  ;;  %2542 = vmatprep.mubr.msk.bf16.mxu0 %vm2721_vm0, %v2720_v0 }
0x1000   : > { %2536 = vmatprep.subr.bf16.mxu0 %v2720_v0 }
0x1003   : > { %2537 = vmatpush3.bf16.msra.mxu0 %v2663_v49 }
0x1004   : > { %2538 = vmatprep.subr.bf16.mxu0 %v2720_v0 }
0x1007   : > { %2539 = vmatpush3.bf16.msra.mxu0 %v2667_v51 }
0x1008   : > { %2540 = vmatprep.subr.bf16.mxu0 %v2720_v0 }
0x100b   : > { %2541 = vmatpush3.bf16.msra.mxu0 %v2671_v52 }
0x10be   : > { %v1928_v53 = vpop.f32.mrf.mxu0 }
0x10bf   : > { %v1934_v50 = vpack.c.bf16 %v1928_v53, %v1928_v53 }
0x10c0   : > { %v2532_v54 = vpop.f32.mrf.mxu0 }
0x10c1   : > { %2344 = vmatmul.mubr.msk.bf16.vlgmr.msra.gmra.mxu1 %vm340_vm1, %v1934_v50  ;;  %2543 = vmatmul.mubr.msk.bf16.vlgmr.msra.gmra.mxu0 %vm340_vm1, %v1934_v50 }
0x10c2   : > { %v1931_v55 = vpop.f32.mrf.mxu0 }
0x10c4   : > { %v2533_v56 = vpop.f32.mrf.mxu0 }
0x1181   : > { %v2052_v58 = vpop.f32.mrf.mxu1  ;;  %v2093_v0 = vpop.f32.mrf.mxu0 }
0x1182   : > { %v2104_v59 = vadd.f32 %v2093_v0, %v3140_v9 }
0x1183   : > { %v2054_v57 = vpop.f32.mrf.mxu1  ;;  %v2544_v45 = vpop.f32.mrf.mxu0 }
0x1184   : > { %2106 = vst [vmem:[%s314_s9 + $0x8] sm:$0xf] %v2104_v59  ;;  %v2101_v60 = vcombine.low %v2052_v58, %v2054_v57 }
0x1185   : > { %v2056_v61 = vpop.f32.mrf.mxu1  ;;  %v2096_v62 = vpop.f32.mrf.mxu0 }
0x1186   : > { %v2103_v63 = vadd.f32 %v2101_v60, %v3143_v15 }
0x1187   : > { %v2057_v1 = vpop.f32.mrf.mxu1  ;;  %v2545_v44 = vpop.f32.mrf.mxu0 }
0x1188   : > { %2105 = vst [vmem:[%s314_s9] sm:$0xff] %v2103_v63 }
0x1189 PF: > { %s15_s20 = sadd.s32 1, %s2718_s20   ;;  %s3216_s18 = smov %s2714_s19 }
0x118a   : > { %p12_p5 = scmp.ge.s32.totalorder %s15_s20, 4   ;;  %s3217_s19 = smov %s3219_s21 }
0x118c   :  { %14 = sbr.rel (!%p12_p5) target bundleno = 2 (0x2), region = 76 }

// kernel: sam_encoder_forward.15
= control target key start
LH: loop header
LB: loop body
LE: loop exit
PB: predicated region body
PF: predicated region fallthrough
CT: control target
= control target key end

     0   :  { %v525_v1 = vmov 0.0   ;;  %vm526_vm0 = vmmov 0   ;;  %vm26_vm1 = vcmask 1043456   ;;  %s653_s0 = inlined_call_operand.vmem [shape: f32[2,4,384], index: 0, kind: input, shape index: {}]   ;;  %s654_s1 = inlined_call_operand.vmem [shape: bf16[384,128], index: 1, kind: input, shape index: {}]   ;;  %s655_s2 = inlined_call_operand.vmem [shape: f32[1,128], index: 2, kind: input, shape index: {}]   ;;  %s656_s3 = inlined_call_operand.hbm [shape: f32[2,128], index: 3, kind: output, shape index: {}]  }
   0x1   :  { %v477_v0 = vld [vmem:[%s654_s1 + $0x78] sm:$0xff]   ;;  %454 = vmatprep.subr.bf16.mxu1 %v525_v1  ;;  %470 = vmatprep.mubr.msk.bf16.mxu1 %vm526_vm0, %v525_v1  ;;  %v480_v4 = vld [vmem:[%s654_s1 + $0x70] sm:$0xff]   ;;  %v483_v7 = vld [vmem:[%s654_s1 + $0x68] sm:$0xff]  }
   0x2   :  { %v478_v2 = vld [vmem:[%s654_s1 + $0xb8] sm:$0xff]   ;;  %423 = vmatprep.subr.bf16.mxu0 %v477_v0  ;;  %v481_v5 = vld [vmem:[%s654_s1 + $0xb0] sm:$0xff]   ;;  %v484_v8 = vld [vmem:[%s654_s1 + $0xa8] sm:$0xff]  }
   0x3   :  { %v479_v3 = vld [vmem:[%s654_s1 + $0x38] sm:$0xff]   ;;  %455 = vmatpush3.bf16.msra.mxu1 %v478_v2  ;;  %v482_v6 = vld [vmem:[%s654_s1 + $0x30] sm:$0xff]   ;;  %v485_v9 = vld [vmem:[%s654_s1 + $0x28] sm:$0xff]  }
   0x4   :  { %424 = vmatpush3.bf16.msra.mxu0 %v479_v3  ;;  %456 = vmatprep.subr.bf16.mxu1 %v525_v1  ;;  %v486_v10 = vld [vmem:[%s654_s1 + $0x60] sm:$0xff]   ;;  %v489_v13 = vld [vmem:[%s654_s1 + $0x58] sm:$0xff]   ;;  %v492_v16 = vld [vmem:[%s654_s1 + $0x50] sm:$0xff]  }
   0x5   :  { %425 = vmatprep.subr.bf16.mxu0 %v480_v4  ;;  %v487_v11 = vld [vmem:[%s654_s1 + $0xa0] sm:$0xff]   ;;  %v490_v14 = vld [vmem:[%s654_s1 + $0x98] sm:$0xff]   ;;  %v493_v17 = vld [vmem:[%s654_s1 + $0x90] sm:$0xff]  }
   0x6   :  { %v488_v12 = vld [vmem:[%s654_s1 + $0x20] sm:$0xff]   ;;  %v491_v15 = vld [vmem:[%s654_s1 + $0x18] sm:$0xff]   ;;  %v494_v18 = vld [vmem:[%s654_s1 + $0x10] sm:$0xff]  }
   0x7   :  { %457 = vmatpush3.bf16.msra.mxu1 %v481_v5  ;;  %v495_v19 = vld [vmem:[%s654_s1 + $0x48] sm:$0xff]   ;;  %v498_v22 = vld [vmem:[%s654_s1 + $0x40] sm:$0xff]   ;;  %v19_v28 = vld [vmem:[%s653_s0 + $0x14] sm:$0xf] }
   0x8   :  { %426 = vmatpush3.bf16.msra.mxu0 %v482_v6  ;;  %458 = vmatprep.subr.bf16.mxu1 %v525_v1  ;;  %v496_v20 = vld [vmem:[%s654_s1 + $0x88] sm:$0xff]   ;;  %v16_v23 = vld [vmem:[%s653_s0] sm:$0xff] }
   0x9   :  { %427 = vmatprep.subr.bf16.mxu0 %v483_v7  ;;  %v497_v21 = vld [vmem:[%s654_s1 + $0x8] sm:$0xff]   ;;  %v22_v26 = vcombine.high %v16_v23, %v16_v23  ;;  %v27_v30 = vsel %vm26_vm1, %v16_v23, 0.0 }
   0xa   :  { %v18_v24 = vld [vmem:[%s653_s0 + $0xc] sm:$0xff]  ;;  %v17_v25 = vld [vmem:[%s653_s0 + $0x8] sm:$0xf] }
   0xb   :  { %459 = vmatpush3.bf16.msra.mxu1 %v484_v8  ;;  %v23_v27 = vcombine.high %v18_v24, %v18_v24  ;;  %v41_v29 = vsel %vm26_vm1, %v17_v25, 0.0 }
   0xc   :  { %428 = vmatpush3.bf16.msra.mxu0 %v485_v9  ;;  %460 = vmatprep.subr.bf16.mxu1 %v525_v1 }
   0xd   :  { %429 = vmatprep.subr.bf16.mxu0 %v486_v10 }
   0xf   :  { %461 = vmatpush3.bf16.msra.mxu1 %v487_v11 }
  0x10   :  { %430 = vmatpush3.bf16.msra.mxu0 %v488_v12  ;;  %462 = vmatprep.subr.bf16.mxu1 %v525_v1 }
  0x11   :  { %431 = vmatprep.subr.bf16.mxu0 %v489_v13 }
  0x13   :  { %463 = vmatpush3.bf16.msra.mxu1 %v490_v14 }
  0x14   :  { %432 = vmatpush3.bf16.msra.mxu0 %v491_v15  ;;  %464 = vmatprep.subr.bf16.mxu1 %v525_v1 }
  0x15   :  { %433 = vmatprep.subr.bf16.mxu0 %v492_v16 }
  0x17   :  { %465 = vmatpush3.bf16.msra.mxu1 %v493_v17 }
  0x18   :  { %434 = vmatpush3.bf16.msra.mxu0 %v494_v18  ;;  %466 = vmatprep.subr.bf16.mxu1 %v525_v1 }
  0x19   :  { %435 = vmatprep.subr.bf16.mxu0 %v495_v19 }
  0x1a   :  { %8 = vsyncpa [#allocation3], 0  ;;  %v42_v31 = vrot.slane %v41_v29, 4  ;;  %v62_v32 = vsel %vm26_vm1, %v19_v28, 0.0  ;;  %v28_v33 = vrot.slane %v27_v30, 4  ;;  %v48_v34 = vsel %vm26_vm1, %v18_v24, 0.0 }
  0x1b   :  { %467 = vmatpush3.bf16.msra.mxu1 %v496_v20  ;;  %v499_v35 = vld [vmem:[%s654_s1 + $0x80] sm:$0xff]   ;;  %v34_v36 = vsel %vm26_vm1, %v22_v26, 0.0  ;;  %v55_v37 = vsel %vm26_vm1, %v23_v27, 0.0  ;;  %v63_v38 = vrot.slane %v62_v32, 4  ;;  %v49_v39 = vrot.slane %v48_v34, 4  ;;  %s527_s14 = smov [#allocation2]  }
  0x1c   :  { %436 = vmatpush3.bf16.msra.mxu0 %v497_v21  ;;  %468 = vmatprep.subr.bf16.mxu1 %v525_v1  ;;  %v500_v40 = vld [vmem:[%s654_s1] sm:$0xff]   ;;  %v35_v41 = vrot.slane %v34_v36, 4  ;;  %v56_v42 = vrot.slane %v55_v37, 4  ;;  %v43_v43 = vadd.f32 %v42_v31, %v41_v29  ;;  %v29_v44 = vadd.f32 %v28_v33, %v27_v30  ;;  %s390_s15 = sshll.u32 %s527_s14, 4  ;;  %s391_s15 = int_to_ptr.vmem [resolvable:$true] %s390_s15 }
  0x1d   :  { %437 = vmatprep.subr.bf16.mxu0 %v498_v22  ;;  %v64_v45 = vadd.f32 %v63_v38, %v62_v32  ;;  %v50_v46 = vadd.f32 %v49_v39, %v48_v34  ;;  %vm149_vm2 = vcmask 1041409   ;;  %s503_s16 = scalar_lea.vmem %s391_s15, 32  ;;  %p508_p1 = scmp.lt.s32.totalorder %s391_s15, %s391_s15 }
  0x1e   :  { %v36_v47 = vadd.f32 %v35_v41, %v34_v36  ;;  %v57_v48 = vadd.f32 %v56_v42, %v55_v37  ;;  %v44_v49 = vrot.slane %v43_v43, 2  ;;  %v30_v50 = vrot.slane %v29_v44, 2  ;;  %v398_v36 = vld [vmem:[%s655_s2] ss:$0 sm:$0xff]  ;;  %p504_p0 = scmp.ne.s32.totalorder %s391_s15, %s503_s16  ;;  %p509_p2 = scmp.lt.s32.totalorder %s503_s16, %s503_s16 }
  0x1f   :  { %469 = vmatpush3.bf16.msra.mxu1 %v499_v35  ;;  %v65_v51 = vrot.slane %v64_v45, 2  ;;  %v51_v52 = vrot.slane %v50_v46, 2 }
  0x20   :  { %438 = vmatpush3.bf16.msra.mxu0 %v500_v40  ;;  %v37_v53 = vrot.slane %v36_v47, 2  ;;  %v58_v54 = vrot.slane %v57_v48, 2  ;;  %v45_v55 = vadd.f32 %v44_v49, %v43_v43  ;;  %v31_v56 = vadd.f32 %v30_v50, %v29_v44  ;;  %p510_p3 = por %p509_p2, %p508_p1 }
  0x21   :  { %v66_v57 = vadd.f32 %v65_v51, %v64_v45  ;;  %v52_v58 = vadd.f32 %v51_v52, %v50_v46 }
  0x22   :  { %v38_v59 = vadd.f32 %v37_v53, %v36_v47  ;;  %v59_v60 = vadd.f32 %v58_v54, %v57_v48  ;;  %v46_v61 = vrot.slane %v45_v55, 1  ;;  %v32_v62 = vrot.slane %v31_v56, 1  ;;  %p511_p4 = pnand %p510_p3, %p504_p0 }
  0x23   :  { %v67_v63 = vrot.slane %v66_v57, 1  ;;  %v53_v0 = vrot.slane %v52_v58, 1 }
  0x24   :  { %v39_v1 = vrot.slane %v38_v59, 1  ;;  %v60_v2 = vrot.slane %v59_v60, 1  ;;  %v47_v3 = vadd.f32 %v46_v61, %v45_v55  ;;  %v33_v4 = vadd.f32 %v32_v62, %v31_v56 }
  0x25   :  { %v68_v5 = vadd.f32 %v67_v63, %v66_v57  ;;  %v54_v6 = vadd.f32 %v53_v0, %v52_v58 }
  0x26   :  { %v40_v7 = vadd.f32 %v39_v1, %v38_v59  ;;  %v61_v8 = vadd.f32 %v60_v2, %v59_v60  ;;  %v72_v9 = vmul.f32 0.25, %v47_v3  ;;  %v70_v10 = vmul.f32 0.25, %v33_v4 }
  0x27   :  { %v75_v11 = vmul.f32 0.25, %v68_v5  ;;  %v73_v12 = vmul.f32 0.25, %v54_v6 }
  0x28   :  { %v71_v13 = vmul.f32 0.25, %v40_v7  ;;  %v74_v14 = vmul.f32 0.25, %v61_v8  ;;  %v78_v15 = vpack.c.bf16 %v72_v9, %v72_v9  ;;  %v76_v16 = vpack.c.bf16 %v70_v10, %v70_v10 }
  0x29   :  { %v81_v17 = vpack.c.bf16 %v75_v11, %v75_v11  ;;  %v79_v18 = vpack.c.bf16 %v73_v12, %v73_v12 }
  0x2a   :  { %v77_v19 = vpack.c.bf16 %v71_v13, %v71_v13  ;;  %v80_v20 = vpack.c.bf16 %v74_v14, %v74_v14  ;;  %v145_v21 = vunpack.c.l.b16 %v78_v15  ;;  %v143_v22 = vunpack.c.l.b16 %v76_v16 }
  0x2b   :  { %v148_v23 = vunpack.c.l.b16 %v81_v17  ;;  %v146_v24 = vunpack.c.l.b16 %v79_v18 }
  0x2c   :  { %v144_v25 = vunpack.c.l.b16 %v77_v19  ;;  %v147_v26 = vunpack.c.l.b16 %v80_v20 }
  0x2d   :  { %v152_v27 = vsel %vm149_vm2, %v148_v23, %v145_v21  ;;  %v150_v28 = vsel %vm149_vm2, %v146_v24, %v143_v22 }
  0x2e   :  { %v151_v29 = vsel %vm149_vm2, %v147_v26, %v144_v25  ;;  %v155_v30 = vpack.c.b16 %v152_v27, %v152_v27  ;;  %v153_v31 = vpack.c.b16 %v150_v28, %v150_v28 }
  0x2f   :  { %v154_v32 = vpack.c.b16 %v151_v29, %v151_v29 }
  0x30   :  { %471 = vmatmul.mubr.bf16.vlgmr.msra.gmra.mxu1 %v155_v30 }
  0x31   :  { %335 = vmatprep.mubr.bf16.mxu0 %v154_v32 }
  0x32   :  { %336 = vmatmul.mubr.bf16.vlgmr.msra.gmra.mxu0 %v153_v31 }
  0xf0   :  { %v377_v33 = vpop.f32.mrf.mxu1 }
  0xf2   :  { %v439_v34 = vpop.f32.mrf.mxu0  ;;  %v472_v35 = vpop.f32.mrf.mxu1 }
  0xf4   :  { %v440_v37 = vpop.f32.mrf.mxu0  ;;  %v380_v38 = vpop.f32.mrf.mxu1 }
  0xf5   :  { %v441_v39 = vadd.f32 %v440_v37, %v439_v34 }
  0xf6   :  { %v442_v40 = vpop.f32.mrf.mxu0  ;;  %v473_v41 = vpop.f32.mrf.mxu1 }
  0xf7   :  { %v338_v42 = vadd.f32 %v441_v39, %v398_v36 }
  0xf8   :  { %v443_v43 = vpop.f32.mrf.mxu0 }
  0xf9   :  { %v378_v44 = vadd.f32 %v377_v33, %v338_v42 }
  0xfb   :  { %383 = vst [vmem:[#allocation2] sm:$0x3] %v378_v44 }
  0xfc   :  { %514 = shalt.err (!%p511_p4)
}
  0xfd   :  { %393 = dma.vmem_to_hbm [thread:$0]  %s391_s15, 32, %s656_s3, [#allocation3]  }
  0xfe   :  { %523 = dma.done.wait [#allocation3], 32  }
  0xff   :  { %524 = vsyncadd [#allocation3], 4294967264 }
 0x100   :  { %397 = vsyncpa [#allocation3], 1 }

// kernel: sam_encoder_forward.11
= control target key start
LH: loop header
LB: loop body
LE: loop exit
PB: predicated region body
PF: predicated region fallthrough
CT: control target
= control target key end

     0   :  { %v6487_v57 = vmov 0   ;;  %s8548_s0 = inlined_call_operand.vmem [shape: f32[8,384], index: 0, kind: input, shape index: {}]   ;;  %s8549_s3 = inlined_call_operand.vmem [shape: bf16[384,1536], index: 3, kind: input, shape index: {}]   ;;  %s8550_s1 = inlined_call_operand.vmem [shape: f32[1,384], index: 1, kind: input, shape index: {}]   ;;  %s8551_s2 = inlined_call_operand.vmem [shape: f32[1,384], index: 2, kind: input, shape index: {}]   ;;  %s8552_s5 = inlined_call_operand.vmem [shape: bf16[1536,384], index: 5, kind: input, shape index: {}]   ;;  %s8553_s4 = inlined_call_operand.vmem [shape: f32[1,1536], index: 4, kind: input, shape index: {}]   ;;  %s8554_s6 = inlined_call_operand.vmem [shape: f32[1,384], index: 6, kind: input, shape index: {}]   ;;  %s8555_s7 = inlined_call_operand.vmem [shape: f32[8,384], index: 7, kind: output, shape index: {}]  }
   0x1   :  { %v27_v0 = vld [vmem:[%s8548_s0] sm:$0xff]  ;;  %v28_v1 = vld [vmem:[%s8548_s0 + $0x8] sm:$0xff]  ;;  %v29_v2 = vld [vmem:[%s8548_s0 + $0x10] sm:$0xff]  ;;  %1960 = vmatprep.mubr.bf16.mxu1 %v6487_v57 }
   0x2   :  { %v30_v3 = vadd.f32 %v28_v1, %v27_v0  ;;  %v5641_v5 = vld [vmem:[%s8549_s3 + $0x2a4] ss:$48 sps:$4 sm:$0xff]   ;;  %v5643_v6 = vld [vmem:[%s8549_s3 + $0x2a0] ss:$48 sps:$4 sm:$0xff]  }
   0x3   :  { %1887 = vmatprep.subr.bf16.mxu0 %v5641_v5  ;;  %v5644_v7 = vld [vmem:[%s8549_s3 + $0x244] ss:$48 sps:$4 sm:$0xff]   ;;  %v5646_v8 = vld [vmem:[%s8549_s3 + $0x240] ss:$48 sps:$4 sm:$0xff]   ;;  %v54_v5 = vlaneseq }
   0x4   :  { %v31_v4 = vadd.f32 %v30_v3, %v29_v2  ;;  %1888 = vmatpush1.bf16.msra.mxu0 %v5643_v6  ;;  %v5647_v9 = vld [vmem:[%s8549_s3 + $0x1e4] ss:$48 sps:$4 sm:$0xff]   ;;  %v5649_v10 = vld [vmem:[%s8549_s3 + $0x1e0] ss:$48 sps:$4 sm:$0xff]  }
   0x5   :  { %1889 = vmatprep.subr.bf16.mxu0 %v5644_v7  ;;  %v5650_v11 = vld [vmem:[%s8549_s3 + $0x184] ss:$48 sps:$4 sm:$0xff]   ;;  %v5652_v12 = vld [vmem:[%s8549_s3 + $0x180] ss:$48 sps:$4 sm:$0xff]   ;;  %v6700_v6 = vshrl.u32 %v54_v5, 7 }
   0x6   :  { %32 = vadd.xlane.f32.xlu0 %v31_v4  ;;  %v5665_v13 = vld [vmem:[%s8549_s3 + $0x8a4] ss:$48 sps:$4 sm:$0xff]   ;;  %v5669_v15 = vld [vmem:[%s8549_s3 + $0x8a0] ss:$48 sps:$4 sm:$0xff]  }
   0x7   :  { %v5653_v14 = vld [vmem:[%s8549_s3 + $0x124] ss:$48 sps:$4 sm:$0xff]   ;;  %1928 = vmatprep.subr.bf16.mxu1 %v5665_v13  ;;  %v5655_v17 = vld [vmem:[%s8549_s3 + $0x120] ss:$48 sps:$4 sm:$0xff]   ;;  %v6703_v7 = vsub.s32 1, %v6700_v6 }
   0x8   :  { %1890 = vmatpush1.bf16.msra.mxu0 %v5646_v8  ;;  %1929 = vmatpush1.bf16.msra.mxu1 %v5669_v15  ;;  %v5671_v16 = vld [vmem:[%s8549_s3 + $0x844] ss:$48 sps:$4 sm:$0xff]   ;;  %v5675_v19 = vld [vmem:[%s8549_s3 + $0x840] ss:$48 sps:$4 sm:$0xff]   ;;  %v6706_v8 = vsub.s32 2, %v6700_v6 }
   0x9   :  { %1891 = vmatprep.subr.bf16.mxu0 %v5647_v9  ;;  %v5656_v18 = vld [vmem:[%s8549_s3 + $0xc4] ss:$48 sps:$4 sm:$0xff]   ;;  %1930 = vmatprep.subr.bf16.mxu1 %v5671_v16  ;;  %v5658_v20 = vld [vmem:[%s8549_s3 + $0xc0] ss:$48 sps:$4 sm:$0xff]   ;;  %v6709_v9 = vsub.s32 0, %v6700_v6 }
   0xa   :  { %v5659_v21 = vld [vmem:[%s8549_s3 + $0x64] ss:$48 sps:$4 sm:$0xff]   ;;  %v5661_v22 = vld [vmem:[%s8549_s3 + $0x60] ss:$48 sps:$4 sm:$0xff]  }
   0xb   :  { %v5662_v23 = vld [vmem:[%s8549_s3 + $0x4] ss:$48 sps:$4 sm:$0xff]   ;;  %v5664_v24 = vld [vmem:[%s8549_s3] ss:$48 sps:$4 sm:$0xff]  }
   0xc   :  { %1892 = vmatpush1.bf16.msra.mxu0 %v5649_v10  ;;  %1931 = vmatpush1.bf16.msra.mxu1 %v5675_v19  ;;  %v5667_v25 = vld [vmem:[%s8549_s3 + $0x5a4] ss:$48 sps:$4 sm:$0xff]   ;;  %v5670_v26 = vld [vmem:[%s8549_s3 + $0x5a0] ss:$48 sps:$4 sm:$0xff]  }
   0xd   :  { %1893 = vmatprep.subr.bf16.mxu0 %v5650_v11  ;;  %v5673_v27 = vld [vmem:[%s8549_s3 + $0x544] ss:$48 sps:$4 sm:$0xff]   ;;  %v5676_v28 = vld [vmem:[%s8549_s3 + $0x540] ss:$48 sps:$4 sm:$0xff]  }
   0xe   :  { %v5677_v39 = vld [vmem:[%s8549_s3 + $0x7e4] ss:$48 sps:$4 sm:$0xff]   ;;  %v5681_v41 = vld [vmem:[%s8549_s3 + $0x7e0] ss:$48 sps:$4 sm:$0xff]  }
   0xf   :  { %v5679_v40 = vld [vmem:[%s8549_s3 + $0x4e4] ss:$48 sps:$4 sm:$0xff]   ;;  %1932 = vmatprep.subr.bf16.mxu1 %v5677_v39  ;;  %v5682_v42 = vld [vmem:[%s8549_s3 + $0x4e0] ss:$48 sps:$4 sm:$0xff]   ;;  %v5725_v39 = vld [vmem:[%s8549_s3 + $0x1e8] ss:$48 sps:$4 sm:$0xff]  }
  0x10   :  { %1894 = vmatpush1.bf16.msra.mxu0 %v5652_v12  ;;  %1933 = vmatpush1.bf16.msra.mxu1 %v5681_v41  ;;  %v5683_v43 = vld [vmem:[%s8549_s3 + $0x784] ss:$48 sps:$4 sm:$0xff]   ;;  %v5687_v45 = vld [vmem:[%s8549_s3 + $0x780] ss:$48 sps:$4 sm:$0xff]   ;;  %v5733_v41 = vld [vmem:[%s8549_s3 + $0x18c] ss:$48 sps:$4 sm:$0xff]  }
  0x11   :  { %1895 = vmatprep.subr.bf16.mxu0 %v5653_v14  ;;  %v5685_v44 = vld [vmem:[%s8549_s3 + $0x484] ss:$48 sps:$4 sm:$0xff]   ;;  %v5688_v46 = vld [vmem:[%s8549_s3 + $0x480] ss:$48 sps:$4 sm:$0xff]   ;;  %1934 = vmatprep.subr.bf16.mxu1 %v5683_v43  ;;  %v5731_v43 = vld [vmem:[%s8549_s3 + $0x188] ss:$48 sps:$4 sm:$0xff]  }
  0x12   :  { %v5689_v47 = vld [vmem:[%s8549_s3 + $0x724] ss:$48 sps:$4 sm:$0xff]   ;;  %v5693_v49 = vld [vmem:[%s8549_s3 + $0x720] ss:$48 sps:$4 sm:$0xff]  }
  0x13   :  { %v5691_v48 = vld [vmem:[%s8549_s3 + $0x424] ss:$48 sps:$4 sm:$0xff]   ;;  %v5694_v50 = vld [vmem:[%s8549_s3 + $0x420] ss:$48 sps:$4 sm:$0xff]  }
  0x14   :  { %1896 = vmatpush1.bf16.msra.mxu0 %v5655_v17  ;;  %1935 = vmatpush1.bf16.msra.mxu1 %v5687_v45  ;;  %v5695_v51 = vld [vmem:[%s8549_s3 + $0x6c4] ss:$48 sps:$4 sm:$0xff]   ;;  %v5699_v53 = vld [vmem:[%s8549_s3 + $0x6c0] ss:$48 sps:$4 sm:$0xff]   ;;  %v5739_v45 = vld [vmem:[%s8549_s3 + $0x12c] ss:$48 sps:$4 sm:$0xff]  }
  0x15   :  { %1897 = vmatprep.subr.bf16.mxu0 %v5656_v18  ;;  %1936 = vmatprep.subr.bf16.mxu1 %v5689_v47  ;;  %v5697_v52 = vld [vmem:[%s8549_s3 + $0x3c4] ss:$48 sps:$4 sm:$0xff]   ;;  %v5700_v54 = vld [vmem:[%s8549_s3 + $0x3c0] ss:$48 sps:$4 sm:$0xff]   ;;  %v5737_v47 = vld [vmem:[%s8549_s3 + $0x128] ss:$48 sps:$4 sm:$0xff]  }
  0x16   :  { %v5701_v55 = vld [vmem:[%s8549_s3 + $0x664] ss:$48 sps:$4 sm:$0xff]   ;;  %v5705_v58 = vld [vmem:[%s8549_s3 + $0x660] ss:$48 sps:$4 sm:$0xff]  }
  0x17   :  { %v5703_v56 = vld [vmem:[%s8549_s3 + $0x364] ss:$48 sps:$4 sm:$0xff]   ;;  %v5706_v59 = vld [vmem:[%s8549_s3 + $0x360] ss:$48 sps:$4 sm:$0xff]  }
  0x18   :  { %1898 = vmatpush1.bf16.msra.mxu0 %v5658_v20  ;;  %1937 = vmatpush1.bf16.msra.mxu1 %v5693_v49  ;;  %v5707_v60 = vld [vmem:[%s8549_s3 + $0x604] ss:$48 sps:$4 sm:$0xff]   ;;  %v5711_v62 = vld [vmem:[%s8549_s3 + $0x600] ss:$48 sps:$4 sm:$0xff]   ;;  %v5745_v49 = vld [vmem:[%s8549_s3 + $0xcc] ss:$48 sps:$4 sm:$0xff]  }
  0x19   :  { %1899 = vmatprep.subr.bf16.mxu0 %v5659_v21  ;;  %1938 = vmatprep.subr.bf16.mxu1 %v5695_v51  ;;  %v5709_v61 = vld [vmem:[%s8549_s3 + $0x304] ss:$48 sps:$4 sm:$0xff]   ;;  %v5712_v63 = vld [vmem:[%s8549_s3 + $0x300] ss:$48 sps:$4 sm:$0xff]   ;;  %v5743_v51 = vld [vmem:[%s8549_s3 + $0xc8] ss:$48 sps:$4 sm:$0xff]  }
  0x1a   :  { %v52_v10 = vld [vmem:[%s8550_s1] sm:$0x7] }
  0x1b   :  { %v72_v11 = vld [vmem:[%s8551_s2] sm:$0x7]  ;;  %v61_v12 = vrot.slane %v52_v10, %v6703_v7  ;;  %v65_v13 = vrot.slane %v52_v10, %v6706_v8  ;;  %v57_v14 = vrot.slane %v52_v10, %v6709_v9  ;;  %v5775_v10 = vld [vmem:[%s8549_s3 + $0x4ec] ss:$48 sps:$4 sm:$0xff]  }
  0x1c   :  { %1900 = vmatpush1.bf16.msra.mxu0 %v5661_v22  ;;  %1939 = vmatpush1.bf16.msra.mxu1 %v5699_v53  ;;  %v81_v16 = vrot.slane %v72_v11, %v6703_v7  ;;  %v85_v17 = vrot.slane %v72_v11, %v6706_v8  ;;  %v77_v21 = vrot.slane %v72_v11, %v6709_v9  ;;  %v5751_v53 = vld [vmem:[%s8549_s3 + $0x6c] ss:$48 sps:$4 sm:$0xff]   ;;  %v5770_v5 = vld [vmem:[%s8549_s3 + $0x250] ss:$48 sps:$4 sm:$0xff]   ;;  %v5778_v11 = vld [vmem:[%s8549_s3 + $0x1f4] ss:$48 sps:$4 sm:$0xff]  }
  0x1d   :  { %1901 = vmatprep.subr.bf16.mxu0 %v5662_v23  ;;  %1940 = vmatprep.subr.bf16.mxu1 %v5701_v55  ;;  %v5749_v55 = vld [vmem:[%s8549_s3 + $0x68] ss:$48 sps:$4 sm:$0xff]  }
  0x20   :  { %1902 = vmatpush1.bf16.msra.mxu0 %v5664_v24  ;;  %1941 = vmatpush1.bf16.msra.mxu1 %v5705_v58  ;;  %v5757_v58 = vld [vmem:[%s8549_s3 + $0xc] ss:$48 sps:$4 sm:$0xff]  }
  0x21   :  { %1903 = vmatprep.subr.bf16.mxu0 %v5667_v25  ;;  %1942 = vmatprep.subr.bf16.mxu1 %v5707_v60  ;;  %v5755_v60 = vld [vmem:[%s8549_s3 + $0x8] ss:$48 sps:$4 sm:$0xff]  }
  0x24   :  { %1904 = vmatpush2.bf16.msra.mxu0 %v5670_v26  ;;  %1943 = vmatpush1.bf16.msra.mxu1 %v5711_v62  ;;  %v5763_v62 = vld [vmem:[%s8549_s3 + $0x5ac] ss:$48 sps:$4 sm:$0xff]  }
  0x25   :  { %1905 = vmatprep.subr.bf16.mxu0 %v5673_v27 }
  0x28   :  { %1906 = vmatpush2.bf16.msra.mxu0 %v5676_v28  ;;  %v5713_v28 = vld [vmem:[%s8549_s3 + $0x2a8] ss:$48 sps:$4 sm:$0xff]  }
  0x29   :  { %1907 = vmatprep.subr.bf16.mxu0 %v5679_v40  ;;  %v5728_v40 = vld [vmem:[%s8549_s3 + $0x7e8] ss:$48 sps:$4 sm:$0xff]  }
  0x2c   :  { %1908 = vmatpush2.bf16.msra.mxu0 %v5682_v42  ;;  %v5736_v42 = vld [vmem:[%s8549_s3 + $0x78c] ss:$48 sps:$4 sm:$0xff]  }
  0x2d   :  { %1909 = vmatprep.subr.bf16.mxu0 %v5685_v44  ;;  %v5734_v44 = vld [vmem:[%s8549_s3 + $0x788] ss:$48 sps:$4 sm:$0xff]  }
  0x30   :  { %1910 = vmatpush2.bf16.msra.mxu0 %v5688_v46  ;;  %v5742_v46 = vld [vmem:[%s8549_s3 + $0x72c] ss:$48 sps:$4 sm:$0xff]  }
  0x31   :  { %1911 = vmatprep.subr.bf16.mxu0 %v5691_v48  ;;  %v5740_v48 = vld [vmem:[%s8549_s3 + $0x728] ss:$48 sps:$4 sm:$0xff]  }
  0x34   :  { %1912 = vmatpush2.bf16.msra.mxu0 %v5694_v50  ;;  %v5748_v50 = vld [vmem:[%s8549_s3 + $0x6cc] ss:$48 sps:$4 sm:$0xff]  }
  0x35   :  { %1913 = vmatprep.subr.bf16.mxu0 %v5697_v52  ;;  %v5746_v52 = vld [vmem:[%s8549_s3 + $0x6c8] ss:$48 sps:$4 sm:$0xff]  }
  0x38   :  { %1914 = vmatpush2.bf16.msra.mxu0 %v5700_v54  ;;  %v5754_v54 = vld [vmem:[%s8549_s3 + $0x66c] ss:$48 sps:$4 sm:$0xff]  }
  0x39   :  { %1915 = vmatprep.subr.bf16.mxu0 %v5703_v56  ;;  %v5752_v56 = vld [vmem:[%s8549_s3 + $0x668] ss:$48 sps:$4 sm:$0xff]  }
  0x3c   :  { %1916 = vmatpush2.bf16.msra.mxu0 %v5706_v59  ;;  %v5760_v59 = vld [vmem:[%s8549_s3 + $0x60c] ss:$48 sps:$4 sm:$0xff]  }
  0x3d   :  { %1917 = vmatprep.subr.bf16.mxu0 %v5709_v61  ;;  %v5758_v61 = vld [vmem:[%s8549_s3 + $0x608] ss:$48 sps:$4 sm:$0xff]  }
  0x40   :  { %1918 = vmatpush2.bf16.msra.mxu0 %v5712_v63  ;;  %v5766_v63 = vld [vmem:[%s8549_s3 + $0x2b4] ss:$48 sps:$4 sm:$0xff]  }
  0x8f   :  { %v33_v29 = vpop.xlane.xlu0 %32 }
  0x90   :  { %v35_v30 = vmul.f32 0.0026041667, %v33_v29 }
  0x92   :  { %v6609_v31 = vsub.f32 %v27_v0, %v35_v30  ;;  %v6611_v32 = vsub.f32 %v28_v1, %v35_v30  ;;  %v6613_v33 = vsub.f32 %v29_v2, %v35_v30  ;;  %v5715_v0 = vld [vmem:[%s8549_s3 + $0x2ac] ss:$48 sps:$4 sm:$0xff]  }
  0x93   :  { %1969 = vmatprep.subr.bf16.mxu1 %v5715_v0  ;;  %v5718_v1 = vld [vmem:[%s8549_s3 + $0x8ac] ss:$48 sps:$4 sm:$0xff]   ;;  %v5761_v0 = vld [vmem:[%s8549_s3 + $0x5a8] ss:$48 sps:$4 sm:$0xff]  }
  0x94   :  { %v39_v34 = vmul.f32 %v6609_v31, %v6609_v31  ;;  %v40_v35 = vmul.f32 %v6611_v32, %v6611_v32  ;;  %v41_v36 = vmul.f32 %v6613_v33, %v6613_v33  ;;  %2010 = vmatprep.subr.bf16.mxu0 %v5718_v1  ;;  %v5764_v1 = vld [vmem:[%s8549_s3 + $0x2b0] ss:$48 sps:$4 sm:$0xff]  }
  0x96   :  { %v42_v37 = vadd.f32 %v40_v35, %v39_v34  ;;  %v5724_v34 = vld [vmem:[%s8549_s3 + $0x84c] ss:$48 sps:$4 sm:$0xff]   ;;  %v5719_v35 = vld [vmem:[%s8549_s3 + $0x248] ss:$48 sps:$4 sm:$0xff]  }
  0x98   :  { %v43_v38 = vadd.f32 %v42_v37, %v41_v36  ;;  %v5722_v36 = vld [vmem:[%s8549_s3 + $0x848] ss:$48 sps:$4 sm:$0xff]   ;;  %v5727_v37 = vld [vmem:[%s8549_s3 + $0x1ec] ss:$48 sps:$4 sm:$0xff]  }
  0x9a   :  { %44 = vadd.xlane.f32.xlu0 %v43_v38  ;;  %v5730_v38 = vld [vmem:[%s8549_s3 + $0x7ec] ss:$48 sps:$4 sm:$0xff]  }
 0x123   :  { %v45_v2 = vpop.xlane.xlu0 %44 }
 0x124   :  { %v46_v3 = vmul.f32 0.0026041667, %v45_v2  ;;  %v5769_v2 = vld [vmem:[%s8549_s3 + $0x54c] ss:$48 sps:$4 sm:$0xff]  }
 0x126   :  { %v47_v4 = vadd.f32 1e-05, %v46_v3  ;;  %v5772_v3 = vld [vmem:[%s8549_s3 + $0x254] ss:$48 sps:$4 sm:$0xff]  }
 0x128   :  { %6457 = vrsqrt.f32 %v47_v4  ;;  %v5767_v4 = vld [vmem:[%s8549_s3 + $0x548] ss:$48 sps:$4 sm:$0xff]  }
 0x135   :  { %v6458_v15 = vpop.eup %6457 }
 0x136   :  { %v50_v18 = vmul.f32 %v6458_v15, %v6611_v32  ;;  %v51_v19 = vmul.f32 %v6458_v15, %v6613_v33  ;;  %v49_v20 = vmul.f32 %v6458_v15, %v6609_v31  ;;  %v5716_v31 = vld [vmem:[%s8549_s3 + $0x8a8] ss:$48 sps:$4 sm:$0xff]   ;;  %v5721_v33 = vld [vmem:[%s8549_s3 + $0x24c] ss:$48 sps:$4 sm:$0xff]   ;;  %v5784_v15 = vld [vmem:[%s8549_s3 + $0x194] ss:$48 sps:$4 sm:$0xff]  }
 0x138   :  { %v70_v22 = vmul.f32 %v61_v12, %v50_v18  ;;  %v71_v23 = vmul.f32 %v65_v13, %v51_v19  ;;  %v69_v24 = vmul.f32 %v57_v14, %v49_v20  ;;  %v5773_v12 = vld [vmem:[%s8549_s3 + $0x4e8] ss:$48 sps:$4 sm:$0xff]   ;;  %v5776_v13 = vld [vmem:[%s8549_s3 + $0x1f0] ss:$48 sps:$4 sm:$0xff]   ;;  %v5781_v14 = vld [vmem:[%s8549_s3 + $0x48c] ss:$48 sps:$4 sm:$0xff]  }
 0x139   :  { %v5787_v18 = vld [vmem:[%s8549_s3 + $0x42c] ss:$48 sps:$4 sm:$0xff]   ;;  %v5790_v19 = vld [vmem:[%s8549_s3 + $0x134] ss:$48 sps:$4 sm:$0xff]   ;;  %v5785_v20 = vld [vmem:[%s8549_s3 + $0x428] ss:$48 sps:$4 sm:$0xff]  }
 0x13a   :  { %v90_v25 = vadd.f32 %v81_v16, %v70_v22  ;;  %v91_v26 = vadd.f32 %v85_v17, %v71_v23  ;;  %v89_v27 = vadd.f32 %v77_v21, %v69_v24  ;;  %v5779_v16 = vld [vmem:[%s8549_s3 + $0x488] ss:$48 sps:$4 sm:$0xff]   ;;  %v5782_v17 = vld [vmem:[%s8549_s3 + $0x190] ss:$48 sps:$4 sm:$0xff]   ;;  %v5793_v22 = vld [vmem:[%s8549_s3 + $0x3cc] ss:$48 sps:$4 sm:$0xff]  }
 0x13b   :  { %v5788_v21 = vld [vmem:[%s8549_s3 + $0x130] ss:$48 sps:$4 sm:$0xff]   ;;  %v5796_v23 = vld [vmem:[%s8549_s3 + $0xd4] ss:$48 sps:$4 sm:$0xff]   ;;  %v5791_v24 = vld [vmem:[%s8549_s3 + $0x3c8] ss:$48 sps:$4 sm:$0xff]  }
 0x13c   :  { %v6729_v29 = vpack.c.bf16 %v90_v25, %v90_v25  ;;  %v6731_v30 = vpack.c.bf16 %v91_v26, %v91_v26  ;;  %v6736_v32 = vpack.c.bf16 %v89_v27, %v89_v27  ;;  %v5794_v25 = vld [vmem:[%s8549_s3 + $0xd0] ss:$48 sps:$4 sm:$0xff]   ;;  %v5799_v26 = vld [vmem:[%s8549_s3 + $0x36c] ss:$48 sps:$4 sm:$0xff]   ;;  %v5802_v27 = vld [vmem:[%s8549_s3 + $0x74] ss:$48 sps:$4 sm:$0xff]  }
 0x13e   :  { %1919 = vmatprep.mubr.bf16.mxu0 %v6729_v29  ;;  %1961 = vmatmul.mubr.bf16.vlgmr.msra.gmra.mxu1 %v6731_v30 }
 0x13f   :  { %1970 = vmatpush1.bf16.msra.mxu1 %v5713_v28  ;;  %1920 = vmatmul.mubr.bf16.vlgmr.msra.gmra.mxu0 %v6736_v32  ;;  %v5797_v28 = vld [vmem:[%s8549_s3 + $0x368] ss:$48 sps:$4 sm:$0xff]  }
 0x140   :  { %2001 = vmatprep.mubr.bf16.mxu1 %v6729_v29  ;;  %2011 = vmatpush1.bf16.msra.mxu0 %v5716_v31  ;;  %v5800_v31 = vld [vmem:[%s8549_s3 + $0x70] ss:$48 sps:$4 sm:$0xff]  }
 0x141   :  { %1971 = vmatprep.subr.bf16.mxu1 %v5721_v33  ;;  %2012 = vmatprep.subr.bf16.mxu0 %v5724_v34  ;;  %v5805_v33 = vld [vmem:[%s8549_s3 + $0x30c] ss:$48 sps:$4 sm:$0xff]   ;;  %v5808_v34 = vld [vmem:[%s8549_s3 + $0x14] ss:$48 sps:$4 sm:$0xff]  }
 0x142   :  { %2042 = vmatprep.mubr.bf16.mxu0 %v6487_v57 }
 0x143   :  { %1972 = vmatpush1.bf16.msra.mxu1 %v5719_v35  ;;  %v5803_v35 = vld [vmem:[%s8549_s3 + $0x308] ss:$48 sps:$4 sm:$0xff]  }
 0x144   :  { %2013 = vmatpush1.bf16.msra.mxu0 %v5722_v36  ;;  %1973 = vmatprep.subr.bf16.mxu1 %v5727_v37  ;;  %v5806_v36 = vld [vmem:[%s8549_s3 + $0x10] ss:$48 sps:$4 sm:$0xff]   ;;  %v5811_v37 = vld [vmem:[%s8549_s3 + $0x8b4] ss:$48 sps:$4 sm:$0xff]  }
 0x145   :  { %2014 = vmatprep.subr.bf16.mxu0 %v5730_v38  ;;  %v5814_v38 = vld [vmem:[%s8549_s3 + $0x5b4] ss:$48 sps:$4 sm:$0xff]  }
 0x147   :  { %1974 = vmatpush1.bf16.msra.mxu1 %v5725_v39  ;;  %v5809_v39 = vld [vmem:[%s8549_s3 + $0x8b0] ss:$48 sps:$4 sm:$0xff]  }
 0x148   :  { %2015 = vmatpush1.bf16.msra.mxu0 %v5728_v40  ;;  %1975 = vmatprep.subr.bf16.mxu1 %v5733_v41  ;;  %v5812_v40 = vld [vmem:[%s8549_s3 + $0x5b0] ss:$48 sps:$4 sm:$0xff]   ;;  %v5817_v41 = vld [vmem:[%s8549_s3 + $0x854] ss:$48 sps:$4 sm:$0xff]  }
 0x149   :  { %2016 = vmatprep.subr.bf16.mxu0 %v5736_v42  ;;  %v5820_v42 = vld [vmem:[%s8549_s3 + $0x554] ss:$48 sps:$4 sm:$0xff]  }
 0x14b   :  { %1976 = vmatpush1.bf16.msra.mxu1 %v5731_v43  ;;  %v5815_v43 = vld [vmem:[%s8549_s3 + $0x850] ss:$48 sps:$4 sm:$0xff]  }
 0x14c   :  { %2017 = vmatpush1.bf16.msra.mxu0 %v5734_v44  ;;  %1977 = vmatprep.subr.bf16.mxu1 %v5739_v45  ;;  %v5818_v44 = vld [vmem:[%s8549_s3 + $0x550] ss:$48 sps:$4 sm:$0xff]   ;;  %v5823_v45 = vld [vmem:[%s8549_s3 + $0x7f4] ss:$48 sps:$4 sm:$0xff]  }
 0x14d   :  { %2018 = vmatprep.subr.bf16.mxu0 %v5742_v46  ;;  %v5826_v46 = vld [vmem:[%s8549_s3 + $0x4f4] ss:$48 sps:$4 sm:$0xff]  }
 0x14f   :  { %1978 = vmatpush1.bf16.msra.mxu1 %v5737_v47  ;;  %v5821_v47 = vld [vmem:[%s8549_s3 + $0x7f0] ss:$48 sps:$4 sm:$0xff]  }
 0x150   :  { %2019 = vmatpush1.bf16.msra.mxu0 %v5740_v48  ;;  %1979 = vmatprep.subr.bf16.mxu1 %v5745_v49  ;;  %v5824_v48 = vld [vmem:[%s8549_s3 + $0x4f0] ss:$48 sps:$4 sm:$0xff]   ;;  %v5829_v49 = vld [vmem:[%s8549_s3 + $0x794] ss:$48 sps:$4 sm:$0xff]  }
 0x151   :  { %2020 = vmatprep.subr.bf16.mxu0 %v5748_v50  ;;  %v5832_v50 = vld [vmem:[%s8549_s3 + $0x494] ss:$48 sps:$4 sm:$0xff]  }
 0x153   :  { %1980 = vmatpush1.bf16.msra.mxu1 %v5743_v51  ;;  %v5827_v51 = vld [vmem:[%s8549_s3 + $0x790] ss:$48 sps:$4 sm:$0xff]  }
 0x154   :  { %2021 = vmatpush1.bf16.msra.mxu0 %v5746_v52  ;;  %1981 = vmatprep.subr.bf16.mxu1 %v5751_v53  ;;  %v5830_v52 = vld [vmem:[%s8549_s3 + $0x490] ss:$48 sps:$4 sm:$0xff]   ;;  %v5835_v53 = vld [vmem:[%s8549_s3 + $0x734] ss:$48 sps:$4 sm:$0xff]  }
 0x155   :  { %2022 = vmatprep.subr.bf16.mxu0 %v5754_v54  ;;  %v5838_v54 = vld [vmem:[%s8549_s3 + $0x434] ss:$48 sps:$4 sm:$0xff]  }
 0x157   :  { %1982 = vmatpush1.bf16.msra.mxu1 %v5749_v55  ;;  %v5833_v55 = vld [vmem:[%s8549_s3 + $0x730] ss:$48 sps:$4 sm:$0xff]  }
 0x158   :  { %2023 = vmatpush1.bf16.msra.mxu0 %v5752_v56  ;;  %1983 = vmatprep.subr.bf16.mxu1 %v5757_v58  ;;  %v5836_v56 = vld [vmem:[%s8549_s3 + $0x430] ss:$48 sps:$4 sm:$0xff]   ;;  %v5841_v58 = vld [vmem:[%s8549_s3 + $0x6d4] ss:$48 sps:$4 sm:$0xff]  }
 0x159   :  { %2024 = vmatprep.subr.bf16.mxu0 %v5760_v59  ;;  %v5844_v59 = vld [vmem:[%s8549_s3 + $0x3d4] ss:$48 sps:$4 sm:$0xff]  }
 0x15b   :  { %1984 = vmatpush1.bf16.msra.mxu1 %v5755_v60  ;;  %v5839_v60 = vld [vmem:[%s8549_s3 + $0x6d0] ss:$48 sps:$4 sm:$0xff]  }
 0x15c   :  { %2025 = vmatpush1.bf16.msra.mxu0 %v5758_v61  ;;  %1985 = vmatprep.subr.bf16.mxu1 %v5763_v62  ;;  %v5842_v61 = vld [vmem:[%s8549_s3 + $0x3d0] ss:$48 sps:$4 sm:$0xff]   ;;  %v5847_v62 = vld [vmem:[%s8549_s3 + $0x674] ss:$48 sps:$4 sm:$0xff]  }
 0x15d   :  { %2051 = vmatprep.subr.bf16.mxu0 %v5766_v63  ;;  %v5850_v63 = vld [vmem:[%s8549_s3 + $0x374] ss:$48 sps:$4 sm:$0xff]  }
 0x15f   :  { %1986 = vmatpush2.bf16.msra.mxu1 %v5761_v0  ;;  %2043 = vmatmul.mubr.bf16.vlgmr.msra.gmra.mxu0 %v6731_v30  ;;  %v5845_v0 = vld [vmem:[%s8549_s3 + $0x670] ss:$48 sps:$4 sm:$0xff]  }
 0x160   :  { %2052 = vmatpush1.bf16.msra.mxu0 %v5764_v1  ;;  %2083 = vmatprep.mubr.bf16.mxu0 %v6729_v29  ;;  %v5848_v1 = vld [vmem:[%s8549_s3 + $0x370] ss:$48 sps:$4 sm:$0xff]  }
 0x161   :  { %1987 = vmatprep.subr.bf16.mxu1 %v5769_v2  ;;  %2053 = vmatprep.subr.bf16.mxu0 %v5772_v3  ;;  %v5853_v2 = vld [vmem:[%s8549_s3 + $0x614] ss:$48 sps:$4 sm:$0xff]  }
 0x162   :  { %v5856_v3 = vld [vmem:[%s8549_s3 + $0x314] ss:$48 sps:$4 sm:$0xff]  }
 0x163   :  { %1988 = vmatpush2.bf16.msra.mxu1 %v5767_v4  ;;  %v5851_v4 = vld [vmem:[%s8549_s3 + $0x610] ss:$48 sps:$4 sm:$0xff]  }
 0x164   :  { %2054 = vmatpush1.bf16.msra.mxu0 %v5770_v5  ;;  %1989 = vmatprep.subr.bf16.mxu1 %v5775_v10  ;;  %v5854_v5 = vld [vmem:[%s8549_s3 + $0x310] ss:$48 sps:$4 sm:$0xff]   ;;  %v5859_v10 = vld [vmem:[%s8549_s3 + $0x2bc] ss:$48 sps:$4 sm:$0xff]  }
 0x165   :  { %2055 = vmatprep.subr.bf16.mxu0 %v5778_v11  ;;  %v5862_v11 = vld [vmem:[%s8549_s3 + $0x8bc] ss:$48 sps:$4 sm:$0xff]  }
 0x167   :  { %1990 = vmatpush2.bf16.msra.mxu1 %v5773_v12  ;;  %v5857_v12 = vld [vmem:[%s8549_s3 + $0x2b8] ss:$48 sps:$4 sm:$0xff]  }
 0x168   :  { %2056 = vmatpush1.bf16.msra.mxu0 %v5776_v13  ;;  %1991 = vmatprep.subr.bf16.mxu1 %v5781_v14  ;;  %v5860_v13 = vld [vmem:[%s8549_s3 + $0x8b8] ss:$48 sps:$4 sm:$0xff]  }
 0x169   :  { %2057 = vmatprep.subr.bf16.mxu0 %v5784_v15  ;;  %v5863_v14 = vld [vmem:[%s8549_s3 + $0x258] ss:$48 sps:$4 sm:$0xff]   ;;  %v5865_v15 = vld [vmem:[%s8549_s3 + $0x25c] ss:$48 sps:$4 sm:$0xff]  }
 0x16b   :  { %1992 = vmatpush2.bf16.msra.mxu1 %v5779_v16  ;;  %v5868_v16 = vld [vmem:[%s8549_s3 + $0x85c] ss:$48 sps:$4 sm:$0xff]  }
 0x16c   :  { %2058 = vmatpush1.bf16.msra.mxu0 %v5782_v17  ;;  %1993 = vmatprep.subr.bf16.mxu1 %v5787_v18  ;;  %v5866_v17 = vld [vmem:[%s8549_s3 + $0x858] ss:$48 sps:$4 sm:$0xff]   ;;  %v5871_v18 = vld [vmem:[%s8549_s3 + $0x1fc] ss:$48 sps:$4 sm:$0xff]  }
 0x16d   :  { %2059 = vmatprep.subr.bf16.mxu0 %v5790_v19  ;;  %v5869_v19 = vld [vmem:[%s8549_s3 + $0x1f8] ss:$48 sps:$4 sm:$0xff]  }
 0x16f   :  { %1994 = vmatpush2.bf16.msra.mxu1 %v5785_v20  ;;  %v5874_v20 = vld [vmem:[%s8549_s3 + $0x7fc] ss:$48 sps:$4 sm:$0xff]  }
 0x170   :  { %2060 = vmatpush1.bf16.msra.mxu0 %v5788_v21  ;;  %1995 = vmatprep.subr.bf16.mxu1 %v5793_v22  ;;  %v5872_v21 = vld [vmem:[%s8549_s3 + $0x7f8] ss:$48 sps:$4 sm:$0xff]   ;;  %v5877_v22 = vld [vmem:[%s8549_s3 + $0x19c] ss:$48 sps:$4 sm:$0xff]  }
 0x171   :  { %2061 = vmatprep.subr.bf16.mxu0 %v5796_v23  ;;  %v5880_v23 = vld [vmem:[%s8549_s3 + $0x79c] ss:$48 sps:$4 sm:$0xff]  }
 0x173   :  { %1996 = vmatpush2.bf16.msra.mxu1 %v5791_v24  ;;  %v5875_v24 = vld [vmem:[%s8549_s3 + $0x198] ss:$48 sps:$4 sm:$0xff]  }
 0x174   :  { %2062 = vmatpush1.bf16.msra.mxu0 %v5794_v25  ;;  %1997 = vmatprep.subr.bf16.mxu1 %v5799_v26  ;;  %v5878_v25 = vld [vmem:[%s8549_s3 + $0x798] ss:$48 sps:$4 sm:$0xff]   ;;  %v5883_v26 = vld [vmem:[%s8549_s3 + $0x13c] ss:$48 sps:$4 sm:$0xff]  }
 0x175   :  { %2063 = vmatprep.subr.bf16.mxu0 %v5802_v27  ;;  %v5886_v27 = vld [vmem:[%s8549_s3 + $0x73c] ss:$48 sps:$4 sm:$0xff]  }
 0x177   :  { %1998 = vmatpush2.bf16.msra.mxu1 %v5797_v28  ;;  %v5881_v28 = vld [vmem:[%s8549_s3 + $0x138] ss:$48 sps:$4 sm:$0xff]  }
 0x178   :  { %2064 = vmatpush1.bf16.msra.mxu0 %v5800_v31  ;;  %1999 = vmatprep.subr.bf16.mxu1 %v5805_v33  ;;  %v5884_v31 = vld [vmem:[%s8549_s3 + $0x738] ss:$48 sps:$4 sm:$0xff]   ;;  %v5889_v33 = vld [vmem:[%s8549_s3 + $0xdc] ss:$48 sps:$4 sm:$0xff]  }
 0x179   :  { %2065 = vmatprep.subr.bf16.mxu0 %v5808_v34  ;;  %v5892_v34 = vld [vmem:[%s8549_s3 + $0x6dc] ss:$48 sps:$4 sm:$0xff]  }
 0x17b   :  { %2000 = vmatpush2.bf16.msra.mxu1 %v5803_v35  ;;  %v5887_v35 = vld [vmem:[%s8549_s3 + $0xd8] ss:$48 sps:$4 sm:$0xff]  }
 0x17c   :  { %2066 = vmatpush1.bf16.msra.mxu0 %v5806_v36  ;;  %2092 = vmatprep.subr.bf16.mxu1 %v5811_v37  ;;  %v5890_v36 = vld [vmem:[%s8549_s3 + $0x6d8] ss:$48 sps:$4 sm:$0xff]   ;;  %v5895_v37 = vld [vmem:[%s8549_s3 + $0x7c] ss:$48 sps:$4 sm:$0xff]  }
 0x17d   :  { %2067 = vmatprep.subr.bf16.mxu0 %v5814_v38  ;;  %v5898_v38 = vld [vmem:[%s8549_s3 + $0x67c] ss:$48 sps:$4 sm:$0xff]  }
 0x17e   :  { %2002 = vmatmul.mubr.bf16.vlgmr.msra.gmra.mxu1 %v6736_v32 }
 0x17f   :  { %2093 = vmatpush1.bf16.msra.mxu1 %v5809_v39  ;;  %2124 = vmatprep.mubr.bf16.mxu1 %v6487_v57  ;;  %v5893_v39 = vld [vmem:[%s8549_s3 + $0x78] ss:$48 sps:$4 sm:$0xff]  }
 0x180   :  { %2068 = vmatpush2.bf16.msra.mxu0 %v5812_v40  ;;  %2094 = vmatprep.subr.bf16.mxu1 %v5817_v41  ;;  %v5896_v40 = vld [vmem:[%s8549_s3 + $0x678] ss:$48 sps:$4 sm:$0xff]   ;;  %v5901_v41 = vld [vmem:[%s8549_s3 + $0x1c] ss:$48 sps:$4 sm:$0xff]  }
 0x181   :  { %2069 = vmatprep.subr.bf16.mxu0 %v5820_v42  ;;  %v5904_v42 = vld [vmem:[%s8549_s3 + $0x61c] ss:$48 sps:$4 sm:$0xff]  }
 0x183   :  { %2095 = vmatpush1.bf16.msra.mxu1 %v5815_v43  ;;  %v5899_v43 = vld [vmem:[%s8549_s3 + $0x18] ss:$48 sps:$4 sm:$0xff]  }
 0x184   :  { %2070 = vmatpush2.bf16.msra.mxu0 %v5818_v44  ;;  %2096 = vmatprep.subr.bf16.mxu1 %v5823_v45  ;;  %v5902_v44 = vld [vmem:[%s8549_s3 + $0x618] ss:$48 sps:$4 sm:$0xff]   ;;  %v5907_v45 = vld [vmem:[%s8549_s3 + $0x5bc] ss:$48 sps:$4 sm:$0xff]  }
 0x185   :  { %2071 = vmatprep.subr.bf16.mxu0 %v5826_v46  ;;  %v5910_v46 = vld [vmem:[%s8549_s3 + $0x2c4] ss:$48 sps:$4 sm:$0xff]  }
 0x187   :  { %2097 = vmatpush1.bf16.msra.mxu1 %v5821_v47  ;;  %v5905_v47 = vld [vmem:[%s8549_s3 + $0x5b8] ss:$48 sps:$4 sm:$0xff]  }
 0x188   :  { %2072 = vmatpush2.bf16.msra.mxu0 %v5824_v48  ;;  %2098 = vmatprep.subr.bf16.mxu1 %v5829_v49  ;;  %v5908_v48 = vld [vmem:[%s8549_s3 + $0x2c0] ss:$48 sps:$4 sm:$0xff]   ;;  %v5913_v49 = vld [vmem:[%s8549_s3 + $0x55c] ss:$48 sps:$4 sm:$0xff]  }
 0x189   :  { %2073 = vmatprep.subr.bf16.mxu0 %v5832_v50  ;;  %v5916_v50 = vld [vmem:[%s8549_s3 + $0x264] ss:$48 sps:$4 sm:$0xff]  }
 0x18b   :  { %2099 = vmatpush1.bf16.msra.mxu1 %v5827_v51  ;;  %v5911_v51 = vld [vmem:[%s8549_s3 + $0x558] ss:$48 sps:$4 sm:$0xff]  }
 0x18c   :  { %2074 = vmatpush2.bf16.msra.mxu0 %v5830_v52  ;;  %2100 = vmatprep.subr.bf16.mxu1 %v5835_v53  ;;  %v5914_v52 = vld [vmem:[%s8549_s3 + $0x260] ss:$48 sps:$4 sm:$0xff]   ;;  %v5919_v53 = vld [vmem:[%s8549_s3 + $0x4fc] ss:$48 sps:$4 sm:$0xff]  }
 0x18d   :  { %2075 = vmatprep.subr.bf16.mxu0 %v5838_v54  ;;  %v5922_v54 = vld [vmem:[%s8549_s3 + $0x204] ss:$48 sps:$4 sm:$0xff]  }
 0x18f   :  { %2101 = vmatpush1.bf16.msra.mxu1 %v5833_v55  ;;  %v5917_v55 = vld [vmem:[%s8549_s3 + $0x4f8] ss:$48 sps:$4 sm:$0xff]  }
 0x190   :  { %2076 = vmatpush2.bf16.msra.mxu0 %v5836_v56  ;;  %2102 = vmatprep.subr.bf16.mxu1 %v5841_v58  ;;  %v5920_v56 = vld [vmem:[%s8549_s3 + $0x200] ss:$48 sps:$4 sm:$0xff]   ;;  %v5925_v58 = vld [vmem:[%s8549_s3 + $0x49c] ss:$48 sps:$4 sm:$0xff]  }
 0x191   :  { %2077 = vmatprep.subr.bf16.mxu0 %v5844_v59  ;;  %v5928_v59 = vld [vmem:[%s8549_s3 + $0x1a4] ss:$48 sps:$4 sm:$0xff]  }
 0x193   :  { %2103 = vmatpush1.bf16.msra.mxu1 %v5839_v60  ;;  %v5923_v60 = vld [vmem:[%s8549_s3 + $0x498] ss:$48 sps:$4 sm:$0xff]  }
 0x194   :  { %2078 = vmatpush2.bf16.msra.mxu0 %v5842_v61  ;;  %2104 = vmatprep.subr.bf16.mxu1 %v5847_v62  ;;  %v5926_v61 = vld [vmem:[%s8549_s3 + $0x1a0] ss:$48 sps:$4 sm:$0xff]   ;;  %v5931_v62 = vld [vmem:[%s8549_s3 + $0x43c] ss:$48 sps:$4 sm:$0xff]  }
 0x195   :  { %2079 = vmatprep.subr.bf16.mxu0 %v5850_v63  ;;  %v5934_v63 = vld [vmem:[%s8549_s3 + $0x144] ss:$48 sps:$4 sm:$0xff]  }
 0x197   :  { %2105 = vmatpush1.bf16.msra.mxu1 %v5845_v0  ;;  %v5929_v0 = vld [vmem:[%s8549_s3 + $0x438] ss:$48 sps:$4 sm:$0xff]  }
 0x198   :  { %2080 = vmatpush2.bf16.msra.mxu0 %v5848_v1  ;;  %2106 = vmatprep.subr.bf16.mxu1 %v5853_v2  ;;  %v5932_v1 = vld [vmem:[%s8549_s3 + $0x140] ss:$48 sps:$4 sm:$0xff]   ;;  %v5937_v2 = vld [vmem:[%s8549_s3 + $0x3dc] ss:$48 sps:$4 sm:$0xff]  }
 0x199   :  { %2081 = vmatprep.subr.bf16.mxu0 %v5856_v3  ;;  %v5940_v3 = vld [vmem:[%s8549_s3 + $0xe4] ss:$48 sps:$4 sm:$0xff]  }
 0x19b   :  { %2107 = vmatpush1.bf16.msra.mxu1 %v5851_v4  ;;  %v5935_v4 = vld [vmem:[%s8549_s3 + $0x3d8] ss:$48 sps:$4 sm:$0xff]  }
 0x19c   :  { %2082 = vmatpush2.bf16.msra.mxu0 %v5854_v5  ;;  %2133 = vmatprep.subr.bf16.mxu1 %v5859_v10  ;;  %v5938_v5 = vld [vmem:[%s8549_s3 + $0xe0] ss:$48 sps:$4 sm:$0xff]   ;;  %v5943_v10 = vld [vmem:[%s8549_s3 + $0x37c] ss:$48 sps:$4 sm:$0xff]  }
 0x19d   :  { %2174 = vmatprep.subr.bf16.mxu0 %v5862_v11  ;;  %v5941_v11 = vld [vmem:[%s8549_s3 + $0x378] ss:$48 sps:$4 sm:$0xff]  }
 0x19e   :  { %2125 = vmatmul.mubr.bf16.vlgmr.msra.gmra.mxu1 %v6731_v30 }
 0x19f   :  { %2084 = vmatmul.mubr.bf16.vlgmr.msra.gmra.mxu0 %v6736_v32  ;;  %2134 = vmatpush1.bf16.msra.mxu1 %v5857_v12  ;;  %v5946_v12 = vld [vmem:[%s8549_s3 + $0x84] ss:$48 sps:$4 sm:$0xff]  }
 0x1a0   :  { %2165 = vmatprep.mubr.bf16.mxu1 %v6729_v29  ;;  %2175 = vmatpush1.bf16.msra.mxu0 %v5860_v13  ;;  %v5944_v13 = vld [vmem:[%s8549_s3 + $0x80] ss:$48 sps:$4 sm:$0xff]  }
 0x1a1   :  { %2135 = vmatprep.subr.bf16.mxu1 %v5865_v15  ;;  %2176 = vmatprep.subr.bf16.mxu0 %v5868_v16  ;;  %v5947_v15 = vld [vmem:[%s8549_s3 + $0x318] ss:$48 sps:$4 sm:$0xff]   ;;  %v5952_v16 = vld [vmem:[%s8549_s3 + $0x24] ss:$48 sps:$4 sm:$0xff]  }
 0x1a2   :  { %2206 = vmatprep.mubr.bf16.mxu0 %v6487_v57 }
 0x1a3   :  { %2136 = vmatpush1.bf16.msra.mxu1 %v5863_v14  ;;  %v5949_v14 = vld [vmem:[%s8549_s3 + $0x31c] ss:$48 sps:$4 sm:$0xff]  }
 0x1a4   :  { %2177 = vmatpush1.bf16.msra.mxu0 %v5866_v17  ;;  %2137 = vmatprep.subr.bf16.mxu1 %v5871_v18  ;;  %v5950_v17 = vld [vmem:[%s8549_s3 + $0x20] ss:$48 sps:$4 sm:$0xff]   ;;  %v5955_v18 = vld [vmem:[%s8549_s3 + $0x8c4] ss:$48 sps:$4 sm:$0xff]  }
 0x1a5   :  { %2178 = vmatprep.subr.bf16.mxu0 %v5874_v20  ;;  %v5958_v20 = vld [vmem:[%s8549_s3 + $0x5c4] ss:$48 sps:$4 sm:$0xff]  }
 0x1a7   :  { %2138 = vmatpush1.bf16.msra.mxu1 %v5869_v19  ;;  %v5953_v19 = vld [vmem:[%s8549_s3 + $0x8c0] ss:$48 sps:$4 sm:$0xff]  }
 0x1a8   :  { %2179 = vmatpush1.bf16.msra.mxu0 %v5872_v21  ;;  %2139 = vmatprep.subr.bf16.mxu1 %v5877_v22  ;;  %v5956_v21 = vld [vmem:[%s8549_s3 + $0x5c0] ss:$48 sps:$4 sm:$0xff]   ;;  %v5961_v22 = vld [vmem:[%s8549_s3 + $0x864] ss:$48 sps:$4 sm:$0xff]  }
 0x1a9   :  { %2180 = vmatprep.subr.bf16.mxu0 %v5880_v23  ;;  %v5964_v23 = vld [vmem:[%s8549_s3 + $0x564] ss:$48 sps:$4 sm:$0xff]  }
 0x1ab   :  { %2140 = vmatpush1.bf16.msra.mxu1 %v5875_v24  ;;  %v5959_v24 = vld [vmem:[%s8549_s3 + $0x860] ss:$48 sps:$4 sm:$0xff]  }
 0x1ac   :  { %2181 = vmatpush1.bf16.msra.mxu0 %v5878_v25  ;;  %2141 = vmatprep.subr.bf16.mxu1 %v5883_v26  ;;  %v5962_v25 = vld [vmem:[%s8549_s3 + $0x560] ss:$48 sps:$4 sm:$0xff]   ;;  %v5967_v26 = vld [vmem:[%s8549_s3 + $0x804] ss:$48 sps:$4 sm:$0xff]  }
 0x1ad   :  { %2182 = vmatprep.subr.bf16.mxu0 %v5886_v27  ;;  %v5970_v27 = vld [vmem:[%s8549_s3 + $0x504] ss:$48 sps:$4 sm:$0xff]  }
 0x1af   :  { %2142 = vmatpush1.bf16.msra.mxu1 %v5881_v28  ;;  %v5965_v28 = vld [vmem:[%s8549_s3 + $0x800] ss:$48 sps:$4 sm:$0xff]  }
 0x1b0   :  { %2183 = vmatpush1.bf16.msra.mxu0 %v5884_v31  ;;  %2143 = vmatprep.subr.bf16.mxu1 %v5889_v33  ;;  %v5968_v31 = vld [vmem:[%s8549_s3 + $0x500] ss:$48 sps:$4 sm:$0xff]   ;;  %v5973_v33 = vld [vmem:[%s8549_s3 + $0x7a4] ss:$48 sps:$4 sm:$0xff]  }
 0x1b1   :  { %2184 = vmatprep.subr.bf16.mxu0 %v5892_v34  ;;  %v5976_v34 = vld [vmem:[%s8549_s3 + $0x4a4] ss:$48 sps:$4 sm:$0xff]  }
 0x1b3   :  { %2144 = vmatpush1.bf16.msra.mxu1 %v5887_v35  ;;  %v5971_v35 = vld [vmem:[%s8549_s3 + $0x7a0] ss:$48 sps:$4 sm:$0xff]  }
 0x1b4   :  { %2185 = vmatpush1.bf16.msra.mxu0 %v5890_v36  ;;  %2145 = vmatprep.subr.bf16.mxu1 %v5895_v37  ;;  %v5974_v36 = vld [vmem:[%s8549_s3 + $0x4a0] ss:$48 sps:$4 sm:$0xff]   ;;  %v5979_v37 = vld [vmem:[%s8549_s3 + $0x744] ss:$48 sps:$4 sm:$0xff]  }
 0x1b5   :  { %2186 = vmatprep.subr.bf16.mxu0 %v5898_v38  ;;  %v5982_v38 = vld [vmem:[%s8549_s3 + $0x444] ss:$48 sps:$4 sm:$0xff]  }
 0x1b7   :  { %2146 = vmatpush1.bf16.msra.mxu1 %v5893_v39  ;;  %v5977_v39 = vld [vmem:[%s8549_s3 + $0x740] ss:$48 sps:$4 sm:$0xff]  }
 0x1b8   :  { %2187 = vmatpush1.bf16.msra.mxu0 %v5896_v40  ;;  %2147 = vmatprep.subr.bf16.mxu1 %v5901_v41  ;;  %v5980_v40 = vld [vmem:[%s8549_s3 + $0x440] ss:$48 sps:$4 sm:$0xff]   ;;  %v5985_v41 = vld [vmem:[%s8549_s3 + $0x6e4] ss:$48 sps:$4 sm:$0xff]  }
 0x1b9   :  { %2188 = vmatprep.subr.bf16.mxu0 %v5904_v42  ;;  %v5988_v42 = vld [vmem:[%s8549_s3 + $0x3e4] ss:$48 sps:$4 sm:$0xff]  }
 0x1bb   :  { %2148 = vmatpush1.bf16.msra.mxu1 %v5899_v43  ;;  %v5983_v43 = vld [vmem:[%s8549_s3 + $0x6e0] ss:$48 sps:$4 sm:$0xff]  }
 0x1bc   :  { %2189 = vmatpush1.bf16.msra.mxu0 %v5902_v44  ;;  %2149 = vmatprep.subr.bf16.mxu1 %v5907_v45  ;;  %v5986_v44 = vld [vmem:[%s8549_s3 + $0x3e0] ss:$48 sps:$4 sm:$0xff]   ;;  %v5991_v45 = vld [vmem:[%s8549_s3 + $0x684] ss:$48 sps:$4 sm:$0xff]  }
 0x1bd   :  { %2215 = vmatprep.subr.bf16.mxu0 %v5910_v46  ;;  %v5994_v46 = vld [vmem:[%s8549_s3 + $0x384] ss:$48 sps:$4 sm:$0xff]  }
 0x1bf   :  { %2150 = vmatpush2.bf16.msra.mxu1 %v5905_v47  ;;  %2207 = vmatmul.mubr.bf16.vlgmr.msra.gmra.mxu0 %v6731_v30  ;;  %v5989_v47 = vld [vmem:[%s8549_s3 + $0x680] ss:$48 sps:$4 sm:$0xff]  }
 0x1c0   :  { %2216 = vmatpush1.bf16.msra.mxu0 %v5908_v48  ;;  %2247 = vmatprep.mubr.bf16.mxu0 %v6729_v29  ;;  %v5992_v48 = vld [vmem:[%s8549_s3 + $0x380] ss:$48 sps:$4 sm:$0xff]  }
 0x1c1   :  { %2151 = vmatprep.subr.bf16.mxu1 %v5913_v49  ;;  %2217 = vmatprep.subr.bf16.mxu0 %v5916_v50  ;;  %v5997_v49 = vld [vmem:[%s8549_s3 + $0x624] ss:$48 sps:$4 sm:$0xff]  }
 0x1c2   :  { %v6000_v50 = vld [vmem:[%s8549_s3 + $0x324] ss:$48 sps:$4 sm:$0xff]  }
 0x1c3   :  { %2152 = vmatpush2.bf16.msra.mxu1 %v5911_v51  ;;  %v5995_v51 = vld [vmem:[%s8549_s3 + $0x620] ss:$48 sps:$4 sm:$0xff]  }
 0x1c4   :  { %2218 = vmatpush1.bf16.msra.mxu0 %v5914_v52  ;;  %2153 = vmatprep.subr.bf16.mxu1 %v5919_v53  ;;  %v5998_v52 = vld [vmem:[%s8549_s3 + $0x320] ss:$48 sps:$4 sm:$0xff]   ;;  %v6003_v53 = vld [vmem:[%s8549_s3 + $0x2cc] ss:$48 sps:$4 sm:$0xff]  }
 0x1c5   :  { %2219 = vmatprep.subr.bf16.mxu0 %v5922_v54  ;;  %v6006_v54 = vld [vmem:[%s8549_s3 + $0x8cc] ss:$48 sps:$4 sm:$0xff]  }
 0x1c7   :  { %2154 = vmatpush2.bf16.msra.mxu1 %v5917_v55  ;;  %v6001_v55 = vld [vmem:[%s8549_s3 + $0x2c8] ss:$48 sps:$4 sm:$0xff]  }
 0x1c8   :  { %2220 = vmatpush1.bf16.msra.mxu0 %v5920_v56  ;;  %2155 = vmatprep.subr.bf16.mxu1 %v5925_v58  ;;  %v6004_v56 = vld [vmem:[%s8549_s3 + $0x8c8] ss:$48 sps:$4 sm:$0xff]   ;;  %v7334_v58 = vld [vmem:[%s8553_s4] sm:$0xff] }
 0x1c9   :  { %2221 = vmatprep.subr.bf16.mxu0 %v5928_v59  ;;  %v6009_v59 = vld [vmem:[%s8549_s3 + $0x26c] ss:$48 sps:$4 sm:$0xff]  }
 0x1cb   :  { %2156 = vmatpush2.bf16.msra.mxu1 %v5923_v60  ;;  %v6012_v60 = vld [vmem:[%s8549_s3 + $0x86c] ss:$48 sps:$4 sm:$0xff]  }
 0x1cc   :  { %2222 = vmatpush1.bf16.msra.mxu0 %v5926_v61  ;;  %2157 = vmatprep.subr.bf16.mxu1 %v5931_v62  ;;  %v6007_v61 = vld [vmem:[%s8549_s3 + $0x268] ss:$48 sps:$4 sm:$0xff]  }
 0x1cd   :  { %2223 = vmatprep.subr.bf16.mxu0 %v5934_v63  ;;  %v394_v63 = vrot.slane %v7334_v58, %v6703_v7 }
 0x1cf   :  { %2158 = vmatpush2.bf16.msra.mxu1 %v5929_v0  ;;  %v6010_v0 = vld [vmem:[%s8549_s3 + $0x868] ss:$48 sps:$4 sm:$0xff]  }
 0x1d0   :  { %2224 = vmatpush1.bf16.msra.mxu0 %v5932_v1  ;;  %2159 = vmatprep.subr.bf16.mxu1 %v5937_v2  ;;  %v6015_v1 = vld [vmem:[%s8549_s3 + $0x20c] ss:$48 sps:$4 sm:$0xff]  }
 0x1d1   :  { %2225 = vmatprep.subr.bf16.mxu0 %v5940_v3  ;;  %v6018_v3 = vld [vmem:[%s8549_s3 + $0x80c] ss:$48 sps:$4 sm:$0xff]  }
 0x1d3   :  { %2160 = vmatpush2.bf16.msra.mxu1 %v5935_v4 }
 0x1d4   :  { %2226 = vmatpush1.bf16.msra.mxu0 %v5938_v5  ;;  %2161 = vmatprep.subr.bf16.mxu1 %v5943_v10  ;;  %v6013_v10 = vld [vmem:[%s8549_s3 + $0x208] ss:$48 sps:$4 sm:$0xff]  }
 0x1d5   :  { %2227 = vmatprep.subr.bf16.mxu0 %v5946_v12 }
 0x1d7   :  { %2162 = vmatpush2.bf16.msra.mxu1 %v5941_v11 }
 0x1d8   :  { %2228 = vmatpush1.bf16.msra.mxu0 %v5944_v13  ;;  %2163 = vmatprep.subr.bf16.mxu1 %v5949_v14  ;;  %v6016_v13 = vld [vmem:[%s8549_s3 + $0x808] ss:$48 sps:$4 sm:$0xff]  }
 0x1d9   :  { %2229 = vmatprep.subr.bf16.mxu0 %v5952_v16 }
 0x1db   :  { %2164 = vmatpush2.bf16.msra.mxu1 %v5947_v15 }
 0x1dc   :  { %2230 = vmatpush1.bf16.msra.mxu0 %v5950_v17  ;;  %2256 = vmatprep.subr.bf16.mxu1 %v5955_v18  ;;  %v6024_v18 = vld [vmem:[%s8549_s3 + $0x7ac] ss:$48 sps:$4 sm:$0xff]  }
 0x1dd   :  { %2231 = vmatprep.subr.bf16.mxu0 %v5958_v20 }
 0x1de   :  { %2166 = vmatmul.mubr.bf16.vlgmr.msra.gmra.mxu1 %v6736_v32 }
 0x1df   :  { %2257 = vmatpush1.bf16.msra.mxu1 %v5953_v19  ;;  %2288 = vmatprep.mubr.bf16.mxu1 %v6487_v57  ;;  %v6019_v19 = vld [vmem:[%s8549_s3 + $0x1a8] ss:$48 sps:$4 sm:$0xff]  }
 0x1e0   :  { %2232 = vmatpush2.bf16.msra.mxu0 %v5956_v21  ;;  %2258 = vmatprep.subr.bf16.mxu1 %v5961_v22  ;;  %v6022_v21 = vld [vmem:[%s8549_s3 + $0x7a8] ss:$48 sps:$4 sm:$0xff]   ;;  %v6027_v22 = vld [vmem:[%s8549_s3 + $0x14c] ss:$48 sps:$4 sm:$0xff]  }
 0x1e1   :  { %2233 = vmatprep.subr.bf16.mxu0 %v5964_v23  ;;  %v6025_v23 = vld [vmem:[%s8549_s3 + $0x148] ss:$48 sps:$4 sm:$0xff]  }
 0x1e3   :  { %2259 = vmatpush1.bf16.msra.mxu1 %v5959_v24  ;;  %v6030_v24 = vld [vmem:[%s8549_s3 + $0x74c] ss:$48 sps:$4 sm:$0xff]  }
 0x1e4   :  { %2234 = vmatpush2.bf16.msra.mxu0 %v5962_v25  ;;  %2260 = vmatprep.subr.bf16.mxu1 %v5967_v26 }
 0x1e5   :  { %2235 = vmatprep.subr.bf16.mxu0 %v5970_v27  ;;  %v6028_v27 = vld [vmem:[%s8549_s3 + $0x748] ss:$48 sps:$4 sm:$0xff]  }
 0x1e7   :  { %2261 = vmatpush1.bf16.msra.mxu1 %v5965_v28  ;;  %v6033_v28 = vld [vmem:[%s8549_s3 + $0xec] ss:$48 sps:$4 sm:$0xff]  }
 0x1e8   :  { %2236 = vmatpush2.bf16.msra.mxu0 %v5968_v31  ;;  %2262 = vmatprep.subr.bf16.mxu1 %v5973_v33  ;;  %v6031_v31 = vld [vmem:[%s8549_s3 + $0xe8] ss:$48 sps:$4 sm:$0xff]   ;;  %v6036_v33 = vld [vmem:[%s8549_s3 + $0x6ec] ss:$48 sps:$4 sm:$0xff]  }
 0x1e9   :  { %2237 = vmatprep.subr.bf16.mxu0 %v5976_v34 }
 0x1eb   :  { %2263 = vmatpush1.bf16.msra.mxu1 %v5971_v35  ;;  %v6034_v35 = vld [vmem:[%s8549_s3 + $0x6e8] ss:$48 sps:$4 sm:$0xff]  }
 0x1ec   :  { %2238 = vmatpush2.bf16.msra.mxu0 %v5974_v36  ;;  %2264 = vmatprep.subr.bf16.mxu1 %v5979_v37  ;;  %v6039_v36 = vld [vmem:[%s8549_s3 + $0x8c] ss:$48 sps:$4 sm:$0xff]   ;;  %v6037_v37 = vld [vmem:[%s8549_s3 + $0x88] ss:$48 sps:$4 sm:$0xff]  }
 0x1ed   :  { %2239 = vmatprep.subr.bf16.mxu0 %v5982_v38  ;;  %v6042_v38 = vld [vmem:[%s8549_s3 + $0x68c] ss:$48 sps:$4 sm:$0xff]  }
 0x1ef   :  { %2265 = vmatpush1.bf16.msra.mxu1 %v5977_v39  ;;  %v6040_v39 = vld [vmem:[%s8549_s3 + $0x688] ss:$48 sps:$4 sm:$0xff]  }
 0x1f0   :  { %2240 = vmatpush2.bf16.msra.mxu0 %v5980_v40  ;;  %2266 = vmatprep.subr.bf16.mxu1 %v5985_v41  ;;  %v6045_v40 = vld [vmem:[%s8549_s3 + $0x2c] ss:$48 sps:$4 sm:$0xff]   ;;  %v6043_v41 = vld [vmem:[%s8549_s3 + $0x28] ss:$48 sps:$4 sm:$0xff]  }
 0x1f1   :  { %2241 = vmatprep.subr.bf16.mxu0 %v5988_v42  ;;  %v6048_v42 = vld [vmem:[%s8549_s3 + $0x62c] ss:$48 sps:$4 sm:$0xff]  }
 0x1f3   :  { %2267 = vmatpush1.bf16.msra.mxu1 %v5983_v43  ;;  %v390_v43 = vrot.slane %v7334_v58, %v6709_v9 }
 0x1f4   :  { %2242 = vmatpush2.bf16.msra.mxu0 %v5986_v44  ;;  %2268 = vmatprep.subr.bf16.mxu1 %v5991_v45  ;;  %v6046_v44 = vld [vmem:[%s8549_s3 + $0x628] ss:$48 sps:$4 sm:$0xff]   ;;  %v6051_v45 = vld [vmem:[%s8549_s3 + $0x5cc] ss:$48 sps:$4 sm:$0xff]  }
 0x1f5   :  { %2243 = vmatprep.subr.bf16.mxu0 %v5994_v46  ;;  %v6049_v46 = vld [vmem:[%s8549_s3 + $0x5c8] ss:$48 sps:$4 sm:$0xff]  }
 0x1f7   :  { %2269 = vmatpush1.bf16.msra.mxu1 %v5989_v47  ;;  %v6054_v47 = vld [vmem:[%s8552_s5 + $0xac] ss:$12 sps:$4 sm:$0xff]  }
 0x1f8   :  { %2244 = vmatpush2.bf16.msra.mxu0 %v5992_v48  ;;  %2270 = vmatprep.subr.bf16.mxu1 %v5997_v49  ;;  %v6052_v49 = vld [vmem:[%s8552_s5 + $0xa8] ss:$12 sps:$4 sm:$0xff]  }
 0x1f9   :  { %2245 = vmatprep.subr.bf16.mxu0 %v6000_v50  ;;  %v6057_v50 = vld [vmem:[%s8549_s3 + $0x56c] ss:$48 sps:$4 sm:$0xff]  }
 0x1fb   :  { %2271 = vmatpush1.bf16.msra.mxu1 %v5995_v51 }
 0x1fc   :  { %2246 = vmatpush2.bf16.msra.mxu0 %v5998_v52  ;;  %2297 = vmatprep.subr.bf16.mxu1 %v6003_v53  ;;  %v6055_v52 = vld [vmem:[%s8549_s3 + $0x568] ss:$48 sps:$4 sm:$0xff]   ;;  %v6060_v53 = vld [vmem:[%s8552_s5 + $0x94] ss:$12 sps:$4 sm:$0xff]  }
 0x1fd   :  { %2338 = vmatprep.subr.bf16.mxu0 %v6006_v54 }
 0x1fe   :  { %2289 = vmatmul.mubr.bf16.vlgmr.msra.gmra.mxu1 %v6731_v30  ;;  %v7346_v62 = vpop.f32.mrf.mxu1 }
 0x1ff   :  { %2248 = vmatmul.mubr.bf16.vlgmr.msra.gmra.mxu0 %v6736_v32  ;;  %2298 = vmatpush1.bf16.msra.mxu1 %v6001_v55  ;;  %v7357_v2 = vpop.f32.mrf.mxu0  ;;  %v6058_v55 = vld [vmem:[%s8552_s5 + $0x90] ss:$12 sps:$4 sm:$0xff]  }
 0x200   :  { %2329 = vmatprep.mubr.bf16.mxu1 %v6729_v29  ;;  %2339 = vmatpush1.bf16.msra.mxu0 %v6004_v56  ;;  %v1964_v4 = vpop.f32.mrf.mxu1  ;;  %v6021_v29 = vld [vmem:[%s8549_s3 + $0x1ac] ss:$48 sps:$4 sm:$0xff]   ;;  %v1922_v48 = vadd.f32 %v7357_v2, %v390_v43 }
 0x201   :  { %v1923_v5 = vpop.f32.mrf.mxu0  ;;  %2299 = vmatprep.subr.bf16.mxu1 %v6009_v59  ;;  %2340 = vmatprep.subr.bf16.mxu0 %v6012_v60  ;;  %v6063_v56 = vld [vmem:[%s8549_s3 + $0x50c] ss:$48 sps:$4 sm:$0xff]  }
 0x202   :  { %v1924_v11 = vadd.f32 %v1923_v5, %v394_v63  ;;  %v1966_v12 = vpop.f32.mrf.mxu1  ;;  %2370 = vmatprep.mubr.bf16.mxu0 %v6487_v57  ;;  %v7461_v54 = vadd.f32 %v7346_v62, %v1922_v48  ;;  %v6061_v62 = vld [vmem:[%s8549_s3 + $0x508] ss:$48 sps:$4 sm:$0xff]  }
 0x203   :  { %2300 = vmatpush1.bf16.msra.mxu1 %v6007_v61  ;;  %v1925_v14 = vpop.f32.mrf.mxu0  ;;  %v6072_v12 = vld [vmem:[%s8552_s5 + $0x64] ss:$12 sps:$4 sm:$0xff]  }
 0x204   :  { %v7373_v15 = vadd.f32 %v1964_v4, %v1924_v11  ;;  %2341 = vmatpush1.bf16.msra.mxu0 %v6010_v0  ;;  %v1967_v16 = vpop.f32.mrf.mxu1  ;;  %2301 = vmatprep.subr.bf16.mxu1 %v6015_v1  ;;  %v6066_v0 = vld [vmem:[%s8552_s5 + $0x7c] ss:$12 sps:$4 sm:$0xff]   ;;  %v2379_v1 = vmul.f32 %v7461_v54, %v7461_v54  ;;  %v6070_v14 = vld [vmem:[%s8552_s5 + $0x60] ss:$12 sps:$4 sm:$0xff]  }
 0x205   :  { %v1926_v17 = vpop.f32.mrf.mxu0  ;;  %2342 = vmatprep.subr.bf16.mxu0 %v6018_v3  ;;  %v6069_v3 = vld [vmem:[%s8549_s3 + $0x4ac] ss:$48 sps:$4 sm:$0xff]   ;;  %v6067_v11 = vld [vmem:[%s8549_s3 + $0x4a8] ss:$48 sps:$4 sm:$0xff]  }
 0x206   :  { %v2380_v57 = vmul.f32 %v7373_v15, %v7373_v15  ;;  %v6078_v16 = vld [vmem:[%s8552_s5 + $0x4c] ss:$12 sps:$4 sm:$0xff]  }
 0x207   :  { %2302 = vmatpush1.bf16.msra.mxu1 %v6013_v10 }
 0x208   :  { %v2392_v20 = vmul.f32 %v2380_v57, %v7373_v15  ;;  %2343 = vmatpush1.bf16.msra.mxu0 %v6016_v13  ;;  %2303 = vmatprep.subr.bf16.mxu1 %v6021_v29  ;;  %v2391_v13 = vmul.f32 %v2379_v1, %v7461_v54  ;;  %v6075_v29 = vld [vmem:[%s8549_s3 + $0x44c] ss:$48 sps:$4 sm:$0xff]  }
 0x209   :  { %2344 = vmatprep.subr.bf16.mxu0 %v6024_v18  ;;  %v6076_v18 = vld [vmem:[%s8552_s5 + $0x48] ss:$12 sps:$4 sm:$0xff]   ;;  %v6081_v57 = vld [vmem:[%s8549_s3 + $0x3ec] ss:$48 sps:$4 sm:$0xff]  }
 0x20a   :  { %v2404_v25 = vmul.f32 0.044715, %v2392_v20  ;;  %v2403_v17 = vmul.f32 0.044715, %v2391_v13 }
 0x20b   :  { %2304 = vmatpush1.bf16.msra.mxu1 %v6019_v19  ;;  %v6084_v19 = vld [vmem:[%s8552_s5 + $0x34] ss:$12 sps:$4 sm:$0xff]  }
 0x20c   :  { %v2416_v26 = vadd.f32 %v2404_v25, %v7373_v15  ;;  %2345 = vmatpush1.bf16.msra.mxu0 %v6022_v21  ;;  %2305 = vmatprep.subr.bf16.mxu1 %v6027_v22  ;;  %v2415_v20 = vadd.f32 %v2403_v17, %v7461_v54  ;;  %v6079_v21 = vld [vmem:[%s8549_s3 + $0x3e8] ss:$48 sps:$4 sm:$0xff]   ;;  %v6082_v22 = vld [vmem:[%s8552_s5 + $0x30] ss:$12 sps:$4 sm:$0xff]  }
 0x20d   :  { %2346 = vmatprep.subr.bf16.mxu0 %v6030_v24  ;;  %v6085_v24 = vld [vmem:[%s8549_s3 + $0x388] ss:$48 sps:$4 sm:$0xff]   ;;  %v6130_v17 = vld [vmem:[%s8552_s5 + $0xf0] ss:$12 sps:$4 sm:$0xff]  }
 0x20e   :  { %v2428_v34 = vmul.f32 0.7978846, %v2416_v26  ;;  %v6090_v25 = vld [vmem:[%s8552_s5 + $0x1c] ss:$12 sps:$4 sm:$0xff]   ;;  %v401_v26 = vsub.s32 3, %v6700_v6 }
 0x20f   :  { %2306 = vmatpush1.bf16.msra.mxu1 %v6025_v23  ;;  %v6087_v23 = vld [vmem:[%s8549_s3 + $0x38c] ss:$48 sps:$4 sm:$0xff]  }
 0x210   :  { %2347 = vmatpush1.bf16.msra.mxu0 %v6028_v27  ;;  %2307 = vmatprep.subr.bf16.mxu1 %v6033_v28  ;;  %6459 = vtanh.f32 %v2428_v34  ;;  %v2427_v27 = vmul.f32 0.7978846, %v2415_v20  ;;  %v6088_v28 = vld [vmem:[%s8552_s5 + $0x18] ss:$12 sps:$4 sm:$0xff]  }
 0x211   :  { %2348 = vmatprep.subr.bf16.mxu0 %v6036_v33  ;;  %v6096_v33 = vld [vmem:[%s8552_s5 + $0x4] ss:$12 sps:$4 sm:$0xff]   ;;  %v6091_v34 = vld [vmem:[%s8549_s3 + $0x328] ss:$48 sps:$4 sm:$0xff]  }
 0x212   :  { %6461 = vtanh.f32 %v2427_v27 }
 0x213   :  { %2308 = vmatpush1.bf16.msra.mxu1 %v6031_v31  ;;  %v6093_v31 = vld [vmem:[%s8549_s3 + $0x32c] ss:$48 sps:$4 sm:$0xff]  }
 0x214   :  { %2349 = vmatpush1.bf16.msra.mxu0 %v6034_v35  ;;  %2309 = vmatprep.subr.bf16.mxu1 %v6039_v36  ;;  %v6094_v35 = vld [vmem:[%s8552_s5] ss:$12 sps:$4 sm:$0xff]  }
 0x215   :  { %2350 = vmatprep.subr.bf16.mxu0 %v6042_v38  ;;  %v6099_v36 = vld [vmem:[%s8552_s5 + $0x22c] ss:$12 sps:$4 sm:$0xff]   ;;  %v6097_v38 = vld [vmem:[%s8552_s5 + $0x228] ss:$12 sps:$4 sm:$0xff]  }
 0x217   :  { %2310 = vmatpush1.bf16.msra.mxu1 %v6037_v37  ;;  %v6102_v37 = vld [vmem:[%s8552_s5 + $0x16c] ss:$12 sps:$4 sm:$0xff]  }
 0x218   :  { %2351 = vmatpush1.bf16.msra.mxu0 %v6040_v39  ;;  %2311 = vmatprep.subr.bf16.mxu1 %v6045_v40  ;;  %v6100_v39 = vld [vmem:[%s8552_s5 + $0x168] ss:$12 sps:$4 sm:$0xff]  }
 0x219   :  { %2352 = vmatprep.subr.bf16.mxu0 %v6048_v42  ;;  %v6105_v40 = vld [vmem:[%s8552_s5 + $0x214] ss:$12 sps:$4 sm:$0xff]  }
 0x21a   :  { %v6108_v42 = vld [vmem:[%s8552_s5 + $0x154] ss:$12 sps:$4 sm:$0xff]  }
 0x21b   :  { %2312 = vmatpush1.bf16.msra.mxu1 %v6043_v41  ;;  %v402_v41 = vrot.slane %v7334_v58, %v401_v26 }
 0x21c   :  { %2353 = vmatpush1.bf16.msra.mxu0 %v6046_v44  ;;  %2313 = vmatprep.subr.bf16.mxu1 %v6051_v45  ;;  %v6103_v44 = vld [vmem:[%s8552_s5 + $0x210] ss:$12 sps:$4 sm:$0xff]  }
 0x21d   :  { %v6460_v51 = vpop.eup %6459  ;;  %4436 = vmatprep.subr.bf16.mxu0 %v6054_v47  ;;  %v6106_v45 = vld [vmem:[%s8552_s5 + $0x150] ss:$12 sps:$4 sm:$0xff]   ;;  %v398_v47 = vrot.slane %v7334_v58, %v6706_v8 }
 0x21e   :  { %v2452_v59 = vadd.f32 1.0, %v6460_v51 }
 0x21f   :  { %v7469_v60 = vpop.f32.mrf.mxu0  ;;  %2314 = vmatpush2.bf16.msra.mxu1 %v6049_v46  ;;  %2371 = vmatmul.mubr.bf16.vlgmr.msra.gmra.mxu0 %v6731_v30  ;;  %v6064_v30 = vld [vmem:[%s8552_s5 + $0x78] ss:$12 sps:$4 sm:$0xff]   ;;  %v6111_v46 = vld [vmem:[%s8552_s5 + $0x1fc] ss:$12 sps:$4 sm:$0xff]  }
 0x220   :  { %4437 = vmatpush1.bf16.msra.mxu0 %v6052_v49  ;;  %2315 = vmatprep.subr.bf16.mxu1 %v6057_v50  ;;  %v2464_v61 = vmul.f32 0.5, %v2452_v59  ;;  %v6109_v49 = vld [vmem:[%s8552_s5 + $0x1f8] ss:$12 sps:$4 sm:$0xff]   ;;  %v6114_v50 = vld [vmem:[%s8552_s5 + $0x13c] ss:$12 sps:$4 sm:$0xff]  }
 0x221   :  { %v7472_v63 = vpop.f32.mrf.mxu0  ;;  %4438 = vmatprep.subr.bf16.mxu0 %v6060_v53  ;;  %v6117_v53 = vld [vmem:[%s8552_s5 + $0x1e4] ss:$12 sps:$4 sm:$0xff]  }
 0x222   :  { %v2476_v2 = vmul.f32 %v2464_v61, %v7373_v15  ;;  %v6073_v15 = vld [vmem:[%s8549_s3 + $0x448] ss:$48 sps:$4 sm:$0xff]  }
 0x223   :  { %v2048_v4 = vpop.f32.mrf.mxu0  ;;  %2316 = vmatpush2.bf16.msra.mxu1 %v6055_v52  ;;  %v6112_v52 = vld [vmem:[%s8552_s5 + $0x138] ss:$12 sps:$4 sm:$0xff]  }
 0x224   :  { %4439 = vmatpush1.bf16.msra.mxu0 %v6058_v55  ;;  %2317 = vmatprep.subr.bf16.mxu1 %v6063_v56  ;;  %v7489_v5 = vpack.c.bf16 %v2476_v2, %v2476_v2  ;;  %v6121_v4 = vld [vmem:[%s8552_s5 + $0x1c8] ss:$12 sps:$4 sm:$0xff]  }
 0x225   :  { %v2049_v10 = vpop.f32.mrf.mxu0  ;;  %4440 = vmatprep.subr.bf16.mxu0 %v6066_v0  ;;  %v6120_v0 = vld [vmem:[%s8552_s5 + $0x124] ss:$12 sps:$4 sm:$0xff]  }
 0x226   :  { %4468 = vmatprep.mubr.bf16.mxu0 %v7489_v5  ;;  %v6126_v10 = vld [vmem:[%s8552_s5 + $0x10c] ss:$12 sps:$4 sm:$0xff]  }
 0x227   :  { %2318 = vmatpush2.bf16.msra.mxu1 %v6061_v62  ;;  %v6115_v62 = vld [vmem:[%s8552_s5 + $0x1e0] ss:$12 sps:$4 sm:$0xff]  }
 0x228   :  { %4441 = vmatpush1.bf16.msra.mxu0 %v6064_v30  ;;  %2319 = vmatprep.subr.bf16.mxu1 %v6069_v3  ;;  %v6123_v30 = vld [vmem:[%s8552_s5 + $0x1cc] ss:$12 sps:$4 sm:$0xff]  }
 0x229   :  { %4442 = vmatprep.subr.bf16.mxu0 %v6072_v12 }
 0x22b   :  { %2320 = vmatpush2.bf16.msra.mxu1 %v6067_v11  ;;  %v6124_v11 = vld [vmem:[%s8552_s5 + $0x108] ss:$12 sps:$4 sm:$0xff]  }
 0x22c   :  { %4443 = vmatpush1.bf16.msra.mxu0 %v6070_v14  ;;  %2321 = vmatprep.subr.bf16.mxu1 %v6075_v29  ;;  %v6462_v14 = vpop.eup %6461  ;;  %v6132_v29 = vld [vmem:[%s8552_s5 + $0xf4] ss:$12 sps:$4 sm:$0xff]  }
 0x22d   :  { %4444 = vmatprep.subr.bf16.mxu0 %v6078_v16  ;;  %v6127_v16 = vld [vmem:[%s8552_s5 + $0x1b0] ss:$12 sps:$4 sm:$0xff]   ;;  %v2451_v20 = vadd.f32 1.0, %v6462_v14 }
 0x22f   :  { %2322 = vmatpush2.bf16.msra.mxu1 %v6073_v15  ;;  %v2463_v27 = vmul.f32 0.5, %v2451_v20  ;;  %v6172_v20 = vld [vmem:[%s8552_s5 + $0x348] ss:$12 sps:$4 sm:$0xff]  }
 0x230   :  { %4445 = vmatpush1.bf16.msra.mxu0 %v6076_v18  ;;  %2323 = vmatprep.subr.bf16.mxu1 %v6081_v57  ;;  %v6135_v18 = vld [vmem:[%s8552_s5 + $0x19c] ss:$12 sps:$4 sm:$0xff]  }
 0x231   :  { %4446 = vmatprep.subr.bf16.mxu0 %v6084_v19  ;;  %v6138_v19 = vld [vmem:[%s8552_s5 + $0xdc] ss:$12 sps:$4 sm:$0xff]  }
 0x233   :  { %2324 = vmatpush2.bf16.msra.mxu1 %v6079_v21  ;;  %v6133_v21 = vld [vmem:[%s8552_s5 + $0x198] ss:$12 sps:$4 sm:$0xff]  }
 0x234   :  { %4447 = vmatpush1.bf16.msra.mxu0 %v6082_v22  ;;  %2325 = vmatprep.subr.bf16.mxu1 %v6087_v23  ;;  %v6136_v22 = vld [vmem:[%s8552_s5 + $0xd8] ss:$12 sps:$4 sm:$0xff]  }
 0x235   :  { %4448 = vmatprep.subr.bf16.mxu0 %v6090_v25  ;;  %v6141_v23 = vld [vmem:[%s8552_s5 + $0x184] ss:$12 sps:$4 sm:$0xff]  }
 0x237   :  { %2326 = vmatpush2.bf16.msra.mxu1 %v6085_v24  ;;  %v6144_v24 = vld [vmem:[%s8552_s5 + $0xc4] ss:$12 sps:$4 sm:$0xff]  }
 0x238   :  { %4449 = vmatpush1.bf16.msra.mxu0 %v6088_v28  ;;  %2327 = vmatprep.subr.bf16.mxu1 %v6093_v31  ;;  %v409_v28 = vsub.s32 5, %v6700_v6  ;;  %v6139_v31 = vld [vmem:[%s8552_s5 + $0x180] ss:$12 sps:$4 sm:$0xff]  }
 0x239   :  { %4450 = vmatprep.subr.bf16.mxu0 %v6096_v33  ;;  %v6142_v33 = vld [vmem:[%s8552_s5 + $0xc0] ss:$12 sps:$4 sm:$0xff]  }
 0x23b   :  { %2328 = vmatpush2.bf16.msra.mxu1 %v6091_v34  ;;  %v6147_v34 = vld [vmem:[%s8552_s5 + $0x2ec] ss:$12 sps:$4 sm:$0xff]  }
 0x23c   :  { %4451 = vmatpush1.bf16.msra.mxu0 %v6094_v35  ;;  %4477 = vmatprep.subr.bf16.mxu1 %v6099_v36  ;;  %v6150_v35 = vld [vmem:[%s8552_s5 + $0x3ac] ss:$12 sps:$4 sm:$0xff]  }
 0x23d   :  { %4452 = vmatprep.subr.bf16.mxu0 %v6102_v37  ;;  %v2475_v37 = vmul.f32 %v2463_v27, %v7461_v54  ;;  %v6175_v27 = vld [vmem:[%s8552_s5 + $0x270] ss:$12 sps:$4 sm:$0xff]  }
 0x23e   :  { %v2003_v43 = vpop.f32.mrf.mxu1  ;;  %2330 = vmatmul.mubr.bf16.vlgmr.msra.gmra.mxu1 %v6736_v32 }
 0x23f   :  { %4478 = vmatpush1.bf16.msra.mxu1 %v6097_v38  ;;  %v2004_v56 = vadd.f32 %v2003_v43, %v398_v47  ;;  %v6145_v38 = vld [vmem:[%s8552_s5 + $0x2e8] ss:$12 sps:$4 sm:$0xff]   ;;  %v405_v43 = vsub.s32 4, %v6700_v6  ;;  %v7686_v54 = vpack.c.bf16 %v2475_v37, %v2475_v37  ;;  %v410_v47 = vrot.slane %v7334_v58, %v409_v28  ;;  %v6178_v28 = vld [vmem:[%s8552_s5 + $0x330] ss:$12 sps:$4 sm:$0xff]  }
 0x240   :  { %v2005_v48 = vpop.f32.mrf.mxu1  ;;  %4453 = vmatpush2.bf16.msra.mxu0 %v6100_v39  ;;  %4479 = vmatprep.subr.bf16.mxu1 %v6105_v40  ;;  %v6184_v37 = vld [vmem:[%s8552_s5 + $0x318] ss:$12 sps:$4 sm:$0xff]  }
 0x241   :  { %v2006_v32 = vadd.f32 %v2005_v48, %v402_v41  ;;  %4454 = vmatprep.subr.bf16.mxu0 %v6108_v42  ;;  %v7616_v2 = vadd.f32 %v7469_v60, %v2004_v56  ;;  %v6129_v60 = vld [vmem:[%s8552_s5 + $0x1b4] ss:$12 sps:$4 sm:$0xff]  }
 0x242   :  { %v2007_v51 = vpop.f32.mrf.mxu1  ;;  %v6148_v41 = vld [vmem:[%s8552_s5 + $0x3a8] ss:$12 sps:$4 sm:$0xff]  }
 0x243   :  { %v7598_v55 = vadd.f32 %v7472_v63, %v2006_v32  ;;  %4480 = vmatpush1.bf16.msra.mxu1 %v6103_v44  ;;  %v6118_v63 = vld [vmem:[%s8552_s5 + $0x120] ss:$12 sps:$4 sm:$0xff]   ;;  %v2381_v13 = vmul.f32 %v7616_v2, %v7616_v2  ;;  %v6151_v32 = vld [vmem:[%s8552_s5 + $0x2d0] ss:$12 sps:$4 sm:$0xff]  }
 0x244   :  { %v2008_v59 = vpop.f32.mrf.mxu1  ;;  %4455 = vmatpush2.bf16.msra.mxu0 %v6106_v45  ;;  %4481 = vmatprep.subr.bf16.mxu1 %v6111_v46  ;;  %v6153_v42 = vld [vmem:[%s8552_s5 + $0x2d4] ss:$12 sps:$4 sm:$0xff]   ;;  %v6154_v51 = vld [vmem:[%s8552_s5 + $0x390] ss:$12 sps:$4 sm:$0xff]  }
 0x245   :  { %v2382_v61 = vmul.f32 %v7598_v55, %v7598_v55  ;;  %4456 = vmatprep.subr.bf16.mxu0 %v6114_v50  ;;  %v2393_v57 = vmul.f32 %v2381_v13, %v7616_v2  ;;  %v6156_v44 = vld [vmem:[%s8552_s5 + $0x394] ss:$12 sps:$4 sm:$0xff]  }
 0x246   :  { %v6163_v13 = vld [vmem:[%s8552_s5 + $0x2a0] ss:$12 sps:$4 sm:$0xff]  }
 0x247   :  { %v2394_v1 = vmul.f32 %v2382_v61, %v7598_v55  ;;  %4482 = vmatpush1.bf16.msra.mxu1 %v6109_v49  ;;  %v2405_v25 = vmul.f32 0.044715, %v2393_v57  ;;  %v6162_v61 = vld [vmem:[%s8552_s5 + $0x37c] ss:$12 sps:$4 sm:$0xff]  }
 0x248   :  { %4457 = vmatpush2.bf16.msra.mxu0 %v6112_v52  ;;  %4483 = vmatprep.subr.bf16.mxu1 %v6117_v53  ;;  %v6159_v52 = vld [vmem:[%s8552_s5 + $0x2bc] ss:$12 sps:$4 sm:$0xff]   ;;  %v406_v53 = vrot.slane %v7334_v58, %v405_v43  ;;  %v6190_v43 = vld [vmem:[%s8552_s5 + $0x300] ss:$12 sps:$4 sm:$0xff]  }
 0x249   :  { %v2406_v3 = vmul.f32 0.044715, %v2394_v1  ;;  %4458 = vmatprep.subr.bf16.mxu0 %v6120_v0  ;;  %v2417_v36 = vadd.f32 %v2405_v25, %v7616_v2  ;;  %v6169_v57 = vld [vmem:[%s8552_s5 + $0x288] ss:$12 sps:$4 sm:$0xff]  }
 0x24b   :  { %v2418_v12 = vadd.f32 %v2406_v3, %v7598_v55  ;;  %4484 = vmatpush1.bf16.msra.mxu1 %v6115_v62  ;;  %v2429_v40 = vmul.f32 0.7978846, %v2417_v36  ;;  %v6181_v36 = vld [vmem:[%s8552_s5 + $0x258] ss:$12 sps:$4 sm:$0xff]  }
 0x24c   :  { %4459 = vmatpush2.bf16.msra.mxu0 %v6118_v63  ;;  %4485 = vmatprep.subr.bf16.mxu1 %v6123_v30  ;;  %v6157_v30 = vld [vmem:[%s8552_s5 + $0x2b8] ss:$12 sps:$4 sm:$0xff]  }
 0x24d   :  { %4460 = vmatprep.subr.bf16.mxu0 %v6126_v10  ;;  %v2430_v15 = vmul.f32 0.7978846, %v2418_v12  ;;  %v6168_v12 = vld [vmem:[%s8552_s5 + $0x364] ss:$12 sps:$4 sm:$0xff]  }
 0x24f   :  { %4486 = vmatpush1.bf16.msra.mxu1 %v6121_v4  ;;  %6463 = vtanh.f32 %v2430_v15  ;;  %v6165_v4 = vld [vmem:[%s8552_s5 + $0x2a4] ss:$12 sps:$4 sm:$0xff]   ;;  %v6171_v15 = vld [vmem:[%s8552_s5 + $0x28c] ss:$12 sps:$4 sm:$0xff]  }
 0x250   :  { %4461 = vmatpush2.bf16.msra.mxu0 %v6124_v11  ;;  %4487 = vmatprep.subr.bf16.mxu1 %v6129_v60  ;;  %6465 = vtanh.f32 %v2429_v40 }
 0x251   :  { %4462 = vmatprep.subr.bf16.mxu0 %v6132_v29  ;;  %v6166_v29 = vld [vmem:[%s8552_s5 + $0x360] ss:$12 sps:$4 sm:$0xff]  }
 0x253   :  { %4488 = vmatpush1.bf16.msra.mxu1 %v6127_v16 }
 0x254   :  { %4463 = vmatpush2.bf16.msra.mxu0 %v6130_v17  ;;  %4489 = vmatprep.subr.bf16.mxu1 %v6135_v18  ;;  %v6174_v17 = vld [vmem:[%s8552_s5 + $0x34c] ss:$12 sps:$4 sm:$0xff]  }
 0x255   :  { %4464 = vmatprep.subr.bf16.mxu0 %v6138_v19 }
 0x257   :  { %4490 = vmatpush1.bf16.msra.mxu1 %v6133_v21  ;;  %v6177_v21 = vld [vmem:[%s8552_s5 + $0x274] ss:$12 sps:$4 sm:$0xff]  }
 0x258   :  { %4465 = vmatpush2.bf16.msra.mxu0 %v6136_v22  ;;  %4491 = vmatprep.subr.bf16.mxu1 %v6141_v23 }
 0x259   :  { %4466 = vmatprep.subr.bf16.mxu0 %v6144_v24  ;;  %v6180_v24 = vld [vmem:[%s8552_s5 + $0x334] ss:$12 sps:$4 sm:$0xff]  }
 0x25b   :  { %4492 = vmatpush1.bf16.msra.mxu1 %v6139_v31  ;;  %v6183_v31 = vld [vmem:[%s8552_s5 + $0x25c] ss:$12 sps:$4 sm:$0xff]  }
 0x25c   :  { %v6464_v39 = vpop.eup %6463  ;;  %4467 = vmatpush2.bf16.msra.mxu0 %v6142_v33  ;;  %4493 = vmatprep.subr.bf16.mxu1 %v6147_v34 }
 0x25d   :  { %4518 = vmatprep.subr.bf16.mxu0 %v6150_v35  ;;  %v2454_v45 = vadd.f32 1.0, %v6464_v39  ;;  %v6466_v22 = vpop.eup %6465  ;;  %v6186_v35 = vld [vmem:[%s8552_s5 + $0x31c] ss:$12 sps:$4 sm:$0xff]  }
 0x25e   :  { %v2126_v46 = vpop.f32.mrf.mxu1  ;;  %v2453_v33 = vadd.f32 1.0, %v6466_v22  ;;  %v6220_v22 = vld [vmem:[%s8552_s5 + $0x3f0] ss:$12 sps:$4 sm:$0xff]  }
 0x25f   :  { %v2085_v48 = vpop.f32.mrf.mxu0  ;;  %4469 = vmatmul.mubr.bf16.vlgmr.msra.gmra.mxu0 %v7686_v54  ;;  %4494 = vmatpush2.bf16.msra.mxu1 %v6145_v38  ;;  %v2466_v49 = vmul.f32 0.5, %v2454_v45  ;;  %v6189_v38 = vld [vmem:[%s8552_s5 + $0x244] ss:$12 sps:$4 sm:$0xff]   ;;  %v6201_v45 = vld [vmem:[%s8552_s5 + $0x52c] ss:$12 sps:$4 sm:$0xff]  }
 0x260   :  { %v2128_v50 = vpop.f32.mrf.mxu1  ;;  %4519 = vmatpush1.bf16.msra.mxu0 %v6148_v41  ;;  %4495 = vmatprep.subr.bf16.mxu1 %v6153_v42  ;;  %v2086_v10 = vadd.f32 %v2085_v48, %v406_v53  ;;  %v2465_v39 = vmul.f32 0.5, %v2453_v33  ;;  %v6192_v41 = vld [vmem:[%s8552_s5 + $0x304] ss:$12 sps:$4 sm:$0xff]   ;;  %v6187_v42 = vld [vmem:[%s8552_s5 + $0x240] ss:$12 sps:$4 sm:$0xff]  }
 0x261   :  { %v2087_v56 = vpop.f32.mrf.mxu0  ;;  %4520 = vmatprep.subr.bf16.mxu0 %v6156_v44  ;;  %v2478_v59 = vmul.f32 %v2466_v49, %v7598_v55  ;;  %v6160_v55 = vld [vmem:[%s8552_s5 + $0x378] ss:$12 sps:$4 sm:$0xff]   ;;  %v6199_v48 = vld [vmem:[%s8552_s5 + $0x528] ss:$12 sps:$4 sm:$0xff]  }
 0x262   :  { %v2088_v62 = vadd.f32 %v2087_v56, %v410_v47  ;;  %v2130_v0 = vpop.f32.mrf.mxu1  ;;  %v7736_v16 = vadd.f32 %v2126_v46, %v2086_v10  ;;  %v2477_v44 = vmul.f32 %v2465_v39, %v7616_v2  ;;  %v6195_v47 = vld [vmem:[%s8552_s5 + $0x46c] ss:$12 sps:$4 sm:$0xff]   ;;  %v6193_v2 = vld [vmem:[%s8552_s5 + $0x468] ss:$12 sps:$4 sm:$0xff]   ;;  %v6234_v33 = vld [vmem:[%s8552_s5 + $0x3c4] ss:$12 sps:$4 sm:$0xff]  }
 0x263   :  { %v2089_v63 = vpop.f32.mrf.mxu0  ;;  %4496 = vmatpush2.bf16.msra.mxu1 %v6151_v32  ;;  %v7707_v1 = vpack.c.bf16 %v2478_v59, %v2478_v59  ;;  %v6207_v49 = vld [vmem:[%s8552_s5 + $0x514] ss:$12 sps:$4 sm:$0xff]   ;;  %v6205_v59 = vld [vmem:[%s8552_s5 + $0x510] ss:$12 sps:$4 sm:$0xff]  }
 0x264   :  { %v7712_v3 = vadd.f32 %v2128_v50, %v2088_v62  ;;  %v2131_v58 = vpop.f32.mrf.mxu1  ;;  %4521 = vmatpush1.bf16.msra.mxu0 %v6154_v51  ;;  %4497 = vmatprep.subr.bf16.mxu1 %v6159_v52  ;;  %v2383_v23 = vmul.f32 %v7736_v16, %v7736_v16  ;;  %v7798_v32 = vpack.c.bf16 %v2477_v44, %v2477_v44  ;;  %v6198_v52 = vld [vmem:[%s8552_s5 + $0x454] ss:$12 sps:$4 sm:$0xff]   ;;  %v6213_v0 = vld [vmem:[%s8552_s5 + $0x4fc] ss:$12 sps:$4 sm:$0xff]  }
 0x265   :  { %v2090_v11 = vpop.f32.mrf.mxu0  ;;  %4509 = vmatprep.mubr.bf16.mxu1 %v7707_v1  ;;  %4522 = vmatprep.subr.bf16.mxu0 %v6162_v61  ;;  %v6196_v61 = vld [vmem:[%s8552_s5 + $0x450] ss:$12 sps:$4 sm:$0xff]   ;;  %v6241_v44 = vld [vmem:[%s8552_s5 + $0x5e8] ss:$12 sps:$4 sm:$0xff]  }
 0x266   :  { %v2384_v60 = vmul.f32 %v7712_v3, %v7712_v3  ;;  %v2395_v34 = vmul.f32 %v2383_v23, %v7736_v16  ;;  %v6202_v11 = vld [vmem:[%s8552_s5 + $0x438] ss:$12 sps:$4 sm:$0xff]   ;;  %v6237_v23 = vld [vmem:[%s8552_s5 + $0x49c] ss:$12 sps:$4 sm:$0xff]  }
 0x267   :  { %4498 = vmatpush2.bf16.msra.mxu1 %v6157_v30  ;;  %v6204_v30 = vld [vmem:[%s8552_s5 + $0x43c] ss:$12 sps:$4 sm:$0xff]  }
 0x268   :  { %v2396_v14 = vmul.f32 %v2384_v60, %v7712_v3  ;;  %4523 = vmatpush1.bf16.msra.mxu0 %v6160_v55  ;;  %4499 = vmatprep.subr.bf16.mxu1 %v6165_v4  ;;  %v2407_v40 = vmul.f32 0.044715, %v2395_v34  ;;  %v6211_v4 = vld [vmem:[%s8552_s5 + $0x4f8] ss:$12 sps:$4 sm:$0xff]  }
 0x269   :  { %4524 = vmatprep.subr.bf16.mxu0 %v6168_v12  ;;  %v6219_v12 = vld [vmem:[%s8552_s5 + $0x4e4] ss:$12 sps:$4 sm:$0xff]  }
 0x26a   :  { %v2408_v18 = vmul.f32 0.044715, %v2396_v14  ;;  %v2419_v46 = vadd.f32 %v2407_v40, %v7736_v16  ;;  %v6208_v14 = vld [vmem:[%s8552_s5 + $0x420] ss:$12 sps:$4 sm:$0xff]   ;;  %v417_v40 = vsub.s32 7, %v6700_v6 }
 0x26b   :  { %4500 = vmatpush2.bf16.msra.mxu1 %v6163_v13  ;;  %v6217_v13 = vld [vmem:[%s8552_s5 + $0x4e0] ss:$12 sps:$4 sm:$0xff]  }
 0x26c   :  { %v2420_v19 = vadd.f32 %v2408_v18, %v7712_v3  ;;  %4525 = vmatpush1.bf16.msra.mxu0 %v6166_v29  ;;  %4501 = vmatprep.subr.bf16.mxu1 %v6171_v15  ;;  %v2431_v51 = vmul.f32 0.7978846, %v2419_v46  ;;  %v6225_v29 = vld [vmem:[%s8552_s5 + $0x4cc] ss:$12 sps:$4 sm:$0xff]   ;;  %v6214_v18 = vld [vmem:[%s8552_s5 + $0x408] ss:$12 sps:$4 sm:$0xff]  }
 0x26d   :  { %4526 = vmatprep.subr.bf16.mxu0 %v6174_v17  ;;  %v6216_v15 = vld [vmem:[%s8552_s5 + $0x40c] ss:$12 sps:$4 sm:$0xff]   ;;  %v6223_v17 = vld [vmem:[%s8552_s5 + $0x4c8] ss:$12 sps:$4 sm:$0xff]  }
 0x26e   :  { %v2432_v25 = vmul.f32 0.7978846, %v2420_v19  ;;  %v6222_v19 = vld [vmem:[%s8552_s5 + $0x3f4] ss:$12 sps:$4 sm:$0xff]  }
 0x26f   :  { %4502 = vmatpush2.bf16.msra.mxu1 %v6169_v57  ;;  %v6231_v57 = vld [vmem:[%s8552_s5 + $0x4b4] ss:$12 sps:$4 sm:$0xff]  }
 0x270   :  { %4527 = vmatpush1.bf16.msra.mxu0 %v6172_v20  ;;  %4503 = vmatprep.subr.bf16.mxu1 %v6177_v21  ;;  %6467 = vtanh.f32 %v2432_v25  ;;  %v6229_v21 = vld [vmem:[%s8552_s5 + $0x4b0] ss:$12 sps:$4 sm:$0xff]  }
 0x271   :  { %4528 = vmatprep.subr.bf16.mxu0 %v6180_v24  ;;  %6469 = vtanh.f32 %v2431_v51  ;;  %v6228_v24 = vld [vmem:[%s8552_s5 + $0x3dc] ss:$12 sps:$4 sm:$0xff]  }
 0x273   :  { %4504 = vmatpush2.bf16.msra.mxu1 %v6175_v27  ;;  %v6235_v27 = vld [vmem:[%s8552_s5 + $0x498] ss:$12 sps:$4 sm:$0xff]  }
 0x274   :  { %4529 = vmatpush1.bf16.msra.mxu0 %v6178_v28  ;;  %4505 = vmatprep.subr.bf16.mxu1 %v6183_v31  ;;  %v6226_v28 = vld [vmem:[%s8552_s5 + $0x3d8] ss:$12 sps:$4 sm:$0xff]  }
 0x275   :  { %4530 = vmatprep.subr.bf16.mxu0 %v6186_v35  ;;  %v6240_v31 = vld [vmem:[%s8552_s5 + $0x484] ss:$12 sps:$4 sm:$0xff]   ;;  %v413_v35 = vsub.s32 6, %v6700_v6 }
 0x276   :  { %v6393_v6 = vld [vmem:[%s8552_s5 + $0x2f0] ss:$12 sps:$4 sm:$0xff]  }
 0x277   :  { %4506 = vmatpush2.bf16.msra.mxu1 %v6181_v36  ;;  %v6238_v36 = vld [vmem:[%s8552_s5 + $0x480] ss:$12 sps:$4 sm:$0xff]  }
 0x278   :  { %4531 = vmatpush1.bf16.msra.mxu0 %v6184_v37  ;;  %4507 = vmatprep.subr.bf16.mxu1 %v6189_v38  ;;  %v6232_v37 = vld [vmem:[%s8552_s5 + $0x3c0] ss:$12 sps:$4 sm:$0xff]  }
 0x279   :  { %4532 = vmatprep.subr.bf16.mxu0 %v6192_v41  ;;  %v6243_v38 = vld [vmem:[%s8552_s5 + $0x5ec] ss:$12 sps:$4 sm:$0xff]  }
 0x27a   :  { %v6246_v41 = vld [vmem:[%s8552_s5 + $0x6ac] ss:$12 sps:$4 sm:$0xff]  }
 0x27b   :  { %4508 = vmatpush2.bf16.msra.mxu1 %v6187_v42  ;;  %v6483_v42 = vld [vmem:[%s8553_s4] sm:$0xff] }
 0x27c   :  { %4533 = vmatpush1.bf16.msra.mxu0 %v6190_v43  ;;  %4559 = vmatprep.subr.bf16.mxu1 %v6201_v45  ;;  %v414_v43 = vrot.slane %v6483_v42, %v413_v35  ;;  %v6249_v45 = vld [vmem:[%s8552_s5 + $0x5d4] ss:$12 sps:$4 sm:$0xff]   ;;  %v6280_v35 = vld [vmem:[%s8552_s5 + $0x618] ss:$12 sps:$4 sm:$0xff]  }
 0x27d   :  { %v6468_v50 = vpop.eup %6467  ;;  %4534 = vmatprep.subr.bf16.mxu0 %v6195_v47  ;;  %v418_v47 = vrot.slane %v6483_v42, %v417_v40  ;;  %v6315_v40 = vld [vmem:[%s8552_s5 + $0x82c] ss:$12 sps:$4 sm:$0xff]  }
 0x27e   :  { %4510 = vmatmul.mubr.bf16.vlgmr.msra.gmra.mxu1 %v7798_v32  ;;  %v2456_v53 = vadd.f32 1.0, %v6468_v50  ;;  %v6470_v20 = vpop.eup %6469  ;;  %v6247_v50 = vld [vmem:[%s8552_s5 + $0x5d0] ss:$12 sps:$4 sm:$0xff]   ;;  %v6291_v42 = vld [vmem:[%s8552_s5 + $0x76c] ss:$12 sps:$4 sm:$0xff]  }
 0x27f   :  { %v7810_v56 = vpop.f32.mrf.mxu0  ;;  %4560 = vmatpush1.bf16.msra.mxu1 %v6199_v48  ;;  %v2455_v25 = vadd.f32 1.0, %v6470_v20  ;;  %v6252_v48 = vld [vmem:[%s8552_s5 + $0x694] ss:$12 sps:$4 sm:$0xff]  }
 0x280   :  { %4535 = vmatpush2.bf16.msra.mxu0 %v6193_v2  ;;  %v2468_v62 = vmul.f32 0.5, %v2456_v53  ;;  %4561 = vmatprep.subr.bf16.mxu1 %v6207_v49  ;;  %v6255_v53 = vld [vmem:[%s8552_s5 + $0x5bc] ss:$12 sps:$4 sm:$0xff]  }
 0x281   :  { %v7821_v63 = vpop.f32.mrf.mxu0  ;;  %4536 = vmatprep.subr.bf16.mxu0 %v6198_v52  ;;  %v2467_v34 = vmul.f32 0.5, %v2455_v25  ;;  %v6250_v52 = vld [vmem:[%s8552_s5 + $0x690] ss:$12 sps:$4 sm:$0xff]  }
 0x282   :  { %v2480_v58 = vmul.f32 %v2468_v62, %v7712_v3  ;;  %v6210_v3 = vld [vmem:[%s8552_s5 + $0x424] ss:$12 sps:$4 sm:$0xff]   ;;  %v6258_v62 = vld [vmem:[%s8552_s5 + $0x67c] ss:$12 sps:$4 sm:$0xff]  }
 0x283   :  { %v2212_v55 = vpop.f32.mrf.mxu0  ;;  %4562 = vmatpush1.bf16.msra.mxu1 %v6205_v59  ;;  %v2479_v39 = vmul.f32 %v2467_v34, %v7736_v16  ;;  %v6244_v16 = vld [vmem:[%s8552_s5 + $0x6a8] ss:$12 sps:$4 sm:$0xff]   ;;  %v6277_v34 = vld [vmem:[%s8552_s5 + $0x558] ss:$12 sps:$4 sm:$0xff]  }
 0x284   :  { %4537 = vmatpush2.bf16.msra.mxu0 %v6196_v61  ;;  %v7830_v10 = vpack.c.bf16 %v2480_v58, %v2480_v58  ;;  %4563 = vmatprep.subr.bf16.mxu1 %v6213_v0  ;;  %v6253_v55 = vld [vmem:[%s8552_s5 + $0x5b8] ss:$12 sps:$4 sm:$0xff]  }
 0x285   :  { %v2213_v60 = vpop.f32.mrf.mxu0  ;;  %4538 = vmatprep.subr.bf16.mxu0 %v6204_v30  ;;  %v7917_v46 = vpack.c.bf16 %v2479_v39, %v2479_v39  ;;  %v6286_v39 = vld [vmem:[%s8552_s5 + $0x600] ss:$12 sps:$4 sm:$0xff]  }
 0x286   :  { %4550 = vmatprep.mubr.bf16.mxu0 %v7830_v10  ;;  %v6264_v60 = vld [vmem:[%s8552_s5 + $0x664] ss:$12 sps:$4 sm:$0xff]  }
 0x287   :  { %4564 = vmatpush1.bf16.msra.mxu1 %v6211_v4  ;;  %v6256_v4 = vld [vmem:[%s8552_s5 + $0x678] ss:$12 sps:$4 sm:$0xff]  }
 0x288   :  { %4539 = vmatpush2.bf16.msra.mxu0 %v6202_v11  ;;  %4565 = vmatprep.subr.bf16.mxu1 %v6219_v12  ;;  %v6261_v11 = vld [vmem:[%s8552_s5 + $0x5a4] ss:$12 sps:$4 sm:$0xff]  }
 0x289   :  { %4540 = vmatprep.subr.bf16.mxu0 %v6210_v3 }
 0x28b   :  { %4566 = vmatpush1.bf16.msra.mxu1 %v6217_v13 }
 0x28c   :  { %4541 = vmatpush2.bf16.msra.mxu0 %v6208_v14  ;;  %4567 = vmatprep.subr.bf16.mxu1 %v6225_v29  ;;  %v6259_v14 = vld [vmem:[%s8552_s5 + $0x5a0] ss:$12 sps:$4 sm:$0xff]  }
 0x28d   :  { %4542 = vmatprep.subr.bf16.mxu0 %v6216_v15  ;;  %v6262_v29 = vld [vmem:[%s8552_s5 + $0x660] ss:$12 sps:$4 sm:$0xff]  }
 0x28e   :  { %v6267_v15 = vld [vmem:[%s8552_s5 + $0x58c] ss:$12 sps:$4 sm:$0xff]  }
 0x28f   :  { %4568 = vmatpush1.bf16.msra.mxu1 %v6223_v17 }
 0x290   :  { %4543 = vmatpush2.bf16.msra.mxu0 %v6214_v18  ;;  %4569 = vmatprep.subr.bf16.mxu1 %v6231_v57  ;;  %v6270_v57 = vld [vmem:[%s8552_s5 + $0x64c] ss:$12 sps:$4 sm:$0xff]  }
 0x291   :  { %4544 = vmatprep.subr.bf16.mxu0 %v6222_v19 }
 0x293   :  { %4570 = vmatpush1.bf16.msra.mxu1 %v6229_v21  ;;  %v6265_v21 = vld [vmem:[%s8552_s5 + $0x588] ss:$12 sps:$4 sm:$0xff]  }
 0x294   :  { %4545 = vmatpush2.bf16.msra.mxu0 %v6220_v22  ;;  %4571 = vmatprep.subr.bf16.mxu1 %v6237_v23  ;;  %v6268_v22 = vld [vmem:[%s8552_s5 + $0x648] ss:$12 sps:$4 sm:$0xff]  }
 0x295   :  { %4546 = vmatprep.subr.bf16.mxu0 %v6228_v24  ;;  %v6273_v23 = vld [vmem:[%s8552_s5 + $0x574] ss:$12 sps:$4 sm:$0xff]  }
 0x296   :  { %v6276_v24 = vld [vmem:[%s8552_s5 + $0x634] ss:$12 sps:$4 sm:$0xff]  }
 0x297   :  { %4572 = vmatpush1.bf16.msra.mxu1 %v6235_v27  ;;  %v6271_v27 = vld [vmem:[%s8552_s5 + $0x570] ss:$12 sps:$4 sm:$0xff]  }
 0x298   :  { %4547 = vmatpush2.bf16.msra.mxu0 %v6226_v28  ;;  %4573 = vmatprep.subr.bf16.mxu1 %v6240_v31  ;;  %v6274_v28 = vld [vmem:[%s8552_s5 + $0x630] ss:$12 sps:$4 sm:$0xff]  }
 0x299   :  { %4548 = vmatprep.subr.bf16.mxu0 %v6234_v33  ;;  %v6279_v31 = vld [vmem:[%s8552_s5 + $0x55c] ss:$12 sps:$4 sm:$0xff]  }
 0x29a   :  { %v6282_v33 = vld [vmem:[%s8552_s5 + $0x61c] ss:$12 sps:$4 sm:$0xff]  }
 0x29b   :  { %4574 = vmatpush1.bf16.msra.mxu1 %v6238_v36  ;;  %v6285_v36 = vld [vmem:[%s8552_s5 + $0x544] ss:$12 sps:$4 sm:$0xff]  }
 0x29c   :  { %4549 = vmatpush2.bf16.msra.mxu0 %v6232_v37  ;;  %4575 = vmatprep.subr.bf16.mxu1 %v6243_v38  ;;  %v6288_v37 = vld [vmem:[%s8552_s5 + $0x604] ss:$12 sps:$4 sm:$0xff]   ;;  %v6283_v38 = vld [vmem:[%s8552_s5 + $0x540] ss:$12 sps:$4 sm:$0xff]  }
 0x29d   :  { %4600 = vmatprep.subr.bf16.mxu0 %v6246_v41  ;;  %v8021_v41 = vld [vmem:[%s8553_s4 + $0x8] sm:$0xf] }
 0x29e   :  { %v2167_v2 = vpop.f32.mrf.mxu1 }
 0x29f   :  { %v2168_v49 = vadd.f32 %v2167_v2, %v414_v43  ;;  %4551 = vmatmul.mubr.bf16.vlgmr.msra.gmra.mxu0 %v7917_v46  ;;  %4576 = vmatpush2.bf16.msra.mxu1 %v6241_v44 }
 0x2a0   :  { %v2169_v51 = vpop.f32.mrf.mxu1  ;;  %4601 = vmatpush1.bf16.msra.mxu0 %v6244_v16  ;;  %4577 = vmatprep.subr.bf16.mxu1 %v6249_v45  ;;  %v422_v45 = vrot.slane %v8021_v41, %v6709_v9 }
 0x2a1   :  { %v7933_v59 = vadd.f32 %v7810_v56, %v2168_v49  ;;  %v2170_v61 = vadd.f32 %v2169_v51, %v418_v47  ;;  %4602 = vmatprep.subr.bf16.mxu0 %v6252_v48  ;;  %v6289_v47 = vld [vmem:[%s8552_s5 + $0x768] ss:$12 sps:$4 sm:$0xff]   ;;  %v426_v51 = vrot.slane %v8021_v41, %v6703_v7 }
 0x2a2   :  { %v2171_v0 = vpop.f32.mrf.mxu1  ;;  %v6294_v49 = vld [vmem:[%s8552_s5 + $0x754] ss:$12 sps:$4 sm:$0xff]  }
 0x2a3   :  { %v2385_v30 = vmul.f32 %v7933_v59, %v7933_v59  ;;  %v7941_v58 = vadd.f32 %v7821_v63, %v2170_v61  ;;  %4578 = vmatpush2.bf16.msra.mxu1 %v6247_v50 }
 0x2a4   :  { %v2172_v56 = vpop.f32.mrf.mxu1  ;;  %4603 = vmatpush1.bf16.msra.mxu0 %v6250_v52  ;;  %4579 = vmatprep.subr.bf16.mxu1 %v6255_v53 }
 0x2a5   :  { %v2397_v12 = vmul.f32 %v2385_v30, %v7933_v59  ;;  %v2386_v63 = vmul.f32 %v7941_v58, %v7941_v58  ;;  %4604 = vmatprep.subr.bf16.mxu0 %v6258_v62  ;;  %v6292_v30 = vld [vmem:[%s8552_s5 + $0x750] ss:$12 sps:$4 sm:$0xff]  }
 0x2a7   :  { %v2409_v3 = vmul.f32 0.044715, %v2397_v12  ;;  %v2398_v13 = vmul.f32 %v2386_v63, %v7941_v58  ;;  %4580 = vmatpush2.bf16.msra.mxu1 %v6253_v55 }
 0x2a8   :  { %4605 = vmatpush1.bf16.msra.mxu0 %v6256_v4  ;;  %4581 = vmatprep.subr.bf16.mxu1 %v6261_v11  ;;  %v6297_v4 = vld [vmem:[%s8552_s5 + $0x73c] ss:$12 sps:$4 sm:$0xff]  }
 0x2a9   :  { %v2421_v17 = vadd.f32 %v2409_v3, %v7933_v59  ;;  %v2410_v18 = vmul.f32 0.044715, %v2398_v13  ;;  %4606 = vmatprep.subr.bf16.mxu0 %v6264_v60 }
 0x2ab   :  { %v2433_v19 = vmul.f32 0.7978846, %v2421_v17  ;;  %v2422_v20 = vadd.f32 %v2410_v18, %v7941_v58  ;;  %4582 = vmatpush2.bf16.msra.mxu1 %v6259_v14  ;;  %v6320_v17 = vld [vmem:[%s8552_s5 + $0x814] ss:$12 sps:$4 sm:$0xff]  }
 0x2ac   :  { %4607 = vmatpush1.bf16.msra.mxu0 %v6262_v29  ;;  %4583 = vmatprep.subr.bf16.mxu1 %v6267_v15  ;;  %v6295_v15 = vld [vmem:[%s8552_s5 + $0x738] ss:$12 sps:$4 sm:$0xff]  }
 0x2ad   :  { %6471 = vtanh.f32 %v2433_v19  ;;  %4608 = vmatprep.subr.bf16.mxu0 %v6270_v57  ;;  %v2434_v25 = vmul.f32 0.7978846, %v2422_v20  ;;  %v6300_v57 = vld [vmem:[%s8552_s5 + $0x724] ss:$12 sps:$4 sm:$0xff]  }
 0x2af   :  { %4584 = vmatpush2.bf16.msra.mxu1 %v6265_v21  ;;  %6473 = vtanh.f32 %v2434_v25  ;;  %v6318_v21 = vld [vmem:[%s8552_s5 + $0x810] ss:$12 sps:$4 sm:$0xff]  }
 0x2b0   :  { %4609 = vmatpush1.bf16.msra.mxu0 %v6268_v22  ;;  %4585 = vmatprep.subr.bf16.mxu1 %v6273_v23  ;;  %v6325_v25 = vld [vmem:[%s8552_s5 + $0x7fc] ss:$12 sps:$4 sm:$0xff]  }
 0x2b1   :  { %4610 = vmatprep.subr.bf16.mxu0 %v6276_v24  ;;  %v6298_v24 = vld [vmem:[%s8552_s5 + $0x720] ss:$12 sps:$4 sm:$0xff]  }
 0x2b3   :  { %4586 = vmatpush2.bf16.msra.mxu1 %v6271_v27  ;;  %v6303_v27 = vld [vmem:[%s8552_s5 + $0x70c] ss:$12 sps:$4 sm:$0xff]  }
 0x2b4   :  { %4611 = vmatpush1.bf16.msra.mxu0 %v6274_v28  ;;  %4587 = vmatprep.subr.bf16.mxu1 %v6279_v31 }
 0x2b5   :  { %4612 = vmatprep.subr.bf16.mxu0 %v6282_v33  ;;  %v6323_v33 = vld [vmem:[%s8552_s5 + $0x7f8] ss:$12 sps:$4 sm:$0xff]  }
 0x2b7   :  { %4588 = vmatpush2.bf16.msra.mxu1 %v6277_v34 }
 0x2b8   :  { %4613 = vmatpush1.bf16.msra.mxu0 %v6280_v35  ;;  %4589 = vmatprep.subr.bf16.mxu1 %v6285_v36  ;;  %v6301_v36 = vld [vmem:[%s8552_s5 + $0x708] ss:$12 sps:$4 sm:$0xff]  }
 0x2b9   :  { %4614 = vmatprep.subr.bf16.mxu0 %v6288_v37  ;;  %v6330_v37 = vld [vmem:[%s8552_s5 + $0x7e4] ss:$12 sps:$4 sm:$0xff]  }
 0x2ba   :  { %v6472_v43 = vpop.eup %6471 }
 0x2bb   :  { %4590 = vmatpush2.bf16.msra.mxu1 %v6283_v38  ;;  %v2457_v44 = vadd.f32 1.0, %v6472_v43  ;;  %v6306_v38 = vld [vmem:[%s8552_s5 + $0x6f4] ss:$12 sps:$4 sm:$0xff]   ;;  %v6335_v43 = vld [vmem:[%s8552_s5 + $0x7cc] ss:$12 sps:$4 sm:$0xff]  }
 0x2bc   :  { %v6474_v16 = vpop.eup %6473  ;;  %4615 = vmatpush1.bf16.msra.mxu0 %v6286_v39  ;;  %4641 = vmatprep.subr.bf16.mxu1 %v6315_v40  ;;  %v6328_v40 = vld [vmem:[%s8552_s5 + $0x7e0] ss:$12 sps:$4 sm:$0xff]  }
 0x2bd   :  { %v2458_v48 = vadd.f32 1.0, %v6474_v16  ;;  %v2469_v2 = vmul.f32 0.5, %v2457_v44  ;;  %4616 = vmatprep.subr.bf16.mxu0 %v6291_v42  ;;  %v6304_v42 = vld [vmem:[%s8552_s5 + $0x6f0] ss:$12 sps:$4 sm:$0xff]   ;;  %v6333_v16 = vld [vmem:[%s8552_s5 + $0x7c8] ss:$12 sps:$4 sm:$0xff]  }
 0x2be   :  { %v2290_v50 = vpop.f32.mrf.mxu1  ;;  %v6309_v44 = vld [vmem:[%s8552_s5 + $0x6dc] ss:$12 sps:$4 sm:$0xff]  }
 0x2bf   :  { %v2249_v52 = vpop.f32.mrf.mxu0  ;;  %v2470_v53 = vmul.f32 0.5, %v2458_v48  ;;  %v2481_v0 = vmul.f32 %v2469_v2, %v7933_v59  ;;  %v6313_v59 = vld [vmem:[%s8552_s5 + $0x828] ss:$12 sps:$4 sm:$0xff]   ;;  %v6312_v48 = vld [vmem:[%s8552_s5 + $0x6c4] ss:$12 sps:$4 sm:$0xff]  }
 0x2c0   :  { %v2250_v61 = vadd.f32 %v2249_v52, %v422_v45  ;;  %v2292_v62 = vpop.f32.mrf.mxu1  ;;  %4617 = vmatpush2.bf16.msra.mxu0 %v6289_v47  ;;  %v6307_v45 = vld [vmem:[%s8552_s5 + $0x6d8] ss:$12 sps:$4 sm:$0xff]   ;;  %v6340_v47 = vld [vmem:[%s8552_s5 + $0x7b4] ss:$12 sps:$4 sm:$0xff]   ;;  %v6338_v2 = vld [vmem:[%s8552_s5 + $0x7b0] ss:$12 sps:$4 sm:$0xff]  }
 0x2c1   :  { %v2251_v55 = vpop.f32.mrf.mxu0  ;;  %v2482_v56 = vmul.f32 %v2470_v53, %v7941_v58  ;;  %4618 = vmatprep.subr.bf16.mxu0 %v6294_v49  ;;  %v8055_v29 = vpack.c.bf16 %v2481_v0, %v2481_v0  ;;  %v6310_v49 = vld [vmem:[%s8552_s5 + $0x6c0] ss:$12 sps:$4 sm:$0xff]   ;;  %v6343_v53 = vld [vmem:[%s8552_s5 + $0x798] ss:$12 sps:$4 sm:$0xff]  }
 0x2c2   :  { %v8044_v11 = vadd.f32 %v2290_v50, %v2250_v61  ;;  %v2252_v12 = vadd.f32 %v2251_v55, %v426_v51  ;;  %v2294_v63 = vpop.f32.mrf.mxu1  ;;  %v6345_v50 = vld [vmem:[%s8552_s5 + $0x79c] ss:$12 sps:$4 sm:$0xff]  }
 0x2c3   :  { %v2253_v60 = vpop.f32.mrf.mxu0  ;;  %v8046_v3 = vpack.c.bf16 %v2482_v56, %v2482_v56  ;;  %v6316_v51 = vld [vmem:[%s8552_s5 + $0x170] ss:$12 sps:$4 sm:$0xff]   ;;  %v6355_v63 = vld [vmem:[%s8552_s5 + $0x8ec] ss:$12 sps:$4 sm:$0xff]  }
 0x2c4   :  { %v2387_v13 = vmul.f32 %v8044_v11, %v8044_v11  ;;  %v8053_v58 = vadd.f32 %v2292_v62, %v2252_v12  ;;  %v2295_v14 = vpop.f32.mrf.mxu1  ;;  %4619 = vmatpush2.bf16.msra.mxu0 %v6292_v30  ;;  %v6350_v62 = vld [vmem:[%s8552_s5 + $0x784] ss:$12 sps:$4 sm:$0xff]  }
 0x2c5   :  { %v2254_v18 = vpop.f32.mrf.mxu0  ;;  %4591 = vmatprep.mubr.bf16.mxu1 %v8046_v3  ;;  %4620 = vmatprep.subr.bf16.mxu0 %v6297_v4  ;;  %v6348_v4 = vld [vmem:[%s8552_s5 + $0x780] ss:$12 sps:$4 sm:$0xff]  }
 0x2c6   :  { %v2399_v19 = vmul.f32 %v2387_v13, %v8044_v11  ;;  %v2388_v20 = vmul.f32 %v8053_v58, %v8053_v58  ;;  %4592 = vmatmul.mubr.bf16.vlgmr.msra.gmra.mxu1 %v8055_v29  ;;  %v6317_v18 = vld [vmem:[%s8552_s5 + $0xb0] ss:$12 sps:$4 sm:$0xff]  }
 0x2c7   :  { %4642 = vmatpush1.bf16.msra.mxu1 %v6313_v59 }
 0x2c8   :  { %v2411_v22 = vmul.f32 0.044715, %v2399_v19  ;;  %v2400_v23 = vmul.f32 %v2388_v20, %v8053_v58  ;;  %4621 = vmatpush2.bf16.msra.mxu0 %v6295_v15  ;;  %4643 = vmatprep.subr.bf16.mxu1 %v6320_v17  ;;  %v6353_v15 = vld [vmem:[%s8552_s5 + $0x8e8] ss:$12 sps:$4 sm:$0xff]   ;;  %v6358_v20 = vld [vmem:[%s8552_s5 + $0x8d0] ss:$12 sps:$4 sm:$0xff]  }
 0x2c9   :  { %4622 = vmatprep.subr.bf16.mxu0 %v6300_v57 }
 0x2ca   :  { %v2423_v28 = vadd.f32 %v2411_v22, %v8044_v11  ;;  %v2412_v31 = vmul.f32 0.044715, %v2400_v23  ;;  %v6365_v22 = vld [vmem:[%s8552_s5 + $0x8bc] ss:$12 sps:$4 sm:$0xff]   ;;  %v6326_v23 = vld [vmem:[%s8552_s5 + $0x140] ss:$12 sps:$4 sm:$0xff]  }
 0x2cb   :  { %4644 = vmatpush1.bf16.msra.mxu1 %v6318_v21  ;;  %v6322_v21 = vld [vmem:[%s8552_s5 + $0x98] ss:$12 sps:$4 sm:$0xff]  }
 0x2cc   :  { %v2435_v34 = vmul.f32 0.7978846, %v2423_v28  ;;  %v2424_v35 = vadd.f32 %v2412_v31, %v8053_v58  ;;  %4623 = vmatpush2.bf16.msra.mxu0 %v6298_v24  ;;  %4645 = vmatprep.subr.bf16.mxu1 %v6325_v25  ;;  %v6363_v24 = vld [vmem:[%s8552_s5 + $0x8b8] ss:$12 sps:$4 sm:$0xff]   ;;  %v6368_v28 = vld [vmem:[%s8552_s5 + $0x8a0] ss:$12 sps:$4 sm:$0xff]  }
 0x2cd   :  { %4624 = vmatprep.subr.bf16.mxu0 %v6303_v27  ;;  %v6370_v25 = vld [vmem:[%s8552_s5 + $0x8a4] ss:$12 sps:$4 sm:$0xff]   ;;  %v6331_v27 = vld [vmem:[%s8552_s5 + $0x128] ss:$12 sps:$4 sm:$0xff]  }
 0x2ce   :  { %6475 = vtanh.f32 %v2435_v34  ;;  %v2436_v39 = vmul.f32 0.7978846, %v2424_v35  ;;  %v6332_v31 = vld [vmem:[%s8552_s5 + $0x68] ss:$12 sps:$4 sm:$0xff]   ;;  %v6336_v34 = vld [vmem:[%s8552_s5 + $0x110] ss:$12 sps:$4 sm:$0xff]  }
 0x2cf   :  { %4646 = vmatpush1.bf16.msra.mxu1 %v6323_v33  ;;  %v6375_v33 = vld [vmem:[%s8552_s5 + $0x88c] ss:$12 sps:$4 sm:$0xff]   ;;  %v6373_v35 = vld [vmem:[%s8552_s5 + $0x888] ss:$12 sps:$4 sm:$0xff]  }
 0x2d0   :  { %4625 = vmatpush2.bf16.msra.mxu0 %v6301_v36  ;;  %6477 = vtanh.f32 %v2436_v39  ;;  %4647 = vmatprep.subr.bf16.mxu1 %v6330_v37  ;;  %v6337_v36 = vld [vmem:[%s8552_s5 + $0x50] ss:$12 sps:$4 sm:$0xff]   ;;  %v6380_v37 = vld [vmem:[%s8552_s5 + $0x874] ss:$12 sps:$4 sm:$0xff]  }
 0x2d1   :  { %4626 = vmatprep.subr.bf16.mxu0 %v6306_v38  ;;  %v6341_v38 = vld [vmem:[%s8552_s5 + $0xf8] ss:$12 sps:$4 sm:$0xff]   ;;  %v6378_v39 = vld [vmem:[%s8552_s5 + $0x870] ss:$12 sps:$4 sm:$0xff]  }
 0x2d3   :  { %4648 = vmatpush1.bf16.msra.mxu1 %v6328_v40  ;;  %v6342_v40 = vld [vmem:[%s8552_s5 + $0x38] ss:$12 sps:$4 sm:$0xff]  }
 0x2d4   :  { %4627 = vmatpush2.bf16.msra.mxu0 %v6304_v42  ;;  %4649 = vmatprep.subr.bf16.mxu1 %v6335_v43  ;;  %v6385_v42 = vld [vmem:[%s8552_s5 + $0x85c] ss:$12 sps:$4 sm:$0xff]   ;;  %v6346_v43 = vld [vmem:[%s8552_s5 + $0xe0] ss:$12 sps:$4 sm:$0xff]  }
 0x2d5   :  { %4628 = vmatprep.subr.bf16.mxu0 %v6309_v44  ;;  %v430_v44 = vrot.slane %v8021_v41, %v6706_v8 }
 0x2d7   :  { %4650 = vmatpush1.bf16.msra.mxu1 %v6333_v16  ;;  %v6383_v16 = vld [vmem:[%s8552_s5 + $0x858] ss:$12 sps:$4 sm:$0xff]  }
 0x2d8   :  { %4629 = vmatpush2.bf16.msra.mxu0 %v6307_v45  ;;  %4651 = vmatprep.subr.bf16.mxu1 %v6340_v47  ;;  %v6347_v45 = vld [vmem:[%s8552_s5 + $0x20] ss:$12 sps:$4 sm:$0xff]   ;;  %v6390_v47 = vld [vmem:[%s8552_s5 + $0x844] ss:$12 sps:$4 sm:$0xff]  }
 0x2d9   :  { %4630 = vmatprep.subr.bf16.mxu0 %v6312_v48  ;;  %v434_v48 = vrot.slane %v8021_v41, %v401_v26 }
 0x2db   :  { %v6476_v52 = vpop.eup %6475  ;;  %4652 = vmatpush1.bf16.msra.mxu1 %v6338_v2  ;;  %v6351_v2 = vld [vmem:[%s8552_s5 + $0xc8] ss:$12 sps:$4 sm:$0xff]  }
 0x2dc   :  { %4631 = vmatpush2.bf16.msra.mxu0 %v6310_v49  ;;  %v2459_v61 = vadd.f32 1.0, %v6476_v52  ;;  %4653 = vmatprep.subr.bf16.mxu1 %v6345_v50 }
 0x2dd   :  { %v6478_v0 = vpop.eup %6477  ;;  %5508 = vmatprep.subr.bf16.mxu0 %v6316_v51  ;;  %v6388_v51 = vld [vmem:[%s8552_s5 + $0x840] ss:$12 sps:$4 sm:$0xff]  }
 0x2de   :  { %v2460_v30 = vadd.f32 1.0, %v6478_v0  ;;  %v2471_v55 = vmul.f32 0.5, %v2459_v61  ;;  %v6356_v61 = vld [vmem:[%s8552_s5 + $0x470] ss:$12 sps:$4 sm:$0xff]  }
 0x2df   :  { %v8140_v56 = vpop.f32.mrf.mxu0  ;;  %4654 = vmatpush1.bf16.msra.mxu1 %v6343_v53  ;;  %v6352_v53 = vld [vmem:[%s8552_s5 + $0x8] ss:$12 sps:$4 sm:$0xff]  }
 0x2e0   :  { %v2472_v12 = vmul.f32 0.5, %v2460_v30  ;;  %4655 = vmatprep.subr.bf16.mxu1 %v6350_v62  ;;  %v2483_v59 = vmul.f32 %v2471_v55, %v8044_v11  ;;  %v6321_v11 = vld [vmem:[%s8552_s5 + $0x158] ss:$12 sps:$4 sm:$0xff]  }
 0x2e1   :  { %v8148_v60 = vpop.f32.mrf.mxu0 }
 0x2e2   :  { %v2484_v13 = vmul.f32 %v2472_v12, %v8053_v58  ;;  %v8160_v19 = vpack.c.bf16 %v2483_v59, %v2483_v59  ;;  %v6360_v58 = vld [vmem:[%s8552_s5 + $0x8d4] ss:$12 sps:$4 sm:$0xff]  }
 0x2e3   :  { %v2376_v14 = vpop.f32.mrf.mxu0  ;;  %4656 = vmatpush1.bf16.msra.mxu1 %v6348_v4  ;;  %v6357_v4 = vld [vmem:[%s8552_s5 + $0x3b0] ss:$12 sps:$4 sm:$0xff]  }
 0x2e4   :  { %v8155_v17 = vpack.c.bf16 %v2484_v13, %v2484_v13  ;;  %4657 = vmatprep.subr.bf16.mxu1 %v6355_v63  ;;  %v6361_v63 = vld [vmem:[%s8552_s5 + $0x458] ss:$12 sps:$4 sm:$0xff]  }
 0x2e5   :  { %v2377_v57 = vpop.f32.mrf.mxu0 }
 0x2e6   :  { %4632 = vmatprep.mubr.bf16.mxu0 %v8155_v17 }
 0x2e7   :  { %4633 = vmatmul.mubr.bf16.vlgmr.msra.gmra.mxu0 %v8160_v19  ;;  %4658 = vmatpush2.bf16.msra.mxu1 %v6353_v15 }
 0x2e8   :  { %5509 = vmatpush3.bf16.msra.mxu0 %v6317_v18  ;;  %4714 = vmatprep.mubr.bf16.mxu0 %v7489_v5  ;;  %v6327_v5 = vld [vmem:[%s8552_s5 + $0x80] ss:$12 sps:$4 sm:$0xff]  }
 0x2e9   :  { %5510 = vmatprep.subr.bf16.mxu0 %v6321_v11  ;;  %4659 = vmatprep.subr.bf16.mxu1 %v6360_v58  ;;  %v6366_v18 = vld [vmem:[%s8552_s5 + $0x440] ss:$12 sps:$4 sm:$0xff]  }
 0x2eb   :  { %4660 = vmatpush2.bf16.msra.mxu1 %v6358_v20  ;;  %v6372_v20 = vld [vmem:[%s8552_s5 + $0x368] ss:$12 sps:$4 sm:$0xff]  }
 0x2ec   :  { %5511 = vmatpush3.bf16.msra.mxu0 %v6322_v21  ;;  %4661 = vmatprep.subr.bf16.mxu1 %v6365_v22  ;;  %v6376_v21 = vld [vmem:[%s8552_s5 + $0x410] ss:$12 sps:$4 sm:$0xff]  }
 0x2ed   :  { %5512 = vmatprep.subr.bf16.mxu0 %v6326_v23  ;;  %v6377_v22 = vld [vmem:[%s8552_s5 + $0x350] ss:$12 sps:$4 sm:$0xff]   ;;  %v6381_v23 = vld [vmem:[%s8552_s5 + $0x3f8] ss:$12 sps:$4 sm:$0xff]  }
 0x2ef   :  { %4662 = vmatpush2.bf16.msra.mxu1 %v6363_v24  ;;  %v6382_v24 = vld [vmem:[%s8552_s5 + $0x338] ss:$12 sps:$4 sm:$0xff]  }
 0x2f0   :  { %5513 = vmatpush3.bf16.msra.mxu0 %v6327_v5  ;;  %4663 = vmatprep.subr.bf16.mxu1 %v6370_v25  ;;  %v6386_v5 = vld [vmem:[%s8552_s5 + $0x3e0] ss:$12 sps:$4 sm:$0xff]  }
 0x2f1   :  { %5514 = vmatprep.subr.bf16.mxu0 %v6331_v27 }
 0x2f3   :  { %4664 = vmatpush2.bf16.msra.mxu1 %v6368_v28 }
 0x2f4   :  { %5515 = vmatpush3.bf16.msra.mxu0 %v6332_v31  ;;  %4665 = vmatprep.subr.bf16.mxu1 %v6375_v33  ;;  %v6387_v31 = vld [vmem:[%s8552_s5 + $0x320] ss:$12 sps:$4 sm:$0xff]   ;;  %v6391_v33 = vld [vmem:[%s8552_s5 + $0x3c8] ss:$12 sps:$4 sm:$0xff]  }
 0x2f5   :  { %5516 = vmatprep.subr.bf16.mxu0 %v6336_v34 }
 0x2f7   :  { %4666 = vmatpush2.bf16.msra.mxu1 %v6373_v35 }
 0x2f8   :  { %5517 = vmatpush3.bf16.msra.mxu0 %v6337_v36  ;;  %4667 = vmatprep.subr.bf16.mxu1 %v6380_v37 }
 0x2f9   :  { %5518 = vmatprep.subr.bf16.mxu0 %v6341_v38  ;;  %v6392_v38 = vld [vmem:[%s8552_s5 + $0x308] ss:$12 sps:$4 sm:$0xff]  }
 0x2fb   :  { %4668 = vmatpush2.bf16.msra.mxu1 %v6378_v39 }
 0x2fc   :  { %5519 = vmatpush3.bf16.msra.mxu0 %v6342_v40  ;;  %4669 = vmatprep.subr.bf16.mxu1 %v6385_v42 }
 0x2fd   :  { %5520 = vmatprep.subr.bf16.mxu0 %v6346_v43  ;;  %v6395_v43 = vld [vmem:[%s8552_s5 + $0x770] ss:$12 sps:$4 sm:$0xff]  }
 0x2fe   :  { %v2331_v49 = vpop.f32.mrf.mxu1 }
 0x2ff   :  { %v2332_v50 = vadd.f32 %v2331_v49, %v430_v44  ;;  %4670 = vmatpush2.bf16.msra.mxu1 %v6383_v16  ;;  %v6397_v49 = vld [vmem:[%s8552_s5 + $0x2d8] ss:$12 sps:$4 sm:$0xff]  }
 0x300   :  { %5521 = vmatpush3.bf16.msra.mxu0 %v6347_v45  ;;  %v2333_v52 = vpop.f32.mrf.mxu1  ;;  %4671 = vmatprep.subr.bf16.mxu1 %v6390_v47  ;;  %v6394_v45 = vld [vmem:[%s8552_s5 + $0x230] ss:$12 sps:$4 sm:$0xff]  }
 0x301   :  { %v2373_v26 = vadd.f32 %v8140_v56, %v2332_v50  ;;  %v2334_v41 = vadd.f32 %v2333_v52, %v434_v48  ;;  %5522 = vmatprep.subr.bf16.mxu0 %v6351_v2  ;;  %v6396_v48 = vld [vmem:[%s8552_s5 + $0x6b0] ss:$12 sps:$4 sm:$0xff]   ;;  %v6399_v50 = vld [vmem:[%s8552_s5 + $0x758] ss:$12 sps:$4 sm:$0xff]  }
 0x302   :  { %v2335_v62 = vpop.f32.mrf.mxu1  ;;  %v6400_v52 = vld [vmem:[%s8552_s5 + $0x698] ss:$12 sps:$4 sm:$0xff]  }
 0x303   :  { %v2389_v0 = vmul.f32 %v2373_v26, %v2373_v26  ;;  %v2375_v30 = vadd.f32 %v8148_v60, %v2334_v41  ;;  %4672 = vmatpush2.bf16.msra.mxu1 %v6388_v51  ;;  %v6362_v60 = vld [vmem:[%s8552_s5 + $0x398] ss:$12 sps:$4 sm:$0xff]   ;;  %v6406_v41 = vld [vmem:[%s8552_s5 + $0x1e8] ss:$12 sps:$4 sm:$0xff]   ;;  %v6409_v62 = vld [vmem:[%s8552_s5 + $0x290] ss:$12 sps:$4 sm:$0xff]  }
 0x304   :  { %5523 = vmatpush3.bf16.msra.mxu0 %v6352_v53  ;;  %v2336_v55 = vpop.f32.mrf.mxu1  ;;  %5530 = vmatprep.subr.bf16.mxu1 %v6393_v6  ;;  %v6398_v51 = vld [vmem:[%s8552_s5 + $0x218] ss:$12 sps:$4 sm:$0xff]   ;;  %v6401_v53 = vld [vmem:[%s8552_s5 + $0x2c0] ss:$12 sps:$4 sm:$0xff]  }
 0x305   :  { %v2401_v12 = vmul.f32 %v2389_v0, %v2373_v26  ;;  %v2390_v56 = vmul.f32 %v2375_v30, %v2375_v30  ;;  %5552 = vmatprep.subr.bf16.mxu0 %v6356_v61  ;;  %v6404_v6 = vld [vmem:[%s8552_s5 + $0x680] ss:$12 sps:$4 sm:$0xff]   ;;  %v6408_v61 = vld [vmem:[%s8552_s5 + $0x668] ss:$12 sps:$4 sm:$0xff]   ;;  %v6411_v0 = vld [vmem:[%s8552_s5 + $0x710] ss:$12 sps:$4 sm:$0xff]  }
 0x306   :  { %v6412_v55 = vld [vmem:[%s8552_s5 + $0x650] ss:$12 sps:$4 sm:$0xff]  }
 0x307   :  { %v2413_v59 = vmul.f32 0.044715, %v2401_v12  ;;  %v2402_v13 = vmul.f32 %v2390_v56, %v2375_v30  ;;  %4715 = vmatmul.mubr.bf16.vlgmr.msra.gmra.mxu0 %v7686_v54  ;;  %v6367_v54 = vld [vmem:[%s8552_s5 + $0x380] ss:$12 sps:$4 sm:$0xff]   ;;  %v6415_v12 = vld [vmem:[%s8552_s5 + $0x6f8] ss:$12 sps:$4 sm:$0xff]  }
 0x308   :  { %5553 = vmatpush3.bf16.msra.mxu0 %v6357_v4  ;;  %4794 = vmatprep.mubr.bf16.mxu0 %v7830_v10  ;;  %v6371_v10 = vld [vmem:[%s8552_s5 + $0x428] ss:$12 sps:$4 sm:$0xff]   ;;  %v6413_v4 = vld [vmem:[%s8552_s5 + $0x278] ss:$12 sps:$4 sm:$0xff]   ;;  %v8388_v56 = vld [vmem:[%s8554_s6] sm:$0x7] }
 0x309   :  { %v2425_v14 = vadd.f32 %v2413_v59, %v2373_v26  ;;  %v2414_v15 = vmul.f32 0.044715, %v2402_v13  ;;  %5554 = vmatprep.subr.bf16.mxu0 %v6361_v63  ;;  %v6414_v63 = vld [vmem:[%s8552_s5 + $0x1b8] ss:$12 sps:$4 sm:$0xff]   ;;  %v6417_v13 = vld [vmem:[%s8552_s5 + $0x260] ss:$12 sps:$4 sm:$0xff]  }
 0x30a   :  { %v6416_v59 = vld [vmem:[%s8552_s5 + $0x638] ss:$12 sps:$4 sm:$0xff]  }
 0x30b   :  { %v2437_v57 = vmul.f32 0.7978846, %v2425_v14  ;;  %v2426_v11 = vadd.f32 %v2414_v15, %v2375_v30  ;;  %v6419_v14 = vld [vmem:[%s8552_s5 + $0x6e0] ss:$12 sps:$4 sm:$0xff]   ;;  %v2892_v15 = vrot.slane %v8388_v56, %v6703_v7  ;;  %v6423_v7 = vld [vmem:[%s8552_s5 + $0x6c8] ss:$12 sps:$4 sm:$0xff]  }
 0x30c   :  { %5555 = vmatpush3.bf16.msra.mxu0 %v6362_v60  ;;  %v2888_v60 = vrot.slane %v8388_v56, %v6709_v9  ;;  %v6421_v9 = vld [vmem:[%s8552_s5 + $0x248] ss:$12 sps:$4 sm:$0xff]  }
 0x30d   :  { %6479 = vtanh.f32 %v2437_v57  ;;  %5556 = vmatprep.subr.bf16.mxu0 %v6366_v18  ;;  %v2438_v58 = vmul.f32 0.7978846, %v2426_v11  ;;  %v6418_v18 = vld [vmem:[%s8552_s5 + $0x1a0] ss:$12 sps:$4 sm:$0xff]  }
 0x30e   :  { %v6420_v57 = vld [vmem:[%s8552_s5 + $0x620] ss:$12 sps:$4 sm:$0xff]  }
 0x30f   :  { %6481 = vtanh.f32 %v2438_v58 }
 0x310   :  { %5557 = vmatpush3.bf16.msra.mxu0 %v6367_v54 }
 0x311   :  { %5558 = vmatprep.subr.bf16.mxu0 %v6371_v10 }
 0x314   :  { %5559 = vmatpush3.bf16.msra.mxu0 %v6372_v20  ;;  %v6422_v20 = vld [vmem:[%s8552_s5 + $0x188] ss:$12 sps:$4 sm:$0xff]  }
 0x315   :  { %5560 = vmatprep.subr.bf16.mxu0 %v6376_v21 }
 0x318   :  { %5561 = vmatpush3.bf16.msra.mxu0 %v6377_v22  ;;  %v6424_v22 = vld [vmem:[%s8552_s5 + $0x608] ss:$12 sps:$4 sm:$0xff]  }
 0x319   :  { %5562 = vmatprep.subr.bf16.mxu0 %v6381_v23  ;;  %v6425_v23 = vld [vmem:[%s8552_s5 + $0x5f0] ss:$12 sps:$4 sm:$0xff]  }
 0x31a   :  { %v6480_v25 = vpop.eup %6479 }
 0x31b   :  { %v2461_v27 = vadd.f32 1.0, %v6480_v25  ;;  %v6426_v25 = vld [vmem:[%s8552_s5 + $0x530] ss:$12 sps:$4 sm:$0xff]  }
 0x31c   :  { %v6482_v28 = vpop.eup %6481  ;;  %5563 = vmatpush3.bf16.msra.mxu0 %v6382_v24 }
 0x31d   :  { %5564 = vmatprep.subr.bf16.mxu0 %v6386_v5  ;;  %v2462_v34 = vadd.f32 1.0, %v6482_v28  ;;  %v2473_v35 = vmul.f32 0.5, %v2461_v27  ;;  %v6427_v28 = vld [vmem:[%s8552_s5 + $0x5d8] ss:$12 sps:$4 sm:$0xff]  }
 0x31f   :  { %v8306_v36 = vpop.f32.mrf.mxu0  ;;  %v2474_v37 = vmul.f32 0.5, %v2462_v34  ;;  %v2485_v39 = vmul.f32 %v2473_v35, %v2373_v26  ;;  %v6407_v26 = vld [vmem:[%s8552_s5 + $0x728] ss:$12 sps:$4 sm:$0xff]   ;;  %v6430_v34 = vld [vmem:[%s8552_s5 + $0x500] ss:$12 sps:$4 sm:$0xff]  }
 0x320   :  { %5565 = vmatpush3.bf16.msra.mxu0 %v6387_v31  ;;  %v4471_v11 = vadd.f32 %v8306_v36, %v2888_v60  ;;  %v6428_v31 = vld [vmem:[%s8552_s5 + $0x518] ss:$12 sps:$4 sm:$0xff]   ;;  %v6434_v35 = vld [vmem:[%s8552_s5 + $0x4d0] ss:$12 sps:$4 sm:$0xff]  }
 0x321   :  { %v8311_v40 = vpop.f32.mrf.mxu0  ;;  %5566 = vmatprep.subr.bf16.mxu0 %v6391_v33  ;;  %v2486_v42 = vmul.f32 %v2474_v37, %v2375_v30  ;;  %v8321_v47 = vpack.c.bf16 %v2485_v39, %v2485_v39  ;;  %v6410_v30 = vld [vmem:[%s8552_s5 + $0x1d0] ss:$12 sps:$4 sm:$0xff]   ;;  %v6429_v33 = vld [vmem:[%s8552_s5 + $0x5c0] ss:$12 sps:$4 sm:$0xff]   ;;  %v6435_v36 = vld [vmem:[%s8552_s5 + $0x578] ss:$12 sps:$4 sm:$0xff]  }
 0x322   :  { %v4473_v10 = vadd.f32 %v8311_v40, %v2892_v15  ;;  %v6436_v37 = vld [vmem:[%s8552_s5 + $0x4b8] ss:$12 sps:$4 sm:$0xff]   ;;  %v6438_v39 = vld [vmem:[%s8552_s5 + $0x4a0] ss:$12 sps:$4 sm:$0xff]   ;;  %v6439_v40 = vld [vmem:[%s8552_s5 + $0x548] ss:$12 sps:$4 sm:$0xff]  }
 0x323   :  { %v4474_v44 = vpop.f32.mrf.mxu0  ;;  %v8316_v16 = vpack.c.bf16 %v2486_v42, %v2486_v42 }
 0x324   :  { %5567 = vmatpush3.bf16.msra.mxu0 %v6392_v38  ;;  %v6437_v38 = vld [vmem:[%s8552_s5 + $0x560] ss:$12 sps:$4 sm:$0xff]  }
 0x325   :  { %v4475_v2 = vpop.f32.mrf.mxu0  ;;  %4673 = vmatprep.mubr.bf16.mxu1 %v8316_v16  ;;  %5596 = vmatprep.subr.bf16.mxu0 %v6395_v43  ;;  %v6440_v43 = vld [vmem:[%s8552_s5 + $0x488] ss:$12 sps:$4 sm:$0xff]  }
 0x326   :  { %4674 = vmatmul.mubr.bf16.vlgmr.msra.gmra.mxu1 %v8321_v47 }
 0x327   :  { %5531 = vmatpush3.bf16.msra.mxu1 %v6394_v45  ;;  %4795 = vmatmul.mubr.bf16.vlgmr.msra.gmra.mxu0 %v7917_v46  ;;  %v6403_v46 = vld [vmem:[%s8552_s5 + $0x740] ss:$12 sps:$4 sm:$0xff]   ;;  %v6441_v45 = vld [vmem:[%s8552_s5 + $0x8f0] ss:$12 sps:$4 sm:$0xff]  }
 0x328   :  { %4754 = vmatprep.mubr.bf16.mxu1 %v7707_v1  ;;  %5597 = vmatpush3.bf16.msra.mxu0 %v6396_v48  ;;  %v6402_v1 = vld [vmem:[%s8552_s5 + $0x200] ss:$12 sps:$4 sm:$0xff]  }
 0x329   :  { %4874 = vmatprep.mubr.bf16.mxu0 %v8155_v17  ;;  %5532 = vmatprep.subr.bf16.mxu1 %v6397_v49  ;;  %v6405_v17 = vld [vmem:[%s8552_s5 + $0x2a8] ss:$12 sps:$4 sm:$0xff]  }
 0x32a   :  { %5598 = vmatprep.subr.bf16.mxu0 %v6399_v50  ;;  %v6442_v50 = vld [vmem:[%s8552_s5 + $0x830] ss:$12 sps:$4 sm:$0xff]  }
 0x32b   :  { %5533 = vmatpush3.bf16.msra.mxu1 %v6398_v51  ;;  %v6443_v51 = vld [vmem:[%s8552_s5 + $0x8d8] ss:$12 sps:$4 sm:$0xff]  }
 0x32c   :  { %5599 = vmatpush3.bf16.msra.mxu0 %v6400_v52  ;;  %5534 = vmatprep.subr.bf16.mxu1 %v6401_v53  ;;  %v6444_v53 = vld [vmem:[%s8552_s5 + $0x818] ss:$12 sps:$4 sm:$0xff]  }
 0x32d   :  { %5600 = vmatprep.subr.bf16.mxu0 %v6403_v46  ;;  %v6445_v46 = vld [vmem:[%s8552_s5 + $0x8c0] ss:$12 sps:$4 sm:$0xff]  }
 0x32f   :  { %5535 = vmatpush3.bf16.msra.mxu1 %v6402_v1  ;;  %v6446_v1 = vld [vmem:[%s8552_s5 + $0x800] ss:$12 sps:$4 sm:$0xff]  }
 0x330   :  { %5601 = vmatpush3.bf16.msra.mxu0 %v6404_v6  ;;  %5536 = vmatprep.subr.bf16.mxu1 %v6405_v17  ;;  %v6449_v6 = vld [vmem:[%s8552_s5 + $0x890] ss:$12 sps:$4 sm:$0xff]  }
 0x331   :  { %5602 = vmatprep.subr.bf16.mxu0 %v6407_v26  ;;  %v6450_v17 = vld [vmem:[%s8552_s5 + $0x7d0] ss:$12 sps:$4 sm:$0xff]   ;;  %v6451_v26 = vld [vmem:[%s8552_s5 + $0x878] ss:$12 sps:$4 sm:$0xff]  }
 0x333   :  { %5537 = vmatpush3.bf16.msra.mxu1 %v6406_v41  ;;  %v6452_v41 = vld [vmem:[%s8552_s5 + $0x7b8] ss:$12 sps:$4 sm:$0xff]  }
 0x334   :  { %5603 = vmatpush3.bf16.msra.mxu0 %v6408_v61  ;;  %5538 = vmatprep.subr.bf16.mxu1 %v6409_v62  ;;  %v6453_v61 = vld [vmem:[%s8552_s5 + $0x860] ss:$12 sps:$4 sm:$0xff]  }
 0x335   :  { %5604 = vmatprep.subr.bf16.mxu0 %v6411_v0  ;;  %v6454_v62 = vld [vmem:[%s8552_s5 + $0x7a0] ss:$12 sps:$4 sm:$0xff]   ;;  %v6455_v0 = vld [vmem:[%s8552_s5 + $0x848] ss:$12 sps:$4 sm:$0xff]  }
 0x337   :  { %5539 = vmatpush3.bf16.msra.mxu1 %v6410_v30  ;;  %v6456_v30 = vld [vmem:[%s8552_s5 + $0x788] ss:$12 sps:$4 sm:$0xff]  }
 0x338   :  { %5605 = vmatpush3.bf16.msra.mxu0 %v6412_v55  ;;  %5540 = vmatprep.subr.bf16.mxu1 %v6413_v4 }
 0x339   :  { %5606 = vmatprep.subr.bf16.mxu0 %v6415_v12 }
 0x33b   :  { %5541 = vmatpush3.bf16.msra.mxu1 %v6414_v63 }
 0x33c   :  { %5607 = vmatpush3.bf16.msra.mxu0 %v6416_v59  ;;  %5542 = vmatprep.subr.bf16.mxu1 %v6417_v13 }
 0x33d   :  { %5608 = vmatprep.subr.bf16.mxu0 %v6419_v14 }
 0x33e   :  { %v4511_v54 = vpop.f32.mrf.mxu1 }
 0x33f   :  { %v4512_v58 = vadd.f32 %v4511_v54, %v4471_v11  ;;  %5543 = vmatpush3.bf16.msra.mxu1 %v6418_v18 }
 0x340   :  { %5609 = vmatpush3.bf16.msra.mxu0 %v6420_v57  ;;  %v4513_v21 = vpop.f32.mrf.mxu1  ;;  %5544 = vmatprep.subr.bf16.mxu1 %v6421_v9 }
 0x341   :  { %v4514_v24 = vadd.f32 %v4513_v21, %v4473_v10  ;;  %5610 = vmatprep.subr.bf16.mxu0 %v6423_v7 }
 0x342   :  { %v4515_v5 = vpop.f32.mrf.mxu1 }
 0x343   :  { %5545 = vmatpush3.bf16.msra.mxu1 %v6422_v20 }
 0x344   :  { %5611 = vmatpush3.bf16.msra.mxu0 %v6424_v22  ;;  %v4516_v27 = vpop.f32.mrf.mxu1  ;;  %5574 = vmatprep.subr.bf16.mxu1 %v6425_v23  ;;  %v6484_v23 = vld [vmem:[%s8548_s0] sm:$0xff] }
 0x346   :  { %4755 = vmatmul.mubr.bf16.vlgmr.msra.gmra.mxu1 %v7798_v32  ;;  %v6431_v32 = vld [vmem:[%s8552_s5 + $0x5a8] ss:$12 sps:$4 sm:$0xff]  }
 0x347   :  { %5575 = vmatpush3.bf16.msra.mxu1 %v6426_v25  ;;  %4834 = vmatprep.mubr.bf16.mxu1 %v8046_v3  ;;  %v6432_v3 = vld [vmem:[%s8552_s5 + $0x4e8] ss:$12 sps:$4 sm:$0xff]  }
 0x348   :  { %4875 = vmatmul.mubr.bf16.vlgmr.msra.gmra.mxu0 %v8160_v19  ;;  %5576 = vmatprep.subr.bf16.mxu1 %v6427_v28  ;;  %v6433_v19 = vld [vmem:[%s8552_s5 + $0x590] ss:$12 sps:$4 sm:$0xff]  }
 0x34b   :  { %5577 = vmatpush3.bf16.msra.mxu1 %v6428_v31  ;;  %v6485_v31 = vld [vmem:[%s8548_s0 + $0x8] sm:$0xff] }
 0x34c   :  { %5578 = vmatprep.subr.bf16.mxu1 %v6429_v33 }
 0x34f   :  { %5579 = vmatpush3.bf16.msra.mxu1 %v6430_v34 }
 0x350   :  { %5580 = vmatprep.subr.bf16.mxu1 %v6431_v32 }
 0x353   :  { %5581 = vmatpush3.bf16.msra.mxu1 %v6432_v3 }
 0x354   :  { %5582 = vmatprep.subr.bf16.mxu1 %v6433_v19  ;;  %v2896_v19 = vrot.slane %v8388_v56, %v6706_v8 }
 0x357   :  { %5583 = vmatpush3.bf16.msra.mxu1 %v6434_v35 }
 0x358   :  { %5584 = vmatprep.subr.bf16.mxu1 %v6435_v36 }
 0x35b   :  { %5585 = vmatpush3.bf16.msra.mxu1 %v6436_v37 }
 0x35c   :  { %5586 = vmatprep.subr.bf16.mxu1 %v6437_v38 }
 0x35f   :  { %5587 = vmatpush3.bf16.msra.mxu1 %v6438_v39  ;;  %v4552_v42 = vpop.f32.mrf.mxu0 }
 0x360   :  { %v4553_v44 = vadd.f32 %v4552_v42, %v4512_v58  ;;  %5588 = vmatprep.subr.bf16.mxu1 %v6439_v40 }
 0x361   :  { %v4554_v48 = vpop.f32.mrf.mxu0 }
 0x362   :  { %v4555_v2 = vadd.f32 %v4554_v48, %v4514_v24 }
 0x363   :  { %5589 = vmatpush3.bf16.msra.mxu1 %v6440_v43  ;;  %v4556_v49 = vpop.f32.mrf.mxu0 }
 0x364   :  { %5618 = vmatprep.subr.bf16.mxu1 %v6441_v45 }
 0x365   :  { %v4557_v52 = vpop.f32.mrf.mxu0 }
 0x366   :  { %4835 = vmatmul.mubr.bf16.vlgmr.msra.gmra.mxu1 %v8055_v29  ;;  %v6447_v29 = vld [vmem:[%s8552_s5 + $0x8a8] ss:$12 sps:$4 sm:$0xff]  }
 0x367   :  { %5619 = vmatpush3.bf16.msra.mxu1 %v6442_v50  ;;  %4914 = vmatprep.mubr.bf16.mxu1 %v8316_v16  ;;  %v6448_v16 = vld [vmem:[%s8552_s5 + $0x7e8] ss:$12 sps:$4 sm:$0xff]  }
 0x368   :  { %5620 = vmatprep.subr.bf16.mxu1 %v6443_v51 }
 0x36b   :  { %5621 = vmatpush3.bf16.msra.mxu1 %v6444_v53 }
 0x36c   :  { %5622 = vmatprep.subr.bf16.mxu1 %v6445_v46 }
 0x36f   :  { %5623 = vmatpush3.bf16.msra.mxu1 %v6446_v1 }
 0x370   :  { %5624 = vmatprep.subr.bf16.mxu1 %v6447_v29 }
 0x373   :  { %5625 = vmatpush3.bf16.msra.mxu1 %v6448_v16 }
 0x374   :  { %5626 = vmatprep.subr.bf16.mxu1 %v6449_v6 }
 0x377   :  { %5627 = vmatpush3.bf16.msra.mxu1 %v6450_v17 }
 0x378   :  { %5628 = vmatprep.subr.bf16.mxu1 %v6451_v26 }
 0x37b   :  { %5629 = vmatpush3.bf16.msra.mxu1 %v6452_v41  ;;  %v6486_v41 = vld [vmem:[%s8548_s0 + $0x10] sm:$0xff] }
 0x37c   :  { %5630 = vmatprep.subr.bf16.mxu1 %v6453_v61 }
 0x37f   :  { %5631 = vmatpush3.bf16.msra.mxu1 %v6454_v62 }
 0x380   :  { %5632 = vmatprep.subr.bf16.mxu1 %v6455_v0 }
 0x383   :  { %5633 = vmatpush3.bf16.msra.mxu1 %v6456_v30 }
 0x386   :  { %4915 = vmatmul.mubr.bf16.vlgmr.msra.gmra.mxu1 %v8321_v47  ;;  %v4593_v55 = vpop.f32.mrf.mxu1 }
 0x387   :  { %v4594_v4 = vadd.f32 %v4593_v55, %v4553_v44 }
 0x388   :  { %v4595_v12 = vpop.f32.mrf.mxu1 }
 0x389   :  { %v4596_v63 = vadd.f32 %v4595_v12, %v4555_v2 }
 0x38a   :  { %v4597_v59 = vpop.f32.mrf.mxu1 }
 0x38c   :  { %v4598_v13 = vpop.f32.mrf.mxu1 }
 0x3a7   :  { %v4634_v60 = vpop.f32.mrf.mxu0 }
 0x3a8   :  { %v4635_v10 = vadd.f32 %v4634_v60, %v4594_v4 }
 0x3a9   :  { %v4636_v14 = vpop.f32.mrf.mxu0 }
 0x3aa   :  { %v4637_v20 = vadd.f32 %v4636_v14, %v4596_v63 }
 0x3ab   :  { %v4638_v15 = vpop.f32.mrf.mxu0 }
 0x3ad   :  { %v4639_v18 = vpop.f32.mrf.mxu0 }
 0x3c7   :  { %v5524_v57 = vpop.f32.mrf.mxu0 }
 0x3c9   :  { %v5525_v9 = vpop.f32.mrf.mxu0 }
 0x3ca   :  { %v5526_v11 = vadd.f32 %v5525_v9, %v5524_v57 }
 0x3cb   :  { %v5527_v7 = vpop.f32.mrf.mxu0 }
 0x3cc   :  { %v4717_v38 = vadd.f32 %v5526_v11, %v2896_v19 }
 0x3cd   :  { %v5528_v54 = vpop.f32.mrf.mxu0 }
 0x3e6   :  { %v4675_v58 = vpop.f32.mrf.mxu1 }
 0x3e7   :  { %v4676_v21 = vadd.f32 %v4675_v58, %v4635_v10  ;;  %v5568_v47 = vpop.f32.mrf.mxu0 }
 0x3e8   :  { %v4677_v22 = vpop.f32.mrf.mxu1 }
 0x3e9   :  { %v4922_v24 = vadd.f32 %v6484_v23, %v4676_v21  ;;  %v4678_v5 = vadd.f32 %v4677_v22, %v4637_v20  ;;  %v5569_v25 = vpop.f32.mrf.mxu0 }
 0x3ea   :  { %v5570_v27 = vadd.f32 %v5569_v25, %v5568_v47  ;;  %v4679_v28 = vpop.f32.mrf.mxu1 }
 0x3eb   :  { %4925 = vst [vmem:[%s8555_s7] sm:$0xff] %v4922_v24  ;;  %v4923_v33 = vadd.f32 %v6485_v31, %v4678_v5  ;;  %v5571_v34 = vpop.f32.mrf.mxu0 }
 0x3ec   :  { %v4680_v32 = vpop.f32.mrf.mxu1 }
 0x3ed   :  { %4926 = vst [vmem:[%s8555_s7 + $0x8] sm:$0xff] %v4923_v33  ;;  %v5572_v3 = vpop.f32.mrf.mxu0 }
 0x406   :  { %v5546_v35 = vpop.f32.mrf.mxu1 }
 0x408   :  { %v5612_v36 = vpop.f32.mrf.mxu0  ;;  %v5547_v37 = vpop.f32.mrf.mxu1 }
 0x409   :  { %v5548_v39 = vadd.f32 %v5547_v37, %v5546_v35 }
 0x40a   :  { %v5613_v40 = vpop.f32.mrf.mxu0  ;;  %v5549_v42 = vpop.f32.mrf.mxu1 }
 0x40b   :  { %v4757_v43 = vadd.f32 %v5548_v39, %v4717_v38  ;;  %v5614_v8 = vadd.f32 %v5613_v40, %v5612_v36 }
 0x40c   :  { %v5615_v44 = vpop.f32.mrf.mxu0  ;;  %v5550_v45 = vpop.f32.mrf.mxu1 }
 0x40d   :  { %v4797_v48 = vadd.f32 %v5570_v27, %v4757_v43 }
 0x40e   :  { %v5616_v2 = vpop.f32.mrf.mxu0 }
 0x426   :  { %v5590_v49 = vpop.f32.mrf.mxu1 }
 0x428   :  { %v5591_v50 = vpop.f32.mrf.mxu1 }
 0x429   :  { %v5592_v53 = vadd.f32 %v5591_v50, %v5590_v49 }
 0x42a   :  { %v5593_v51 = vpop.f32.mrf.mxu1 }
 0x42b   :  { %v4837_v46 = vadd.f32 %v5592_v53, %v4797_v48 }
 0x42c   :  { %v5594_v52 = vpop.f32.mrf.mxu1 }
 0x42d   :  { %v4877_v29 = vadd.f32 %v5614_v8, %v4837_v46 }
 0x446   :  { %v5634_v1 = vpop.f32.mrf.mxu1 }
 0x448   :  { %v5635_v56 = vpop.f32.mrf.mxu1 }
 0x449   :  { %v5636_v16 = vadd.f32 %v5635_v56, %v5634_v1 }
 0x44a   :  { %v5637_v6 = vpop.f32.mrf.mxu1 }
 0x44b   :  { %v4917_v17 = vadd.f32 %v5636_v16, %v4877_v29 }
 0x44c   :  { %v5638_v26 = vpop.f32.mrf.mxu1 }
 0x44d   :  { %v4924_v61 = vadd.f32 %v6486_v41, %v4917_v17 }
 0x44f   :  { %4927 = vst [vmem:[%s8555_s7 + $0x10] sm:$0xff] %v4924_v61 }

</bundles_post_ra>
